<compile_context>
chip_gen: v7x
topology: tpu7x:2x2x1
jax: 0.10.0
libtpu: 0.0.40
codegen_flags: <defaults>
</compile_context>

<pallas_src>
import functools
import math

import jax
import jax.numpy as jnp
from jax.experimental import pallas as pl
from jax.experimental.pallas import tpu as pltpu

ACT_NONE, ACT_RELU, ACT_LEAKY = 0, 1, 2
LEAKY_SLOPE = 0.2   # the reference module explicitly uses nn.LeakyReLU(0.2)


# ----------------------------- Pallas kernel --------------------------------

def _mm_kernel(a_ref, w_ref, b_ref, *refs, act):
    """(tm,K)bf16 @ (K,tn)bf16 -> f32, + bias [+ residual], activation, f32 store."""
    o_ref = refs[-1]
    acc = jnp.dot(a_ref[...], w_ref[...], preferred_element_type=jnp.float32)
    acc = acc + b_ref[...]
    if len(refs) == 2:                       # fused residual (bottleneck tail)
        acc = acc + refs[0][...]
    if act == ACT_RELU:
        acc = jnp.maximum(acc, 0.0)
    elif act == ACT_LEAKY:
        acc = jnp.where(acc >= 0.0, acc, LEAKY_SLOPE * acc)
    o_ref[...] = acc.astype(o_ref.dtype)


def _round_up(x, m):
    return ((x + m - 1) // m) * m


def _choose_tile_m(M):
    """M tile: multiple of 8, <=512, minimal padding, prefer >=2 grid steps (v7x)."""
    m8 = _round_up(M, 8)
    best = None
    for tm in range(512, 0, -8):
        if tm > m8:
            continue
        m_pad = _round_up(m8, tm)
        steps = m_pad // tm
        key = (m_pad, 0 if steps >= 2 else 1, -tm)
        if best is None or key < best[0]:
            best = (key, tm, m_pad)
    return best[1], best[2]


def matmul_bias_act(a, wmat, bias, act, residual=None):
    """Fused conv-as-matmul. a: (M,K) bf16, wmat: (K,Coutp) bf16 (Coutp % 128 == 0),
    bias: (Cout,) f32. Optional residual (M,Cout) f32 added before the activation."""
    M, K = a.shape
    K2, coutp = wmat.shape
    assert K == K2
    cout = bias.shape[0]
    tm, m_pad = _choose_tile_m(M)
    tn = coutp if coutp <= 512 else (256 if coutp % 256 == 0 else 128)
    if m_pad != M:
        a = jnp.pad(a, ((0, m_pad - M), (0, 0)))
    bias_p = jnp.pad(bias.reshape(1, cout), ((0, 0), (0, coutp - cout)))

    inputs = [a, wmat, bias_p]
    in_specs = [
        pl.BlockSpec((tm, K), lambda i, j: (i, 0)),    # patch tile (bf16)
        pl.BlockSpec((K, tn), lambda i, j: (0, j)),    # weight tile (BN scale folded)
        pl.BlockSpec((1, tn), lambda i, j: (0, j)),    # bias
    ]
    if residual is not None:
        res = jnp.pad(residual.astype(jnp.float32),
                      ((0, m_pad - M), (0, coutp - cout)))
        inputs.append(res)
        in_specs.append(pl.BlockSpec((tm, tn), lambda i, j: (i, j)))

    out = pl.pallas_call(
        functools.partial(_mm_kernel, act=act),
        out_shape=jax.ShapeDtypeStruct((m_pad, coutp), jnp.float32),
        grid=(m_pad // tm, coutp // tn),
        in_specs=in_specs,
        out_specs=pl.BlockSpec((tm, tn), lambda i, j: (i, j)),
        compiler_params=pltpu.CompilerParams(
            dimension_semantics=("parallel", "parallel"),
            vmem_limit_bytes=32 * 1024 * 1024),
    )(*inputs)
    return out[:M, :cout]


# --------------------------- conv building block -----------------------------

def im2col(x, k, stride, pad):
    """x: (N,H,W,C) bf16 -> patches (N*OH*OW, k*k*C), K ordered (kh, kw, cin)."""
    # TODO(synk): for k>1 this still materializes k*k shifted copies in HBM; an
    # implicit-GEMM version (K grid axis + shifted-window index_map, accumulator in
    # VMEM) would remove the k^2 activation-byte blowup.
    n, h, w, c = x.shape
    if pad > 0:
        x = jnp.pad(x, ((0, 0), (pad, pad), (pad, pad), (0, 0)))
    oh = (h + 2 * pad - k) // stride + 1
    ow = (w + 2 * pad - k) // stride + 1
    if k == 1:
        xs = x[:, ::stride, ::stride, :][:, :oh, :ow, :]
        return xs.reshape(n * oh * ow, c), (n, oh, ow)
    cols = []
    for kh in range(k):
        for kw in range(k):
            cols.append(x[:, kh:kh + stride * (oh - 1) + 1:stride,
                          kw:kw + stride * (ow - 1) + 1:stride, :])
    patches = jnp.stack(cols, axis=3)                  # (n, oh, ow, k*k, c)
    return patches.reshape(n * oh * ow, k * k * c), (n, oh, ow)


def conv2d_fused(x, p, stride, pad, act, residual=None):
    """Conv2d + folded BN/bias + activation (+ optional fused residual add+ReLU)."""
    wmat, bias = p["wmat"], p["bias"]
    cin = x.shape[-1]
    k = int(round(math.sqrt(wmat.shape[0] // cin)))
    a, (n, oh, ow) = im2col(x.astype(jnp.bfloat16), k, stride, pad)
    res2d = None if residual is None else residual.reshape(-1, residual.shape[-1])
    out = matmul_bias_act(a, wmat, bias, act, residual=res2d)
    return out.reshape(n, oh, ow, bias.shape[0])


def max_pool_3x3_s2_p1(x):
    """MaxPool2d(kernel=3, stride=2, padding=1), PyTorch semantics (-inf padding).
    Implemented as a fused jnp.maximum tree (no k*k HBM stack; tiny, no Pallas win)."""
    n, h, w, c = x.shape
    xp = jnp.pad(x, ((0, 0), (1, 1), (1, 1), (0, 0)), constant_values=-jnp.inf)
    oh = (h + 2 - 3) // 2 + 1
    ow = (w + 2 - 3) // 2 + 1
    out = None
    for kh in range(3):
        for kw in range(3):
            win = xp[:, kh:kh + 2 * (oh - 1) + 1:2, kw:kw + 2 * (ow - 1) + 1:2, :]
            out = win if out is None else jnp.maximum(out, win)
    return out


# ------------------------------ parameters -----------------------------------

def _key_iter(key):
    while True:
        key, sub = jax.random.split(key)
        yield sub


def _pack_conv(w, bias, scale=None):
    """PyTorch-layout weight (Cout,Cin,k,k) -> (K, Coutp) bf16 matrix with the BN
    scale folded into the columns and Cout zero-padded to a multiple of 128."""
    cout, cin, k, _ = w.shape
    wmat = jnp.transpose(w, (2, 3, 1, 0)).reshape(k * k * cin, cout)
    if scale is not None:
        wmat = wmat * scale[None, :]
    coutp = _round_up(cout, 128)
    wmat = jnp.pad(wmat, ((0, 0), (0, coutp - cout))).astype(jnp.bfloat16)
    return {"wmat": wmat, "bias": bias.astype(jnp.float32)}


def init_conv_bn(kit, cin, cout, k, eps=1e-5):
    fan_in = cin * k * k
    w = jax.random.normal(next(kit), (cout, cin, k, k), jnp.float32) * (0.5 / math.sqrt(fan_in))
    gamma = 1.0 + 0.1 * jax.random.normal(next(kit), (cout,), jnp.float32)
    beta = 0.05 * jax.random.normal(next(kit), (cout,), jnp.float32)
    mean = 0.05 * jax.random.normal(next(kit), (cout,), jnp.float32)
    var = 0.9 + 0.2 * jax.random.uniform(next(kit), (cout,), jnp.float32)
    scale = gamma / jnp.sqrt(var + eps)     # BatchNorm (eval mode) folded into weight
    bias = beta - mean * scale
    return _pack_conv(w, bias, scale)


def init_head(kit, cin, ncls):
    """conf(3x3, ncls out) + loc(3x3, 4 out) merged into ONE lane-dense matmul."""
    def conv(co):
        fan_in = cin * 9
        w = jax.random.normal(next(kit), (co, cin, 3, 3), jnp.float32) * (0.5 / math.sqrt(fan_in))
        b = 0.05 * jax.random.normal(next(kit), (co,), jnp.float32)
        return w, b
    wc, bc = conv(ncls)
    wl, bl = conv(4)
    w = jnp.concatenate([wc, wl], axis=0)   # conf channels first, then loc
    b = jnp.concatenate([bc, bl], axis=0)
    return _pack_conv(w, b)


class Config:
    classNumber = 3
    # each mbox: [feature-source index into (l2, l3, l4, l5, l6), aspect params (unused)]
    mboxes = [[0, 1.0, 1.0], [1, 1.0, 1.0], [2, 1.0, 1.0], [3, 2.0, 0.5], [4, 1.0, 1.0]]


def init_params(key, config, width=8):
    """ResNet50-structured params (width-scaled), layer5/6, merged mbox heads."""
    kit = _key_iter(key)
    exp = 4
    p = {"conv1": init_conv_bn(kit, 3, width, 7)}

    def make_layer(inplanes, planes, blocks, stride):
        layer = []
        for b in range(blocks):
            s = stride if b == 0 else 1
            blk = {
                "conv1": init_conv_bn(kit, inplanes, planes, 1),
                "conv2": init_conv_bn(kit, planes, planes, 3),
                "conv3": init_conv_bn(kit, planes, planes * exp, 1),
            }
            if s != 1 or inplanes != planes * exp:
                blk["down"] = init_conv_bn(kit, inplanes, planes * exp, 1)
            layer.append(blk)
            inplanes = planes * exp
        return layer, inplanes

    inpl = width
    p["layer1"], inpl = make_layer(inpl, width, 3, 1)
    p["layer2"], inpl = make_layer(inpl, width * 2, 4, 2)
    p["layer3"], inpl = make_layer(inpl, width * 4, 6, 2)
    p["layer4"], inpl = make_layer(inpl, width * 8, 3, 2)

    c4 = width * 32                                    # scaled analogue of 2048
    p["layer5"] = [init_conv_bn(kit, c4, c4 // 2, 1),
                   init_conv_bn(kit, c4 // 2, c4 // 2, 3)]
    p["layer6"] = [init_conv_bn(kit, c4 // 2, c4 // 4, 1),
                   init_conv_bn(kit, c4 // 4, c4 // 4, 3)]

    in_channels = [width * 8, width * 16, width * 32, c4 // 2, c4 // 4]
    p["head"] = [init_head(kit, in_channels[mb[0]], config.classNumber)
                 for mb in config.mboxes]
    return p


# -------------------------------- forward ------------------------------------

def run_layer(x, layer, first_stride):
    # TODO(synk): layer3..layer6 blocks are small enough that the whole 1x1->3x3->1x1
    # bottleneck (and downsample) could be fused into a single kernel with VMEM-resident
    # intermediates; kept as separate fused-matmul calls here.
    for b, blk in enumerate(layer):
        s = first_stride if b == 0 else 1
        identity = x
        out = conv2d_fused(x, blk["conv1"], 1, 0, ACT_RELU)
        out = conv2d_fused(out, blk["conv2"], s, 1, ACT_RELU)
        if "down" in blk:
            identity = conv2d_fused(x, blk["down"], s, 0, ACT_NONE)
        # conv3 + BN + residual add + ReLU fused into one matmul epilogue
        x = conv2d_fused(out, blk["conv3"], 1, 0, ACT_RELU, residual=identity)
    return x


def ez_detect_forward(params, x_nchw, config):
    batch = x_nchw.shape[0]
    x = jnp.transpose(x_nchw, (0, 2, 3, 1))                  # NCHW -> NHWC
    x = conv2d_fused(x, params["conv1"], 2, 3, ACT_RELU)     # conv1 + bn1 + relu
    x = max_pool_3x3_s2_p1(x)                                # maxpool
    x = run_layer(x, params["layer1"], 1)
    l2 = run_layer(x, params["layer2"], 2)
    l3 = run_layer(l2, params["layer3"], 2)
    l4 = run_layer(l3, params["layer4"], 2)
    l5 = conv2d_fused(l4, params["layer5"][0], 1, 0, ACT_RELU)
    l5 = conv2d_fused(l5, params["layer5"][1], 1, 0, ACT_RELU)
    l6 = conv2d_fused(l5, params["layer6"][0], 1, 0, ACT_LEAKY)
    l6 = conv2d_fused(l6, params["layer6"][1], 2, 1, ACT_LEAKY)

    feats = [l2, l3, l4, l5, l6]
    ncls = config.classNumber
    confs, locs = [], []
    for i, mb in enumerate(config.mboxes):
        f = feats[mb[0]]
        # merged conf+loc head: one lane-dense matmul per feature source
        out = conv2d_fused(f, params["head"][i], 1, 1, ACT_NONE)   # (b,oh,ow,ncls+4)
        confs.append(out[..., :ncls].reshape(batch, -1, ncls))     # == permute+view
        locs.append(out[..., ncls:ncls + 4].reshape(batch, -1, 4))
    return jnp.concatenate(confs, axis=1), jnp.concatenate(locs, axis=1)


# ---------------------------------- main --------------------------------------

if __name__ == "__main__":
    config = Config()
    key = jax.random.PRNGKey(0)
    pkey, xkey = jax.random.split(key)
    params = init_params(pkey, config, width=8)
    x = jax.random.normal(xkey, (2, 3, 96, 96), jnp.float32)  # NCHW input, like PyTorch

    fwd = jax.jit(functools.partial(ez_detect_forward, config=config))
    conf, loc = fwd(params, x)
    jax.block_until_ready((conf, loc))

    # spatial sizes: l2=12x12, l3=6x6, l4=3x3, l5=1x1, l6=1x1 -> 191 boxes total
    assert conf.shape == (2, 191, config.classNumber), conf.shape
    assert loc.shape == (2, 191, 4), loc.shape
    assert bool(jnp.all(jnp.isfinite(conf))) and bool(jnp.all(jnp.isfinite(loc)))
    print("KERNEL_OK")
</pallas_src>

<mosaic_0001>
module attributes {stable_mosaic.version = 11 : i64} {
  func.func @_mm_kernel(%arg0: i32, %arg1: i32, %arg2: memref<512x147xbf16, #tpu.memory_space<vmem>>, %arg3: memref<147x128xbf16, #tpu.memory_space<vmem>>, %arg4: memref<1x128xf32, #tpu.memory_space<vmem>>, %arg5: memref<512x128xf32, #tpu.memory_space<vmem>>) attributes {dimension_semantics = [#tpu.dimension_semantics<parallel>, #tpu.dimension_semantics<parallel>], iteration_bounds = array<i64: 9, 1>, scalar_prefetch = 0 : i64, scratch_operands = 0 : i64, tpu.core_type = #tpu.core_type<tc>, window_params = [{transform_indices = @transform_0, window_bounds = array<i64: 512, 147>}, {transform_indices = @transform_1, window_bounds = array<i64: 147, 128>}, {transform_indices = @transform_2, window_bounds = array<i64: 1, 128>}, {transform_indices = @transform_3, window_bounds = array<i64: 512, 128>}]} {
    %c0 = arith.constant 0 : index
    %c0_0 = arith.constant 0 : index
    %0 = vector.load %arg2[%c0, %c0_0] : memref<512x147xbf16, #tpu.memory_space<vmem>>, vector<512x147xbf16>
    %c0_1 = arith.constant 0 : index
    %c0_2 = arith.constant 0 : index
    %1 = vector.load %arg3[%c0_1, %c0_2] : memref<147x128xbf16, #tpu.memory_space<vmem>>, vector<147x128xbf16>
    %cst = arith.constant dense<0.000000e+00> : vector<512x128xf32>
    %2 = tpu.matmul %0, %1, %cst {dimension_numbers = #tpu.dot_dimension_numbers<[1], [0], [0], [1], [0, 0, 1, 1], [], []>} : vector<512x147xbf16>, vector<147x128xbf16>, vector<512x128xf32> -> vector<512x128xf32>
    %c0_3 = arith.constant 0 : index
    %c0_4 = arith.constant 0 : index
    %3 = vector.load %arg4[%c0_3, %c0_4] : memref<1x128xf32, #tpu.memory_space<vmem>>, vector<1x128xf32>
    %4 = vector.broadcast %3 : vector<1x128xf32> to vector<512x128xf32>
    %5 = arith.addf %2, %4 : vector<512x128xf32>
    %cst_5 = arith.constant 0.000000e+00 : f32
    %6 = vector.broadcast %cst_5 : f32 to vector<512x128xf32>
    %7 = arith.maximumf %5, %6 : vector<512x128xf32>
    %c0_6 = arith.constant 0 : index
    %c0_7 = arith.constant 0 : index
    %8 = vector.load %arg5[%c0_6, %c0_7] : memref<512x128xf32, #tpu.memory_space<vmem>>, vector<512x128xf32>
    tpu.vector_store %arg5[%c0_6, %c0_7], %7 {strides = array<i32>} : memref<512x128xf32, #tpu.memory_space<vmem>>, vector<512x128xf32>,
    return
  }
  func.func @transform_0(%arg0: i32, %arg1: i32) -> (i32, i32) {
    %c0_i32 = arith.constant 0 : i32
    %c0_i32_0 = arith.constant 0 : i32
    return %arg0, %c0_i32 : i32, i32
  }
  func.func @transform_1(%arg0: i32, %arg1: i32) -> (i32, i32) {
    %c0_i32 = arith.constant 0 : i32
    %c0_i32_0 = arith.constant 0 : i32
    return %c0_i32, %arg1 : i32, i32
  }
  func.func @transform_2(%arg0: i32, %arg1: i32) -> (i32, i32) {
    %c0_i32 = arith.constant 0 : i32
    %c0_i32_0 = arith.constant 0 : i32
    return %c0_i32, %arg1 : i32, i32
  }
  func.func @transform_3(%arg0: i32, %arg1: i32) -> (i32, i32) {
    %c0_i32 = arith.constant 0 : i32
    return %arg0, %arg1 : i32, i32
  }
}

module attributes {stable_mosaic.version = 11 : i64} {
  func.func @_mm_kernel(%arg0: i32, %arg1: i32, %arg2: memref<384x8xbf16, #tpu.memory_space<vmem>>, %arg3: memref<8x128xbf16, #tpu.memory_space<vmem>>, %arg4: memref<1x128xf32, #tpu.memory_space<vmem>>, %arg5: memref<384x128xf32, #tpu.memory_space<vmem>>) attributes {dimension_semantics = [#tpu.dimension_semantics<parallel>, #tpu.dimension_semantics<parallel>], iteration_bounds = array<i64: 3, 1>, scalar_prefetch = 0 : i64, scratch_operands = 0 : i64, tpu.core_type = #tpu.core_type<tc>, window_params = [{transform_indices = @transform_0, window_bounds = array<i64: 384, 8>}, {transform_indices = @transform_1, window_bounds = array<i64: 8, 128>}, {transform_indices = @transform_2, window_bounds = array<i64: 1, 128>}, {transform_indices = @transform_3, window_bounds = array<i64: 384, 128>}]} {
    %c0 = arith.constant 0 : index
    %c0_0 = arith.constant 0 : index
    %0 = vector.load %arg2[%c0, %c0_0] : memref<384x8xbf16, #tpu.memory_space<vmem>>, vector<384x8xbf16>
    %c0_1 = arith.constant 0 : index
    %c0_2 = arith.constant 0 : index
    %1 = vector.load %arg3[%c0_1, %c0_2] : memref<8x128xbf16, #tpu.memory_space<vmem>>, vector<8x128xbf16>
    %cst = arith.constant dense<0.000000e+00> : vector<384x128xf32>
    %2 = tpu.matmul %0, %1, %cst {dimension_numbers = #tpu.dot_dimension_numbers<[1], [0], [0], [1], [0, 0, 1, 1], [], []>} : vector<384x8xbf16>, vector<8x128xbf16>, vector<384x128xf32> -> vector<384x128xf32>
    %c0_3 = arith.constant 0 : index
    %c0_4 = arith.constant 0 : index
    %3 = vector.load %arg4[%c0_3, %c0_4] : memref<1x128xf32, #tpu.memory_space<vmem>>, vector<1x128xf32>
    %4 = vector.broadcast %3 : vector<1x128xf32> to vector<384x128xf32>
    %5 = arith.addf %2, %4 : vector<384x128xf32>
    %cst_5 = arith.constant 0.000000e+00 : f32
    %6 = vector.broadcast %cst_5 : f32 to vector<384x128xf32>
    %7 = arith.maximumf %5, %6 : vector<384x128xf32>
    %c0_6 = arith.constant 0 : index
    %c0_7 = arith.constant 0 : index
    %8 = vector.load %arg5[%c0_6, %c0_7] : memref<384x128xf32, #tpu.memory_space<vmem>>, vector<384x128xf32>
    tpu.vector_store %arg5[%c0_6, %c0_7], %7 {strides = array<i32>} : memref<384x128xf32, #tpu.memory_space<vmem>>, vector<384x128xf32>,
    return
  }
  func.func @transform_0(%arg0: i32, %arg1: i32) -> (i32, i32) {
    %c0_i32 = arith.constant 0 : i32
    %c0_i32_0 = arith.constant 0 : i32
    return %arg0, %c0_i32 : i32, i32
  }
  func.func @transform_1(%arg0: i32, %arg1: i32) -> (i32, i32) {
    %c0_i32 = arith.constant 0 : i32
    %c0_i32_0 = arith.constant 0 : i32
    return %c0_i32, %arg1 : i32, i32
  }
  func.func @transform_2(%arg0: i32, %arg1: i32) -> (i32, i32) {
    %c0_i32 = arith.constant 0 : i32
    %c0_i32_0 = arith.constant 0 : i32
    return %c0_i32, %arg1 : i32, i32
  }
  func.func @transform_3(%arg0: i32, %arg1: i32) -> (i32, i32) {
    %c0_i32 = arith.constant 0 : i32
    return %arg0, %arg1 : i32, i32
  }
}

module attributes {stable_mosaic.version = 11 : i64} {
  func.func @_mm_kernel(%arg0: i32, %arg1: i32, %arg2: memref<384x72xbf16, #tpu.memory_space<vmem>>, %arg3: memref<72x128xbf16, #tpu.memory_space<vmem>>, %arg4: memref<1x128xf32, #tpu.memory_space<vmem>>, %arg5: memref<384x128xf32, #tpu.memory_space<vmem>>) attributes {dimension_semantics = [#tpu.dimension_semantics<parallel>, #tpu.dimension_semantics<parallel>], iteration_bounds = array<i64: 3, 1>, scalar_prefetch = 0 : i64, scratch_operands = 0 : i64, tpu.core_type = #tpu.core_type<tc>, window_params = [{transform_indices = @transform_0, window_bounds = array<i64: 384, 72>}, {transform_indices = @transform_1, window_bounds = array<i64: 72, 128>}, {transform_indices = @transform_2, window_bounds = array<i64: 1, 128>}, {transform_indices = @transform_3, window_bounds = array<i64: 384, 128>}]} {
    %c0 = arith.constant 0 : index
    %c0_0 = arith.constant 0 : index
    %0 = vector.load %arg2[%c0, %c0_0] : memref<384x72xbf16, #tpu.memory_space<vmem>>, vector<384x72xbf16>
    %c0_1 = arith.constant 0 : index
    %c0_2 = arith.constant 0 : index
    %1 = vector.load %arg3[%c0_1, %c0_2] : memref<72x128xbf16, #tpu.memory_space<vmem>>, vector<72x128xbf16>
    %cst = arith.constant dense<0.000000e+00> : vector<384x128xf32>
    %2 = tpu.matmul %0, %1, %cst {dimension_numbers = #tpu.dot_dimension_numbers<[1], [0], [0], [1], [0, 0, 1, 1], [], []>} : vector<384x72xbf16>, vector<72x128xbf16>, vector<384x128xf32> -> vector<384x128xf32>
    %c0_3 = arith.constant 0 : index
    %c0_4 = arith.constant 0 : index
    %3 = vector.load %arg4[%c0_3, %c0_4] : memref<1x128xf32, #tpu.memory_space<vmem>>, vector<1x128xf32>
    %4 = vector.broadcast %3 : vector<1x128xf32> to vector<384x128xf32>
    %5 = arith.addf %2, %4 : vector<384x128xf32>
    %cst_5 = arith.constant 0.000000e+00 : f32
    %6 = vector.broadcast %cst_5 : f32 to vector<384x128xf32>
    %7 = arith.maximumf %5, %6 : vector<384x128xf32>
    %c0_6 = arith.constant 0 : index
    %c0_7 = arith.constant 0 : index
    %8 = vector.load %arg5[%c0_6, %c0_7] : memref<384x128xf32, #tpu.memory_space<vmem>>, vector<384x128xf32>
    tpu.vector_store %arg5[%c0_6, %c0_7], %7 {strides = array<i32>} : memref<384x128xf32, #tpu.memory_space<vmem>>, vector<384x128xf32>,
    return
  }
  func.func @transform_0(%arg0: i32, %arg1: i32) -> (i32, i32) {
    %c0_i32 = arith.constant 0 : i32
    %c0_i32_0 = arith.constant 0 : i32
    return %arg0, %c0_i32 : i32, i32
  }
  func.func @transform_1(%arg0: i32, %arg1: i32) -> (i32, i32) {
    %c0_i32 = arith.constant 0 : i32
    %c0_i32_0 = arith.constant 0 : i32
    return %c0_i32, %arg1 : i32, i32
  }
  func.func @transform_2(%arg0: i32, %arg1: i32) -> (i32, i32) {
    %c0_i32 = arith.constant 0 : i32
    %c0_i32_0 = arith.constant 0 : i32
    return %c0_i32, %arg1 : i32, i32
  }
  func.func @transform_3(%arg0: i32, %arg1: i32) -> (i32, i32) {
    %c0_i32 = arith.constant 0 : i32
    return %arg0, %arg1 : i32, i32
  }
}

module attributes {stable_mosaic.version = 11 : i64} {
  func.func @_mm_kernel(%arg0: i32, %arg1: i32, %arg2: memref<384x8xbf16, #tpu.memory_space<vmem>>, %arg3: memref<8x128xbf16, #tpu.memory_space<vmem>>, %arg4: memref<1x128xf32, #tpu.memory_space<vmem>>, %arg5: memref<384x128xf32, #tpu.memory_space<vmem>>) attributes {dimension_semantics = [#tpu.dimension_semantics<parallel>, #tpu.dimension_semantics<parallel>], iteration_bounds = array<i64: 3, 1>, scalar_prefetch = 0 : i64, scratch_operands = 0 : i64, tpu.core_type = #tpu.core_type<tc>, window_params = [{transform_indices = @transform_0, window_bounds = array<i64: 384, 8>}, {transform_indices = @transform_1, window_bounds = array<i64: 8, 128>}, {transform_indices = @transform_2, window_bounds = array<i64: 1, 128>}, {transform_indices = @transform_3, window_bounds = array<i64: 384, 128>}]} {
    %c0 = arith.constant 0 : index
    %c0_0 = arith.constant 0 : index
    %0 = vector.load %arg2[%c0, %c0_0] : memref<384x8xbf16, #tpu.memory_space<vmem>>, vector<384x8xbf16>
    %c0_1 = arith.constant 0 : index
    %c0_2 = arith.constant 0 : index
    %1 = vector.load %arg3[%c0_1, %c0_2] : memref<8x128xbf16, #tpu.memory_space<vmem>>, vector<8x128xbf16>
    %cst = arith.constant dense<0.000000e+00> : vector<384x128xf32>
    %2 = tpu.matmul %0, %1, %cst {dimension_numbers = #tpu.dot_dimension_numbers<[1], [0], [0], [1], [0, 0, 1, 1], [], []>} : vector<384x8xbf16>, vector<8x128xbf16>, vector<384x128xf32> -> vector<384x128xf32>
    %c0_3 = arith.constant 0 : index
    %c0_4 = arith.constant 0 : index
    %3 = vector.load %arg4[%c0_3, %c0_4] : memref<1x128xf32, #tpu.memory_space<vmem>>, vector<1x128xf32>
    %4 = vector.broadcast %3 : vector<1x128xf32> to vector<384x128xf32>
    %5 = arith.addf %2, %4 : vector<384x128xf32>
    %c0_5 = arith.constant 0 : index
    %c0_6 = arith.constant 0 : index
    %6 = vector.load %arg5[%c0_5, %c0_6] : memref<384x128xf32, #tpu.memory_space<vmem>>, vector<384x128xf32>
    tpu.vector_store %arg5[%c0_5, %c0_6], %5 {strides = array<i32>} : memref<384x128xf32, #tpu.memory_space<vmem>>, vector<384x128xf32>,
    return
  }
  func.func @transform_0(%arg0: i32, %arg1: i32) -> (i32, i32) {
    %c0_i32 = arith.constant 0 : i32
    %c0_i32_0 = arith.constant 0 : i32
    return %arg0, %c0_i32 : i32, i32
  }
  func.func @transform_1(%arg0: i32, %arg1: i32) -> (i32, i32) {
    %c0_i32 = arith.constant 0 : i32
    %c0_i32_0 = arith.constant 0 : i32
    return %c0_i32, %arg1 : i32, i32
  }
  func.func @transform_2(%arg0: i32, %arg1: i32) -> (i32, i32) {
    %c0_i32 = arith.constant 0 : i32
    %c0_i32_0 = arith.constant 0 : i32
    return %c0_i32, %arg1 : i32, i32
  }
  func.func @transform_3(%arg0: i32, %arg1: i32) -> (i32, i32) {
    %c0_i32 = arith.constant 0 : i32
    return %arg0, %arg1 : i32, i32
  }
}

module attributes {stable_mosaic.version = 11 : i64} {
  func.func @_mm_kernel(%arg0: i32, %arg1: i32, %arg2: memref<384x8xbf16, #tpu.memory_space<vmem>>, %arg3: memref<8x128xbf16, #tpu.memory_space<vmem>>, %arg4: memref<1x128xf32, #tpu.memory_space<vmem>>, %arg5: memref<384x128xf32, #tpu.memory_space<vmem>>, %arg6: memref<384x128xf32, #tpu.memory_space<vmem>>) attributes {dimension_semantics = [#tpu.dimension_semantics<parallel>, #tpu.dimension_semantics<parallel>], iteration_bounds = array<i64: 3, 1>, scalar_prefetch = 0 : i64, scratch_operands = 0 : i64, tpu.core_type = #tpu.core_type<tc>, window_params = [{transform_indices = @transform_0, window_bounds = array<i64: 384, 8>}, {transform_indices = @transform_1, window_bounds = array<i64: 8, 128>}, {transform_indices = @transform_2, window_bounds = array<i64: 1, 128>}, {transform_indices = @transform_3, window_bounds = array<i64: 384, 128>}, {transform_indices = @transform_4, window_bounds = array<i64: 384, 128>}]} {
    %c0 = arith.constant 0 : index
    %c0_0 = arith.constant 0 : index
    %0 = vector.load %arg2[%c0, %c0_0] : memref<384x8xbf16, #tpu.memory_space<vmem>>, vector<384x8xbf16>
    %c0_1 = arith.constant 0 : index
    %c0_2 = arith.constant 0 : index
    %1 = vector.load %arg3[%c0_1, %c0_2] : memref<8x128xbf16, #tpu.memory_space<vmem>>, vector<8x128xbf16>
    %cst = arith.constant dense<0.000000e+00> : vector<384x128xf32>
    %2 = tpu.matmul %0, %1, %cst {dimension_numbers = #tpu.dot_dimension_numbers<[1], [0], [0], [1], [0, 0, 1, 1], [], []>} : vector<384x8xbf16>, vector<8x128xbf16>, vector<384x128xf32> -> vector<384x128xf32>
    %c0_3 = arith.constant 0 : index
    %c0_4 = arith.constant 0 : index
    %3 = vector.load %arg4[%c0_3, %c0_4] : memref<1x128xf32, #tpu.memory_space<vmem>>, vector<1x128xf32>
    %4 = vector.broadcast %3 : vector<1x128xf32> to vector<384x128xf32>
    %5 = arith.addf %2, %4 : vector<384x128xf32>
    %c0_5 = arith.constant 0 : index
    %c0_6 = arith.constant 0 : index
    %6 = vector.load %arg5[%c0_5, %c0_6] : memref<384x128xf32, #tpu.memory_space<vmem>>, vector<384x128xf32>
    %7 = arith.addf %5, %6 : vector<384x128xf32>
    %cst_7 = arith.constant 0.000000e+00 : f32
    %8 = vector.broadcast %cst_7 : f32 to vector<384x128xf32>
    %9 = arith.maximumf %7, %8 : vector<384x128xf32>
    %c0_8 = arith.constant 0 : index
    %c0_9 = arith.constant 0 : index
    %10 = vector.load %arg6[%c0_8, %c0_9] : memref<384x128xf32, #tpu.memory_space<vmem>>, vector<384x128xf32>
    tpu.vector_store %arg6[%c0_8, %c0_9], %9 {strides = array<i32>} : memref<384x128xf32, #tpu.memory_space<vmem>>, vector<384x128xf32>,
    return
  }
  func.func @transform_0(%arg0: i32, %arg1: i32) -> (i32, i32) {
    %c0_i32 = arith.constant 0 : i32
    %c0_i32_0 = arith.constant 0 : i32
    return %arg0, %c0_i32 : i32, i32
  }
  func.func @transform_1(%arg0: i32, %arg1: i32) -> (i32, i32) {
    %c0_i32 = arith.constant 0 : i32
    %c0_i32_0 = arith.constant 0 : i32
    return %c0_i32, %arg1 : i32, i32
  }
  func.func @transform_2(%arg0: i32, %arg1: i32) -> (i32, i32) {
    %c0_i32 = arith.constant 0 : i32
    %c0_i32_0 = arith.constant 0 : i32
    return %c0_i32, %arg1 : i32, i32
  }
  func.func @transform_3(%arg0: i32, %arg1: i32) -> (i32, i32) {
    %c0_i32 = arith.constant 0 : i32
    return %arg0, %arg1 : i32, i32
  }
  func.func @transform_4(%arg0: i32, %arg1: i32) -> (i32, i32) {
    %c0_i32 = arith.constant 0 : i32
    return %arg0, %arg1 : i32, i32
  }
}

module attributes {stable_mosaic.version = 11 : i64} {
  func.func @_mm_kernel(%arg0: i32, %arg1: i32, %arg2: memref<384x32xbf16, #tpu.memory_space<vmem>>, %arg3: memref<32x128xbf16, #tpu.memory_space<vmem>>, %arg4: memref<1x128xf32, #tpu.memory_space<vmem>>, %arg5: memref<384x128xf32, #tpu.memory_space<vmem>>) attributes {dimension_semantics = [#tpu.dimension_semantics<parallel>, #tpu.dimension_semantics<parallel>], iteration_bounds = array<i64: 3, 1>, scalar_prefetch = 0 : i64, scratch_operands = 0 : i64, tpu.core_type = #tpu.core_type<tc>, window_params = [{transform_indices = @transform_0, window_bounds = array<i64: 384, 32>}, {transform_indices = @transform_1, window_bounds = array<i64: 32, 128>}, {transform_indices = @transform_2, window_bounds = array<i64: 1, 128>}, {transform_indices = @transform_3, window_bounds = array<i64: 384, 128>}]} {
    %c0 = arith.constant 0 : index
    %c0_0 = arith.constant 0 : index
    %0 = vector.load %arg2[%c0, %c0_0] : memref<384x32xbf16, #tpu.memory_space<vmem>>, vector<384x32xbf16>
    %c0_1 = arith.constant 0 : index
    %c0_2 = arith.constant 0 : index
    %1 = vector.load %arg3[%c0_1, %c0_2] : memref<32x128xbf16, #tpu.memory_space<vmem>>, vector<32x128xbf16>
    %cst = arith.constant dense<0.000000e+00> : vector<384x128xf32>
    %2 = tpu.matmul %0, %1, %cst {dimension_numbers = #tpu.dot_dimension_numbers<[1], [0], [0], [1], [0, 0, 1, 1], [], []>} : vector<384x32xbf16>, vector<32x128xbf16>, vector<384x128xf32> -> vector<384x128xf32>
    %c0_3 = arith.constant 0 : index
    %c0_4 = arith.constant 0 : index
    %3 = vector.load %arg4[%c0_3, %c0_4] : memref<1x128xf32, #tpu.memory_space<vmem>>, vector<1x128xf32>
    %4 = vector.broadcast %3 : vector<1x128xf32> to vector<384x128xf32>
    %5 = arith.addf %2, %4 : vector<384x128xf32>
    %cst_5 = arith.constant 0.000000e+00 : f32
    %6 = vector.broadcast %cst_5 : f32 to vector<384x128xf32>
    %7 = arith.maximumf %5, %6 : vector<384x128xf32>
    %c0_6 = arith.constant 0 : index
    %c0_7 = arith.constant 0 : index
    %8 = vector.load %arg5[%c0_6, %c0_7] : memref<384x128xf32, #tpu.memory_space<vmem>>, vector<384x128xf32>
    tpu.vector_store %arg5[%c0_6, %c0_7], %7 {strides = array<i32>} : memref<384x128xf32, #tpu.memory_space<vmem>>, vector<384x128xf32>,
    return
  }
  func.func @transform_0(%arg0: i32, %arg1: i32) -> (i32, i32) {
    %c0_i32 = arith.constant 0 : i32
    %c0_i32_0 = arith.constant 0 : i32
    return %arg0, %c0_i32 : i32, i32
  }
  func.func @transform_1(%arg0: i32, %arg1: i32) -> (i32, i32) {
    %c0_i32 = arith.constant 0 : i32
    %c0_i32_0 = arith.constant 0 : i32
    return %c0_i32, %arg1 : i32, i32
  }
  func.func @transform_2(%arg0: i32, %arg1: i32) -> (i32, i32) {
    %c0_i32 = arith.constant 0 : i32
    %c0_i32_0 = arith.constant 0 : i32
    return %c0_i32, %arg1 : i32, i32
  }
  func.func @transform_3(%arg0: i32, %arg1: i32) -> (i32, i32) {
    %c0_i32 = arith.constant 0 : i32
    return %arg0, %arg1 : i32, i32
  }
}

module attributes {stable_mosaic.version = 11 : i64} {
  func.func @_mm_kernel(%arg0: i32, %arg1: i32, %arg2: memref<144x144xbf16, #tpu.memory_space<vmem>>, %arg3: memref<144x128xbf16, #tpu.memory_space<vmem>>, %arg4: memref<1x128xf32, #tpu.memory_space<vmem>>, %arg5: memref<144x128xf32, #tpu.memory_space<vmem>>) attributes {dimension_semantics = [#tpu.dimension_semantics<parallel>, #tpu.dimension_semantics<parallel>], iteration_bounds = array<i64: 2, 1>, scalar_prefetch = 0 : i64, scratch_operands = 0 : i64, tpu.core_type = #tpu.core_type<tc>, window_params = [{transform_indices = @transform_0, window_bounds = array<i64: 144, 144>}, {transform_indices = @transform_1, window_bounds = array<i64: 144, 128>}, {transform_indices = @transform_2, window_bounds = array<i64: 1, 128>}, {transform_indices = @transform_3, window_bounds = array<i64: 144, 128>}]} {
    %c0 = arith.constant 0 : index
    %c0_0 = arith.constant 0 : index
    %0 = vector.load %arg2[%c0, %c0_0] : memref<144x144xbf16, #tpu.memory_space<vmem>>, vector<144x144xbf16>
    %c0_1 = arith.constant 0 : index
    %c0_2 = arith.constant 0 : index
    %1 = vector.load %arg3[%c0_1, %c0_2] : memref<144x128xbf16, #tpu.memory_space<vmem>>, vector<144x128xbf16>
    %cst = arith.constant dense<0.000000e+00> : vector<144x128xf32>
    %2 = tpu.matmul %0, %1, %cst {dimension_numbers = #tpu.dot_dimension_numbers<[1], [0], [0], [1], [0, 0, 1, 1], [], []>} : vector<144x144xbf16>, vector<144x128xbf16>, vector<144x128xf32> -> vector<144x128xf32>
    %c0_3 = arith.constant 0 : index
    %c0_4 = arith.constant 0 : index
    %3 = vector.load %arg4[%c0_3, %c0_4] : memref<1x128xf32, #tpu.memory_space<vmem>>, vector<1x128xf32>
    %4 = vector.broadcast %3 : vector<1x128xf32> to vector<144x128xf32>
    %5 = arith.addf %2, %4 : vector<144x128xf32>
    %cst_5 = arith.constant 0.000000e+00 : f32
    %6 = vector.broadcast %cst_5 : f32 to vector<144x128xf32>
    %7 = arith.maximumf %5, %6 : vector<144x128xf32>
    %c0_6 = arith.constant 0 : index
    %c0_7 = arith.constant 0 : index
    %8 = vector.load %arg5[%c0_6, %c0_7] : memref<144x128xf32, #tpu.memory_space<vmem>>, vector<144x128xf32>
    tpu.vector_store %arg5[%c0_6, %c0_7], %7 {strides = array<i32>} : memref<144x128xf32, #tpu.memory_space<vmem>>, vector<144x128xf32>,
    return
  }
  func.func @transform_0(%arg0: i32, %arg1: i32) -> (i32, i32) {
    %c0_i32 = arith.constant 0 : i32
    %c0_i32_0 = arith.constant 0 : i32
    return %arg0, %c0_i32 : i32, i32
  }
  func.func @transform_1(%arg0: i32, %arg1: i32) -> (i32, i32) {
    %c0_i32 = arith.constant 0 : i32
    %c0_i32_0 = arith.constant 0 : i32
    return %c0_i32, %arg1 : i32, i32
  }
  func.func @transform_2(%arg0: i32, %arg1: i32) -> (i32, i32) {
    %c0_i32 = arith.constant 0 : i32
    %c0_i32_0 = arith.constant 0 : i32
    return %c0_i32, %arg1 : i32, i32
  }
  func.func @transform_3(%arg0: i32, %arg1: i32) -> (i32, i32) {
    %c0_i32 = arith.constant 0 : i32
    return %arg0, %arg1 : i32, i32
  }
}

module attributes {stable_mosaic.version = 11 : i64} {
  func.func @_mm_kernel(%arg0: i32, %arg1: i32, %arg2: memref<144x32xbf16, #tpu.memory_space<vmem>>, %arg3: memref<32x128xbf16, #tpu.memory_space<vmem>>, %arg4: memref<1x128xf32, #tpu.memory_space<vmem>>, %arg5: memref<144x128xf32, #tpu.memory_space<vmem>>) attributes {dimension_semantics = [#tpu.dimension_semantics<parallel>, #tpu.dimension_semantics<parallel>], iteration_bounds = array<i64: 2, 1>, scalar_prefetch = 0 : i64, scratch_operands = 0 : i64, tpu.core_type = #tpu.core_type<tc>, window_params = [{transform_indices = @transform_0, window_bounds = array<i64: 144, 32>}, {transform_indices = @transform_1, window_bounds = array<i64: 32, 128>}, {transform_indices = @transform_2, window_bounds = array<i64: 1, 128>}, {transform_indices = @transform_3, window_bounds = array<i64: 144, 128>}]} {
    %c0 = arith.constant 0 : index
    %c0_0 = arith.constant 0 : index
    %0 = vector.load %arg2[%c0, %c0_0] : memref<144x32xbf16, #tpu.memory_space<vmem>>, vector<144x32xbf16>
    %c0_1 = arith.constant 0 : index
    %c0_2 = arith.constant 0 : index
    %1 = vector.load %arg3[%c0_1, %c0_2] : memref<32x128xbf16, #tpu.memory_space<vmem>>, vector<32x128xbf16>
    %cst = arith.constant dense<0.000000e+00> : vector<144x128xf32>
    %2 = tpu.matmul %0, %1, %cst {dimension_numbers = #tpu.dot_dimension_numbers<[1], [0], [0], [1], [0, 0, 1, 1], [], []>} : vector<144x32xbf16>, vector<32x128xbf16>, vector<144x128xf32> -> vector<144x128xf32>
    %c0_3 = arith.constant 0 : index
    %c0_4 = arith.constant 0 : index
    %3 = vector.load %arg4[%c0_3, %c0_4] : memref<1x128xf32, #tpu.memory_space<vmem>>, vector<1x128xf32>
    %4 = vector.broadcast %3 : vector<1x128xf32> to vector<144x128xf32>
    %5 = arith.addf %2, %4 : vector<144x128xf32>
    %c0_5 = arith.constant 0 : index
    %c0_6 = arith.constant 0 : index
    %6 = vector.load %arg5[%c0_5, %c0_6] : memref<144x128xf32, #tpu.memory_space<vmem>>, vector<144x128xf32>
    tpu.vector_store %arg5[%c0_5, %c0_6], %5 {strides = array<i32>} : memref<144x128xf32, #tpu.memory_space<vmem>>, vector<144x128xf32>,
    return
  }
  func.func @transform_0(%arg0: i32, %arg1: i32) -> (i32, i32) {
    %c0_i32 = arith.constant 0 : i32
    %c0_i32_0 = arith.constant 0 : i32
    return %arg0, %c0_i32 : i32, i32
  }
  func.func @transform_1(%arg0: i32, %arg1: i32) -> (i32, i32) {
    %c0_i32 = arith.constant 0 : i32
    %c0_i32_0 = arith.constant 0 : i32
    return %c0_i32, %arg1 : i32, i32
  }
  func.func @transform_2(%arg0: i32, %arg1: i32) -> (i32, i32) {
    %c0_i32 = arith.constant 0 : i32
    %c0_i32_0 = arith.constant 0 : i32
    return %c0_i32, %arg1 : i32, i32
  }
  func.func @transform_3(%arg0: i32, %arg1: i32) -> (i32, i32) {
    %c0_i32 = arith.constant 0 : i32
    return %arg0, %arg1 : i32, i32
  }
}

module attributes {stable_mosaic.version = 11 : i64} {
  func.func @_mm_kernel(%arg0: i32, %arg1: i32, %arg2: memref<144x16xbf16, #tpu.memory_space<vmem>>, %arg3: memref<16x128xbf16, #tpu.memory_space<vmem>>, %arg4: memref<1x128xf32, #tpu.memory_space<vmem>>, %arg5: memref<144x128xf32, #tpu.memory_space<vmem>>, %arg6: memref<144x128xf32, #tpu.memory_space<vmem>>) attributes {dimension_semantics = [#tpu.dimension_semantics<parallel>, #tpu.dimension_semantics<parallel>], iteration_bounds = array<i64: 2, 1>, scalar_prefetch = 0 : i64, scratch_operands = 0 : i64, tpu.core_type = #tpu.core_type<tc>, window_params = [{transform_indices = @transform_0, window_bounds = array<i64: 144, 16>}, {transform_indices = @transform_1, window_bounds = array<i64: 16, 128>}, {transform_indices = @transform_2, window_bounds = array<i64: 1, 128>}, {transform_indices = @transform_3, window_bounds = array<i64: 144, 128>}, {transform_indices = @transform_4, window_bounds = array<i64: 144, 128>}]} {
    %c0 = arith.constant 0 : index
    %c0_0 = arith.constant 0 : index
    %0 = vector.load %arg2[%c0, %c0_0] : memref<144x16xbf16, #tpu.memory_space<vmem>>, vector<144x16xbf16>
    %c0_1 = arith.constant 0 : index
    %c0_2 = arith.constant 0 : index
    %1 = vector.load %arg3[%c0_1, %c0_2] : memref<16x128xbf16, #tpu.memory_space<vmem>>, vector<16x128xbf16>
    %cst = arith.constant dense<0.000000e+00> : vector<144x128xf32>
    %2 = tpu.matmul %0, %1, %cst {dimension_numbers = #tpu.dot_dimension_numbers<[1], [0], [0], [1], [0, 0, 1, 1], [], []>} : vector<144x16xbf16>, vector<16x128xbf16>, vector<144x128xf32> -> vector<144x128xf32>
    %c0_3 = arith.constant 0 : index
    %c0_4 = arith.constant 0 : index
    %3 = vector.load %arg4[%c0_3, %c0_4] : memref<1x128xf32, #tpu.memory_space<vmem>>, vector<1x128xf32>
    %4 = vector.broadcast %3 : vector<1x128xf32> to vector<144x128xf32>
    %5 = arith.addf %2, %4 : vector<144x128xf32>
    %c0_5 = arith.constant 0 : index
    %c0_6 = arith.constant 0 : index
    %6 = vector.load %arg5[%c0_5, %c0_6] : memref<144x128xf32, #tpu.memory_space<vmem>>, vector<144x128xf32>
    %7 = arith.addf %5, %6 : vector<144x128xf32>
    %cst_7 = arith.constant 0.000000e+00 : f32
    %8 = vector.broadcast %cst_7 : f32 to vector<144x128xf32>
    %9 = arith.maximumf %7, %8 : vector<144x128xf32>
    %c0_8 = arith.constant 0 : index
    %c0_9 = arith.constant 0 : index
    %10 = vector.load %arg6[%c0_8, %c0_9] : memref<144x128xf32, #tpu.memory_space<vmem>>, vector<144x128xf32>
    tpu.vector_store %arg6[%c0_8, %c0_9], %9 {strides = array<i32>} : memref<144x128xf32, #tpu.memory_space<vmem>>, vector<144x128xf32>,
    return
  }
  func.func @transform_0(%arg0: i32, %arg1: i32) -> (i32, i32) {
    %c0_i32 = arith.constant 0 : i32
    %c0_i32_0 = arith.constant 0 : i32
    return %arg0, %c0_i32 : i32, i32
  }
  func.func @transform_1(%arg0: i32, %arg1: i32) -> (i32, i32) {
    %c0_i32 = arith.constant 0 : i32
    %c0_i32_0 = arith.constant 0 : i32
    return %c0_i32, %arg1 : i32, i32
  }
  func.func @transform_2(%arg0: i32, %arg1: i32) -> (i32, i32) {
    %c0_i32 = arith.constant 0 : i32
    %c0_i32_0 = arith.constant 0 : i32
    return %c0_i32, %arg1 : i32, i32
  }
  func.func @transform_3(%arg0: i32, %arg1: i32) -> (i32, i32) {
    %c0_i32 = arith.constant 0 : i32
    return %arg0, %arg1 : i32, i32
  }
  func.func @transform_4(%arg0: i32, %arg1: i32) -> (i32, i32) {
    %c0_i32 = arith.constant 0 : i32
    return %arg0, %arg1 : i32, i32
  }
}

module attributes {stable_mosaic.version = 11 : i64} {
  func.func @_mm_kernel(%arg0: i32, %arg1: i32, %arg2: memref<144x64xbf16, #tpu.memory_space<vmem>>, %arg3: memref<64x128xbf16, #tpu.memory_space<vmem>>, %arg4: memref<1x128xf32, #tpu.memory_space<vmem>>, %arg5: memref<144x128xf32, #tpu.memory_space<vmem>>) attributes {dimension_semantics = [#tpu.dimension_semantics<parallel>, #tpu.dimension_semantics<parallel>], iteration_bounds = array<i64: 2, 1>, scalar_prefetch = 0 : i64, scratch_operands = 0 : i64, tpu.core_type = #tpu.core_type<tc>, window_params = [{transform_indices = @transform_0, window_bounds = array<i64: 144, 64>}, {transform_indices = @transform_1, window_bounds = array<i64: 64, 128>}, {transform_indices = @transform_2, window_bounds = array<i64: 1, 128>}, {transform_indices = @transform_3, window_bounds = array<i64: 144, 128>}]} {
    %c0 = arith.constant 0 : index
    %c0_0 = arith.constant 0 : index
    %0 = vector.load %arg2[%c0, %c0_0] : memref<144x64xbf16, #tpu.memory_space<vmem>>, vector<144x64xbf16>
    %c0_1 = arith.constant 0 : index
    %c0_2 = arith.constant 0 : index
    %1 = vector.load %arg3[%c0_1, %c0_2] : memref<64x128xbf16, #tpu.memory_space<vmem>>, vector<64x128xbf16>
    %cst = arith.constant dense<0.000000e+00> : vector<144x128xf32>
    %2 = tpu.matmul %0, %1, %cst {dimension_numbers = #tpu.dot_dimension_numbers<[1], [0], [0], [1], [0, 0, 1, 1], [], []>} : vector<144x64xbf16>, vector<64x128xbf16>, vector<144x128xf32> -> vector<144x128xf32>
    %c0_3 = arith.constant 0 : index
    %c0_4 = arith.constant 0 : index
    %3 = vector.load %arg4[%c0_3, %c0_4] : memref<1x128xf32, #tpu.memory_space<vmem>>, vector<1x128xf32>
    %4 = vector.broadcast %3 : vector<1x128xf32> to vector<144x128xf32>
    %5 = arith.addf %2, %4 : vector<144x128xf32>
    %cst_5 = arith.constant 0.000000e+00 : f32
    %6 = vector.broadcast %cst_5 : f32 to vector<144x128xf32>
    %7 = arith.maximumf %5, %6 : vector<144x128xf32>
    %c0_6 = arith.constant 0 : index
    %c0_7 = arith.constant 0 : index
    %8 = vector.load %arg5[%c0_6, %c0_7] : memref<144x128xf32, #tpu.memory_space<vmem>>, vector<144x128xf32>
    tpu.vector_store %arg5[%c0_6, %c0_7], %7 {strides = array<i32>} : memref<144x128xf32, #tpu.memory_space<vmem>>, vector<144x128xf32>,
    return
  }
  func.func @transform_0(%arg0: i32, %arg1: i32) -> (i32, i32) {
    %c0_i32 = arith.constant 0 : i32
    %c0_i32_0 = arith.constant 0 : i32
    return %arg0, %c0_i32 : i32, i32
  }
  func.func @transform_1(%arg0: i32, %arg1: i32) -> (i32, i32) {
    %c0_i32 = arith.constant 0 : i32
    %c0_i32_0 = arith.constant 0 : i32
    return %c0_i32, %arg1 : i32, i32
  }
  func.func @transform_2(%arg0: i32, %arg1: i32) -> (i32, i32) {
    %c0_i32 = arith.constant 0 : i32
    %c0_i32_0 = arith.constant 0 : i32
    return %c0_i32, %arg1 : i32, i32
  }
  func.func @transform_3(%arg0: i32, %arg1: i32) -> (i32, i32) {
    %c0_i32 = arith.constant 0 : i32
    return %arg0, %arg1 : i32, i32
  }
}

module attributes {stable_mosaic.version = 11 : i64} {
  func.func @_mm_kernel(%arg0: i32, %arg1: i32, %arg2: memref<24x288xbf16, #tpu.memory_space<vmem>>, %arg3: memref<288x128xbf16, #tpu.memory_space<vmem>>, %arg4: memref<1x128xf32, #tpu.memory_space<vmem>>, %arg5: memref<24x128xf32, #tpu.memory_space<vmem>>) attributes {dimension_semantics = [#tpu.dimension_semantics<parallel>, #tpu.dimension_semantics<parallel>], iteration_bounds = array<i64: 3, 1>, scalar_prefetch = 0 : i64, scratch_operands = 0 : i64, tpu.core_type = #tpu.core_type<tc>, window_params = [{transform_indices = @transform_0, window_bounds = array<i64: 24, 288>}, {transform_indices = @transform_1, window_bounds = array<i64: 288, 128>}, {transform_indices = @transform_2, window_bounds = array<i64: 1, 128>}, {transform_indices = @transform_3, window_bounds = array<i64: 24, 128>}]} {
    %c0 = arith.constant 0 : index
    %c0_0 = arith.constant 0 : index
    %0 = vector.load %arg2[%c0, %c0_0] : memref<24x288xbf16, #tpu.memory_space<vmem>>, vector<24x288xbf16>
    %c0_1 = arith.constant 0 : index
    %c0_2 = arith.constant 0 : index
    %1 = vector.load %arg3[%c0_1, %c0_2] : memref<288x128xbf16, #tpu.memory_space<vmem>>, vector<288x128xbf16>
    %cst = arith.constant dense<0.000000e+00> : vector<24x128xf32>
    %2 = tpu.matmul %0, %1, %cst {dimension_numbers = #tpu.dot_dimension_numbers<[1], [0], [0], [1], [0, 0, 1, 1], [], []>} : vector<24x288xbf16>, vector<288x128xbf16>, vector<24x128xf32> -> vector<24x128xf32>
    %c0_3 = arith.constant 0 : index
    %c0_4 = arith.constant 0 : index
    %3 = vector.load %arg4[%c0_3, %c0_4] : memref<1x128xf32, #tpu.memory_space<vmem>>, vector<1x128xf32>
    %4 = vector.broadcast %3 : vector<1x128xf32> to vector<24x128xf32>
    %5 = arith.addf %2, %4 : vector<24x128xf32>
    %cst_5 = arith.constant 0.000000e+00 : f32
    %6 = vector.broadcast %cst_5 : f32 to vector<24x128xf32>
    %7 = arith.maximumf %5, %6 : vector<24x128xf32>
    %c0_6 = arith.constant 0 : index
    %c0_7 = arith.constant 0 : index
    %8 = vector.load %arg5[%c0_6, %c0_7] : memref<24x128xf32, #tpu.memory_space<vmem>>, vector<24x128xf32>
    tpu.vector_store %arg5[%c0_6, %c0_7], %7 {strides = array<i32>} : memref<24x128xf32, #tpu.memory_space<vmem>>, vector<24x128xf32>,
    return
  }
  func.func @transform_0(%arg0: i32, %arg1: i32) -> (i32, i32) {
    %c0_i32 = arith.constant 0 : i32
    %c0_i32_0 = arith.constant 0 : i32
    return %arg0, %c0_i32 : i32, i32
  }
  func.func @transform_1(%arg0: i32, %arg1: i32) -> (i32, i32) {
    %c0_i32 = arith.constant 0 : i32
    %c0_i32_0 = arith.constant 0 : i32
    return %c0_i32, %arg1 : i32, i32
  }
  func.func @transform_2(%arg0: i32, %arg1: i32) -> (i32, i32) {
    %c0_i32 = arith.constant 0 : i32
    %c0_i32_0 = arith.constant 0 : i32
    return %c0_i32, %arg1 : i32, i32
  }
  func.func @transform_3(%arg0: i32, %arg1: i32) -> (i32, i32) {
    %c0_i32 = arith.constant 0 : i32
    return %arg0, %arg1 : i32, i32
  }
}

module attributes {stable_mosaic.version = 11 : i64} {
  func.func @_mm_kernel(%arg0: i32, %arg1: i32, %arg2: memref<24x32xbf16, #tpu.memory_space<vmem>>, %arg3: memref<32x128xbf16, #tpu.memory_space<vmem>>, %arg4: memref<1x128xf32, #tpu.memory_space<vmem>>, %arg5: memref<24x128xf32, #tpu.memory_space<vmem>>, %arg6: memref<24x128xf32, #tpu.memory_space<vmem>>) attributes {dimension_semantics = [#tpu.dimension_semantics<parallel>, #tpu.dimension_semantics<parallel>], iteration_bounds = array<i64: 3, 1>, scalar_prefetch = 0 : i64, scratch_operands = 0 : i64, tpu.core_type = #tpu.core_type<tc>, window_params = [{transform_indices = @transform_0, window_bounds = array<i64: 24, 32>}, {transform_indices = @transform_1, window_bounds = array<i64: 32, 128>}, {transform_indices = @transform_2, window_bounds = array<i64: 1, 128>}, {transform_indices = @transform_3, window_bounds = array<i64: 24, 128>}, {transform_indices = @transform_4, window_bounds = array<i64: 24, 128>}]} {
    %c0 = arith.constant 0 : index
    %c0_0 = arith.constant 0 : index
    %0 = vector.load %arg2[%c0, %c0_0] : memref<24x32xbf16, #tpu.memory_space<vmem>>, vector<24x32xbf16>
    %c0_1 = arith.constant 0 : index
    %c0_2 = arith.constant 0 : index
    %1 = vector.load %arg3[%c0_1, %c0_2] : memref<32x128xbf16, #tpu.memory_space<vmem>>, vector<32x128xbf16>
    %cst = arith.constant dense<0.000000e+00> : vector<24x128xf32>
    %2 = tpu.matmul %0, %1, %cst {dimension_numbers = #tpu.dot_dimension_numbers<[1], [0], [0], [1], [0, 0, 1, 1], [], []>} : vector<24x32xbf16>, vector<32x128xbf16>, vector<24x128xf32> -> vector<24x128xf32>
    %c0_3 = arith.constant 0 : index
    %c0_4 = arith.constant 0 : index
    %3 = vector.load %arg4[%c0_3, %c0_4] : memref<1x128xf32, #tpu.memory_space<vmem>>, vector<1x128xf32>
    %4 = vector.broadcast %3 : vector<1x128xf32> to vector<24x128xf32>
    %5 = arith.addf %2, %4 : vector<24x128xf32>
    %c0_5 = arith.constant 0 : index
    %c0_6 = arith.constant 0 : index
    %6 = vector.load %arg5[%c0_5, %c0_6] : memref<24x128xf32, #tpu.memory_space<vmem>>, vector<24x128xf32>
    %7 = arith.addf %5, %6 : vector<24x128xf32>
    %cst_7 = arith.constant 0.000000e+00 : f32
    %8 = vector.broadcast %cst_7 : f32 to vector<24x128xf32>
    %9 = arith.maximumf %7, %8 : vector<24x128xf32>
    %c0_8 = arith.constant 0 : index
    %c0_9 = arith.constant 0 : index
    %10 = vector.load %arg6[%c0_8, %c0_9] : memref<24x128xf32, #tpu.memory_space<vmem>>, vector<24x128xf32>
    tpu.vector_store %arg6[%c0_8, %c0_9], %9 {strides = array<i32>} : memref<24x128xf32, #tpu.memory_space<vmem>>, vector<24x128xf32>,
    return
  }
  func.func @transform_0(%arg0: i32, %arg1: i32) -> (i32, i32) {
    %c0_i32 = arith.constant 0 : i32
    %c0_i32_0 = arith.constant 0 : i32
    return %arg0, %c0_i32 : i32, i32
  }
  func.func @transform_1(%arg0: i32, %arg1: i32) -> (i32, i32) {
    %c0_i32 = arith.constant 0 : i32
    %c0_i32_0 = arith.constant 0 : i32
    return %c0_i32, %arg1 : i32, i32
  }
  func.func @transform_2(%arg0: i32, %arg1: i32) -> (i32, i32) {
    %c0_i32 = arith.constant 0 : i32
    %c0_i32_0 = arith.constant 0 : i32
    return %c0_i32, %arg1 : i32, i32
  }
  func.func @transform_3(%arg0: i32, %arg1: i32) -> (i32, i32) {
    %c0_i32 = arith.constant 0 : i32
    return %arg0, %arg1 : i32, i32
  }
  func.func @transform_4(%arg0: i32, %arg1: i32) -> (i32, i32) {
    %c0_i32 = arith.constant 0 : i32
    return %arg0, %arg1 : i32, i32
  }
}

module attributes {stable_mosaic.version = 11 : i64} {
  func.func @_mm_kernel(%arg0: i32, %arg1: i32, %arg2: memref<24x64xbf16, #tpu.memory_space<vmem>>, %arg3: memref<64x128xbf16, #tpu.memory_space<vmem>>, %arg4: memref<1x128xf32, #tpu.memory_space<vmem>>, %arg5: memref<24x128xf32, #tpu.memory_space<vmem>>) attributes {dimension_semantics = [#tpu.dimension_semantics<parallel>, #tpu.dimension_semantics<parallel>], iteration_bounds = array<i64: 3, 1>, scalar_prefetch = 0 : i64, scratch_operands = 0 : i64, tpu.core_type = #tpu.core_type<tc>, window_params = [{transform_indices = @transform_0, window_bounds = array<i64: 24, 64>}, {transform_indices = @transform_1, window_bounds = array<i64: 64, 128>}, {transform_indices = @transform_2, window_bounds = array<i64: 1, 128>}, {transform_indices = @transform_3, window_bounds = array<i64: 24, 128>}]} {
    %c0 = arith.constant 0 : index
    %c0_0 = arith.constant 0 : index
    %0 = vector.load %arg2[%c0, %c0_0] : memref<24x64xbf16, #tpu.memory_space<vmem>>, vector<24x64xbf16>
    %c0_1 = arith.constant 0 : index
    %c0_2 = arith.constant 0 : index
    %1 = vector.load %arg3[%c0_1, %c0_2] : memref<64x128xbf16, #tpu.memory_space<vmem>>, vector<64x128xbf16>
    %cst = arith.constant dense<0.000000e+00> : vector<24x128xf32>
    %2 = tpu.matmul %0, %1, %cst {dimension_numbers = #tpu.dot_dimension_numbers<[1], [0], [0], [1], [0, 0, 1, 1], [], []>} : vector<24x64xbf16>, vector<64x128xbf16>, vector<24x128xf32> -> vector<24x128xf32>
    %c0_3 = arith.constant 0 : index
    %c0_4 = arith.constant 0 : index
    %3 = vector.load %arg4[%c0_3, %c0_4] : memref<1x128xf32, #tpu.memory_space<vmem>>, vector<1x128xf32>
    %4 = vector.broadcast %3 : vector<1x128xf32> to vector<24x128xf32>
    %5 = arith.addf %2, %4 : vector<24x128xf32>
    %c0_5 = arith.constant 0 : index
    %c0_6 = arith.constant 0 : index
    %6 = vector.load %arg5[%c0_5, %c0_6] : memref<24x128xf32, #tpu.memory_space<vmem>>, vector<24x128xf32>
    tpu.vector_store %arg5[%c0_5, %c0_6], %5 {strides = array<i32>} : memref<24x128xf32, #tpu.memory_space<vmem>>, vector<24x128xf32>,
    return
  }
  func.func @transform_0(%arg0: i32, %arg1: i32) -> (i32, i32) {
    %c0_i32 = arith.constant 0 : i32
    %c0_i32_0 = arith.constant 0 : i32
    return %arg0, %c0_i32 : i32, i32
  }
  func.func @transform_1(%arg0: i32, %arg1: i32) -> (i32, i32) {
    %c0_i32 = arith.constant 0 : i32
    %c0_i32_0 = arith.constant 0 : i32
    return %c0_i32, %arg1 : i32, i32
  }
  func.func @transform_2(%arg0: i32, %arg1: i32) -> (i32, i32) {
    %c0_i32 = arith.constant 0 : i32
    %c0_i32_0 = arith.constant 0 : i32
    return %c0_i32, %arg1 : i32, i32
  }
  func.func @transform_3(%arg0: i32, %arg1: i32) -> (i32, i32) {
    %c0_i32 = arith.constant 0 : i32
    return %arg0, %arg1 : i32, i32
  }
}

module attributes {stable_mosaic.version = 11 : i64} {
  func.func @_mm_kernel(%arg0: i32, %arg1: i32, %arg2: memref<24x128xbf16, #tpu.memory_space<vmem>>, %arg3: memref<128x128xbf16, #tpu.memory_space<vmem>>, %arg4: memref<1x128xf32, #tpu.memory_space<vmem>>, %arg5: memref<24x128xf32, #tpu.memory_space<vmem>>) attributes {dimension_semantics = [#tpu.dimension_semantics<parallel>, #tpu.dimension_semantics<parallel>], iteration_bounds = array<i64: 3, 1>, scalar_prefetch = 0 : i64, scratch_operands = 0 : i64, tpu.core_type = #tpu.core_type<tc>, window_params = [{transform_indices = @transform_0, window_bounds = array<i64: 24, 128>}, {transform_indices = @transform_1, window_bounds = array<i64: 128, 128>}, {transform_indices = @transform_2, window_bounds = array<i64: 1, 128>}, {transform_indices = @transform_3, window_bounds = array<i64: 24, 128>}]} {
    %c0 = arith.constant 0 : index
    %c0_0 = arith.constant 0 : index
    %0 = vector.load %arg2[%c0, %c0_0] : memref<24x128xbf16, #tpu.memory_space<vmem>>, vector<24x128xbf16>
    %c0_1 = arith.constant 0 : index
    %c0_2 = arith.constant 0 : index
    %1 = vector.load %arg3[%c0_1, %c0_2] : memref<128x128xbf16, #tpu.memory_space<vmem>>, vector<128x128xbf16>
    %cst = arith.constant dense<0.000000e+00> : vector<24x128xf32>
    %2 = tpu.matmul %0, %1, %cst {dimension_numbers = #tpu.dot_dimension_numbers<[1], [0], [0], [1], [0, 0, 1, 1], [], []>} : vector<24x128xbf16>, vector<128x128xbf16>, vector<24x128xf32> -> vector<24x128xf32>
    %c0_3 = arith.constant 0 : index
    %c0_4 = arith.constant 0 : index
    %3 = vector.load %arg4[%c0_3, %c0_4] : memref<1x128xf32, #tpu.memory_space<vmem>>, vector<1x128xf32>
    %4 = vector.broadcast %3 : vector<1x128xf32> to vector<24x128xf32>
    %5 = arith.addf %2, %4 : vector<24x128xf32>
    %cst_5 = arith.constant 0.000000e+00 : f32
    %6 = vector.broadcast %cst_5 : f32 to vector<24x128xf32>
    %7 = arith.maximumf %5, %6 : vector<24x128xf32>
    %c0_6 = arith.constant 0 : index
    %c0_7 = arith.constant 0 : index
    %8 = vector.load %arg5[%c0_6, %c0_7] : memref<24x128xf32, #tpu.memory_space<vmem>>, vector<24x128xf32>
    tpu.vector_store %arg5[%c0_6, %c0_7], %7 {strides = array<i32>} : memref<24x128xf32, #tpu.memory_space<vmem>>, vector<24x128xf32>,
    return
  }
  func.func @transform_0(%arg0: i32, %arg1: i32) -> (i32, i32) {
    %c0_i32 = arith.constant 0 : i32
    %c0_i32_0 = arith.constant 0 : i32
    return %arg0, %c0_i32 : i32, i32
  }
  func.func @transform_1(%arg0: i32, %arg1: i32) -> (i32, i32) {
    %c0_i32 = arith.constant 0 : i32
    %c0_i32_0 = arith.constant 0 : i32
    return %c0_i32, %arg1 : i32, i32
  }
  func.func @transform_2(%arg0: i32, %arg1: i32) -> (i32, i32) {
    %c0_i32 = arith.constant 0 : i32
    %c0_i32_0 = arith.constant 0 : i32
    return %c0_i32, %arg1 : i32, i32
  }
  func.func @transform_3(%arg0: i32, %arg1: i32) -> (i32, i32) {
    %c0_i32 = arith.constant 0 : i32
    return %arg0, %arg1 : i32, i32
  }
}

module attributes {stable_mosaic.version = 11 : i64} {
  func.func @_mm_kernel(%arg0: i32, %arg1: i32, %arg2: memref<8x576xbf16, #tpu.memory_space<vmem>>, %arg3: memref<576x128xbf16, #tpu.memory_space<vmem>>, %arg4: memref<1x128xf32, #tpu.memory_space<vmem>>, %arg5: memref<8x128xf32, #tpu.memory_space<vmem>>) attributes {dimension_semantics = [#tpu.dimension_semantics<parallel>, #tpu.dimension_semantics<parallel>], iteration_bounds = array<i64: 3, 1>, scalar_prefetch = 0 : i64, scratch_operands = 0 : i64, tpu.core_type = #tpu.core_type<tc>, window_params = [{transform_indices = @transform_0, window_bounds = array<i64: 8, 576>}, {transform_indices = @transform_1, window_bounds = array<i64: 576, 128>}, {transform_indices = @transform_2, window_bounds = array<i64: 1, 128>}, {transform_indices = @transform_3, window_bounds = array<i64: 8, 128>}]} {
    %c0 = arith.constant 0 : index
    %c0_0 = arith.constant 0 : index
    %0 = vector.load %arg2[%c0, %c0_0] : memref<8x576xbf16, #tpu.memory_space<vmem>>, vector<8x576xbf16>
    %c0_1 = arith.constant 0 : index
    %c0_2 = arith.constant 0 : index
    %1 = vector.load %arg3[%c0_1, %c0_2] : memref<576x128xbf16, #tpu.memory_space<vmem>>, vector<576x128xbf16>
    %cst = arith.constant dense<0.000000e+00> : vector<8x128xf32>
    %2 = tpu.matmul %0, %1, %cst {dimension_numbers = #tpu.dot_dimension_numbers<[1], [0], [0], [1], [0, 0, 1, 1], [], []>} : vector<8x576xbf16>, vector<576x128xbf16>, vector<8x128xf32> -> vector<8x128xf32>
    %c0_3 = arith.constant 0 : index
    %c0_4 = arith.constant 0 : index
    %3 = vector.load %arg4[%c0_3, %c0_4] : memref<1x128xf32, #tpu.memory_space<vmem>>, vector<1x128xf32>
    %4 = vector.broadcast %3 : vector<1x128xf32> to vector<8x128xf32>
    %5 = arith.addf %2, %4 : vector<8x128xf32>
    %cst_5 = arith.constant 0.000000e+00 : f32
    %6 = vector.broadcast %cst_5 : f32 to vector<8x128xf32>
    %7 = arith.maximumf %5, %6 : vector<8x128xf32>
    %c0_6 = arith.constant 0 : index
    %c0_7 = arith.constant 0 : index
    %8 = vector.load %arg5[%c0_6, %c0_7] : memref<8x128xf32, #tpu.memory_space<vmem>>, vector<8x128xf32>
    tpu.vector_store %arg5[%c0_6, %c0_7], %7 {strides = array<i32>} : memref<8x128xf32, #tpu.memory_space<vmem>>, vector<8x128xf32>,
    return
  }
  func.func @transform_0(%arg0: i32, %arg1: i32) -> (i32, i32) {
    %c0_i32 = arith.constant 0 : i32
    %c0_i32_0 = arith.constant 0 : i32
    return %arg0, %c0_i32 : i32, i32
  }
  func.func @transform_1(%arg0: i32, %arg1: i32) -> (i32, i32) {
    %c0_i32 = arith.constant 0 : i32
    %c0_i32_0 = arith.constant 0 : i32
    return %c0_i32, %arg1 : i32, i32
  }
  func.func @transform_2(%arg0: i32, %arg1: i32) -> (i32, i32) {
    %c0_i32 = arith.constant 0 : i32
    %c0_i32_0 = arith.constant 0 : i32
    return %c0_i32, %arg1 : i32, i32
  }
  func.func @transform_3(%arg0: i32, %arg1: i32) -> (i32, i32) {
    %c0_i32 = arith.constant 0 : i32
    return %arg0, %arg1 : i32, i32
  }
}

module attributes {stable_mosaic.version = 11 : i64} {
  func.func @_mm_kernel(%arg0: i32, %arg1: i32, %arg2: memref<8x128xbf16, #tpu.memory_space<vmem>>, %arg3: memref<128x256xbf16, #tpu.memory_space<vmem>>, %arg4: memref<1x256xf32, #tpu.memory_space<vmem>>, %arg5: memref<8x256xf32, #tpu.memory_space<vmem>>) attributes {dimension_semantics = [#tpu.dimension_semantics<parallel>, #tpu.dimension_semantics<parallel>], iteration_bounds = array<i64: 3, 1>, scalar_prefetch = 0 : i64, scratch_operands = 0 : i64, tpu.core_type = #tpu.core_type<tc>, window_params = [{transform_indices = @transform_0, window_bounds = array<i64: 8, 128>}, {transform_indices = @transform_1, window_bounds = array<i64: 128, 256>}, {transform_indices = @transform_2, window_bounds = array<i64: 1, 256>}, {transform_indices = @transform_3, window_bounds = array<i64: 8, 256>}]} {
    %c0 = arith.constant 0 : index
    %c0_0 = arith.constant 0 : index
    %0 = vector.load %arg2[%c0, %c0_0] : memref<8x128xbf16, #tpu.memory_space<vmem>>, vector<8x128xbf16>
    %c0_1 = arith.constant 0 : index
    %c0_2 = arith.constant 0 : index
    %1 = vector.load %arg3[%c0_1, %c0_2] : memref<128x256xbf16, #tpu.memory_space<vmem>>, vector<128x256xbf16>
    %cst = arith.constant dense<0.000000e+00> : vector<8x256xf32>
    %2 = tpu.matmul %0, %1, %cst {dimension_numbers = #tpu.dot_dimension_numbers<[1], [0], [0], [1], [0, 0, 1, 1], [], []>} : vector<8x128xbf16>, vector<128x256xbf16>, vector<8x256xf32> -> vector<8x256xf32>
    %c0_3 = arith.constant 0 : index
    %c0_4 = arith.constant 0 : index
    %3 = vector.load %arg4[%c0_3, %c0_4] : memref<1x256xf32, #tpu.memory_space<vmem>>, vector<1x256xf32>
    %4 = vector.broadcast %3 : vector<1x256xf32> to vector<8x256xf32>
    %5 = arith.addf %2, %4 : vector<8x256xf32>
    %c0_5 = arith.constant 0 : index
    %c0_6 = arith.constant 0 : index
    %6 = vector.load %arg5[%c0_5, %c0_6] : memref<8x256xf32, #tpu.memory_space<vmem>>, vector<8x256xf32>
    tpu.vector_store %arg5[%c0_5, %c0_6], %5 {strides = array<i32>} : memref<8x256xf32, #tpu.memory_space<vmem>>, vector<8x256xf32>,
    return
  }
  func.func @transform_0(%arg0: i32, %arg1: i32) -> (i32, i32) {
    %c0_i32 = arith.constant 0 : i32
    %c0_i32_0 = arith.constant 0 : i32
    return %arg0, %c0_i32 : i32, i32
  }
  func.func @transform_1(%arg0: i32, %arg1: i32) -> (i32, i32) {
    %c0_i32 = arith.constant 0 : i32
    %c0_i32_0 = arith.constant 0 : i32
    return %c0_i32, %arg1 : i32, i32
  }
  func.func @transform_2(%arg0: i32, %arg1: i32) -> (i32, i32) {
    %c0_i32 = arith.constant 0 : i32
    %c0_i32_0 = arith.constant 0 : i32
    return %c0_i32, %arg1 : i32, i32
  }
  func.func @transform_3(%arg0: i32, %arg1: i32) -> (i32, i32) {
    %c0_i32 = arith.constant 0 : i32
    return %arg0, %arg1 : i32, i32
  }
}

module attributes {stable_mosaic.version = 11 : i64} {
  func.func @_mm_kernel(%arg0: i32, %arg1: i32, %arg2: memref<8x64xbf16, #tpu.memory_space<vmem>>, %arg3: memref<64x256xbf16, #tpu.memory_space<vmem>>, %arg4: memref<1x256xf32, #tpu.memory_space<vmem>>, %arg5: memref<8x256xf32, #tpu.memory_space<vmem>>, %arg6: memref<8x256xf32, #tpu.memory_space<vmem>>) attributes {dimension_semantics = [#tpu.dimension_semantics<parallel>, #tpu.dimension_semantics<parallel>], iteration_bounds = array<i64: 3, 1>, scalar_prefetch = 0 : i64, scratch_operands = 0 : i64, tpu.core_type = #tpu.core_type<tc>, window_params = [{transform_indices = @transform_0, window_bounds = array<i64: 8, 64>}, {transform_indices = @transform_1, window_bounds = array<i64: 64, 256>}, {transform_indices = @transform_2, window_bounds = array<i64: 1, 256>}, {transform_indices = @transform_3, window_bounds = array<i64: 8, 256>}, {transform_indices = @transform_4, window_bounds = array<i64: 8, 256>}]} {
    %c0 = arith.constant 0 : index
    %c0_0 = arith.constant 0 : index
    %0 = vector.load %arg2[%c0, %c0_0] : memref<8x64xbf16, #tpu.memory_space<vmem>>, vector<8x64xbf16>
    %c0_1 = arith.constant 0 : index
    %c0_2 = arith.constant 0 : index
    %1 = vector.load %arg3[%c0_1, %c0_2] : memref<64x256xbf16, #tpu.memory_space<vmem>>, vector<64x256xbf16>
    %cst = arith.constant dense<0.000000e+00> : vector<8x256xf32>
    %2 = tpu.matmul %0, %1, %cst {dimension_numbers = #tpu.dot_dimension_numbers<[1], [0], [0], [1], [0, 0, 1, 1], [], []>} : vector<8x64xbf16>, vector<64x256xbf16>, vector<8x256xf32> -> vector<8x256xf32>
    %c0_3 = arith.constant 0 : index
    %c0_4 = arith.constant 0 : index
    %3 = vector.load %arg4[%c0_3, %c0_4] : memref<1x256xf32, #tpu.memory_space<vmem>>, vector<1x256xf32>
    %4 = vector.broadcast %3 : vector<1x256xf32> to vector<8x256xf32>
    %5 = arith.addf %2, %4 : vector<8x256xf32>
    %c0_5 = arith.constant 0 : index
    %c0_6 = arith.constant 0 : index
    %6 = vector.load %arg5[%c0_5, %c0_6] : memref<8x256xf32, #tpu.memory_space<vmem>>, vector<8x256xf32>
    %7 = arith.addf %5, %6 : vector<8x256xf32>
    %cst_7 = arith.constant 0.000000e+00 : f32
    %8 = vector.broadcast %cst_7 : f32 to vector<8x256xf32>
    %9 = arith.maximumf %7, %8 : vector<8x256xf32>
    %c0_8 = arith.constant 0 : index
    %c0_9 = arith.constant 0 : index
    %10 = vector.load %arg6[%c0_8, %c0_9] : memref<8x256xf32, #tpu.memory_space<vmem>>, vector<8x256xf32>
    tpu.vector_store %arg6[%c0_8, %c0_9], %9 {strides = array<i32>} : memref<8x256xf32, #tpu.memory_space<vmem>>, vector<8x256xf32>,
    return
  }
  func.func @transform_0(%arg0: i32, %arg1: i32) -> (i32, i32) {
    %c0_i32 = arith.constant 0 : i32
    %c0_i32_0 = arith.constant 0 : i32
    return %arg0, %c0_i32 : i32, i32
  }
  func.func @transform_1(%arg0: i32, %arg1: i32) -> (i32, i32) {
    %c0_i32 = arith.constant 0 : i32
    %c0_i32_0 = arith.constant 0 : i32
    return %c0_i32, %arg1 : i32, i32
  }
  func.func @transform_2(%arg0: i32, %arg1: i32) -> (i32, i32) {
    %c0_i32 = arith.constant 0 : i32
    %c0_i32_0 = arith.constant 0 : i32
    return %c0_i32, %arg1 : i32, i32
  }
  func.func @transform_3(%arg0: i32, %arg1: i32) -> (i32, i32) {
    %c0_i32 = arith.constant 0 : i32
    return %arg0, %arg1 : i32, i32
  }
  func.func @transform_4(%arg0: i32, %arg1: i32) -> (i32, i32) {
    %c0_i32 = arith.constant 0 : i32
    return %arg0, %arg1 : i32, i32
  }
}

module attributes {stable_mosaic.version = 11 : i64} {
  func.func @_mm_kernel(%arg0: i32, %arg1: i32, %arg2: memref<8x256xbf16, #tpu.memory_space<vmem>>, %arg3: memref<256x128xbf16, #tpu.memory_space<vmem>>, %arg4: memref<1x128xf32, #tpu.memory_space<vmem>>, %arg5: memref<8x128xf32, #tpu.memory_space<vmem>>) attributes {dimension_semantics = [#tpu.dimension_semantics<parallel>, #tpu.dimension_semantics<parallel>], iteration_bounds = array<i64: 3, 1>, scalar_prefetch = 0 : i64, scratch_operands = 0 : i64, tpu.core_type = #tpu.core_type<tc>, window_params = [{transform_indices = @transform_0, window_bounds = array<i64: 8, 256>}, {transform_indices = @transform_1, window_bounds = array<i64: 256, 128>}, {transform_indices = @transform_2, window_bounds = array<i64: 1, 128>}, {transform_indices = @transform_3, window_bounds = array<i64: 8, 128>}]} {
    %c0 = arith.constant 0 : index
    %c0_0 = arith.constant 0 : index
    %0 = vector.load %arg2[%c0, %c0_0] : memref<8x256xbf16, #tpu.memory_space<vmem>>, vector<8x256xbf16>
    %c0_1 = arith.constant 0 : index
    %c0_2 = arith.constant 0 : index
    %1 = vector.load %arg3[%c0_1, %c0_2] : memref<256x128xbf16, #tpu.memory_space<vmem>>, vector<256x128xbf16>
    %cst = arith.constant dense<0.000000e+00> : vector<8x128xf32>
    %2 = tpu.matmul %0, %1, %cst {dimension_numbers = #tpu.dot_dimension_numbers<[1], [0], [0], [1], [0, 0, 1, 1], [], []>} : vector<8x256xbf16>, vector<256x128xbf16>, vector<8x128xf32> -> vector<8x128xf32>
    %c0_3 = arith.constant 0 : index
    %c0_4 = arith.constant 0 : index
    %3 = vector.load %arg4[%c0_3, %c0_4] : memref<1x128xf32, #tpu.memory_space<vmem>>, vector<1x128xf32>
    %4 = vector.broadcast %3 : vector<1x128xf32> to vector<8x128xf32>
    %5 = arith.addf %2, %4 : vector<8x128xf32>
    %cst_5 = arith.constant 0.000000e+00 : f32
    %6 = vector.broadcast %cst_5 : f32 to vector<8x128xf32>
    %7 = arith.maximumf %5, %6 : vector<8x128xf32>
    %c0_6 = arith.constant 0 : index
    %c0_7 = arith.constant 0 : index
    %8 = vector.load %arg5[%c0_6, %c0_7] : memref<8x128xf32, #tpu.memory_space<vmem>>, vector<8x128xf32>
    tpu.vector_store %arg5[%c0_6, %c0_7], %7 {strides = array<i32>} : memref<8x128xf32, #tpu.memory_space<vmem>>, vector<8x128xf32>,
    return
  }
  func.func @transform_0(%arg0: i32, %arg1: i32) -> (i32, i32) {
    %c0_i32 = arith.constant 0 : i32
    %c0_i32_0 = arith.constant 0 : i32
    return %arg0, %c0_i32 : i32, i32
  }
  func.func @transform_1(%arg0: i32, %arg1: i32) -> (i32, i32) {
    %c0_i32 = arith.constant 0 : i32
    %c0_i32_0 = arith.constant 0 : i32
    return %c0_i32, %arg1 : i32, i32
  }
  func.func @transform_2(%arg0: i32, %arg1: i32) -> (i32, i32) {
    %c0_i32 = arith.constant 0 : i32
    %c0_i32_0 = arith.constant 0 : i32
    return %c0_i32, %arg1 : i32, i32
  }
  func.func @transform_3(%arg0: i32, %arg1: i32) -> (i32, i32) {
    %c0_i32 = arith.constant 0 : i32
    return %arg0, %arg1 : i32, i32
  }
}

module attributes {stable_mosaic.version = 11 : i64} {
  func.func @_mm_kernel(%arg0: i32, %arg1: i32, %arg2: memref<8x1152xbf16, #tpu.memory_space<vmem>>, %arg3: memref<1152x128xbf16, #tpu.memory_space<vmem>>, %arg4: memref<1x128xf32, #tpu.memory_space<vmem>>, %arg5: memref<8x128xf32, #tpu.memory_space<vmem>>) attributes {dimension_semantics = [#tpu.dimension_semantics<parallel>, #tpu.dimension_semantics<parallel>], iteration_bounds = array<i64: 1, 1>, scalar_prefetch = 0 : i64, scratch_operands = 0 : i64, tpu.core_type = #tpu.core_type<tc>, window_params = [{transform_indices = @transform_0, window_bounds = array<i64: 8, 1152>}, {transform_indices = @transform_1, window_bounds = array<i64: 1152, 128>}, {transform_indices = @transform_2, window_bounds = array<i64: 1, 128>}, {transform_indices = @transform_3, window_bounds = array<i64: 8, 128>}]} {
    %c0 = arith.constant 0 : index
    %c0_0 = arith.constant 0 : index
    %0 = vector.load %arg2[%c0, %c0_0] : memref<8x1152xbf16, #tpu.memory_space<vmem>>, vector<8x1152xbf16>
    %c0_1 = arith.constant 0 : index
    %c0_2 = arith.constant 0 : index
    %1 = vector.load %arg3[%c0_1, %c0_2] : memref<1152x128xbf16, #tpu.memory_space<vmem>>, vector<1152x128xbf16>
    %cst = arith.constant dense<0.000000e+00> : vector<8x128xf32>
    %2 = tpu.matmul %0, %1, %cst {dimension_numbers = #tpu.dot_dimension_numbers<[1], [0], [0], [1], [0, 0, 1, 1], [], []>} : vector<8x1152xbf16>, vector<1152x128xbf16>, vector<8x128xf32> -> vector<8x128xf32>
    %c0_3 = arith.constant 0 : index
    %c0_4 = arith.constant 0 : index
    %3 = vector.load %arg4[%c0_3, %c0_4] : memref<1x128xf32, #tpu.memory_space<vmem>>, vector<1x128xf32>
    %4 = vector.broadcast %3 : vector<1x128xf32> to vector<8x128xf32>
    %5 = arith.addf %2, %4 : vector<8x128xf32>
    %cst_5 = arith.constant 0.000000e+00 : f32
    %6 = vector.broadcast %cst_5 : f32 to vector<8x128xf32>
    %7 = arith.maximumf %5, %6 : vector<8x128xf32>
    %c0_6 = arith.constant 0 : index
    %c0_7 = arith.constant 0 : index
    %8 = vector.load %arg5[%c0_6, %c0_7] : memref<8x128xf32, #tpu.memory_space<vmem>>, vector<8x128xf32>
    tpu.vector_store %arg5[%c0_6, %c0_7], %7 {strides = array<i32>} : memref<8x128xf32, #tpu.memory_space<vmem>>, vector<8x128xf32>,
    return
  }
  func.func @transform_0(%arg0: i32, %arg1: i32) -> (i32, i32) {
    %c0_i32 = arith.constant 0 : i32
    %c0_i32_0 = arith.constant 0 : i32
    return %arg0, %c0_i32 : i32, i32
  }
  func.func @transform_1(%arg0: i32, %arg1: i32) -> (i32, i32) {
    %c0_i32 = arith.constant 0 : i32
    %c0_i32_0 = arith.constant 0 : i32
    return %c0_i32, %arg1 : i32, i32
  }
  func.func @transform_2(%arg0: i32, %arg1: i32) -> (i32, i32) {
    %c0_i32 = arith.constant 0 : i32
    %c0_i32_0 = arith.constant 0 : i32
    return %c0_i32, %arg1 : i32, i32
  }
  func.func @transform_3(%arg0: i32, %arg1: i32) -> (i32, i32) {
    %c0_i32 = arith.constant 0 : i32
    return %arg0, %arg1 : i32, i32
  }
}

module attributes {stable_mosaic.version = 11 : i64} {
  func.func @_mm_kernel(%arg0: i32, %arg1: i32, %arg2: memref<8x128xbf16, #tpu.memory_space<vmem>>, %arg3: memref<128x128xbf16, #tpu.memory_space<vmem>>, %arg4: memref<1x128xf32, #tpu.memory_space<vmem>>, %arg5: memref<8x128xf32, #tpu.memory_space<vmem>>) attributes {dimension_semantics = [#tpu.dimension_semantics<parallel>, #tpu.dimension_semantics<parallel>], iteration_bounds = array<i64: 1, 1>, scalar_prefetch = 0 : i64, scratch_operands = 0 : i64, tpu.core_type = #tpu.core_type<tc>, window_params = [{transform_indices = @transform_0, window_bounds = array<i64: 8, 128>}, {transform_indices = @transform_1, window_bounds = array<i64: 128, 128>}, {transform_indices = @transform_2, window_bounds = array<i64: 1, 128>}, {transform_indices = @transform_3, window_bounds = array<i64: 8, 128>}]} {
    %c0 = arith.constant 0 : index
    %c0_0 = arith.constant 0 : index
    %0 = vector.load %arg2[%c0, %c0_0] : memref<8x128xbf16, #tpu.memory_space<vmem>>, vector<8x128xbf16>
    %c0_1 = arith.constant 0 : index
    %c0_2 = arith.constant 0 : index
    %1 = vector.load %arg3[%c0_1, %c0_2] : memref<128x128xbf16, #tpu.memory_space<vmem>>, vector<128x128xbf16>
    %cst = arith.constant dense<0.000000e+00> : vector<8x128xf32>
    %2 = tpu.matmul %0, %1, %cst {dimension_numbers = #tpu.dot_dimension_numbers<[1], [0], [0], [1], [0, 0, 1, 1], [], []>} : vector<8x128xbf16>, vector<128x128xbf16>, vector<8x128xf32> -> vector<8x128xf32>
    %c0_3 = arith.constant 0 : index
    %c0_4 = arith.constant 0 : index
    %3 = vector.load %arg4[%c0_3, %c0_4] : memref<1x128xf32, #tpu.memory_space<vmem>>, vector<1x128xf32>
    %4 = vector.broadcast %3 : vector<1x128xf32> to vector<8x128xf32>
    %5 = arith.addf %2, %4 : vector<8x128xf32>
    %cst_5 = arith.constant 0.000000e+00 : f32
    %6 = vector.broadcast %cst_5 : f32 to vector<8x128xf32>
    %7 = arith.cmpf oge, %5, %6 : vector<8x128xf32>
    %cst_6 = arith.constant 2.000000e-01 : f32
    %8 = vector.broadcast %cst_6 : f32 to vector<8x128xf32>
    %9 = arith.mulf %8, %5 : vector<8x128xf32>
    %10 = arith.select %7, %5, %9 : vector<8x128xi1>, vector<8x128xf32>
    %c0_7 = arith.constant 0 : index
    %c0_8 = arith.constant 0 : index
    %11 = vector.load %arg5[%c0_7, %c0_8] : memref<8x128xf32, #tpu.memory_space<vmem>>, vector<8x128xf32>
    tpu.vector_store %arg5[%c0_7, %c0_8], %10 {strides = array<i32>} : memref<8x128xf32, #tpu.memory_space<vmem>>, vector<8x128xf32>,
    return
  }
  func.func @transform_0(%arg0: i32, %arg1: i32) -> (i32, i32) {
    %c0_i32 = arith.constant 0 : i32
    %c0_i32_0 = arith.constant 0 : i32
    return %arg0, %c0_i32 : i32, i32
  }
  func.func @transform_1(%arg0: i32, %arg1: i32) -> (i32, i32) {
    %c0_i32 = arith.constant 0 : i32
    %c0_i32_0 = arith.constant 0 : i32
    return %c0_i32, %arg1 : i32, i32
  }
  func.func @transform_2(%arg0: i32, %arg1: i32) -> (i32, i32) {
    %c0_i32 = arith.constant 0 : i32
    %c0_i32_0 = arith.constant 0 : i32
    return %c0_i32, %arg1 : i32, i32
  }
  func.func @transform_3(%arg0: i32, %arg1: i32) -> (i32, i32) {
    %c0_i32 = arith.constant 0 : i32
    return %arg0, %arg1 : i32, i32
  }
}

module attributes {stable_mosaic.version = 11 : i64} {
  func.func @_mm_kernel(%arg0: i32, %arg1: i32, %arg2: memref<8x576xbf16, #tpu.memory_space<vmem>>, %arg3: memref<576x128xbf16, #tpu.memory_space<vmem>>, %arg4: memref<1x128xf32, #tpu.memory_space<vmem>>, %arg5: memref<8x128xf32, #tpu.memory_space<vmem>>) attributes {dimension_semantics = [#tpu.dimension_semantics<parallel>, #tpu.dimension_semantics<parallel>], iteration_bounds = array<i64: 1, 1>, scalar_prefetch = 0 : i64, scratch_operands = 0 : i64, tpu.core_type = #tpu.core_type<tc>, window_params = [{transform_indices = @transform_0, window_bounds = array<i64: 8, 576>}, {transform_indices = @transform_1, window_bounds = array<i64: 576, 128>}, {transform_indices = @transform_2, window_bounds = array<i64: 1, 128>}, {transform_indices = @transform_3, window_bounds = array<i64: 8, 128>}]} {
    %c0 = arith.constant 0 : index
    %c0_0 = arith.constant 0 : index
    %0 = vector.load %arg2[%c0, %c0_0] : memref<8x576xbf16, #tpu.memory_space<vmem>>, vector<8x576xbf16>
    %c0_1 = arith.constant 0 : index
    %c0_2 = arith.constant 0 : index
    %1 = vector.load %arg3[%c0_1, %c0_2] : memref<576x128xbf16, #tpu.memory_space<vmem>>, vector<576x128xbf16>
    %cst = arith.constant dense<0.000000e+00> : vector<8x128xf32>
    %2 = tpu.matmul %0, %1, %cst {dimension_numbers = #tpu.dot_dimension_numbers<[1], [0], [0], [1], [0, 0, 1, 1], [], []>} : vector<8x576xbf16>, vector<576x128xbf16>, vector<8x128xf32> -> vector<8x128xf32>
    %c0_3 = arith.constant 0 : index
    %c0_4 = arith.constant 0 : index
    %3 = vector.load %arg4[%c0_3, %c0_4] : memref<1x128xf32, #tpu.memory_space<vmem>>, vector<1x128xf32>
    %4 = vector.broadcast %3 : vector<1x128xf32> to vector<8x128xf32>
    %5 = arith.addf %2, %4 : vector<8x128xf32>
    %cst_5 = arith.constant 0.000000e+00 : f32
    %6 = vector.broadcast %cst_5 : f32 to vector<8x128xf32>
    %7 = arith.cmpf oge, %5, %6 : vector<8x128xf32>
    %cst_6 = arith.constant 2.000000e-01 : f32
    %8 = vector.broadcast %cst_6 : f32 to vector<8x128xf32>
    %9 = arith.mulf %8, %5 : vector<8x128xf32>
    %10 = arith.select %7, %5, %9 : vector<8x128xi1>, vector<8x128xf32>
    %c0_7 = arith.constant 0 : index
    %c0_8 = arith.constant 0 : index
    %11 = vector.load %arg5[%c0_7, %c0_8] : memref<8x128xf32, #tpu.memory_space<vmem>>, vector<8x128xf32>
    tpu.vector_store %arg5[%c0_7, %c0_8], %10 {strides = array<i32>} : memref<8x128xf32, #tpu.memory_space<vmem>>, vector<8x128xf32>,
    return
  }
  func.func @transform_0(%arg0: i32, %arg1: i32) -> (i32, i32) {
    %c0_i32 = arith.constant 0 : i32
    %c0_i32_0 = arith.constant 0 : i32
    return %arg0, %c0_i32 : i32, i32
  }
  func.func @transform_1(%arg0: i32, %arg1: i32) -> (i32, i32) {
    %c0_i32 = arith.constant 0 : i32
    %c0_i32_0 = arith.constant 0 : i32
    return %c0_i32, %arg1 : i32, i32
  }
  func.func @transform_2(%arg0: i32, %arg1: i32) -> (i32, i32) {
    %c0_i32 = arith.constant 0 : i32
    %c0_i32_0 = arith.constant 0 : i32
    return %c0_i32, %arg1 : i32, i32
  }
  func.func @transform_3(%arg0: i32, %arg1: i32) -> (i32, i32) {
    %c0_i32 = arith.constant 0 : i32
    return %arg0, %arg1 : i32, i32
  }
}

module attributes {stable_mosaic.version = 11 : i64} {
  func.func @_mm_kernel(%arg0: i32, %arg1: i32, %arg2: memref<8x576xbf16, #tpu.memory_space<vmem>>, %arg3: memref<576x128xbf16, #tpu.memory_space<vmem>>, %arg4: memref<1x128xf32, #tpu.memory_space<vmem>>, %arg5: memref<8x128xf32, #tpu.memory_space<vmem>>) attributes {dimension_semantics = [#tpu.dimension_semantics<parallel>, #tpu.dimension_semantics<parallel>], iteration_bounds = array<i64: 1, 1>, scalar_prefetch = 0 : i64, scratch_operands = 0 : i64, tpu.core_type = #tpu.core_type<tc>, window_params = [{transform_indices = @transform_0, window_bounds = array<i64: 8, 576>}, {transform_indices = @transform_1, window_bounds = array<i64: 576, 128>}, {transform_indices = @transform_2, window_bounds = array<i64: 1, 128>}, {transform_indices = @transform_3, window_bounds = array<i64: 8, 128>}]} {
    %c0 = arith.constant 0 : index
    %c0_0 = arith.constant 0 : index
    %0 = vector.load %arg2[%c0, %c0_0] : memref<8x576xbf16, #tpu.memory_space<vmem>>, vector<8x576xbf16>
    %c0_1 = arith.constant 0 : index
    %c0_2 = arith.constant 0 : index
    %1 = vector.load %arg3[%c0_1, %c0_2] : memref<576x128xbf16, #tpu.memory_space<vmem>>, vector<576x128xbf16>
    %cst = arith.constant dense<0.000000e+00> : vector<8x128xf32>
    %2 = tpu.matmul %0, %1, %cst {dimension_numbers = #tpu.dot_dimension_numbers<[1], [0], [0], [1], [0, 0, 1, 1], [], []>} : vector<8x576xbf16>, vector<576x128xbf16>, vector<8x128xf32> -> vector<8x128xf32>
    %c0_3 = arith.constant 0 : index
    %c0_4 = arith.constant 0 : index
    %3 = vector.load %arg4[%c0_3, %c0_4] : memref<1x128xf32, #tpu.memory_space<vmem>>, vector<1x128xf32>
    %4 = vector.broadcast %3 : vector<1x128xf32> to vector<8x128xf32>
    %5 = arith.addf %2, %4 : vector<8x128xf32>
    %c0_5 = arith.constant 0 : index
    %c0_6 = arith.constant 0 : index
    %6 = vector.load %arg5[%c0_5, %c0_6] : memref<8x128xf32, #tpu.memory_space<vmem>>, vector<8x128xf32>
    tpu.vector_store %arg5[%c0_5, %c0_6], %5 {strides = array<i32>} : memref<8x128xf32, #tpu.memory_space<vmem>>, vector<8x128xf32>,
    return
  }
  func.func @transform_0(%arg0: i32, %arg1: i32) -> (i32, i32) {
    %c0_i32 = arith.constant 0 : i32
    %c0_i32_0 = arith.constant 0 : i32
    return %arg0, %c0_i32 : i32, i32
  }
  func.func @transform_1(%arg0: i32, %arg1: i32) -> (i32, i32) {
    %c0_i32 = arith.constant 0 : i32
    %c0_i32_0 = arith.constant 0 : i32
    return %c0_i32, %arg1 : i32, i32
  }
  func.func @transform_2(%arg0: i32, %arg1: i32) -> (i32, i32) {
    %c0_i32 = arith.constant 0 : i32
    %c0_i32_0 = arith.constant 0 : i32
    return %c0_i32, %arg1 : i32, i32
  }
  func.func @transform_3(%arg0: i32, %arg1: i32) -> (i32, i32) {
    %c0_i32 = arith.constant 0 : i32
    return %arg0, %arg1 : i32, i32
  }
}

module attributes {stable_mosaic.version = 11 : i64} {
  func.func @_mm_kernel(%arg0: i32, %arg1: i32, %arg2: memref<8x1152xbf16, #tpu.memory_space<vmem>>, %arg3: memref<1152x128xbf16, #tpu.memory_space<vmem>>, %arg4: memref<1x128xf32, #tpu.memory_space<vmem>>, %arg5: memref<8x128xf32, #tpu.memory_space<vmem>>) attributes {dimension_semantics = [#tpu.dimension_semantics<parallel>, #tpu.dimension_semantics<parallel>], iteration_bounds = array<i64: 1, 1>, scalar_prefetch = 0 : i64, scratch_operands = 0 : i64, tpu.core_type = #tpu.core_type<tc>, window_params = [{transform_indices = @transform_0, window_bounds = array<i64: 8, 1152>}, {transform_indices = @transform_1, window_bounds = array<i64: 1152, 128>}, {transform_indices = @transform_2, window_bounds = array<i64: 1, 128>}, {transform_indices = @transform_3, window_bounds = array<i64: 8, 128>}]} {
    %c0 = arith.constant 0 : index
    %c0_0 = arith.constant 0 : index
    %0 = vector.load %arg2[%c0, %c0_0] : memref<8x1152xbf16, #tpu.memory_space<vmem>>, vector<8x1152xbf16>
    %c0_1 = arith.constant 0 : index
    %c0_2 = arith.constant 0 : index
    %1 = vector.load %arg3[%c0_1, %c0_2] : memref<1152x128xbf16, #tpu.memory_space<vmem>>, vector<1152x128xbf16>
    %cst = arith.constant dense<0.000000e+00> : vector<8x128xf32>
    %2 = tpu.matmul %0, %1, %cst {dimension_numbers = #tpu.dot_dimension_numbers<[1], [0], [0], [1], [0, 0, 1, 1], [], []>} : vector<8x1152xbf16>, vector<1152x128xbf16>, vector<8x128xf32> -> vector<8x128xf32>
    %c0_3 = arith.constant 0 : index
    %c0_4 = arith.constant 0 : index
    %3 = vector.load %arg4[%c0_3, %c0_4] : memref<1x128xf32, #tpu.memory_space<vmem>>, vector<1x128xf32>
    %4 = vector.broadcast %3 : vector<1x128xf32> to vector<8x128xf32>
    %5 = arith.addf %2, %4 : vector<8x128xf32>
    %c0_5 = arith.constant 0 : index
    %c0_6 = arith.constant 0 : index
    %6 = vector.load %arg5[%c0_5, %c0_6] : memref<8x128xf32, #tpu.memory_space<vmem>>, vector<8x128xf32>
    tpu.vector_store %arg5[%c0_5, %c0_6], %5 {strides = array<i32>} : memref<8x128xf32, #tpu.memory_space<vmem>>, vector<8x128xf32>,
    return
  }
  func.func @transform_0(%arg0: i32, %arg1: i32) -> (i32, i32) {
    %c0_i32 = arith.constant 0 : i32
    %c0_i32_0 = arith.constant 0 : i32
    return %arg0, %c0_i32 : i32, i32
  }
  func.func @transform_1(%arg0: i32, %arg1: i32) -> (i32, i32) {
    %c0_i32 = arith.constant 0 : i32
    %c0_i32_0 = arith.constant 0 : i32
    return %c0_i32, %arg1 : i32, i32
  }
  func.func @transform_2(%arg0: i32, %arg1: i32) -> (i32, i32) {
    %c0_i32 = arith.constant 0 : i32
    %c0_i32_0 = arith.constant 0 : i32
    return %c0_i32, %arg1 : i32, i32
  }
  func.func @transform_3(%arg0: i32, %arg1: i32) -> (i32, i32) {
    %c0_i32 = arith.constant 0 : i32
    return %arg0, %arg1 : i32, i32
  }
}

module attributes {stable_mosaic.version = 11 : i64} {
  func.func @_mm_kernel(%arg0: i32, %arg1: i32, %arg2: memref<8x2304xbf16, #tpu.memory_space<vmem>>, %arg3: memref<2304x128xbf16, #tpu.memory_space<vmem>>, %arg4: memref<1x128xf32, #tpu.memory_space<vmem>>, %arg5: memref<8x128xf32, #tpu.memory_space<vmem>>) attributes {dimension_semantics = [#tpu.dimension_semantics<parallel>, #tpu.dimension_semantics<parallel>], iteration_bounds = array<i64: 3, 1>, scalar_prefetch = 0 : i64, scratch_operands = 0 : i64, tpu.core_type = #tpu.core_type<tc>, window_params = [{transform_indices = @transform_0, window_bounds = array<i64: 8, 2304>}, {transform_indices = @transform_1, window_bounds = array<i64: 2304, 128>}, {transform_indices = @transform_2, window_bounds = array<i64: 1, 128>}, {transform_indices = @transform_3, window_bounds = array<i64: 8, 128>}]} {
    %c0 = arith.constant 0 : index
    %c0_0 = arith.constant 0 : index
    %0 = vector.load %arg2[%c0, %c0_0] : memref<8x2304xbf16, #tpu.memory_space<vmem>>, vector<8x2304xbf16>
    %c0_1 = arith.constant 0 : index
    %c0_2 = arith.constant 0 : index
    %1 = vector.load %arg3[%c0_1, %c0_2] : memref<2304x128xbf16, #tpu.memory_space<vmem>>, vector<2304x128xbf16>
    %cst = arith.constant dense<0.000000e+00> : vector<8x128xf32>
    %2 = tpu.matmul %0, %1, %cst {dimension_numbers = #tpu.dot_dimension_numbers<[1], [0], [0], [1], [0, 0, 1, 1], [], []>} : vector<8x2304xbf16>, vector<2304x128xbf16>, vector<8x128xf32> -> vector<8x128xf32>
    %c0_3 = arith.constant 0 : index
    %c0_4 = arith.constant 0 : index
    %3 = vector.load %arg4[%c0_3, %c0_4] : memref<1x128xf32, #tpu.memory_space<vmem>>, vector<1x128xf32>
    %4 = vector.broadcast %3 : vector<1x128xf32> to vector<8x128xf32>
    %5 = arith.addf %2, %4 : vector<8x128xf32>
    %c0_5 = arith.constant 0 : index
    %c0_6 = arith.constant 0 : index
    %6 = vector.load %arg5[%c0_5, %c0_6] : memref<8x128xf32, #tpu.memory_space<vmem>>, vector<8x128xf32>
    tpu.vector_store %arg5[%c0_5, %c0_6], %5 {strides = array<i32>} : memref<8x128xf32, #tpu.memory_space<vmem>>, vector<8x128xf32>,
    return
  }
  func.func @transform_0(%arg0: i32, %arg1: i32) -> (i32, i32) {
    %c0_i32 = arith.constant 0 : i32
    %c0_i32_0 = arith.constant 0 : i32
    return %arg0, %c0_i32 : i32, i32
  }
  func.func @transform_1(%arg0: i32, %arg1: i32) -> (i32, i32) {
    %c0_i32 = arith.constant 0 : i32
    %c0_i32_0 = arith.constant 0 : i32
    return %c0_i32, %arg1 : i32, i32
  }
  func.func @transform_2(%arg0: i32, %arg1: i32) -> (i32, i32) {
    %c0_i32 = arith.constant 0 : i32
    %c0_i32_0 = arith.constant 0 : i32
    return %c0_i32, %arg1 : i32, i32
  }
  func.func @transform_3(%arg0: i32, %arg1: i32) -> (i32, i32) {
    %c0_i32 = arith.constant 0 : i32
    return %arg0, %arg1 : i32, i32
  }
}

module attributes {stable_mosaic.version = 11 : i64} {
  func.func @_mm_kernel(%arg0: i32, %arg1: i32, %arg2: memref<24x1152xbf16, #tpu.memory_space<vmem>>, %arg3: memref<1152x128xbf16, #tpu.memory_space<vmem>>, %arg4: memref<1x128xf32, #tpu.memory_space<vmem>>, %arg5: memref<24x128xf32, #tpu.memory_space<vmem>>) attributes {dimension_semantics = [#tpu.dimension_semantics<parallel>, #tpu.dimension_semantics<parallel>], iteration_bounds = array<i64: 3, 1>, scalar_prefetch = 0 : i64, scratch_operands = 0 : i64, tpu.core_type = #tpu.core_type<tc>, window_params = [{transform_indices = @transform_0, window_bounds = array<i64: 24, 1152>}, {transform_indices = @transform_1, window_bounds = array<i64: 1152, 128>}, {transform_indices = @transform_2, window_bounds = array<i64: 1, 128>}, {transform_indices = @transform_3, window_bounds = array<i64: 24, 128>}]} {
    %c0 = arith.constant 0 : index
    %c0_0 = arith.constant 0 : index
    %0 = vector.load %arg2[%c0, %c0_0] : memref<24x1152xbf16, #tpu.memory_space<vmem>>, vector<24x1152xbf16>
    %c0_1 = arith.constant 0 : index
    %c0_2 = arith.constant 0 : index
    %1 = vector.load %arg3[%c0_1, %c0_2] : memref<1152x128xbf16, #tpu.memory_space<vmem>>, vector<1152x128xbf16>
    %cst = arith.constant dense<0.000000e+00> : vector<24x128xf32>
    %2 = tpu.matmul %0, %1, %cst {dimension_numbers = #tpu.dot_dimension_numbers<[1], [0], [0], [1], [0, 0, 1, 1], [], []>} : vector<24x1152xbf16>, vector<1152x128xbf16>, vector<24x128xf32> -> vector<24x128xf32>
    %c0_3 = arith.constant 0 : index
    %c0_4 = arith.constant 0 : index
    %3 = vector.load %arg4[%c0_3, %c0_4] : memref<1x128xf32, #tpu.memory_space<vmem>>, vector<1x128xf32>
    %4 = vector.broadcast %3 : vector<1x128xf32> to vector<24x128xf32>
    %5 = arith.addf %2, %4 : vector<24x128xf32>
    %c0_5 = arith.constant 0 : index
    %c0_6 = arith.constant 0 : index
    %6 = vector.load %arg5[%c0_5, %c0_6] : memref<24x128xf32, #tpu.memory_space<vmem>>, vector<24x128xf32>
    tpu.vector_store %arg5[%c0_5, %c0_6], %5 {strides = array<i32>} : memref<24x128xf32, #tpu.memory_space<vmem>>, vector<24x128xf32>,
    return
  }
  func.func @transform_0(%arg0: i32, %arg1: i32) -> (i32, i32) {
    %c0_i32 = arith.constant 0 : i32
    %c0_i32_0 = arith.constant 0 : i32
    return %arg0, %c0_i32 : i32, i32
  }
  func.func @transform_1(%arg0: i32, %arg1: i32) -> (i32, i32) {
    %c0_i32 = arith.constant 0 : i32
    %c0_i32_0 = arith.constant 0 : i32
    return %c0_i32, %arg1 : i32, i32
  }
  func.func @transform_2(%arg0: i32, %arg1: i32) -> (i32, i32) {
    %c0_i32 = arith.constant 0 : i32
    %c0_i32_0 = arith.constant 0 : i32
    return %c0_i32, %arg1 : i32, i32
  }
  func.func @transform_3(%arg0: i32, %arg1: i32) -> (i32, i32) {
    %c0_i32 = arith.constant 0 : i32
    return %arg0, %arg1 : i32, i32
  }
}

module attributes {stable_mosaic.version = 11 : i64} {
  func.func @_mm_kernel(%arg0: i32, %arg1: i32, %arg2: memref<144x576xbf16, #tpu.memory_space<vmem>>, %arg3: memref<576x128xbf16, #tpu.memory_space<vmem>>, %arg4: memref<1x128xf32, #tpu.memory_space<vmem>>, %arg5: memref<144x128xf32, #tpu.memory_space<vmem>>) attributes {dimension_semantics = [#tpu.dimension_semantics<parallel>, #tpu.dimension_semantics<parallel>], iteration_bounds = array<i64: 2, 1>, scalar_prefetch = 0 : i64, scratch_operands = 0 : i64, tpu.core_type = #tpu.core_type<tc>, window_params = [{transform_indices = @transform_0, window_bounds = array<i64: 144, 576>}, {transform_indices = @transform_1, window_bounds = array<i64: 576, 128>}, {transform_indices = @transform_2, window_bounds = array<i64: 1, 128>}, {transform_indices = @transform_3, window_bounds = array<i64: 144, 128>}]} {
    %c0 = arith.constant 0 : index
    %c0_0 = arith.constant 0 : index
    %0 = vector.load %arg2[%c0, %c0_0] : memref<144x576xbf16, #tpu.memory_space<vmem>>, vector<144x576xbf16>
    %c0_1 = arith.constant 0 : index
    %c0_2 = arith.constant 0 : index
    %1 = vector.load %arg3[%c0_1, %c0_2] : memref<576x128xbf16, #tpu.memory_space<vmem>>, vector<576x128xbf16>
    %cst = arith.constant dense<0.000000e+00> : vector<144x128xf32>
    %2 = tpu.matmul %0, %1, %cst {dimension_numbers = #tpu.dot_dimension_numbers<[1], [0], [0], [1], [0, 0, 1, 1], [], []>} : vector<144x576xbf16>, vector<576x128xbf16>, vector<144x128xf32> -> vector<144x128xf32>
    %c0_3 = arith.constant 0 : index
    %c0_4 = arith.constant 0 : index
    %3 = vector.load %arg4[%c0_3, %c0_4] : memref<1x128xf32, #tpu.memory_space<vmem>>, vector<1x128xf32>
    %4 = vector.broadcast %3 : vector<1x128xf32> to vector<144x128xf32>
    %5 = arith.addf %2, %4 : vector<144x128xf32>
    %c0_5 = arith.constant 0 : index
    %c0_6 = arith.constant 0 : index
    %6 = vector.load %arg5[%c0_5, %c0_6] : memref<144x128xf32, #tpu.memory_space<vmem>>, vector<144x128xf32>
    tpu.vector_store %arg5[%c0_5, %c0_6], %5 {strides = array<i32>} : memref<144x128xf32, #tpu.memory_space<vmem>>, vector<144x128xf32>,
    return
  }
  func.func @transform_0(%arg0: i32, %arg1: i32) -> (i32, i32) {
    %c0_i32 = arith.constant 0 : i32
    %c0_i32_0 = arith.constant 0 : i32
    return %arg0, %c0_i32 : i32, i32
  }
  func.func @transform_1(%arg0: i32, %arg1: i32) -> (i32, i32) {
    %c0_i32 = arith.constant 0 : i32
    %c0_i32_0 = arith.constant 0 : i32
    return %c0_i32, %arg1 : i32, i32
  }
  func.func @transform_2(%arg0: i32, %arg1: i32) -> (i32, i32) {
    %c0_i32 = arith.constant 0 : i32
    %c0_i32_0 = arith.constant 0 : i32
    return %c0_i32, %arg1 : i32, i32
  }
  func.func @transform_3(%arg0: i32, %arg1: i32) -> (i32, i32) {
    %c0_i32 = arith.constant 0 : i32
    return %arg0, %arg1 : i32, i32
  }
}

</mosaic_0001>

<bundles_post_ra>
// kernel: ez_detect_forward.62
= control target key start
LH: loop header
LB: loop body
LE: loop exit
PB: predicated region body
PF: predicated region fallthrough
CT: control target
= control target key end

     0   :  { %s1607_s12 = smov 0   ;;  %s1609_s13 = smov 0   ;;  %s1910_s0 = inlined_call_operand.vmem [shape: bf16[4608,147], index: 0, kind: input, shape index: {}]   ;;  %s1911_s1 = inlined_call_operand.vmem [shape: bf16[147,128], index: 1, kind: input, shape index: {}]   ;;  %s1912_s2 = inlined_call_operand.vmem [shape: f32[1,128], index: 2, kind: input, shape index: {}]   ;;  %s1913_s3 = inlined_call_operand.vmem [shape: f32[4608,128], index: 3, kind: output, shape index: {}]  }
   0x1   :  { %s1611_s14 = smov 0  }
   0x2 LB: > { %s25_s15 = sadd.s32 1, %s1579_s13  ;;  %p1293_p0 = scmp.ge.s32.totalorder %s1583_s14, 1  ;;  %s1583_s14 = sphi %s1611_s14, %s13_s14   ;;  %s1579_s13 = sphi %s1609_s13, %s1915_s13   ;;  %s1575_s12 = sphi %s1607_s12, %s1914_s12  }
   0x3   : > { %p27_p1 = scmp.ge.s32.totalorder %s25_s15, 9  ;;  %p170_p2 = scmp.lt.s32.totalorder %s1583_s14, 10 }
   0x5   : > { %s1917_s15 = smov (%p27_p1, %s25_s15), 0  ;;  %p171_p3 = pnand %p1293_p0, %p170_p2 }
   0x6   : > { %v1455_v0 = vld [vmem:[%s1911_s1] sm:$0xff] (!%p171_p3)   ;;  %v1585_v1 = vmov (!%p171_p3), 0   ;;  %v1456_v2 = vld [vmem:[%s1911_s1 + $0x8] sm:$0xff] (!%p171_p3)   ;;  %v1457_v3 = vld [vmem:[%s1911_s1 + $0x10] sm:$0xff] (!%p171_p3)   ;;  %s1294_s22 = sshll.u32 (!%p171_p3), %s1575_s12, 6  ;;  %vm664_vm0 = vcmask (!%p171_p3), 154624  }
   0x7   : > { %174 = sbr.rel (%p171_p3) target bundleno = 386 (0x182), region = 32  ;;  %768 = vmatprep.subr.bf16.mxu0 (!%p171_p3), %v1585_v1  ;;  %1409 = vmatprep.subr.bf16.mxu1 (!%p171_p3), %v1585_v1  ;;  %p206_p4 = scmp.lt.s32.totalorder (!%p171_p3), %s1294_s22, 575  ;;  %v1458_v4 = vld [vmem:[%s1911_s1 + $0x18] sm:$0xff] (!%p171_p3)   ;;  %v1459_v5 = vld [vmem:[%s1911_s1 + $0x20] sm:$0xff] (!%p171_p3)   ;;  %v1460_v8 = vld [vmem:[%s1911_s1 + $0x28] sm:$0xff] (!%p171_p3)   ;;  %vm761_vm1 = vcmask (!%p171_p3), 1040384  }
   0x8   : > { %769 = vmatpush1.bf16.msra.mxu0 (!%p171_p3), %v1455_v0  ;;  %1419 = vmatpush1.bf16.msra.mxu1 (!%p171_p3), %v1455_v0  ;;  %v1461_v9 = vld [vmem:[%s1911_s1 + $0x30] sm:$0xff] (!%p171_p3)   ;;  %v1462_v10 = vld [vmem:[%s1911_s1 + $0x38] sm:$0xff] (!%p171_p3)   ;;  %vm762_vm2 = vcmask (!%p171_p3), 1041408   ;;  %v1586_v11 = vmov (!%p171_p3), 65535   ;;  %v1463_v13 = vld [vmem:[%s1911_s1 + $0x40] sm:$0xff] (!%p171_p3)  }
   0x9   : > { %770 = vmatprep.subr.bf16.mxu0 (!%p171_p3), %v1585_v1  ;;  %1410 = vmatprep.subr.bf16.mxu1 (!%p171_p3), %v1585_v1  ;;  %v763_v12 = vsel (!%p171_p3), %vm761_vm1, 4294967295, %v1586_v11  ;;  %v1464_v14 = vld [vmem:[%s1911_s1 + $0x48] ss:$0 sps:$4 sm:$0x33] (!%p171_p3)  }
   0xa   : > { %v764_v15 = vsel (!%p171_p3), %vm762_vm2, %v763_v12, 0 }
   0xb   : > { %v766_v16 = vand.u32 (!%p171_p3), %v1464_v14, %v764_v15  ;;  %v1764_v15 = vld [vmem:[%s1912_s2] ss:$0 sm:$0xff] (!%p171_p3) }
   0xc   : > { %771 = vmatpush1.bf16.msra.mxu0 (!%p171_p3), %v1456_v2  ;;  %1420 = vmatpush1.bf16.msra.mxu1 (!%p171_p3), %v1456_v2 }
   0xd   : > { %772 = vmatprep.subr.bf16.mxu0 (!%p171_p3), %v1585_v1  ;;  %1411 = vmatprep.subr.bf16.mxu1 (!%p171_p3), %v1585_v1 }
   0xe   : > { %s1919_s22 = smov (!%p206_p4, %s1294_s22), 575 }
   0xf   : > { %s1408_s25 = sshll.u32 %s1919_s22, 3 }
  0x10   : > { %773 = vmatpush1.bf16.msra.mxu0 %v1457_v3  ;;  %1421 = vmatpush1.bf16.msra.mxu1 %v1457_v3  ;;  %s1645_s28 = scalar_lea.vmem %s1910_s0, %s1408_s25  ;;  %s1773_s21 = scalar_lea.vmem %s1913_s3, %s1408_s25 }
  0x11   : > { %774 = vmatprep.subr.bf16.mxu0 %v1585_v1  ;;  %1412 = vmatprep.subr.bf16.mxu1 %v1585_v1  ;;  %v1467_v6 = vld [vmem:[%s1645_s28 + $0x4] ss:$8 sps:$4 sm:$0xff]   ;;  %v1465_v17 = vld [vmem:[%s1645_s28] ss:$8 sps:$4 sm:$0xff]   ;;  %v1471_v19 = vld [vmem:[%s1645_s28 + $0x14] ss:$8 sps:$4 sm:$0xff]  }
  0x12   : > { %v1470_v7 = vld [vmem:[%s1645_s28 + $0x104] ss:$8 sps:$4 sm:$0xff]   ;;  %1374 = vmatprep.mubr.msk.bf16.mxu0 %vm664_vm0, %v1467_v6  ;;  %v1468_v18 = vld [vmem:[%s1645_s28 + $0x100] ss:$8 sps:$4 sm:$0xff]   ;;  %v1473_v20 = vld [vmem:[%s1645_s28 + $0x114] ss:$8 sps:$4 sm:$0xff]  }
  0x13   : > { %1390 = vmatprep.mubr.msk.bf16.mxu1 %vm664_vm0, %v1470_v7  ;;  %v1475_v21 = vld [vmem:[%s1645_s28 + $0x10] ss:$8 sps:$4 sm:$0xff]   ;;  %v1477_v23 = vld [vmem:[%s1645_s28 + $0x24] ss:$8 sps:$4 sm:$0xff]   ;;  %v1481_v25 = vld [vmem:[%s1645_s28 + $0x20] ss:$8 sps:$4 sm:$0xff]  }
  0x14   : > { %775 = vmatpush1.bf16.msra.mxu0 %v1458_v4  ;;  %1422 = vmatpush1.bf16.msra.mxu1 %v1458_v4  ;;  %v1476_v22 = vld [vmem:[%s1645_s28 + $0x110] ss:$8 sps:$4 sm:$0xff]   ;;  %v1479_v24 = vld [vmem:[%s1645_s28 + $0x124] ss:$8 sps:$4 sm:$0xff]   ;;  %v1482_v26 = vld [vmem:[%s1645_s28 + $0x120] ss:$8 sps:$4 sm:$0xff]  }
  0x15   : > { %776 = vmatprep.subr.bf16.mxu0 %v1585_v1  ;;  %1413 = vmatprep.subr.bf16.mxu1 %v1585_v1  ;;  %v1483_v27 = vld [vmem:[%s1645_s28 + $0x34] ss:$8 sps:$4 sm:$0xff]   ;;  %v1487_v29 = vld [vmem:[%s1645_s28 + $0x30] ss:$8 sps:$4 sm:$0xff]   ;;  %v1489_v31 = vld [vmem:[%s1645_s28 + $0x44] ss:$8 sps:$4 sm:$0xff]  }
  0x16   : > { %v1485_v28 = vld [vmem:[%s1645_s28 + $0x134] ss:$8 sps:$4 sm:$0xff]   ;;  %v1488_v30 = vld [vmem:[%s1645_s28 + $0x130] ss:$8 sps:$4 sm:$0xff]   ;;  %v1491_v32 = vld [vmem:[%s1645_s28 + $0x144] ss:$8 sps:$4 sm:$0xff]  }
  0x17   : > { %v1493_v33 = vld [vmem:[%s1645_s28 + $0x40] ss:$8 sps:$4 sm:$0xff]   ;;  %v1495_v35 = vld [vmem:[%s1645_s28 + $0x54] ss:$8 sps:$4 sm:$0xff]   ;;  %v1499_v37 = vld [vmem:[%s1645_s28 + $0x50] ss:$8 sps:$4 sm:$0xff]  }
  0x18   : > { %777 = vmatpush1.bf16.msra.mxu0 %v1459_v5  ;;  %1423 = vmatpush1.bf16.msra.mxu1 %v1459_v5  ;;  %v1494_v34 = vld [vmem:[%s1645_s28 + $0x140] ss:$8 sps:$4 sm:$0xff]   ;;  %v1497_v36 = vld [vmem:[%s1645_s28 + $0x154] ss:$8 sps:$4 sm:$0xff]   ;;  %v1500_v38 = vld [vmem:[%s1645_s28 + $0x150] ss:$8 sps:$4 sm:$0xff]  }
  0x19   : > { %778 = vmatprep.subr.bf16.mxu0 %v1585_v1  ;;  %1414 = vmatprep.subr.bf16.mxu1 %v1585_v1  ;;  %v1501_v39 = vld [vmem:[%s1645_s28 + $0x64] ss:$8 sps:$4 sm:$0xff]   ;;  %v1505_v41 = vld [vmem:[%s1645_s28 + $0x60] ss:$8 sps:$4 sm:$0xff]   ;;  %v1507_v43 = vld [vmem:[%s1645_s28 + $0x74] ss:$8 sps:$4 sm:$0xff]  }
  0x1a   : > { %v1503_v40 = vld [vmem:[%s1645_s28 + $0x164] ss:$8 sps:$4 sm:$0xff]   ;;  %v1506_v42 = vld [vmem:[%s1645_s28 + $0x160] ss:$8 sps:$4 sm:$0xff]   ;;  %v1509_v44 = vld [vmem:[%s1645_s28 + $0x174] ss:$8 sps:$4 sm:$0xff]  }
  0x1b   : > { %v1511_v45 = vld [vmem:[%s1645_s28 + $0x70] ss:$8 sps:$4 sm:$0xff]   ;;  %v1513_v47 = vld [vmem:[%s1645_s28 + $0x84] ss:$8 sps:$4 sm:$0xff]   ;;  %v1517_v49 = vld [vmem:[%s1645_s28 + $0x80] ss:$8 sps:$4 sm:$0xff]  }
  0x1c   : > { %779 = vmatpush1.bf16.msra.mxu0 %v1460_v8  ;;  %1424 = vmatpush1.bf16.msra.mxu1 %v1460_v8  ;;  %v1512_v46 = vld [vmem:[%s1645_s28 + $0x170] ss:$8 sps:$4 sm:$0xff]   ;;  %v1515_v48 = vld [vmem:[%s1645_s28 + $0x184] ss:$8 sps:$4 sm:$0xff]   ;;  %v1518_v50 = vld [vmem:[%s1645_s28 + $0x180] ss:$8 sps:$4 sm:$0xff]  }
  0x1d   : > { %780 = vmatprep.subr.bf16.mxu0 %v1585_v1  ;;  %1415 = vmatprep.subr.bf16.mxu1 %v1585_v1  ;;  %v1519_v51 = vld [vmem:[%s1645_s28 + $0x94] ss:$8 sps:$4 sm:$0xff]   ;;  %v1523_v53 = vld [vmem:[%s1645_s28 + $0x90] ss:$8 sps:$4 sm:$0xff]   ;;  %v1525_v55 = vld [vmem:[%s1645_s28 + $0xa4] ss:$8 sps:$4 sm:$0xff]  }
  0x1e   : > { %v1521_v52 = vld [vmem:[%s1645_s28 + $0x194] ss:$8 sps:$4 sm:$0xff]   ;;  %v1524_v54 = vld [vmem:[%s1645_s28 + $0x190] ss:$8 sps:$4 sm:$0xff]   ;;  %v1527_v56 = vld [vmem:[%s1645_s28 + $0x1a4] ss:$8 sps:$4 sm:$0xff]  }
  0x1f   : > { %v1529_v57 = vld [vmem:[%s1645_s28 + $0xa0] ss:$8 sps:$4 sm:$0xff]   ;;  %v1531_v59 = vld [vmem:[%s1645_s28 + $0xb4] ss:$8 sps:$4 sm:$0xff]   ;;  %v1535_v61 = vld [vmem:[%s1645_s28 + $0xb0] ss:$8 sps:$4 sm:$0xff]  }
  0x20   : > { %781 = vmatpush1.bf16.msra.mxu0 %v1461_v9  ;;  %1425 = vmatpush1.bf16.msra.mxu1 %v1461_v9  ;;  %v1530_v58 = vld [vmem:[%s1645_s28 + $0x1a0] ss:$8 sps:$4 sm:$0xff]   ;;  %v1533_v60 = vld [vmem:[%s1645_s28 + $0x1b4] ss:$8 sps:$4 sm:$0xff]   ;;  %v1536_v62 = vld [vmem:[%s1645_s28 + $0x1b0] ss:$8 sps:$4 sm:$0xff]  }
  0x21   : > { %782 = vmatprep.subr.bf16.mxu0 %v1585_v1  ;;  %1416 = vmatprep.subr.bf16.mxu1 %v1585_v1  ;;  %v1537_v63 = vld [vmem:[%s1645_s28 + $0xc4] ss:$8 sps:$4 sm:$0xff]   ;;  %v1542_v2 = vld [vmem:[%s1645_s28 + $0x1c0] ss:$8 sps:$4 sm:$0xff]   ;;  %v1543_v3 = vld [vmem:[%s1645_s28 + $0xd4] ss:$8 sps:$4 sm:$0xff]  }
  0x22   : > { %v1539_v0 = vld [vmem:[%s1645_s28 + $0x1c4] ss:$8 sps:$4 sm:$0xff]   ;;  %v1545_v4 = vld [vmem:[%s1645_s28 + $0x1d4] ss:$8 sps:$4 sm:$0xff]   ;;  %v1547_v5 = vld [vmem:[%s1645_s28 + $0xd0] ss:$8 sps:$4 sm:$0xff]  }
  0x23   : > { %v1548_v6 = vld [vmem:[%s1645_s28 + $0x1d0] ss:$8 sps:$4 sm:$0xff]   ;;  %v1549_v7 = vld [vmem:[%s1645_s28 + $0xe4] ss:$8 sps:$4 sm:$0xff]   ;;  %v1553_v9 = vld [vmem:[%s1645_s28 + $0xe0] ss:$8 sps:$4 sm:$0xff]  }
  0x24   : > { %783 = vmatpush1.bf16.msra.mxu0 %v1462_v10  ;;  %1426 = vmatpush1.bf16.msra.mxu1 %v1462_v10  ;;  %v1551_v8 = vld [vmem:[%s1645_s28 + $0x1e4] ss:$8 sps:$4 sm:$0xff]   ;;  %v1554_v10 = vld [vmem:[%s1645_s28 + $0x1e0] ss:$8 sps:$4 sm:$0xff]   ;;  %v1555_v11 = vld [vmem:[%s1645_s28 + $0xf4] ss:$8 sps:$4 sm:$0xff]  }
  0x25   : > { %784 = vmatprep.subr.bf16.mxu0 %v1585_v1  ;;  %1417 = vmatprep.subr.bf16.mxu1 %v1585_v1  ;;  %v1557_v12 = vld [vmem:[%s1645_s28 + $0x1f4] ss:$8 sps:$4 sm:$0xff]   ;;  %v1560_v14 = vld [vmem:[%s1645_s28 + $0x1f0] ss:$8 sps:$4 sm:$0xff]  }
  0x28   : > { %785 = vmatpush1.bf16.msra.mxu0 %v1463_v13  ;;  %1427 = vmatpush1.bf16.msra.mxu1 %v1463_v13  ;;  %v1559_v13 = vld [vmem:[%s1645_s28 + $0xf0] ss:$8 sps:$4 sm:$0xff]  }
  0x29   : > { %786 = vmatprep.subr.bf16.mxu0 %v1585_v1  ;;  %1418 = vmatprep.subr.bf16.mxu1 %v1585_v1  ;;  %v1541_v1 = vld [vmem:[%s1645_s28 + $0xc0] ss:$8 sps:$4 sm:$0xff]  }
  0x2c   : > { %787 = vmatpush1.bf16.msra.mxu0 %v766_v16  ;;  %1428 = vmatpush1.bf16.msra.mxu1 %v766_v16 }
  0x2f   : > { %801 = vmatmul.mubr.bf16.vlgmr.msra.gmra.mrb[0].mxu0 %v1465_v17  ;;  %929 = vmatmul.mubr.bf16.vlgmr.msra.gmra.mrb[0].mxu1 %v1468_v18 }
  0x30   : > { %1375 = vmatprep.mubr.msk.bf16.mxu0 %vm664_vm0, %v1471_v19  ;;  %1391 = vmatprep.mubr.msk.bf16.mxu1 %vm664_vm0, %v1473_v20 }
  0x37   : > { %809 = vmatmul.mubr.bf16.gmra.mrb[4].mxu0 %v1475_v21  ;;  %937 = vmatmul.mubr.bf16.gmra.mrb[4].mxu1 %v1476_v22 }
  0x38   : > { %1376 = vmatprep.mubr.msk.bf16.mxu0 %vm664_vm0, %v1477_v23  ;;  %1392 = vmatprep.mubr.msk.bf16.mxu1 %vm664_vm0, %v1479_v24 }
  0x3f   : > { %817 = vmatmul.mubr.bf16.gmra.mrb[8].mxu0 %v1481_v25  ;;  %945 = vmatmul.mubr.bf16.gmra.mrb[8].mxu1 %v1482_v26 }
  0x40   : > { %1377 = vmatprep.mubr.msk.bf16.mxu0 %vm664_vm0, %v1483_v27  ;;  %1393 = vmatprep.mubr.msk.bf16.mxu1 %vm664_vm0, %v1485_v28 }
  0x47   : > { %825 = vmatmul.mubr.bf16.gmra.mrb[12].mxu0 %v1487_v29  ;;  %953 = vmatmul.mubr.bf16.gmra.mrb[12].mxu1 %v1488_v30 }
  0x48   : > { %1378 = vmatprep.mubr.msk.bf16.mxu0 %vm664_vm0, %v1489_v31  ;;  %1394 = vmatprep.mubr.msk.bf16.mxu1 %vm664_vm0, %v1491_v32 }
  0x4f   : > { %833 = vmatmul.mubr.bf16.gmra.mrb[16].mxu0 %v1493_v33  ;;  %961 = vmatmul.mubr.bf16.gmra.mrb[16].mxu1 %v1494_v34 }
  0x50   : > { %1379 = vmatprep.mubr.msk.bf16.mxu0 %vm664_vm0, %v1495_v35  ;;  %1395 = vmatprep.mubr.msk.bf16.mxu1 %vm664_vm0, %v1497_v36 }
  0x57   : > { %841 = vmatmul.mubr.bf16.gmra.mrb[20].mxu0 %v1499_v37  ;;  %969 = vmatmul.mubr.bf16.gmra.mrb[20].mxu1 %v1500_v38 }
  0x58   : > { %1380 = vmatprep.mubr.msk.bf16.mxu0 %vm664_vm0, %v1501_v39  ;;  %1396 = vmatprep.mubr.msk.bf16.mxu1 %vm664_vm0, %v1503_v40 }
  0x5f   : > { %849 = vmatmul.mubr.bf16.gmra.mrb[24].mxu0 %v1505_v41  ;;  %977 = vmatmul.mubr.bf16.gmra.mrb[24].mxu1 %v1506_v42 }
  0x60   : > { %1381 = vmatprep.mubr.msk.bf16.mxu0 %vm664_vm0, %v1507_v43  ;;  %1397 = vmatprep.mubr.msk.bf16.mxu1 %vm664_vm0, %v1509_v44 }
  0x67   : > { %857 = vmatmul.mubr.bf16.gmra.mrb[28].mxu0 %v1511_v45  ;;  %985 = vmatmul.mubr.bf16.gmra.mrb[28].mxu1 %v1512_v46 }
  0x68   : > { %1382 = vmatprep.mubr.msk.bf16.mxu0 %vm664_vm0, %v1513_v47  ;;  %1398 = vmatprep.mubr.msk.bf16.mxu1 %vm664_vm0, %v1515_v48 }
  0x6f   : > { %865 = vmatmul.mubr.bf16.gmra.mrb[32].mxu0 %v1517_v49  ;;  %993 = vmatmul.mubr.bf16.gmra.mrb[32].mxu1 %v1518_v50 }
  0x70   : > { %1383 = vmatprep.mubr.msk.bf16.mxu0 %vm664_vm0, %v1519_v51  ;;  %1399 = vmatprep.mubr.msk.bf16.mxu1 %vm664_vm0, %v1521_v52 }
  0x77   : > { %873 = vmatmul.mubr.bf16.gmra.mrb[36].mxu0 %v1523_v53  ;;  %1001 = vmatmul.mubr.bf16.gmra.mrb[36].mxu1 %v1524_v54 }
  0x78   : > { %1384 = vmatprep.mubr.msk.bf16.mxu0 %vm664_vm0, %v1525_v55  ;;  %1400 = vmatprep.mubr.msk.bf16.mxu1 %vm664_vm0, %v1527_v56 }
  0x7f   : > { %881 = vmatmul.mubr.bf16.gmra.mrb[40].mxu0 %v1529_v57  ;;  %1009 = vmatmul.mubr.bf16.gmra.mrb[40].mxu1 %v1530_v58 }
  0x80   : > { %1385 = vmatprep.mubr.msk.bf16.mxu0 %vm664_vm0, %v1531_v59  ;;  %1401 = vmatprep.mubr.msk.bf16.mxu1 %vm664_vm0, %v1533_v60 }
  0x87   : > { %889 = vmatmul.mubr.bf16.gmra.mrb[44].mxu0 %v1535_v61  ;;  %1017 = vmatmul.mubr.bf16.gmra.mrb[44].mxu1 %v1536_v62 }
  0x88   : > { %1386 = vmatprep.mubr.msk.bf16.mxu0 %vm664_vm0, %v1537_v63  ;;  %1402 = vmatprep.mubr.msk.bf16.mxu1 %vm664_vm0, %v1539_v0 }
  0x8f   : > { %897 = vmatmul.mubr.bf16.gmra.mrb[48].mxu0 %v1541_v1  ;;  %1025 = vmatmul.mubr.bf16.gmra.mrb[48].mxu1 %v1542_v2 }
  0x90   : > { %1387 = vmatprep.mubr.msk.bf16.mxu0 %vm664_vm0, %v1543_v3  ;;  %1403 = vmatprep.mubr.msk.bf16.mxu1 %vm664_vm0, %v1545_v4 }
  0x97   : > { %905 = vmatmul.mubr.bf16.gmra.mrb[52].mxu0 %v1547_v5  ;;  %1033 = vmatmul.mubr.bf16.gmra.mrb[52].mxu1 %v1548_v6 }
  0x98   : > { %1388 = vmatprep.mubr.msk.bf16.mxu0 %vm664_vm0, %v1549_v7  ;;  %1404 = vmatprep.mubr.msk.bf16.mxu1 %vm664_vm0, %v1551_v8 }
  0x9f   : > { %913 = vmatmul.mubr.bf16.gmra.mrb[56].mxu0 %v1553_v9  ;;  %1041 = vmatmul.mubr.bf16.gmra.mrb[56].mxu1 %v1554_v10 }
  0xa0   : > { %1389 = vmatprep.mubr.msk.bf16.mxu0 %vm664_vm0, %v1555_v11  ;;  %1405 = vmatprep.mubr.msk.bf16.mxu1 %vm664_vm0, %v1557_v12 }
  0xa7   : > { %921 = vmatmul.mubr.bf16.gmra.mrb[60].mxu0 %v1559_v13  ;;  %1049 = vmatmul.mubr.bf16.gmra.mrb[60].mxu1 %v1560_v14 }
 0x102   : > { %v802_v16 = vpop.f32.mrb[0].mxu0  ;;  %v930_v17 = vpop.f32.mrb[0].mxu1 }
 0x103   : > { %v803_v18 = vadd.f32 %v1764_v15, %v802_v16  ;;  %v931_v19 = vadd.f32 %v1764_v15, %v930_v17  ;;  %v804_v20 = vpop.f32.mrb[1].mxu0  ;;  %v932_v21 = vpop.f32.mrb[1].mxu1 }
 0x104   : > { %v805_v22 = vpop.f32.mrb[2].mxu0  ;;  %v933_v23 = vpop.f32.mrb[2].mxu1 }
 0x105   : > { %v1057_v24 = vmax.f32 %v803_v18, 0.0  ;;  %v1089_v25 = vmax.f32 %v931_v19, 0.0  ;;  %v806_v26 = vadd.f32 %v1764_v15, %v805_v22  ;;  %v934_v27 = vadd.f32 %v1764_v15, %v933_v23  ;;  %v807_v28 = vpop.f32.mrb[3].mxu0  ;;  %v935_v29 = vpop.f32.mrb[3].mxu1 }
 0x107   : > { %1121 = vst [vmem:[%s1773_s21] sm:$0xff] %v1057_v24  ;;  %1153 = vst [vmem:[%s1773_s21 + $0x100] sm:$0xff] %v1089_v25  ;;  %v1058_v30 = vmax.f32 %v806_v26, 0.0  ;;  %v1090_v31 = vmax.f32 %v934_v27, 0.0 }
 0x109   : > { %1122 = vst [vmem:[%s1773_s21 + $0x8] sm:$0xff] %v1058_v30  ;;  %1154 = vst [vmem:[%s1773_s21 + $0x108] sm:$0xff] %v1090_v31 }
 0x10a   : > { %v810_v32 = vpop.f32.mrb[4].mxu0  ;;  %v938_v33 = vpop.f32.mrb[4].mxu1 }
 0x10b   : > { %v811_v34 = vadd.f32 %v1764_v15, %v810_v32  ;;  %v939_v35 = vadd.f32 %v1764_v15, %v938_v33  ;;  %v812_v36 = vpop.f32.mrb[5].mxu0  ;;  %v940_v37 = vpop.f32.mrb[5].mxu1 }
 0x10c   : > { %v813_v38 = vpop.f32.mrb[6].mxu0  ;;  %v941_v39 = vpop.f32.mrb[6].mxu1 }
 0x10d   : > { %v1059_v40 = vmax.f32 %v811_v34, 0.0  ;;  %v1091_v41 = vmax.f32 %v939_v35, 0.0  ;;  %v814_v42 = vadd.f32 %v1764_v15, %v813_v38  ;;  %v942_v43 = vadd.f32 %v1764_v15, %v941_v39  ;;  %v815_v44 = vpop.f32.mrb[7].mxu0  ;;  %v943_v45 = vpop.f32.mrb[7].mxu1 }
 0x10f   : > { %1123 = vst [vmem:[%s1773_s21 + $0x10] sm:$0xff] %v1059_v40  ;;  %1155 = vst [vmem:[%s1773_s21 + $0x110] sm:$0xff] %v1091_v41  ;;  %v1060_v46 = vmax.f32 %v814_v42, 0.0  ;;  %v1092_v47 = vmax.f32 %v942_v43, 0.0 }
 0x111   : > { %1124 = vst [vmem:[%s1773_s21 + $0x18] sm:$0xff] %v1060_v46  ;;  %1156 = vst [vmem:[%s1773_s21 + $0x118] sm:$0xff] %v1092_v47 }
 0x112   : > { %v818_v48 = vpop.f32.mrb[8].mxu0  ;;  %v946_v49 = vpop.f32.mrb[8].mxu1 }
 0x113   : > { %v819_v50 = vadd.f32 %v1764_v15, %v818_v48  ;;  %v947_v51 = vadd.f32 %v1764_v15, %v946_v49  ;;  %v820_v52 = vpop.f32.mrb[9].mxu0  ;;  %v948_v53 = vpop.f32.mrb[9].mxu1 }
 0x114   : > { %v821_v54 = vpop.f32.mrb[10].mxu0  ;;  %v949_v55 = vpop.f32.mrb[10].mxu1 }
 0x115   : > { %v1061_v56 = vmax.f32 %v819_v50, 0.0  ;;  %v1093_v57 = vmax.f32 %v947_v51, 0.0  ;;  %v822_v58 = vadd.f32 %v1764_v15, %v821_v54  ;;  %v950_v59 = vadd.f32 %v1764_v15, %v949_v55  ;;  %v823_v60 = vpop.f32.mrb[11].mxu0  ;;  %v951_v61 = vpop.f32.mrb[11].mxu1 }
 0x117   : > { %1125 = vst [vmem:[%s1773_s21 + $0x20] sm:$0xff] %v1061_v56  ;;  %1157 = vst [vmem:[%s1773_s21 + $0x120] sm:$0xff] %v1093_v57  ;;  %v1062_v62 = vmax.f32 %v822_v58, 0.0  ;;  %v1094_v63 = vmax.f32 %v950_v59, 0.0 }
 0x119   : > { %1126 = vst [vmem:[%s1773_s21 + $0x28] sm:$0xff] %v1062_v62  ;;  %1158 = vst [vmem:[%s1773_s21 + $0x128] sm:$0xff] %v1094_v63 }
 0x11a   : > { %v826_v0 = vpop.f32.mrb[12].mxu0  ;;  %v954_v1 = vpop.f32.mrb[12].mxu1 }
 0x11b   : > { %v827_v2 = vadd.f32 %v1764_v15, %v826_v0  ;;  %v955_v3 = vadd.f32 %v1764_v15, %v954_v1  ;;  %v828_v4 = vpop.f32.mrb[13].mxu0  ;;  %v956_v5 = vpop.f32.mrb[13].mxu1 }
 0x11c   : > { %v829_v6 = vpop.f32.mrb[14].mxu0  ;;  %v957_v7 = vpop.f32.mrb[14].mxu1 }
 0x11d   : > { %v1063_v8 = vmax.f32 %v827_v2, 0.0  ;;  %v1095_v9 = vmax.f32 %v955_v3, 0.0  ;;  %v830_v10 = vadd.f32 %v1764_v15, %v829_v6  ;;  %v958_v11 = vadd.f32 %v1764_v15, %v957_v7  ;;  %v831_v12 = vpop.f32.mrb[15].mxu0  ;;  %v959_v13 = vpop.f32.mrb[15].mxu1 }
 0x11f   : > { %1127 = vst [vmem:[%s1773_s21 + $0x30] sm:$0xff] %v1063_v8  ;;  %1159 = vst [vmem:[%s1773_s21 + $0x130] sm:$0xff] %v1095_v9  ;;  %v1064_v14 = vmax.f32 %v830_v10, 0.0  ;;  %v1096_v16 = vmax.f32 %v958_v11, 0.0 }
 0x121   : > { %1128 = vst [vmem:[%s1773_s21 + $0x38] sm:$0xff] %v1064_v14  ;;  %1160 = vst [vmem:[%s1773_s21 + $0x138] sm:$0xff] %v1096_v16 }
 0x122   : > { %v834_v17 = vpop.f32.mrb[16].mxu0  ;;  %v962_v18 = vpop.f32.mrb[16].mxu1 }
 0x123   : > { %v835_v19 = vadd.f32 %v1764_v15, %v834_v17  ;;  %v963_v20 = vadd.f32 %v1764_v15, %v962_v18  ;;  %v836_v21 = vpop.f32.mrb[17].mxu0  ;;  %v964_v22 = vpop.f32.mrb[17].mxu1 }
 0x124   : > { %v837_v23 = vpop.f32.mrb[18].mxu0  ;;  %v965_v24 = vpop.f32.mrb[18].mxu1 }
 0x125   : > { %v1065_v25 = vmax.f32 %v835_v19, 0.0  ;;  %v1097_v26 = vmax.f32 %v963_v20, 0.0  ;;  %v838_v27 = vadd.f32 %v1764_v15, %v837_v23  ;;  %v966_v28 = vadd.f32 %v1764_v15, %v965_v24  ;;  %v839_v29 = vpop.f32.mrb[19].mxu0  ;;  %v967_v30 = vpop.f32.mrb[19].mxu1 }
 0x127   : > { %1129 = vst [vmem:[%s1773_s21 + $0x40] sm:$0xff] %v1065_v25  ;;  %1161 = vst [vmem:[%s1773_s21 + $0x140] sm:$0xff] %v1097_v26  ;;  %v1066_v31 = vmax.f32 %v838_v27, 0.0  ;;  %v1098_v32 = vmax.f32 %v966_v28, 0.0 }
 0x129   : > { %1130 = vst [vmem:[%s1773_s21 + $0x48] sm:$0xff] %v1066_v31  ;;  %1162 = vst [vmem:[%s1773_s21 + $0x148] sm:$0xff] %v1098_v32 }
 0x12a   : > { %v842_v33 = vpop.f32.mrb[20].mxu0  ;;  %v970_v34 = vpop.f32.mrb[20].mxu1 }
 0x12b   : > { %v843_v35 = vadd.f32 %v1764_v15, %v842_v33  ;;  %v971_v36 = vadd.f32 %v1764_v15, %v970_v34  ;;  %v844_v37 = vpop.f32.mrb[21].mxu0  ;;  %v972_v38 = vpop.f32.mrb[21].mxu1 }
 0x12c   : > { %v845_v39 = vpop.f32.mrb[22].mxu0  ;;  %v973_v40 = vpop.f32.mrb[22].mxu1 }
 0x12d   : > { %v1067_v41 = vmax.f32 %v843_v35, 0.0  ;;  %v1099_v42 = vmax.f32 %v971_v36, 0.0  ;;  %v846_v43 = vadd.f32 %v1764_v15, %v845_v39  ;;  %v974_v44 = vadd.f32 %v1764_v15, %v973_v40  ;;  %v847_v45 = vpop.f32.mrb[23].mxu0  ;;  %v975_v46 = vpop.f32.mrb[23].mxu1 }
 0x12f   : > { %1131 = vst [vmem:[%s1773_s21 + $0x50] sm:$0xff] %v1067_v41  ;;  %1163 = vst [vmem:[%s1773_s21 + $0x150] sm:$0xff] %v1099_v42  ;;  %v1068_v47 = vmax.f32 %v846_v43, 0.0  ;;  %v1100_v48 = vmax.f32 %v974_v44, 0.0 }
 0x131   : > { %1132 = vst [vmem:[%s1773_s21 + $0x58] sm:$0xff] %v1068_v47  ;;  %1164 = vst [vmem:[%s1773_s21 + $0x158] sm:$0xff] %v1100_v48 }
 0x132   : > { %v850_v49 = vpop.f32.mrb[24].mxu0  ;;  %v978_v50 = vpop.f32.mrb[24].mxu1 }
 0x133   : > { %v851_v51 = vadd.f32 %v1764_v15, %v850_v49  ;;  %v979_v52 = vadd.f32 %v1764_v15, %v978_v50  ;;  %v852_v53 = vpop.f32.mrb[25].mxu0  ;;  %v980_v54 = vpop.f32.mrb[25].mxu1 }
 0x134   : > { %v853_v55 = vpop.f32.mrb[26].mxu0  ;;  %v981_v56 = vpop.f32.mrb[26].mxu1 }
 0x135   : > { %v1069_v57 = vmax.f32 %v851_v51, 0.0  ;;  %v1101_v58 = vmax.f32 %v979_v52, 0.0  ;;  %v854_v59 = vadd.f32 %v1764_v15, %v853_v55  ;;  %v982_v60 = vadd.f32 %v1764_v15, %v981_v56  ;;  %v855_v61 = vpop.f32.mrb[27].mxu0  ;;  %v983_v62 = vpop.f32.mrb[27].mxu1 }
 0x137   : > { %1133 = vst [vmem:[%s1773_s21 + $0x60] sm:$0xff] %v1069_v57  ;;  %1165 = vst [vmem:[%s1773_s21 + $0x160] sm:$0xff] %v1101_v58  ;;  %v1070_v63 = vmax.f32 %v854_v59, 0.0  ;;  %v1102_v0 = vmax.f32 %v982_v60, 0.0 }
 0x139   : > { %1134 = vst [vmem:[%s1773_s21 + $0x68] sm:$0xff] %v1070_v63  ;;  %1166 = vst [vmem:[%s1773_s21 + $0x168] sm:$0xff] %v1102_v0 }
 0x13a   : > { %v858_v1 = vpop.f32.mrb[28].mxu0  ;;  %v986_v2 = vpop.f32.mrb[28].mxu1 }
 0x13b   : > { %v859_v3 = vadd.f32 %v1764_v15, %v858_v1  ;;  %v987_v4 = vadd.f32 %v1764_v15, %v986_v2  ;;  %v860_v5 = vpop.f32.mrb[29].mxu0  ;;  %v988_v6 = vpop.f32.mrb[29].mxu1 }
 0x13c   : > { %v861_v7 = vpop.f32.mrb[30].mxu0  ;;  %v989_v8 = vpop.f32.mrb[30].mxu1 }
 0x13d   : > { %v1071_v9 = vmax.f32 %v859_v3, 0.0  ;;  %v1103_v10 = vmax.f32 %v987_v4, 0.0  ;;  %v862_v11 = vadd.f32 %v1764_v15, %v861_v7  ;;  %v990_v12 = vadd.f32 %v1764_v15, %v989_v8  ;;  %v863_v13 = vpop.f32.mrb[31].mxu0  ;;  %v991_v14 = vpop.f32.mrb[31].mxu1 }
 0x13f   : > { %1135 = vst [vmem:[%s1773_s21 + $0x70] sm:$0xff] %v1071_v9  ;;  %1167 = vst [vmem:[%s1773_s21 + $0x170] sm:$0xff] %v1103_v10  ;;  %v1072_v16 = vmax.f32 %v862_v11, 0.0  ;;  %v1104_v17 = vmax.f32 %v990_v12, 0.0 }
 0x141   : > { %1136 = vst [vmem:[%s1773_s21 + $0x78] sm:$0xff] %v1072_v16  ;;  %1168 = vst [vmem:[%s1773_s21 + $0x178] sm:$0xff] %v1104_v17 }
 0x142   : > { %v866_v18 = vpop.f32.mrb[32].mxu0  ;;  %v994_v19 = vpop.f32.mrb[32].mxu1 }
 0x143   : > { %v867_v20 = vadd.f32 %v1764_v15, %v866_v18  ;;  %v995_v21 = vadd.f32 %v1764_v15, %v994_v19  ;;  %v868_v22 = vpop.f32.mrb[33].mxu0  ;;  %v996_v23 = vpop.f32.mrb[33].mxu1 }
 0x144   : > { %v869_v24 = vpop.f32.mrb[34].mxu0  ;;  %v997_v25 = vpop.f32.mrb[34].mxu1 }
 0x145   : > { %v1073_v26 = vmax.f32 %v867_v20, 0.0  ;;  %v1105_v27 = vmax.f32 %v995_v21, 0.0  ;;  %v870_v28 = vadd.f32 %v1764_v15, %v869_v24  ;;  %v998_v29 = vadd.f32 %v1764_v15, %v997_v25  ;;  %v871_v30 = vpop.f32.mrb[35].mxu0  ;;  %v999_v31 = vpop.f32.mrb[35].mxu1 }
 0x147   : > { %1137 = vst [vmem:[%s1773_s21 + $0x80] sm:$0xff] %v1073_v26  ;;  %1169 = vst [vmem:[%s1773_s21 + $0x180] sm:$0xff] %v1105_v27  ;;  %v1074_v32 = vmax.f32 %v870_v28, 0.0  ;;  %v1106_v33 = vmax.f32 %v998_v29, 0.0 }
 0x149   : > { %1138 = vst [vmem:[%s1773_s21 + $0x88] sm:$0xff] %v1074_v32  ;;  %1170 = vst [vmem:[%s1773_s21 + $0x188] sm:$0xff] %v1106_v33 }
 0x14a   : > { %v874_v34 = vpop.f32.mrb[36].mxu0  ;;  %v1002_v35 = vpop.f32.mrb[36].mxu1 }
 0x14b   : > { %v875_v36 = vadd.f32 %v1764_v15, %v874_v34  ;;  %v1003_v37 = vadd.f32 %v1764_v15, %v1002_v35  ;;  %v876_v38 = vpop.f32.mrb[37].mxu0  ;;  %v1004_v39 = vpop.f32.mrb[37].mxu1 }
 0x14c   : > { %v877_v40 = vpop.f32.mrb[38].mxu0  ;;  %v1005_v41 = vpop.f32.mrb[38].mxu1 }
 0x14d   : > { %v1075_v42 = vmax.f32 %v875_v36, 0.0  ;;  %v1107_v43 = vmax.f32 %v1003_v37, 0.0  ;;  %v878_v44 = vadd.f32 %v1764_v15, %v877_v40  ;;  %v1006_v45 = vadd.f32 %v1764_v15, %v1005_v41  ;;  %v879_v46 = vpop.f32.mrb[39].mxu0  ;;  %v1007_v47 = vpop.f32.mrb[39].mxu1 }
 0x14f   : > { %1139 = vst [vmem:[%s1773_s21 + $0x90] sm:$0xff] %v1075_v42  ;;  %1171 = vst [vmem:[%s1773_s21 + $0x190] sm:$0xff] %v1107_v43  ;;  %v1076_v48 = vmax.f32 %v878_v44, 0.0  ;;  %v1108_v49 = vmax.f32 %v1006_v45, 0.0 }
 0x151   : > { %1140 = vst [vmem:[%s1773_s21 + $0x98] sm:$0xff] %v1076_v48  ;;  %1172 = vst [vmem:[%s1773_s21 + $0x198] sm:$0xff] %v1108_v49 }
 0x152   : > { %v882_v50 = vpop.f32.mrb[40].mxu0  ;;  %v1010_v51 = vpop.f32.mrb[40].mxu1 }
 0x153   : > { %v883_v52 = vadd.f32 %v1764_v15, %v882_v50  ;;  %v1011_v53 = vadd.f32 %v1764_v15, %v1010_v51  ;;  %v884_v54 = vpop.f32.mrb[41].mxu0  ;;  %v1012_v55 = vpop.f32.mrb[41].mxu1 }
 0x154   : > { %v885_v56 = vpop.f32.mrb[42].mxu0  ;;  %v1013_v57 = vpop.f32.mrb[42].mxu1 }
 0x155   : > { %v1077_v58 = vmax.f32 %v883_v52, 0.0  ;;  %v1109_v59 = vmax.f32 %v1011_v53, 0.0  ;;  %v886_v60 = vadd.f32 %v1764_v15, %v885_v56  ;;  %v1014_v61 = vadd.f32 %v1764_v15, %v1013_v57  ;;  %v887_v62 = vpop.f32.mrb[43].mxu0  ;;  %v1015_v63 = vpop.f32.mrb[43].mxu1 }
 0x157   : > { %1141 = vst [vmem:[%s1773_s21 + $0xa0] sm:$0xff] %v1077_v58  ;;  %1173 = vst [vmem:[%s1773_s21 + $0x1a0] sm:$0xff] %v1109_v59  ;;  %v1078_v0 = vmax.f32 %v886_v60, 0.0  ;;  %v1110_v1 = vmax.f32 %v1014_v61, 0.0 }
 0x159   : > { %1142 = vst [vmem:[%s1773_s21 + $0xa8] sm:$0xff] %v1078_v0  ;;  %1174 = vst [vmem:[%s1773_s21 + $0x1a8] sm:$0xff] %v1110_v1 }
 0x15a   : > { %v890_v2 = vpop.f32.mrb[44].mxu0  ;;  %v1018_v3 = vpop.f32.mrb[44].mxu1 }
 0x15b   : > { %v891_v4 = vadd.f32 %v1764_v15, %v890_v2  ;;  %v1019_v5 = vadd.f32 %v1764_v15, %v1018_v3  ;;  %v892_v6 = vpop.f32.mrb[45].mxu0  ;;  %v1020_v7 = vpop.f32.mrb[45].mxu1 }
 0x15c   : > { %v893_v8 = vpop.f32.mrb[46].mxu0  ;;  %v1021_v9 = vpop.f32.mrb[46].mxu1 }
 0x15d   : > { %v1079_v10 = vmax.f32 %v891_v4, 0.0  ;;  %v1111_v11 = vmax.f32 %v1019_v5, 0.0  ;;  %v894_v12 = vadd.f32 %v1764_v15, %v893_v8  ;;  %v1022_v13 = vadd.f32 %v1764_v15, %v1021_v9  ;;  %v895_v14 = vpop.f32.mrb[47].mxu0  ;;  %v1023_v16 = vpop.f32.mrb[47].mxu1 }
 0x15f   : > { %1143 = vst [vmem:[%s1773_s21 + $0xb0] sm:$0xff] %v1079_v10  ;;  %1175 = vst [vmem:[%s1773_s21 + $0x1b0] sm:$0xff] %v1111_v11  ;;  %v1080_v17 = vmax.f32 %v894_v12, 0.0  ;;  %v1112_v18 = vmax.f32 %v1022_v13, 0.0 }
 0x161   : > { %1144 = vst [vmem:[%s1773_s21 + $0xb8] sm:$0xff] %v1080_v17  ;;  %1176 = vst [vmem:[%s1773_s21 + $0x1b8] sm:$0xff] %v1112_v18 }
 0x162   : > { %v898_v19 = vpop.f32.mrb[48].mxu0  ;;  %v1026_v20 = vpop.f32.mrb[48].mxu1 }
 0x163   : > { %v899_v21 = vadd.f32 %v1764_v15, %v898_v19  ;;  %v1027_v22 = vadd.f32 %v1764_v15, %v1026_v20  ;;  %v900_v23 = vpop.f32.mrb[49].mxu0  ;;  %v1028_v24 = vpop.f32.mrb[49].mxu1 }
 0x164   : > { %v901_v25 = vpop.f32.mrb[50].mxu0  ;;  %v1029_v26 = vpop.f32.mrb[50].mxu1 }
 0x165   : > { %v1081_v27 = vmax.f32 %v899_v21, 0.0  ;;  %v1113_v28 = vmax.f32 %v1027_v22, 0.0  ;;  %v902_v29 = vadd.f32 %v1764_v15, %v901_v25  ;;  %v1030_v30 = vadd.f32 %v1764_v15, %v1029_v26  ;;  %v903_v31 = vpop.f32.mrb[51].mxu0  ;;  %v1031_v32 = vpop.f32.mrb[51].mxu1 }
 0x167   : > { %1145 = vst [vmem:[%s1773_s21 + $0xc0] sm:$0xff] %v1081_v27  ;;  %1177 = vst [vmem:[%s1773_s21 + $0x1c0] sm:$0xff] %v1113_v28  ;;  %v1082_v33 = vmax.f32 %v902_v29, 0.0  ;;  %v1114_v34 = vmax.f32 %v1030_v30, 0.0 }
 0x169   : > { %1146 = vst [vmem:[%s1773_s21 + $0xc8] sm:$0xff] %v1082_v33  ;;  %1178 = vst [vmem:[%s1773_s21 + $0x1c8] sm:$0xff] %v1114_v34 }
 0x16a   : > { %v906_v35 = vpop.f32.mrb[52].mxu0  ;;  %v1034_v36 = vpop.f32.mrb[52].mxu1 }
 0x16b   : > { %v907_v37 = vadd.f32 %v1764_v15, %v906_v35  ;;  %v1035_v38 = vadd.f32 %v1764_v15, %v1034_v36  ;;  %v908_v39 = vpop.f32.mrb[53].mxu0  ;;  %v1036_v40 = vpop.f32.mrb[53].mxu1 }
 0x16c   : > { %v909_v41 = vpop.f32.mrb[54].mxu0  ;;  %v1037_v42 = vpop.f32.mrb[54].mxu1 }
 0x16d   : > { %v1083_v43 = vmax.f32 %v907_v37, 0.0  ;;  %v1115_v44 = vmax.f32 %v1035_v38, 0.0  ;;  %v910_v45 = vadd.f32 %v1764_v15, %v909_v41  ;;  %v1038_v46 = vadd.f32 %v1764_v15, %v1037_v42  ;;  %v911_v47 = vpop.f32.mrb[55].mxu0  ;;  %v1039_v48 = vpop.f32.mrb[55].mxu1 }
 0x16f   : > { %1147 = vst [vmem:[%s1773_s21 + $0xd0] sm:$0xff] %v1083_v43  ;;  %1179 = vst [vmem:[%s1773_s21 + $0x1d0] sm:$0xff] %v1115_v44  ;;  %v1084_v49 = vmax.f32 %v910_v45, 0.0  ;;  %v1116_v50 = vmax.f32 %v1038_v46, 0.0 }
 0x171   : > { %1148 = vst [vmem:[%s1773_s21 + $0xd8] sm:$0xff] %v1084_v49  ;;  %1180 = vst [vmem:[%s1773_s21 + $0x1d8] sm:$0xff] %v1116_v50 }
 0x172   : > { %v914_v51 = vpop.f32.mrb[56].mxu0  ;;  %v1042_v52 = vpop.f32.mrb[56].mxu1 }
 0x173   : > { %v915_v53 = vadd.f32 %v1764_v15, %v914_v51  ;;  %v1043_v54 = vadd.f32 %v1764_v15, %v1042_v52  ;;  %v916_v55 = vpop.f32.mrb[57].mxu0  ;;  %v1044_v56 = vpop.f32.mrb[57].mxu1 }
 0x174   : > { %v917_v57 = vpop.f32.mrb[58].mxu0  ;;  %v1045_v58 = vpop.f32.mrb[58].mxu1 }
 0x175   : > { %v1085_v59 = vmax.f32 %v915_v53, 0.0  ;;  %v1117_v60 = vmax.f32 %v1043_v54, 0.0  ;;  %v918_v61 = vadd.f32 %v1764_v15, %v917_v57  ;;  %v1046_v62 = vadd.f32 %v1764_v15, %v1045_v58  ;;  %v919_v63 = vpop.f32.mrb[59].mxu0  ;;  %v1047_v0 = vpop.f32.mrb[59].mxu1 }
 0x177   : > { %1149 = vst [vmem:[%s1773_s21 + $0xe0] sm:$0xff] %v1085_v59  ;;  %1181 = vst [vmem:[%s1773_s21 + $0x1e0] sm:$0xff] %v1117_v60  ;;  %v1086_v1 = vmax.f32 %v918_v61, 0.0  ;;  %v1118_v2 = vmax.f32 %v1046_v62, 0.0 }
 0x179   : > { %1150 = vst [vmem:[%s1773_s21 + $0xe8] sm:$0xff] %v1086_v1  ;;  %1182 = vst [vmem:[%s1773_s21 + $0x1e8] sm:$0xff] %v1118_v2 }
 0x17a   : > { %v922_v3 = vpop.f32.mrb[60].mxu0  ;;  %v1050_v4 = vpop.f32.mrb[60].mxu1 }
 0x17b   : > { %v923_v5 = vadd.f32 %v1764_v15, %v922_v3  ;;  %v1051_v6 = vadd.f32 %v1764_v15, %v1050_v4  ;;  %v924_v7 = vpop.f32.mrb[61].mxu0  ;;  %v1052_v8 = vpop.f32.mrb[61].mxu1 }
 0x17c   : > { %v925_v9 = vpop.f32.mrb[62].mxu0  ;;  %v1053_v10 = vpop.f32.mrb[62].mxu1 }
 0x17d   : > { %v1087_v11 = vmax.f32 %v923_v5, 0.0  ;;  %v1119_v12 = vmax.f32 %v1051_v6, 0.0  ;;  %v926_v13 = vadd.f32 %v1764_v15, %v925_v9  ;;  %v1054_v14 = vadd.f32 %v1764_v15, %v1053_v10  ;;  %v927_v16 = vpop.f32.mrb[63].mxu0  ;;  %v1055_v17 = vpop.f32.mrb[63].mxu1 }
 0x17f   : > { %1151 = vst [vmem:[%s1773_s21 + $0xf0] sm:$0xff] %v1087_v11  ;;  %1183 = vst [vmem:[%s1773_s21 + $0x1f0] sm:$0xff] %v1119_v12  ;;  %v1088_v18 = vmax.f32 %v926_v13, 0.0  ;;  %v1120_v19 = vmax.f32 %v1054_v14, 0.0 }
 0x181   : > { %1152 = vst [vmem:[%s1773_s21 + $0xf8] sm:$0xff] %v1088_v18  ;;  %1184 = vst [vmem:[%s1773_s21 + $0x1f8] sm:$0xff] %v1120_v19 }
 0x182 PF: > { %s13_s14 = sadd.s32 1, %s1583_s14   ;;  %s1914_s12 = smov %s1579_s13 }
 0x183   : > { %p10_p5 = scmp.ge.s32.totalorder %s13_s14, 11   ;;  %s1915_s13 = smov %s1917_s15 }
 0x185   :  { %12 = sbr.rel (!%p10_p5) target bundleno = 2 (0x2), region = 68 }

// kernel: ez_detect_forward.63
= control target key start
LH: loop header
LB: loop body
LE: loop exit
PB: predicated region body
PF: predicated region fallthrough
CT: control target
= control target key end

     0   :  { %s1133_s12 = smov 0   ;;  %s1135_s13 = smov 0   ;;  %s1326_s0 = inlined_call_operand.vmem [shape: bf16[1152,8], index: 0, kind: input, shape index: {}]   ;;  %s1327_s1 = inlined_call_operand.vmem [shape: bf16[8,128], index: 1, kind: input, shape index: {}]   ;;  %s1328_s2 = inlined_call_operand.vmem [shape: f32[1,128], index: 2, kind: input, shape index: {}]   ;;  %s1329_s3 = inlined_call_operand.vmem [shape: f32[1152,128], index: 3, kind: output, shape index: {}]  }
   0x1   :  { %s1137_s14 = smov 0  }
   0x2 LB: > { %s25_s15 = sadd.s32 1, %s1107_s13  ;;  %p908_p0 = scmp.ge.s32.totalorder %s1111_s14, 1  ;;  %s1111_s14 = sphi %s1137_s14, %s13_s14   ;;  %s1107_s13 = sphi %s1135_s13, %s1331_s13   ;;  %s1103_s12 = sphi %s1133_s12, %s1330_s12  }
   0x3   : > { %p27_p1 = scmp.ge.s32.totalorder %s25_s15, 3  ;;  %p169_p2 = scmp.lt.s32.totalorder %s1111_s14, 4 }
   0x5   : > { %s1333_s15 = smov (%p27_p1, %s25_s15), 0  ;;  %p170_p3 = pnand %p908_p0, %p169_p2 }
   0x6   : > { %v274_v0 = vld [vmem:[%s1327_s1] sm:$0xf] (!%p170_p3)  ;;  %vm475_vm0 = vcmask (!%p170_p3), 1043456   ;;  %s203_s18 = smul.u32 (!%p170_p3), 48, %s1103_s12  ;;  %vm402_vm1 = vcmask (!%p170_p3), 64512  }
   0x7   : > { %173 = sbr.rel (%p170_p3) target bundleno = 280 (0x118), region = 32  ;;  %1039 = vmatprep.subr.msk.bf16.mxu0 (!%p170_p3), %vm475_vm0, %v274_v0  ;;  %1040 = vmatprep.subr.msk.bf16.mxu1 (!%p170_p3), %vm475_vm0, %v274_v0  ;;  %v477_v1 = vsel (!%p170_p3), %vm475_vm0, %v274_v0, 0  ;;  %v1213_v26 = vld [vmem:[%s1328_s2] ss:$0 sm:$0xff] (!%p170_p3) }
   0x8   : > { %988 = vmatpush3.bf16.msra.mxu0 (!%p170_p3), %v477_v1  ;;  %1038 = vmatpush3.bf16.msra.mxu1 (!%p170_p3), %v477_v1  ;;  %p204_p4 = scmp.lt.s32.totalorder (!%p170_p3), %s203_s18, 143 }
   0xe   : > { %s1335_s18 = smov (!%p204_p4, %s203_s18), 143 }
   0xf   : > { %s909_s19 = sshll.u32 %s1335_s18, 2  ;;  %s910_s25 = sshll.u32 %s1335_s18, 3 }
  0x10   : > { %s1160_s22 = scalar_lea.vmem %s1326_s0, %s909_s19  ;;  %s1220_s28 = scalar_lea.vmem %s1329_s3, %s910_s25 }
  0x11   : > { %v1065_v2 = vld [vmem:[%s1160_s22] sm:$0xff]   ;;  %v1067_v4 = vld [vmem:[%s1160_s22 + $0x8] sm:$0xff]   ;;  %v1069_v6 = vld [vmem:[%s1160_s22 + $0x10] sm:$0xff]  }
  0x12   : > { %v1066_v3 = vld [vmem:[%s1160_s22 + $0x60] sm:$0xff]   ;;  %989 = vmatprep.mubr.msk.bf16.mxu0 %vm402_vm1, %v1065_v2  ;;  %v1068_v5 = vld [vmem:[%s1160_s22 + $0x68] sm:$0xff]   ;;  %v1070_v7 = vld [vmem:[%s1160_s22 + $0x70] sm:$0xff]  }
  0x13   : > { %1013 = vmatprep.mubr.msk.bf16.mxu1 %vm402_vm1, %v1066_v3  ;;  %990 = vmatmul.mubr.msk.bf16.vlgmr.msra.gmra.mrb[0].mxu0 %vm402_vm1, %v1067_v4  ;;  %v1071_v8 = vld [vmem:[%s1160_s22 + $0x18] sm:$0xff]   ;;  %v1073_v10 = vld [vmem:[%s1160_s22 + $0x20] sm:$0xff]   ;;  %v1075_v12 = vld [vmem:[%s1160_s22 + $0x28] sm:$0xff]  }
  0x14   : > { %1014 = vmatmul.mubr.msk.bf16.vlgmr.msra.gmra.mrb[0].mxu1 %vm402_vm1, %v1068_v5  ;;  %993 = vmatprep.mubr.msk.bf16.mxu0 %vm402_vm1, %v1069_v6  ;;  %v1072_v9 = vld [vmem:[%s1160_s22 + $0x78] sm:$0xff]   ;;  %v1074_v11 = vld [vmem:[%s1160_s22 + $0x80] sm:$0xff]   ;;  %v1076_v13 = vld [vmem:[%s1160_s22 + $0x88] sm:$0xff]  }
  0x15   : > { %1017 = vmatprep.mubr.msk.bf16.mxu1 %vm402_vm1, %v1070_v7  ;;  %v1077_v14 = vld [vmem:[%s1160_s22 + $0x30] sm:$0xff]   ;;  %v1079_v16 = vld [vmem:[%s1160_s22 + $0x38] sm:$0xff]   ;;  %v1081_v18 = vld [vmem:[%s1160_s22 + $0x40] sm:$0xff]  }
  0x16   : > { %v1078_v15 = vld [vmem:[%s1160_s22 + $0x90] sm:$0xff]   ;;  %v1080_v17 = vld [vmem:[%s1160_s22 + $0x98] sm:$0xff]   ;;  %v1082_v19 = vld [vmem:[%s1160_s22 + $0xa0] sm:$0xff]  }
  0x17   : > { %v1083_v20 = vld [vmem:[%s1160_s22 + $0x48] sm:$0xff]   ;;  %v1085_v22 = vld [vmem:[%s1160_s22 + $0x50] sm:$0xff]   ;;  %v1087_v24 = vld [vmem:[%s1160_s22 + $0x58] sm:$0xff]  }
  0x18   : > { %v1084_v21 = vld [vmem:[%s1160_s22 + $0xa8] sm:$0xff]   ;;  %v1086_v23 = vld [vmem:[%s1160_s22 + $0xb0] sm:$0xff]   ;;  %v1088_v25 = vld [vmem:[%s1160_s22 + $0xb8] sm:$0xff]  }
  0x1b   : > { %994 = vmatmul.mubr.msk.bf16.gmra.mrb[4].mxu0 %vm402_vm1, %v1071_v8 }
  0x1c   : > { %1018 = vmatmul.mubr.msk.bf16.gmra.mrb[4].mxu1 %vm402_vm1, %v1072_v9  ;;  %997 = vmatprep.mubr.msk.bf16.mxu0 %vm402_vm1, %v1073_v10 }
  0x1d   : > { %1021 = vmatprep.mubr.msk.bf16.mxu1 %vm402_vm1, %v1074_v11 }
  0x23   : > { %998 = vmatmul.mubr.msk.bf16.gmra.mrb[8].mxu0 %vm402_vm1, %v1075_v12 }
  0x24   : > { %1022 = vmatmul.mubr.msk.bf16.gmra.mrb[8].mxu1 %vm402_vm1, %v1076_v13  ;;  %1001 = vmatprep.mubr.msk.bf16.mxu0 %vm402_vm1, %v1077_v14 }
  0x25   : > { %1025 = vmatprep.mubr.msk.bf16.mxu1 %vm402_vm1, %v1078_v15 }
  0x2b   : > { %1002 = vmatmul.mubr.msk.bf16.gmra.mrb[12].mxu0 %vm402_vm1, %v1079_v16 }
  0x2c   : > { %1026 = vmatmul.mubr.msk.bf16.gmra.mrb[12].mxu1 %vm402_vm1, %v1080_v17  ;;  %1005 = vmatprep.mubr.msk.bf16.mxu0 %vm402_vm1, %v1081_v18 }
  0x2d   : > { %1029 = vmatprep.mubr.msk.bf16.mxu1 %vm402_vm1, %v1082_v19 }
  0x33   : > { %1006 = vmatmul.mubr.msk.bf16.gmra.mrb[16].mxu0 %vm402_vm1, %v1083_v20 }
  0x34   : > { %1030 = vmatmul.mubr.msk.bf16.gmra.mrb[16].mxu1 %vm402_vm1, %v1084_v21  ;;  %1009 = vmatprep.mubr.msk.bf16.mxu0 %vm402_vm1, %v1085_v22 }
  0x35   : > { %1033 = vmatprep.mubr.msk.bf16.mxu1 %vm402_vm1, %v1086_v23 }
  0x3b   : > { %1010 = vmatmul.mubr.msk.bf16.gmra.mrb[20].mxu0 %vm402_vm1, %v1087_v24 }
  0x3c   : > { %1034 = vmatmul.mubr.msk.bf16.gmra.mrb[20].mxu1 %vm402_vm1, %v1088_v25 }
  0xe6   : > { %v991_v27 = vpop.f32.mrb[0].mxu0 }
  0xe7   : > { %v522_v28 = vadd.f32 %v991_v27, %v1213_v26  ;;  %v1015_v29 = vpop.f32.mrb[0].mxu1  ;;  %v513_v30 = vpop.f32.mrb[1].mxu0 }
  0xe8   : > { %v618_v31 = vadd.f32 %v1015_v29, %v1213_v26  ;;  %v514_v32 = vadd.f32 %v1213_v26, %v513_v30  ;;  %v609_v33 = vpop.f32.mrb[1].mxu1  ;;  %v992_v34 = vpop.f32.mrb[2].mxu0 }
  0xe9   : > { %v706_v35 = vmax.f32 %v522_v28, 0.0  ;;  %v610_v36 = vadd.f32 %v1213_v26, %v609_v33  ;;  %v525_v37 = vadd.f32 %v992_v34, %v1213_v26  ;;  %v1016_v38 = vpop.f32.mrb[2].mxu1  ;;  %v516_v39 = vpop.f32.mrb[3].mxu0 }
  0xea   : > { %v730_v40 = vmax.f32 %v618_v31, 0.0  ;;  %v704_v41 = vmax.f32 %v514_v32, 0.0  ;;  %v621_v42 = vadd.f32 %v1016_v38, %v1213_v26  ;;  %v517_v43 = vadd.f32 %v1213_v26, %v516_v39  ;;  %v612_v44 = vpop.f32.mrb[3].mxu1 }
  0xeb   : > { %754 = vst [vmem:[%s1220_s28 + $0x10] sm:$0xff] %v706_v35  ;;  %v728_v45 = vmax.f32 %v610_v36, 0.0  ;;  %v707_v46 = vmax.f32 %v525_v37, 0.0  ;;  %v613_v47 = vadd.f32 %v1213_v26, %v612_v44 }
  0xec   : > { %778 = vst [vmem:[%s1220_s28 + $0xd0] sm:$0xff] %v730_v40  ;;  %752 = vst [vmem:[%s1220_s28] sm:$0xff] %v704_v41  ;;  %v731_v48 = vmax.f32 %v621_v42, 0.0  ;;  %v705_v49 = vmax.f32 %v517_v43, 0.0 }
  0xed   : > { %776 = vst [vmem:[%s1220_s28 + $0xc0] sm:$0xff] %v728_v45  ;;  %755 = vst [vmem:[%s1220_s28 + $0x18] sm:$0xff] %v707_v46  ;;  %v729_v50 = vmax.f32 %v613_v47, 0.0 }
  0xee   : > { %779 = vst [vmem:[%s1220_s28 + $0xd8] sm:$0xff] %v731_v48  ;;  %753 = vst [vmem:[%s1220_s28 + $0x8] sm:$0xff] %v705_v49  ;;  %v995_v51 = vpop.f32.mrb[4].mxu0 }
  0xef   : > { %777 = vst [vmem:[%s1220_s28 + $0xc8] sm:$0xff] %v729_v50  ;;  %v538_v52 = vadd.f32 %v995_v51, %v1213_v26  ;;  %v1019_v53 = vpop.f32.mrb[4].mxu1  ;;  %v529_v54 = vpop.f32.mrb[5].mxu0 }
  0xf0   : > { %v634_v55 = vadd.f32 %v1019_v53, %v1213_v26  ;;  %v530_v56 = vadd.f32 %v1213_v26, %v529_v54  ;;  %v625_v57 = vpop.f32.mrb[5].mxu1  ;;  %v996_v58 = vpop.f32.mrb[6].mxu0 }
  0xf1   : > { %v710_v59 = vmax.f32 %v538_v52, 0.0  ;;  %v626_v60 = vadd.f32 %v1213_v26, %v625_v57  ;;  %v541_v61 = vadd.f32 %v996_v58, %v1213_v26  ;;  %v1020_v62 = vpop.f32.mrb[6].mxu1  ;;  %v532_v63 = vpop.f32.mrb[7].mxu0 }
  0xf2   : > { %v734_v0 = vmax.f32 %v634_v55, 0.0  ;;  %v708_v1 = vmax.f32 %v530_v56, 0.0  ;;  %v637_v2 = vadd.f32 %v1020_v62, %v1213_v26  ;;  %v533_v3 = vadd.f32 %v1213_v26, %v532_v63  ;;  %v628_v4 = vpop.f32.mrb[7].mxu1 }
  0xf3   : > { %758 = vst [vmem:[%s1220_s28 + $0x30] sm:$0xff] %v710_v59  ;;  %v732_v5 = vmax.f32 %v626_v60, 0.0  ;;  %v711_v6 = vmax.f32 %v541_v61, 0.0  ;;  %v629_v7 = vadd.f32 %v1213_v26, %v628_v4 }
  0xf4   : > { %782 = vst [vmem:[%s1220_s28 + $0xf0] sm:$0xff] %v734_v0  ;;  %756 = vst [vmem:[%s1220_s28 + $0x20] sm:$0xff] %v708_v1  ;;  %v735_v8 = vmax.f32 %v637_v2, 0.0  ;;  %v709_v9 = vmax.f32 %v533_v3, 0.0 }
  0xf5   : > { %780 = vst [vmem:[%s1220_s28 + $0xe0] sm:$0xff] %v732_v5  ;;  %759 = vst [vmem:[%s1220_s28 + $0x38] sm:$0xff] %v711_v6  ;;  %v733_v10 = vmax.f32 %v629_v7, 0.0 }
  0xf6   : > { %783 = vst [vmem:[%s1220_s28 + $0xf8] sm:$0xff] %v735_v8  ;;  %757 = vst [vmem:[%s1220_s28 + $0x28] sm:$0xff] %v709_v9  ;;  %v999_v11 = vpop.f32.mrb[8].mxu0 }
  0xf7   : > { %781 = vst [vmem:[%s1220_s28 + $0xe8] sm:$0xff] %v733_v10  ;;  %v554_v12 = vadd.f32 %v999_v11, %v1213_v26  ;;  %v1023_v13 = vpop.f32.mrb[8].mxu1  ;;  %v545_v14 = vpop.f32.mrb[9].mxu0 }
  0xf8   : > { %v650_v15 = vadd.f32 %v1023_v13, %v1213_v26  ;;  %v546_v16 = vadd.f32 %v1213_v26, %v545_v14  ;;  %v641_v17 = vpop.f32.mrb[9].mxu1  ;;  %v1000_v18 = vpop.f32.mrb[10].mxu0 }
  0xf9   : > { %v714_v19 = vmax.f32 %v554_v12, 0.0  ;;  %v642_v20 = vadd.f32 %v1213_v26, %v641_v17  ;;  %v557_v21 = vadd.f32 %v1000_v18, %v1213_v26  ;;  %v1024_v22 = vpop.f32.mrb[10].mxu1  ;;  %v548_v23 = vpop.f32.mrb[11].mxu0 }
  0xfa   : > { %v738_v24 = vmax.f32 %v650_v15, 0.0  ;;  %v712_v25 = vmax.f32 %v546_v16, 0.0  ;;  %v653_v27 = vadd.f32 %v1024_v22, %v1213_v26  ;;  %v549_v28 = vadd.f32 %v1213_v26, %v548_v23  ;;  %v644_v29 = vpop.f32.mrb[11].mxu1 }
  0xfb   : > { %762 = vst [vmem:[%s1220_s28 + $0x50] sm:$0xff] %v714_v19  ;;  %v736_v30 = vmax.f32 %v642_v20, 0.0  ;;  %v715_v31 = vmax.f32 %v557_v21, 0.0  ;;  %v645_v32 = vadd.f32 %v1213_v26, %v644_v29 }
  0xfc   : > { %786 = vst [vmem:[%s1220_s28 + $0x110] sm:$0xff] %v738_v24  ;;  %760 = vst [vmem:[%s1220_s28 + $0x40] sm:$0xff] %v712_v25  ;;  %v739_v33 = vmax.f32 %v653_v27, 0.0  ;;  %v713_v34 = vmax.f32 %v549_v28, 0.0 }
  0xfd   : > { %784 = vst [vmem:[%s1220_s28 + $0x100] sm:$0xff] %v736_v30  ;;  %763 = vst [vmem:[%s1220_s28 + $0x58] sm:$0xff] %v715_v31  ;;  %v737_v35 = vmax.f32 %v645_v32, 0.0 }
  0xfe   : > { %787 = vst [vmem:[%s1220_s28 + $0x118] sm:$0xff] %v739_v33  ;;  %761 = vst [vmem:[%s1220_s28 + $0x48] sm:$0xff] %v713_v34  ;;  %v1003_v36 = vpop.f32.mrb[12].mxu0 }
  0xff   : > { %785 = vst [vmem:[%s1220_s28 + $0x108] sm:$0xff] %v737_v35  ;;  %v570_v37 = vadd.f32 %v1003_v36, %v1213_v26  ;;  %v1027_v38 = vpop.f32.mrb[12].mxu1  ;;  %v561_v39 = vpop.f32.mrb[13].mxu0 }
 0x100   : > { %v666_v40 = vadd.f32 %v1027_v38, %v1213_v26  ;;  %v562_v41 = vadd.f32 %v1213_v26, %v561_v39  ;;  %v657_v42 = vpop.f32.mrb[13].mxu1  ;;  %v1004_v43 = vpop.f32.mrb[14].mxu0 }
 0x101   : > { %v718_v44 = vmax.f32 %v570_v37, 0.0  ;;  %v658_v45 = vadd.f32 %v1213_v26, %v657_v42  ;;  %v573_v46 = vadd.f32 %v1004_v43, %v1213_v26  ;;  %v1028_v47 = vpop.f32.mrb[14].mxu1  ;;  %v564_v48 = vpop.f32.mrb[15].mxu0 }
 0x102   : > { %v742_v49 = vmax.f32 %v666_v40, 0.0  ;;  %v716_v50 = vmax.f32 %v562_v41, 0.0  ;;  %v669_v51 = vadd.f32 %v1028_v47, %v1213_v26  ;;  %v565_v52 = vadd.f32 %v1213_v26, %v564_v48  ;;  %v660_v53 = vpop.f32.mrb[15].mxu1 }
 0x103   : > { %766 = vst [vmem:[%s1220_s28 + $0x70] sm:$0xff] %v718_v44  ;;  %v740_v54 = vmax.f32 %v658_v45, 0.0  ;;  %v719_v55 = vmax.f32 %v573_v46, 0.0  ;;  %v661_v56 = vadd.f32 %v1213_v26, %v660_v53 }
 0x104   : > { %790 = vst [vmem:[%s1220_s28 + $0x130] sm:$0xff] %v742_v49  ;;  %764 = vst [vmem:[%s1220_s28 + $0x60] sm:$0xff] %v716_v50  ;;  %v743_v57 = vmax.f32 %v669_v51, 0.0  ;;  %v717_v58 = vmax.f32 %v565_v52, 0.0 }
 0x105   : > { %788 = vst [vmem:[%s1220_s28 + $0x120] sm:$0xff] %v740_v54  ;;  %767 = vst [vmem:[%s1220_s28 + $0x78] sm:$0xff] %v719_v55  ;;  %v741_v59 = vmax.f32 %v661_v56, 0.0 }
 0x106   : > { %791 = vst [vmem:[%s1220_s28 + $0x138] sm:$0xff] %v743_v57  ;;  %765 = vst [vmem:[%s1220_s28 + $0x68] sm:$0xff] %v717_v58  ;;  %v1007_v60 = vpop.f32.mrb[16].mxu0 }
 0x107   : > { %789 = vst [vmem:[%s1220_s28 + $0x128] sm:$0xff] %v741_v59  ;;  %v586_v61 = vadd.f32 %v1007_v60, %v1213_v26  ;;  %v1031_v62 = vpop.f32.mrb[16].mxu1  ;;  %v577_v63 = vpop.f32.mrb[17].mxu0 }
 0x108   : > { %v682_v0 = vadd.f32 %v1031_v62, %v1213_v26  ;;  %v578_v1 = vadd.f32 %v1213_v26, %v577_v63  ;;  %v673_v2 = vpop.f32.mrb[17].mxu1  ;;  %v1008_v3 = vpop.f32.mrb[18].mxu0 }
 0x109   : > { %v722_v4 = vmax.f32 %v586_v61, 0.0  ;;  %v674_v5 = vadd.f32 %v1213_v26, %v673_v2  ;;  %v589_v6 = vadd.f32 %v1008_v3, %v1213_v26  ;;  %v1032_v7 = vpop.f32.mrb[18].mxu1  ;;  %v580_v8 = vpop.f32.mrb[19].mxu0 }
 0x10a   : > { %v746_v9 = vmax.f32 %v682_v0, 0.0  ;;  %v720_v10 = vmax.f32 %v578_v1, 0.0  ;;  %v685_v11 = vadd.f32 %v1032_v7, %v1213_v26  ;;  %v581_v12 = vadd.f32 %v1213_v26, %v580_v8  ;;  %v676_v13 = vpop.f32.mrb[19].mxu1 }
 0x10b   : > { %770 = vst [vmem:[%s1220_s28 + $0x90] sm:$0xff] %v722_v4  ;;  %v744_v14 = vmax.f32 %v674_v5, 0.0  ;;  %v723_v15 = vmax.f32 %v589_v6, 0.0  ;;  %v677_v16 = vadd.f32 %v1213_v26, %v676_v13 }
 0x10c   : > { %794 = vst [vmem:[%s1220_s28 + $0x150] sm:$0xff] %v746_v9  ;;  %768 = vst [vmem:[%s1220_s28 + $0x80] sm:$0xff] %v720_v10  ;;  %v747_v17 = vmax.f32 %v685_v11, 0.0  ;;  %v721_v18 = vmax.f32 %v581_v12, 0.0 }
 0x10d   : > { %792 = vst [vmem:[%s1220_s28 + $0x140] sm:$0xff] %v744_v14  ;;  %771 = vst [vmem:[%s1220_s28 + $0x98] sm:$0xff] %v723_v15  ;;  %v745_v19 = vmax.f32 %v677_v16, 0.0 }
 0x10e   : > { %795 = vst [vmem:[%s1220_s28 + $0x158] sm:$0xff] %v747_v17  ;;  %769 = vst [vmem:[%s1220_s28 + $0x88] sm:$0xff] %v721_v18  ;;  %v1011_v20 = vpop.f32.mrb[20].mxu0 }
 0x10f   : > { %793 = vst [vmem:[%s1220_s28 + $0x148] sm:$0xff] %v745_v19  ;;  %v602_v21 = vadd.f32 %v1011_v20, %v1213_v26  ;;  %v1035_v22 = vpop.f32.mrb[20].mxu1  ;;  %v593_v23 = vpop.f32.mrb[21].mxu0 }
 0x110   : > { %v698_v24 = vadd.f32 %v1035_v22, %v1213_v26  ;;  %v594_v25 = vadd.f32 %v1213_v26, %v593_v23  ;;  %v689_v27 = vpop.f32.mrb[21].mxu1  ;;  %v1012_v28 = vpop.f32.mrb[22].mxu0 }
 0x111   : > { %v726_v29 = vmax.f32 %v602_v21, 0.0  ;;  %v690_v30 = vadd.f32 %v1213_v26, %v689_v27  ;;  %v605_v31 = vadd.f32 %v1012_v28, %v1213_v26  ;;  %v1036_v32 = vpop.f32.mrb[22].mxu1  ;;  %v596_v33 = vpop.f32.mrb[23].mxu0 }
 0x112   : > { %v750_v34 = vmax.f32 %v698_v24, 0.0  ;;  %v724_v35 = vmax.f32 %v594_v25, 0.0  ;;  %v701_v36 = vadd.f32 %v1036_v32, %v1213_v26  ;;  %v597_v37 = vadd.f32 %v1213_v26, %v596_v33  ;;  %v692_v38 = vpop.f32.mrb[23].mxu1 }
 0x113   : > { %774 = vst [vmem:[%s1220_s28 + $0xb0] sm:$0xff] %v726_v29  ;;  %v748_v39 = vmax.f32 %v690_v30, 0.0  ;;  %v727_v40 = vmax.f32 %v605_v31, 0.0  ;;  %v693_v41 = vadd.f32 %v1213_v26, %v692_v38 }
 0x114   : > { %798 = vst [vmem:[%s1220_s28 + $0x170] sm:$0xff] %v750_v34  ;;  %772 = vst [vmem:[%s1220_s28 + $0xa0] sm:$0xff] %v724_v35  ;;  %v751_v42 = vmax.f32 %v701_v36, 0.0  ;;  %v725_v43 = vmax.f32 %v597_v37, 0.0 }
 0x115   : > { %796 = vst [vmem:[%s1220_s28 + $0x160] sm:$0xff] %v748_v39  ;;  %775 = vst [vmem:[%s1220_s28 + $0xb8] sm:$0xff] %v727_v40  ;;  %v749_v44 = vmax.f32 %v693_v41, 0.0 }
 0x116   : > { %799 = vst [vmem:[%s1220_s28 + $0x178] sm:$0xff] %v751_v42  ;;  %773 = vst [vmem:[%s1220_s28 + $0xa8] sm:$0xff] %v725_v43 }
 0x117   : > { %797 = vst [vmem:[%s1220_s28 + $0x168] sm:$0xff] %v749_v44 }
 0x118 PF: > { %s13_s14 = sadd.s32 1, %s1111_s14   ;;  %s1330_s12 = smov %s1107_s13 }
 0x119   : > { %p10_p5 = scmp.ge.s32.totalorder %s13_s14, 5   ;;  %s1331_s13 = smov %s1333_s15 }
 0x11b   :  { %12 = sbr.rel (!%p10_p5) target bundleno = 2 (0x2), region = 68 }

// kernel: ez_detect_forward.65
= control target key start
LH: loop header
LB: loop body
LE: loop exit
PB: predicated region body
PF: predicated region fallthrough
CT: control target
= control target key end

     0   :  { %s1085_s12 = smov 0   ;;  %s1087_s13 = smov 0   ;;  %s1278_s0 = inlined_call_operand.vmem [shape: bf16[1152,8], index: 0, kind: input, shape index: {}]   ;;  %s1279_s1 = inlined_call_operand.vmem [shape: bf16[8,128], index: 1, kind: input, shape index: {}]   ;;  %s1280_s2 = inlined_call_operand.vmem [shape: f32[1,128], index: 2, kind: input, shape index: {}]   ;;  %s1281_s3 = inlined_call_operand.vmem [shape: f32[1152,128], index: 3, kind: output, shape index: {}]  }
   0x1   :  { %s1089_s14 = smov 0  }
   0x2 LB: > { %s25_s15 = sadd.s32 1, %s1059_s13  ;;  %p860_p0 = scmp.ge.s32.totalorder %s1063_s14, 1  ;;  %s1063_s14 = sphi %s1089_s14, %s13_s14   ;;  %s1059_s13 = sphi %s1087_s13, %s1283_s13   ;;  %s1055_s12 = sphi %s1085_s12, %s1282_s12  }
   0x3   : > { %p27_p1 = scmp.ge.s32.totalorder %s25_s15, 3  ;;  %p169_p2 = scmp.lt.s32.totalorder %s1063_s14, 4 }
   0x5   : > { %s1285_s15 = smov (%p27_p1, %s25_s15), 0  ;;  %p170_p3 = pnand %p860_p0, %p169_p2 }
   0x6   : > { %v274_v0 = vld [vmem:[%s1279_s1] sm:$0xf] (!%p170_p3)  ;;  %vm475_vm0 = vcmask (!%p170_p3), 1043456   ;;  %s203_s18 = smul.u32 (!%p170_p3), 48, %s1055_s12  ;;  %vm402_vm1 = vcmask (!%p170_p3), 64512  }
   0x7   : > { %173 = sbr.rel (%p170_p3) target bundleno = 278 (0x116), region = 32  ;;  %991 = vmatprep.subr.msk.bf16.mxu0 (!%p170_p3), %vm475_vm0, %v274_v0  ;;  %992 = vmatprep.subr.msk.bf16.mxu1 (!%p170_p3), %vm475_vm0, %v274_v0  ;;  %v477_v1 = vsel (!%p170_p3), %vm475_vm0, %v274_v0, 0  ;;  %v1166_v26 = vld [vmem:[%s1280_s2] ss:$0 sm:$0xff] (!%p170_p3) }
   0x8   : > { %940 = vmatpush3.bf16.msra.mxu0 (!%p170_p3), %v477_v1  ;;  %990 = vmatpush3.bf16.msra.mxu1 (!%p170_p3), %v477_v1  ;;  %p204_p4 = scmp.lt.s32.totalorder (!%p170_p3), %s203_s18, 143 }
   0xe   : > { %s1287_s18 = smov (!%p204_p4, %s203_s18), 143 }
   0xf   : > { %s861_s19 = sshll.u32 %s1287_s18, 2  ;;  %s862_s23 = sshll.u32 %s1287_s18, 3 }
  0x10   : > { %s1112_s22 = scalar_lea.vmem %s1278_s0, %s861_s19  ;;  %s1171_s28 = scalar_lea.vmem %s1281_s3, %s862_s23 }
  0x11   : > { %v1017_v2 = vld [vmem:[%s1112_s22] sm:$0xff]   ;;  %v1019_v4 = vld [vmem:[%s1112_s22 + $0x8] sm:$0xff]   ;;  %v1021_v6 = vld [vmem:[%s1112_s22 + $0x10] sm:$0xff]  }
  0x12   : > { %v1018_v3 = vld [vmem:[%s1112_s22 + $0x60] sm:$0xff]   ;;  %941 = vmatprep.mubr.msk.bf16.mxu0 %vm402_vm1, %v1017_v2  ;;  %v1020_v5 = vld [vmem:[%s1112_s22 + $0x68] sm:$0xff]   ;;  %v1022_v7 = vld [vmem:[%s1112_s22 + $0x70] sm:$0xff]  }
  0x13   : > { %965 = vmatprep.mubr.msk.bf16.mxu1 %vm402_vm1, %v1018_v3  ;;  %942 = vmatmul.mubr.msk.bf16.vlgmr.msra.gmra.mrb[0].mxu0 %vm402_vm1, %v1019_v4  ;;  %v1023_v8 = vld [vmem:[%s1112_s22 + $0x18] sm:$0xff]   ;;  %v1025_v10 = vld [vmem:[%s1112_s22 + $0x20] sm:$0xff]   ;;  %v1027_v12 = vld [vmem:[%s1112_s22 + $0x28] sm:$0xff]  }
  0x14   : > { %966 = vmatmul.mubr.msk.bf16.vlgmr.msra.gmra.mrb[0].mxu1 %vm402_vm1, %v1020_v5  ;;  %945 = vmatprep.mubr.msk.bf16.mxu0 %vm402_vm1, %v1021_v6  ;;  %v1024_v9 = vld [vmem:[%s1112_s22 + $0x78] sm:$0xff]   ;;  %v1026_v11 = vld [vmem:[%s1112_s22 + $0x80] sm:$0xff]   ;;  %v1028_v13 = vld [vmem:[%s1112_s22 + $0x88] sm:$0xff]  }
  0x15   : > { %969 = vmatprep.mubr.msk.bf16.mxu1 %vm402_vm1, %v1022_v7  ;;  %v1029_v14 = vld [vmem:[%s1112_s22 + $0x30] sm:$0xff]   ;;  %v1031_v16 = vld [vmem:[%s1112_s22 + $0x38] sm:$0xff]   ;;  %v1033_v18 = vld [vmem:[%s1112_s22 + $0x40] sm:$0xff]  }
  0x16   : > { %v1030_v15 = vld [vmem:[%s1112_s22 + $0x90] sm:$0xff]   ;;  %v1032_v17 = vld [vmem:[%s1112_s22 + $0x98] sm:$0xff]   ;;  %v1034_v19 = vld [vmem:[%s1112_s22 + $0xa0] sm:$0xff]  }
  0x17   : > { %v1035_v20 = vld [vmem:[%s1112_s22 + $0x48] sm:$0xff]   ;;  %v1037_v22 = vld [vmem:[%s1112_s22 + $0x50] sm:$0xff]   ;;  %v1039_v24 = vld [vmem:[%s1112_s22 + $0x58] sm:$0xff]  }
  0x18   : > { %v1036_v21 = vld [vmem:[%s1112_s22 + $0xa8] sm:$0xff]   ;;  %v1038_v23 = vld [vmem:[%s1112_s22 + $0xb0] sm:$0xff]   ;;  %v1040_v25 = vld [vmem:[%s1112_s22 + $0xb8] sm:$0xff]  }
  0x1b   : > { %946 = vmatmul.mubr.msk.bf16.gmra.mrb[4].mxu0 %vm402_vm1, %v1023_v8 }
  0x1c   : > { %970 = vmatmul.mubr.msk.bf16.gmra.mrb[4].mxu1 %vm402_vm1, %v1024_v9  ;;  %949 = vmatprep.mubr.msk.bf16.mxu0 %vm402_vm1, %v1025_v10 }
  0x1d   : > { %973 = vmatprep.mubr.msk.bf16.mxu1 %vm402_vm1, %v1026_v11 }
  0x23   : > { %950 = vmatmul.mubr.msk.bf16.gmra.mrb[8].mxu0 %vm402_vm1, %v1027_v12 }
  0x24   : > { %974 = vmatmul.mubr.msk.bf16.gmra.mrb[8].mxu1 %vm402_vm1, %v1028_v13  ;;  %953 = vmatprep.mubr.msk.bf16.mxu0 %vm402_vm1, %v1029_v14 }
  0x25   : > { %977 = vmatprep.mubr.msk.bf16.mxu1 %vm402_vm1, %v1030_v15 }
  0x2b   : > { %954 = vmatmul.mubr.msk.bf16.gmra.mrb[12].mxu0 %vm402_vm1, %v1031_v16 }
  0x2c   : > { %978 = vmatmul.mubr.msk.bf16.gmra.mrb[12].mxu1 %vm402_vm1, %v1032_v17  ;;  %957 = vmatprep.mubr.msk.bf16.mxu0 %vm402_vm1, %v1033_v18 }
  0x2d   : > { %981 = vmatprep.mubr.msk.bf16.mxu1 %vm402_vm1, %v1034_v19 }
  0x33   : > { %958 = vmatmul.mubr.msk.bf16.gmra.mrb[16].mxu0 %vm402_vm1, %v1035_v20 }
  0x34   : > { %982 = vmatmul.mubr.msk.bf16.gmra.mrb[16].mxu1 %vm402_vm1, %v1036_v21  ;;  %961 = vmatprep.mubr.msk.bf16.mxu0 %vm402_vm1, %v1037_v22 }
  0x35   : > { %985 = vmatprep.mubr.msk.bf16.mxu1 %vm402_vm1, %v1038_v23 }
  0x3b   : > { %962 = vmatmul.mubr.msk.bf16.gmra.mrb[20].mxu0 %vm402_vm1, %v1039_v24 }
  0x3c   : > { %986 = vmatmul.mubr.msk.bf16.gmra.mrb[20].mxu1 %vm402_vm1, %v1040_v25 }
  0xe6   : > { %v943_v27 = vpop.f32.mrb[0].mxu0 }
  0xe7   : > { %v522_v28 = vadd.f32 %v943_v27, %v1166_v26  ;;  %v967_v29 = vpop.f32.mrb[0].mxu1  ;;  %v513_v30 = vpop.f32.mrb[1].mxu0 }
  0xe8   : > { %v618_v31 = vadd.f32 %v967_v29, %v1166_v26  ;;  %v514_v32 = vadd.f32 %v1166_v26, %v513_v30  ;;  %v609_v33 = vpop.f32.mrb[1].mxu1  ;;  %v944_v34 = vpop.f32.mrb[2].mxu0 }
  0xe9   : > { %706 = vst [vmem:[%s1171_s28 + $0x10] sm:$0xff] %v522_v28  ;;  %v610_v35 = vadd.f32 %v1166_v26, %v609_v33  ;;  %v525_v36 = vadd.f32 %v944_v34, %v1166_v26  ;;  %v968_v37 = vpop.f32.mrb[2].mxu1  ;;  %v516_v38 = vpop.f32.mrb[3].mxu0 }
  0xea   : > { %730 = vst [vmem:[%s1171_s28 + $0xd0] sm:$0xff] %v618_v31  ;;  %704 = vst [vmem:[%s1171_s28] sm:$0xff] %v514_v32  ;;  %v621_v39 = vadd.f32 %v968_v37, %v1166_v26  ;;  %v517_v40 = vadd.f32 %v1166_v26, %v516_v38  ;;  %v612_v41 = vpop.f32.mrb[3].mxu1 }
  0xeb   : > { %728 = vst [vmem:[%s1171_s28 + $0xc0] sm:$0xff] %v610_v35  ;;  %707 = vst [vmem:[%s1171_s28 + $0x18] sm:$0xff] %v525_v36  ;;  %v613_v42 = vadd.f32 %v1166_v26, %v612_v41 }
  0xec   : > { %731 = vst [vmem:[%s1171_s28 + $0xd8] sm:$0xff] %v621_v39  ;;  %705 = vst [vmem:[%s1171_s28 + $0x8] sm:$0xff] %v517_v40 }
  0xed   : > { %729 = vst [vmem:[%s1171_s28 + $0xc8] sm:$0xff] %v613_v42 }
  0xee   : > { %v947_v43 = vpop.f32.mrb[4].mxu0 }
  0xef   : > { %v538_v44 = vadd.f32 %v947_v43, %v1166_v26  ;;  %v971_v45 = vpop.f32.mrb[4].mxu1  ;;  %v529_v46 = vpop.f32.mrb[5].mxu0 }
  0xf0   : > { %v634_v47 = vadd.f32 %v971_v45, %v1166_v26  ;;  %v530_v48 = vadd.f32 %v1166_v26, %v529_v46  ;;  %v625_v49 = vpop.f32.mrb[5].mxu1  ;;  %v948_v50 = vpop.f32.mrb[6].mxu0 }
  0xf1   : > { %710 = vst [vmem:[%s1171_s28 + $0x30] sm:$0xff] %v538_v44  ;;  %v626_v51 = vadd.f32 %v1166_v26, %v625_v49  ;;  %v541_v52 = vadd.f32 %v948_v50, %v1166_v26  ;;  %v972_v53 = vpop.f32.mrb[6].mxu1  ;;  %v532_v54 = vpop.f32.mrb[7].mxu0 }
  0xf2   : > { %734 = vst [vmem:[%s1171_s28 + $0xf0] sm:$0xff] %v634_v47  ;;  %708 = vst [vmem:[%s1171_s28 + $0x20] sm:$0xff] %v530_v48  ;;  %v637_v55 = vadd.f32 %v972_v53, %v1166_v26  ;;  %v533_v56 = vadd.f32 %v1166_v26, %v532_v54  ;;  %v628_v57 = vpop.f32.mrb[7].mxu1 }
  0xf3   : > { %732 = vst [vmem:[%s1171_s28 + $0xe0] sm:$0xff] %v626_v51  ;;  %711 = vst [vmem:[%s1171_s28 + $0x38] sm:$0xff] %v541_v52  ;;  %v629_v58 = vadd.f32 %v1166_v26, %v628_v57 }
  0xf4   : > { %735 = vst [vmem:[%s1171_s28 + $0xf8] sm:$0xff] %v637_v55  ;;  %709 = vst [vmem:[%s1171_s28 + $0x28] sm:$0xff] %v533_v56 }
  0xf5   : > { %733 = vst [vmem:[%s1171_s28 + $0xe8] sm:$0xff] %v629_v58 }
  0xf6   : > { %v951_v59 = vpop.f32.mrb[8].mxu0 }
  0xf7   : > { %v554_v60 = vadd.f32 %v951_v59, %v1166_v26  ;;  %v975_v61 = vpop.f32.mrb[8].mxu1  ;;  %v545_v62 = vpop.f32.mrb[9].mxu0 }
  0xf8   : > { %v650_v63 = vadd.f32 %v975_v61, %v1166_v26  ;;  %v546_v0 = vadd.f32 %v1166_v26, %v545_v62  ;;  %v641_v1 = vpop.f32.mrb[9].mxu1  ;;  %v952_v2 = vpop.f32.mrb[10].mxu0 }
  0xf9   : > { %714 = vst [vmem:[%s1171_s28 + $0x50] sm:$0xff] %v554_v60  ;;  %v642_v3 = vadd.f32 %v1166_v26, %v641_v1  ;;  %v557_v4 = vadd.f32 %v952_v2, %v1166_v26  ;;  %v976_v5 = vpop.f32.mrb[10].mxu1  ;;  %v548_v6 = vpop.f32.mrb[11].mxu0 }
  0xfa   : > { %738 = vst [vmem:[%s1171_s28 + $0x110] sm:$0xff] %v650_v63  ;;  %712 = vst [vmem:[%s1171_s28 + $0x40] sm:$0xff] %v546_v0  ;;  %v653_v7 = vadd.f32 %v976_v5, %v1166_v26  ;;  %v549_v8 = vadd.f32 %v1166_v26, %v548_v6  ;;  %v644_v9 = vpop.f32.mrb[11].mxu1 }
  0xfb   : > { %736 = vst [vmem:[%s1171_s28 + $0x100] sm:$0xff] %v642_v3  ;;  %715 = vst [vmem:[%s1171_s28 + $0x58] sm:$0xff] %v557_v4  ;;  %v645_v10 = vadd.f32 %v1166_v26, %v644_v9 }
  0xfc   : > { %739 = vst [vmem:[%s1171_s28 + $0x118] sm:$0xff] %v653_v7  ;;  %713 = vst [vmem:[%s1171_s28 + $0x48] sm:$0xff] %v549_v8 }
  0xfd   : > { %737 = vst [vmem:[%s1171_s28 + $0x108] sm:$0xff] %v645_v10 }
  0xfe   : > { %v955_v11 = vpop.f32.mrb[12].mxu0 }
  0xff   : > { %v570_v12 = vadd.f32 %v955_v11, %v1166_v26  ;;  %v979_v13 = vpop.f32.mrb[12].mxu1  ;;  %v561_v14 = vpop.f32.mrb[13].mxu0 }
 0x100   : > { %v666_v15 = vadd.f32 %v979_v13, %v1166_v26  ;;  %v562_v16 = vadd.f32 %v1166_v26, %v561_v14  ;;  %v657_v17 = vpop.f32.mrb[13].mxu1  ;;  %v956_v18 = vpop.f32.mrb[14].mxu0 }
 0x101   : > { %718 = vst [vmem:[%s1171_s28 + $0x70] sm:$0xff] %v570_v12  ;;  %v658_v19 = vadd.f32 %v1166_v26, %v657_v17  ;;  %v573_v20 = vadd.f32 %v956_v18, %v1166_v26  ;;  %v980_v21 = vpop.f32.mrb[14].mxu1  ;;  %v564_v22 = vpop.f32.mrb[15].mxu0 }
 0x102   : > { %742 = vst [vmem:[%s1171_s28 + $0x130] sm:$0xff] %v666_v15  ;;  %716 = vst [vmem:[%s1171_s28 + $0x60] sm:$0xff] %v562_v16  ;;  %v669_v23 = vadd.f32 %v980_v21, %v1166_v26  ;;  %v565_v24 = vadd.f32 %v1166_v26, %v564_v22  ;;  %v660_v25 = vpop.f32.mrb[15].mxu1 }
 0x103   : > { %740 = vst [vmem:[%s1171_s28 + $0x120] sm:$0xff] %v658_v19  ;;  %719 = vst [vmem:[%s1171_s28 + $0x78] sm:$0xff] %v573_v20  ;;  %v661_v27 = vadd.f32 %v1166_v26, %v660_v25 }
 0x104   : > { %743 = vst [vmem:[%s1171_s28 + $0x138] sm:$0xff] %v669_v23  ;;  %717 = vst [vmem:[%s1171_s28 + $0x68] sm:$0xff] %v565_v24 }
 0x105   : > { %741 = vst [vmem:[%s1171_s28 + $0x128] sm:$0xff] %v661_v27 }
 0x106   : > { %v959_v28 = vpop.f32.mrb[16].mxu0 }
 0x107   : > { %v586_v29 = vadd.f32 %v959_v28, %v1166_v26  ;;  %v983_v30 = vpop.f32.mrb[16].mxu1  ;;  %v577_v31 = vpop.f32.mrb[17].mxu0 }
 0x108   : > { %v682_v32 = vadd.f32 %v983_v30, %v1166_v26  ;;  %v578_v33 = vadd.f32 %v1166_v26, %v577_v31  ;;  %v673_v34 = vpop.f32.mrb[17].mxu1  ;;  %v960_v35 = vpop.f32.mrb[18].mxu0 }
 0x109   : > { %722 = vst [vmem:[%s1171_s28 + $0x90] sm:$0xff] %v586_v29  ;;  %v674_v36 = vadd.f32 %v1166_v26, %v673_v34  ;;  %v589_v37 = vadd.f32 %v960_v35, %v1166_v26  ;;  %v984_v38 = vpop.f32.mrb[18].mxu1  ;;  %v580_v39 = vpop.f32.mrb[19].mxu0 }
 0x10a   : > { %746 = vst [vmem:[%s1171_s28 + $0x150] sm:$0xff] %v682_v32  ;;  %720 = vst [vmem:[%s1171_s28 + $0x80] sm:$0xff] %v578_v33  ;;  %v685_v40 = vadd.f32 %v984_v38, %v1166_v26  ;;  %v581_v41 = vadd.f32 %v1166_v26, %v580_v39  ;;  %v676_v42 = vpop.f32.mrb[19].mxu1 }
 0x10b   : > { %744 = vst [vmem:[%s1171_s28 + $0x140] sm:$0xff] %v674_v36  ;;  %723 = vst [vmem:[%s1171_s28 + $0x98] sm:$0xff] %v589_v37  ;;  %v677_v43 = vadd.f32 %v1166_v26, %v676_v42 }
 0x10c   : > { %747 = vst [vmem:[%s1171_s28 + $0x158] sm:$0xff] %v685_v40  ;;  %721 = vst [vmem:[%s1171_s28 + $0x88] sm:$0xff] %v581_v41 }
 0x10d   : > { %745 = vst [vmem:[%s1171_s28 + $0x148] sm:$0xff] %v677_v43 }
 0x10e   : > { %v963_v44 = vpop.f32.mrb[20].mxu0 }
 0x10f   : > { %v602_v45 = vadd.f32 %v963_v44, %v1166_v26  ;;  %v987_v46 = vpop.f32.mrb[20].mxu1  ;;  %v593_v47 = vpop.f32.mrb[21].mxu0 }
 0x110   : > { %v698_v48 = vadd.f32 %v987_v46, %v1166_v26  ;;  %v594_v49 = vadd.f32 %v1166_v26, %v593_v47  ;;  %v689_v50 = vpop.f32.mrb[21].mxu1  ;;  %v964_v51 = vpop.f32.mrb[22].mxu0 }
 0x111   : > { %726 = vst [vmem:[%s1171_s28 + $0xb0] sm:$0xff] %v602_v45  ;;  %v690_v52 = vadd.f32 %v1166_v26, %v689_v50  ;;  %v605_v53 = vadd.f32 %v964_v51, %v1166_v26  ;;  %v988_v54 = vpop.f32.mrb[22].mxu1  ;;  %v596_v55 = vpop.f32.mrb[23].mxu0 }
 0x112   : > { %750 = vst [vmem:[%s1171_s28 + $0x170] sm:$0xff] %v698_v48  ;;  %724 = vst [vmem:[%s1171_s28 + $0xa0] sm:$0xff] %v594_v49  ;;  %v701_v56 = vadd.f32 %v988_v54, %v1166_v26  ;;  %v597_v57 = vadd.f32 %v1166_v26, %v596_v55  ;;  %v692_v58 = vpop.f32.mrb[23].mxu1 }
 0x113   : > { %748 = vst [vmem:[%s1171_s28 + $0x160] sm:$0xff] %v690_v52  ;;  %727 = vst [vmem:[%s1171_s28 + $0xb8] sm:$0xff] %v605_v53  ;;  %v693_v59 = vadd.f32 %v1166_v26, %v692_v58 }
 0x114   : > { %751 = vst [vmem:[%s1171_s28 + $0x178] sm:$0xff] %v701_v56  ;;  %725 = vst [vmem:[%s1171_s28 + $0xa8] sm:$0xff] %v597_v57 }
 0x115   : > { %749 = vst [vmem:[%s1171_s28 + $0x168] sm:$0xff] %v693_v59 }
 0x116 PF: > { %s13_s14 = sadd.s32 1, %s1063_s14   ;;  %s1282_s12 = smov %s1059_s13 }
 0x117   : > { %p10_p5 = scmp.ge.s32.totalorder %s13_s14, 5   ;;  %s1283_s13 = smov %s1285_s15 }
 0x119   :  { %12 = sbr.rel (!%p10_p5) target bundleno = 2 (0x2), region = 68 }

// kernel: ez_detect_forward.64
= control target key start
LH: loop header
LB: loop body
LE: loop exit
PB: predicated region body
PF: predicated region fallthrough
CT: control target
= control target key end

     0   :  { %s1198_s12 = smov 0   ;;  %s1200_s13 = smov 0   ;;  %s1403_s0 = inlined_call_operand.vmem [shape: bf16[1152,72], index: 0, kind: input, shape index: {}]   ;;  %s1404_s1 = inlined_call_operand.vmem [shape: bf16[72,128], index: 1, kind: input, shape index: {}]   ;;  %s1405_s2 = inlined_call_operand.vmem [shape: f32[1,128], index: 2, kind: input, shape index: {}]   ;;  %s1406_s3 = inlined_call_operand.vmem [shape: f32[1152,128], index: 3, kind: output, shape index: {}]  }
   0x1   :  { %s1202_s14 = smov 0  }
   0x2 LB: > { %s25_s15 = sadd.s32 1, %s1172_s13  ;;  %p943_p0 = scmp.ge.s32.totalorder %s1176_s14, 1  ;;  %s1176_s14 = sphi %s1202_s14, %s13_s14   ;;  %s1172_s13 = sphi %s1200_s13, %s1408_s13   ;;  %s1168_s12 = sphi %s1198_s12, %s1407_s12  }
   0x3   : > { %p27_p1 = scmp.ge.s32.totalorder %s25_s15, 3  ;;  %p169_p2 = scmp.lt.s32.totalorder %s1176_s14, 4 }
   0x5   : > { %s1410_s15 = smov (%p27_p1, %s25_s15), 0  ;;  %p170_p3 = pnand %p943_p0, %p169_p2 }
   0x6   : > { %v1125_v0 = vld [vmem:[%s1404_s1] sm:$0xff] (!%p170_p3)   ;;  %v1126_v1 = vld [vmem:[%s1404_s1 + $0x8] sm:$0xff] (!%p170_p3)   ;;  %s203_s20 = smul.u32 (!%p170_p3), 48, %s1168_s12  ;;  %v1127_v2 = vld [vmem:[%s1404_s1 + $0x10] sm:$0xff] (!%p170_p3)   ;;  %vm437_vm0 = vcmask (!%p170_p3), 588800   ;;  %vm510_vm1 = vcmask (!%p170_p3), 1043456  }
   0x7   : > { %173 = sbr.rel (%p170_p3) target bundleno = 287 (0x11f), region = 32  ;;  %1031 = vmatprep.subr.bf16.mxu0 (!%p170_p3), %v1125_v0  ;;  %1089 = vmatprep.subr.bf16.mxu1 (!%p170_p3), %v1125_v0  ;;  %v1128_v3 = vld [vmem:[%s1404_s1 + $0x18] sm:$0xff] (!%p170_p3)   ;;  %v1129_v6 = vld [vmem:[%s1404_s1 + $0x20] ss:$0 sps:$4 sm:$0xff] (!%p170_p3)  }
   0x8   : > { %1032 = vmatpush3.bf16.msra.mxu0 (!%p170_p3), %v1125_v0  ;;  %1094 = vmatpush3.bf16.msra.mxu1 (!%p170_p3), %v1125_v0  ;;  %p204_p4 = scmp.lt.s32.totalorder (!%p170_p3), %s203_s20, 143  ;;  %v512_v7 = vsel (!%p170_p3), %vm510_vm1, %v1129_v6, 0  ;;  %v1290_v30 = vld [vmem:[%s1405_s2] ss:$0 sm:$0xff] (!%p170_p3) }
   0x9   : > { %1033 = vmatprep.subr.bf16.mxu0 (!%p170_p3), %v1126_v1  ;;  %1090 = vmatprep.subr.bf16.mxu1 (!%p170_p3), %v1126_v1 }
   0xc   : > { %1034 = vmatpush3.bf16.msra.mxu0 (!%p170_p3), %v1126_v1  ;;  %1095 = vmatpush3.bf16.msra.mxu1 (!%p170_p3), %v1126_v1 }
   0xd   : > { %1035 = vmatprep.subr.bf16.mxu0 (!%p170_p3), %v1127_v2  ;;  %1091 = vmatprep.subr.bf16.mxu1 (!%p170_p3), %v1127_v2 }
   0xe   : > { %s1412_s20 = smov (!%p204_p4, %s203_s20), 143 }
   0xf   : > { %s944_s23 = sshll.u32 %s1412_s20, 2  ;;  %s945_s6 = sshll.u32 %s1412_s20, 3 }
  0x10   : > { %s1234_s28 = scalar_lea.vmem %s1403_s0, %s944_s23  ;;  %1036 = vmatpush3.bf16.msra.mxu0 %v1127_v2  ;;  %1096 = vmatpush3.bf16.msra.mxu1 %v1127_v2  ;;  %s1298_s9 = scalar_lea.vmem %s1406_s3, %s945_s6 }
  0x11   : > { %v1130_v4 = vld [vmem:[%s1234_s28] sm:$0xff]   ;;  %1037 = vmatprep.subr.bf16.mxu0 %v1128_v3  ;;  %1092 = vmatprep.subr.bf16.mxu1 %v1128_v3  ;;  %v1132_v8 = vld [vmem:[%s1234_s28 + $0x8] sm:$0xff]   ;;  %v1134_v10 = vld [vmem:[%s1234_s28 + $0x10] sm:$0xff]  }
  0x12   : > { %v1131_v5 = vld [vmem:[%s1234_s28 + $0x60] sm:$0xff]   ;;  %1041 = vmatprep.mubr.msk.bf16.mxu0 %vm437_vm0, %v1130_v4  ;;  %v1133_v9 = vld [vmem:[%s1234_s28 + $0x68] sm:$0xff]   ;;  %v1135_v11 = vld [vmem:[%s1234_s28 + $0x70] sm:$0xff]  }
  0x13   : > { %1065 = vmatprep.mubr.msk.bf16.mxu1 %vm437_vm0, %v1131_v5  ;;  %v1136_v12 = vld [vmem:[%s1234_s28 + $0x18] sm:$0xff]   ;;  %v1138_v14 = vld [vmem:[%s1234_s28 + $0x20] sm:$0xff]   ;;  %v1140_v16 = vld [vmem:[%s1234_s28 + $0x28] sm:$0xff]  }
  0x14   : > { %1038 = vmatpush3.bf16.msra.mxu0 %v1128_v3  ;;  %1097 = vmatpush3.bf16.msra.mxu1 %v1128_v3  ;;  %v1137_v13 = vld [vmem:[%s1234_s28 + $0x78] sm:$0xff]   ;;  %v1139_v15 = vld [vmem:[%s1234_s28 + $0x80] sm:$0xff]   ;;  %v1141_v17 = vld [vmem:[%s1234_s28 + $0x88] sm:$0xff]  }
  0x15   : > { %1099 = vmatprep.subr.msk.bf16.mxu0 %vm510_vm1, %v1129_v6  ;;  %1100 = vmatprep.subr.msk.bf16.mxu1 %vm510_vm1, %v1129_v6  ;;  %v1142_v18 = vld [vmem:[%s1234_s28 + $0x30] sm:$0xff]   ;;  %v1144_v20 = vld [vmem:[%s1234_s28 + $0x38] sm:$0xff]   ;;  %v1146_v22 = vld [vmem:[%s1234_s28 + $0x40] sm:$0xff]  }
  0x16   : > { %v1143_v19 = vld [vmem:[%s1234_s28 + $0x90] sm:$0xff]   ;;  %v1145_v21 = vld [vmem:[%s1234_s28 + $0x98] sm:$0xff]   ;;  %v1147_v23 = vld [vmem:[%s1234_s28 + $0xa0] sm:$0xff]  }
  0x17   : > { %v1148_v24 = vld [vmem:[%s1234_s28 + $0x48] sm:$0xff]   ;;  %v1150_v26 = vld [vmem:[%s1234_s28 + $0x50] sm:$0xff]   ;;  %v1152_v28 = vld [vmem:[%s1234_s28 + $0x58] sm:$0xff]  }
  0x18   : > { %1040 = vmatpush3.bf16.msra.mxu0 %v512_v7  ;;  %1098 = vmatpush3.bf16.msra.mxu1 %v512_v7  ;;  %v1149_v25 = vld [vmem:[%s1234_s28 + $0xa8] sm:$0xff]   ;;  %v1151_v27 = vld [vmem:[%s1234_s28 + $0xb0] sm:$0xff]   ;;  %v1153_v29 = vld [vmem:[%s1234_s28 + $0xb8] sm:$0xff]  }
  0x1b   : > { %1042 = vmatmul.mubr.msk.bf16.vlgmr.msra.gmra.mrb[0].mxu0 %vm437_vm0, %v1132_v8  ;;  %1066 = vmatmul.mubr.msk.bf16.vlgmr.msra.gmra.mrb[0].mxu1 %vm437_vm0, %v1133_v9 }
  0x1c   : > { %1045 = vmatprep.mubr.msk.bf16.mxu0 %vm437_vm0, %v1134_v10  ;;  %1069 = vmatprep.mubr.msk.bf16.mxu1 %vm437_vm0, %v1135_v11 }
  0x23   : > { %1046 = vmatmul.mubr.msk.bf16.gmra.mrb[4].mxu0 %vm437_vm0, %v1136_v12  ;;  %1070 = vmatmul.mubr.msk.bf16.gmra.mrb[4].mxu1 %vm437_vm0, %v1137_v13 }
  0x24   : > { %1049 = vmatprep.mubr.msk.bf16.mxu0 %vm437_vm0, %v1138_v14  ;;  %1073 = vmatprep.mubr.msk.bf16.mxu1 %vm437_vm0, %v1139_v15 }
  0x2b   : > { %1050 = vmatmul.mubr.msk.bf16.gmra.mrb[8].mxu0 %vm437_vm0, %v1140_v16  ;;  %1074 = vmatmul.mubr.msk.bf16.gmra.mrb[8].mxu1 %vm437_vm0, %v1141_v17 }
  0x2c   : > { %1053 = vmatprep.mubr.msk.bf16.mxu0 %vm437_vm0, %v1142_v18  ;;  %1077 = vmatprep.mubr.msk.bf16.mxu1 %vm437_vm0, %v1143_v19 }
  0x33   : > { %1054 = vmatmul.mubr.msk.bf16.gmra.mrb[12].mxu0 %vm437_vm0, %v1144_v20  ;;  %1078 = vmatmul.mubr.msk.bf16.gmra.mrb[12].mxu1 %vm437_vm0, %v1145_v21 }
  0x34   : > { %1057 = vmatprep.mubr.msk.bf16.mxu0 %vm437_vm0, %v1146_v22  ;;  %1081 = vmatprep.mubr.msk.bf16.mxu1 %vm437_vm0, %v1147_v23 }
  0x3b   : > { %1058 = vmatmul.mubr.msk.bf16.gmra.mrb[16].mxu0 %vm437_vm0, %v1148_v24  ;;  %1082 = vmatmul.mubr.msk.bf16.gmra.mrb[16].mxu1 %vm437_vm0, %v1149_v25 }
  0x3c   : > { %1061 = vmatprep.mubr.msk.bf16.mxu0 %vm437_vm0, %v1150_v26  ;;  %1085 = vmatprep.mubr.msk.bf16.mxu1 %vm437_vm0, %v1151_v27 }
  0x43   : > { %1062 = vmatmul.mubr.msk.bf16.gmra.mrb[20].mxu0 %vm437_vm0, %v1152_v28  ;;  %1086 = vmatmul.mubr.msk.bf16.gmra.mrb[20].mxu1 %vm437_vm0, %v1153_v29 }
  0xee   : > { %v1043_v31 = vpop.f32.mrb[0].mxu0  ;;  %v1067_v32 = vpop.f32.mrb[0].mxu1 }
  0xef   : > { %v557_v33 = vadd.f32 %v1043_v31, %v1290_v30  ;;  %v653_v34 = vadd.f32 %v1067_v32, %v1290_v30  ;;  %v548_v35 = vpop.f32.mrb[1].mxu0  ;;  %v644_v36 = vpop.f32.mrb[1].mxu1 }
  0xf0   : > { %v549_v37 = vadd.f32 %v1290_v30, %v548_v35  ;;  %v645_v38 = vadd.f32 %v1290_v30, %v644_v36  ;;  %v1044_v39 = vpop.f32.mrb[2].mxu0  ;;  %v1068_v40 = vpop.f32.mrb[2].mxu1 }
  0xf1   : > { %v741_v41 = vmax.f32 %v557_v33, 0.0  ;;  %v765_v42 = vmax.f32 %v653_v34, 0.0  ;;  %v560_v43 = vadd.f32 %v1044_v39, %v1290_v30  ;;  %v656_v44 = vadd.f32 %v1068_v40, %v1290_v30  ;;  %v551_v45 = vpop.f32.mrb[3].mxu0  ;;  %v647_v46 = vpop.f32.mrb[3].mxu1 }
  0xf2   : > { %v739_v47 = vmax.f32 %v549_v37, 0.0  ;;  %v763_v48 = vmax.f32 %v645_v38, 0.0  ;;  %v552_v49 = vadd.f32 %v1290_v30, %v551_v45  ;;  %v648_v50 = vadd.f32 %v1290_v30, %v647_v46 }
  0xf3   : > { %789 = vst [vmem:[%s1298_s9 + $0x10] sm:$0xff] %v741_v41  ;;  %813 = vst [vmem:[%s1298_s9 + $0xd0] sm:$0xff] %v765_v42  ;;  %v742_v51 = vmax.f32 %v560_v43, 0.0  ;;  %v766_v52 = vmax.f32 %v656_v44, 0.0 }
  0xf4   : > { %787 = vst [vmem:[%s1298_s9] sm:$0xff] %v739_v47  ;;  %811 = vst [vmem:[%s1298_s9 + $0xc0] sm:$0xff] %v763_v48  ;;  %v740_v53 = vmax.f32 %v552_v49, 0.0  ;;  %v764_v54 = vmax.f32 %v648_v50, 0.0 }
  0xf5   : > { %790 = vst [vmem:[%s1298_s9 + $0x18] sm:$0xff] %v742_v51  ;;  %814 = vst [vmem:[%s1298_s9 + $0xd8] sm:$0xff] %v766_v52 }
  0xf6   : > { %788 = vst [vmem:[%s1298_s9 + $0x8] sm:$0xff] %v740_v53  ;;  %812 = vst [vmem:[%s1298_s9 + $0xc8] sm:$0xff] %v764_v54  ;;  %v1047_v55 = vpop.f32.mrb[4].mxu0  ;;  %v1071_v56 = vpop.f32.mrb[4].mxu1 }
  0xf7   : > { %v573_v57 = vadd.f32 %v1047_v55, %v1290_v30  ;;  %v669_v58 = vadd.f32 %v1071_v56, %v1290_v30  ;;  %v564_v59 = vpop.f32.mrb[5].mxu0  ;;  %v660_v60 = vpop.f32.mrb[5].mxu1 }
  0xf8   : > { %v565_v61 = vadd.f32 %v1290_v30, %v564_v59  ;;  %v661_v62 = vadd.f32 %v1290_v30, %v660_v60  ;;  %v1048_v63 = vpop.f32.mrb[6].mxu0  ;;  %v1072_v0 = vpop.f32.mrb[6].mxu1 }
  0xf9   : > { %v745_v1 = vmax.f32 %v573_v57, 0.0  ;;  %v769_v2 = vmax.f32 %v669_v58, 0.0  ;;  %v576_v3 = vadd.f32 %v1048_v63, %v1290_v30  ;;  %v672_v4 = vadd.f32 %v1072_v0, %v1290_v30  ;;  %v567_v5 = vpop.f32.mrb[7].mxu0  ;;  %v663_v6 = vpop.f32.mrb[7].mxu1 }
  0xfa   : > { %v743_v7 = vmax.f32 %v565_v61, 0.0  ;;  %v767_v8 = vmax.f32 %v661_v62, 0.0  ;;  %v568_v9 = vadd.f32 %v1290_v30, %v567_v5  ;;  %v664_v10 = vadd.f32 %v1290_v30, %v663_v6 }
  0xfb   : > { %793 = vst [vmem:[%s1298_s9 + $0x30] sm:$0xff] %v745_v1  ;;  %817 = vst [vmem:[%s1298_s9 + $0xf0] sm:$0xff] %v769_v2  ;;  %v746_v11 = vmax.f32 %v576_v3, 0.0  ;;  %v770_v12 = vmax.f32 %v672_v4, 0.0 }
  0xfc   : > { %791 = vst [vmem:[%s1298_s9 + $0x20] sm:$0xff] %v743_v7  ;;  %815 = vst [vmem:[%s1298_s9 + $0xe0] sm:$0xff] %v767_v8  ;;  %v744_v13 = vmax.f32 %v568_v9, 0.0  ;;  %v768_v14 = vmax.f32 %v664_v10, 0.0 }
  0xfd   : > { %794 = vst [vmem:[%s1298_s9 + $0x38] sm:$0xff] %v746_v11  ;;  %818 = vst [vmem:[%s1298_s9 + $0xf8] sm:$0xff] %v770_v12 }
  0xfe   : > { %792 = vst [vmem:[%s1298_s9 + $0x28] sm:$0xff] %v744_v13  ;;  %816 = vst [vmem:[%s1298_s9 + $0xe8] sm:$0xff] %v768_v14  ;;  %v1051_v15 = vpop.f32.mrb[8].mxu0  ;;  %v1075_v16 = vpop.f32.mrb[8].mxu1 }
  0xff   : > { %v589_v17 = vadd.f32 %v1051_v15, %v1290_v30  ;;  %v685_v18 = vadd.f32 %v1075_v16, %v1290_v30  ;;  %v580_v19 = vpop.f32.mrb[9].mxu0  ;;  %v676_v20 = vpop.f32.mrb[9].mxu1 }
 0x100   : > { %v581_v21 = vadd.f32 %v1290_v30, %v580_v19  ;;  %v677_v22 = vadd.f32 %v1290_v30, %v676_v20  ;;  %v1052_v23 = vpop.f32.mrb[10].mxu0  ;;  %v1076_v24 = vpop.f32.mrb[10].mxu1 }
 0x101   : > { %v749_v25 = vmax.f32 %v589_v17, 0.0  ;;  %v773_v26 = vmax.f32 %v685_v18, 0.0  ;;  %v592_v27 = vadd.f32 %v1052_v23, %v1290_v30  ;;  %v688_v28 = vadd.f32 %v1076_v24, %v1290_v30  ;;  %v583_v29 = vpop.f32.mrb[11].mxu0  ;;  %v679_v31 = vpop.f32.mrb[11].mxu1 }
 0x102   : > { %v747_v32 = vmax.f32 %v581_v21, 0.0  ;;  %v771_v33 = vmax.f32 %v677_v22, 0.0  ;;  %v584_v34 = vadd.f32 %v1290_v30, %v583_v29  ;;  %v680_v35 = vadd.f32 %v1290_v30, %v679_v31 }
 0x103   : > { %797 = vst [vmem:[%s1298_s9 + $0x50] sm:$0xff] %v749_v25  ;;  %821 = vst [vmem:[%s1298_s9 + $0x110] sm:$0xff] %v773_v26  ;;  %v750_v36 = vmax.f32 %v592_v27, 0.0  ;;  %v774_v37 = vmax.f32 %v688_v28, 0.0 }
 0x104   : > { %795 = vst [vmem:[%s1298_s9 + $0x40] sm:$0xff] %v747_v32  ;;  %819 = vst [vmem:[%s1298_s9 + $0x100] sm:$0xff] %v771_v33  ;;  %v748_v38 = vmax.f32 %v584_v34, 0.0  ;;  %v772_v39 = vmax.f32 %v680_v35, 0.0 }
 0x105   : > { %798 = vst [vmem:[%s1298_s9 + $0x58] sm:$0xff] %v750_v36  ;;  %822 = vst [vmem:[%s1298_s9 + $0x118] sm:$0xff] %v774_v37 }
 0x106   : > { %796 = vst [vmem:[%s1298_s9 + $0x48] sm:$0xff] %v748_v38  ;;  %820 = vst [vmem:[%s1298_s9 + $0x108] sm:$0xff] %v772_v39  ;;  %v1055_v40 = vpop.f32.mrb[12].mxu0  ;;  %v1079_v41 = vpop.f32.mrb[12].mxu1 }
 0x107   : > { %v605_v42 = vadd.f32 %v1055_v40, %v1290_v30  ;;  %v701_v43 = vadd.f32 %v1079_v41, %v1290_v30  ;;  %v596_v44 = vpop.f32.mrb[13].mxu0  ;;  %v692_v45 = vpop.f32.mrb[13].mxu1 }
 0x108   : > { %v597_v46 = vadd.f32 %v1290_v30, %v596_v44  ;;  %v693_v47 = vadd.f32 %v1290_v30, %v692_v45  ;;  %v1056_v48 = vpop.f32.mrb[14].mxu0  ;;  %v1080_v49 = vpop.f32.mrb[14].mxu1 }
 0x109   : > { %v753_v50 = vmax.f32 %v605_v42, 0.0  ;;  %v777_v51 = vmax.f32 %v701_v43, 0.0  ;;  %v608_v52 = vadd.f32 %v1056_v48, %v1290_v30  ;;  %v704_v53 = vadd.f32 %v1080_v49, %v1290_v30  ;;  %v599_v54 = vpop.f32.mrb[15].mxu0  ;;  %v695_v55 = vpop.f32.mrb[15].mxu1 }
 0x10a   : > { %v751_v56 = vmax.f32 %v597_v46, 0.0  ;;  %v775_v57 = vmax.f32 %v693_v47, 0.0  ;;  %v600_v58 = vadd.f32 %v1290_v30, %v599_v54  ;;  %v696_v59 = vadd.f32 %v1290_v30, %v695_v55 }
 0x10b   : > { %801 = vst [vmem:[%s1298_s9 + $0x70] sm:$0xff] %v753_v50  ;;  %825 = vst [vmem:[%s1298_s9 + $0x130] sm:$0xff] %v777_v51  ;;  %v754_v60 = vmax.f32 %v608_v52, 0.0  ;;  %v778_v61 = vmax.f32 %v704_v53, 0.0 }
 0x10c   : > { %799 = vst [vmem:[%s1298_s9 + $0x60] sm:$0xff] %v751_v56  ;;  %823 = vst [vmem:[%s1298_s9 + $0x120] sm:$0xff] %v775_v57  ;;  %v752_v62 = vmax.f32 %v600_v58, 0.0  ;;  %v776_v63 = vmax.f32 %v696_v59, 0.0 }
 0x10d   : > { %802 = vst [vmem:[%s1298_s9 + $0x78] sm:$0xff] %v754_v60  ;;  %826 = vst [vmem:[%s1298_s9 + $0x138] sm:$0xff] %v778_v61 }
 0x10e   : > { %800 = vst [vmem:[%s1298_s9 + $0x68] sm:$0xff] %v752_v62  ;;  %824 = vst [vmem:[%s1298_s9 + $0x128] sm:$0xff] %v776_v63  ;;  %v1059_v0 = vpop.f32.mrb[16].mxu0  ;;  %v1083_v1 = vpop.f32.mrb[16].mxu1 }
 0x10f   : > { %v621_v2 = vadd.f32 %v1059_v0, %v1290_v30  ;;  %v717_v3 = vadd.f32 %v1083_v1, %v1290_v30  ;;  %v612_v4 = vpop.f32.mrb[17].mxu0  ;;  %v708_v5 = vpop.f32.mrb[17].mxu1 }
 0x110   : > { %v613_v6 = vadd.f32 %v1290_v30, %v612_v4  ;;  %v709_v7 = vadd.f32 %v1290_v30, %v708_v5  ;;  %v1060_v8 = vpop.f32.mrb[18].mxu0  ;;  %v1084_v9 = vpop.f32.mrb[18].mxu1 }
 0x111   : > { %v757_v10 = vmax.f32 %v621_v2, 0.0  ;;  %v781_v11 = vmax.f32 %v717_v3, 0.0  ;;  %v624_v12 = vadd.f32 %v1060_v8, %v1290_v30  ;;  %v720_v13 = vadd.f32 %v1084_v9, %v1290_v30  ;;  %v615_v14 = vpop.f32.mrb[19].mxu0  ;;  %v711_v15 = vpop.f32.mrb[19].mxu1 }
 0x112   : > { %v755_v16 = vmax.f32 %v613_v6, 0.0  ;;  %v779_v17 = vmax.f32 %v709_v7, 0.0  ;;  %v616_v18 = vadd.f32 %v1290_v30, %v615_v14  ;;  %v712_v19 = vadd.f32 %v1290_v30, %v711_v15 }
 0x113   : > { %805 = vst [vmem:[%s1298_s9 + $0x90] sm:$0xff] %v757_v10  ;;  %829 = vst [vmem:[%s1298_s9 + $0x150] sm:$0xff] %v781_v11  ;;  %v758_v20 = vmax.f32 %v624_v12, 0.0  ;;  %v782_v21 = vmax.f32 %v720_v13, 0.0 }
 0x114   : > { %803 = vst [vmem:[%s1298_s9 + $0x80] sm:$0xff] %v755_v16  ;;  %827 = vst [vmem:[%s1298_s9 + $0x140] sm:$0xff] %v779_v17  ;;  %v756_v22 = vmax.f32 %v616_v18, 0.0  ;;  %v780_v23 = vmax.f32 %v712_v19, 0.0 }
 0x115   : > { %806 = vst [vmem:[%s1298_s9 + $0x98] sm:$0xff] %v758_v20  ;;  %830 = vst [vmem:[%s1298_s9 + $0x158] sm:$0xff] %v782_v21 }
 0x116   : > { %804 = vst [vmem:[%s1298_s9 + $0x88] sm:$0xff] %v756_v22  ;;  %828 = vst [vmem:[%s1298_s9 + $0x148] sm:$0xff] %v780_v23  ;;  %v1063_v24 = vpop.f32.mrb[20].mxu0  ;;  %v1087_v25 = vpop.f32.mrb[20].mxu1 }
 0x117   : > { %v637_v26 = vadd.f32 %v1063_v24, %v1290_v30  ;;  %v733_v27 = vadd.f32 %v1087_v25, %v1290_v30  ;;  %v628_v28 = vpop.f32.mrb[21].mxu0  ;;  %v724_v29 = vpop.f32.mrb[21].mxu1 }
 0x118   : > { %v629_v31 = vadd.f32 %v1290_v30, %v628_v28  ;;  %v725_v32 = vadd.f32 %v1290_v30, %v724_v29  ;;  %v1064_v33 = vpop.f32.mrb[22].mxu0  ;;  %v1088_v34 = vpop.f32.mrb[22].mxu1 }
 0x119   : > { %v761_v35 = vmax.f32 %v637_v26, 0.0  ;;  %v785_v36 = vmax.f32 %v733_v27, 0.0  ;;  %v640_v37 = vadd.f32 %v1064_v33, %v1290_v30  ;;  %v736_v38 = vadd.f32 %v1088_v34, %v1290_v30  ;;  %v631_v39 = vpop.f32.mrb[23].mxu0  ;;  %v727_v40 = vpop.f32.mrb[23].mxu1 }
 0x11a   : > { %v759_v41 = vmax.f32 %v629_v31, 0.0  ;;  %v783_v42 = vmax.f32 %v725_v32, 0.0  ;;  %v632_v43 = vadd.f32 %v1290_v30, %v631_v39  ;;  %v728_v44 = vadd.f32 %v1290_v30, %v727_v40 }
 0x11b   : > { %809 = vst [vmem:[%s1298_s9 + $0xb0] sm:$0xff] %v761_v35  ;;  %833 = vst [vmem:[%s1298_s9 + $0x170] sm:$0xff] %v785_v36  ;;  %v762_v45 = vmax.f32 %v640_v37, 0.0  ;;  %v786_v46 = vmax.f32 %v736_v38, 0.0 }
 0x11c   : > { %807 = vst [vmem:[%s1298_s9 + $0xa0] sm:$0xff] %v759_v41  ;;  %831 = vst [vmem:[%s1298_s9 + $0x160] sm:$0xff] %v783_v42  ;;  %v760_v47 = vmax.f32 %v632_v43, 0.0  ;;  %v784_v48 = vmax.f32 %v728_v44, 0.0 }
 0x11d   : > { %810 = vst [vmem:[%s1298_s9 + $0xb8] sm:$0xff] %v762_v45  ;;  %834 = vst [vmem:[%s1298_s9 + $0x178] sm:$0xff] %v786_v46 }
 0x11e   : > { %808 = vst [vmem:[%s1298_s9 + $0xa8] sm:$0xff] %v760_v47  ;;  %832 = vst [vmem:[%s1298_s9 + $0x168] sm:$0xff] %v784_v48 }
 0x11f PF: > { %s13_s14 = sadd.s32 1, %s1176_s14   ;;  %s1407_s12 = smov %s1172_s13 }
 0x120   : > { %p10_p5 = scmp.ge.s32.totalorder %s13_s14, 5   ;;  %s1408_s13 = smov %s1410_s15 }
 0x122   :  { %12 = sbr.rel (!%p10_p5) target bundleno = 2 (0x2), region = 68 }

// kernel: ez_detect_forward.66
= control target key start
LH: loop header
LB: loop body
LE: loop exit
PB: predicated region body
PF: predicated region fallthrough
CT: control target
= control target key end

     0   :  { %s1310_s15 = smov 0   ;;  %s1312_s16 = smov 0   ;;  %s1556_s0 = inlined_call_operand.vmem [shape: bf16[1152,8], index: 0, kind: input, shape index: {}]   ;;  %s1557_s1 = inlined_call_operand.vmem [shape: bf16[8,128], index: 1, kind: input, shape index: {}]   ;;  %s1558_s2 = inlined_call_operand.vmem [shape: f32[1,128], index: 2, kind: input, shape index: {}]   ;;  %s1559_s3 = inlined_call_operand.vmem [shape: f32[1152,128], index: 3, kind: input, shape index: {}]   ;;  %s1560_s4 = inlined_call_operand.vmem [shape: f32[1152,128], index: 4, kind: output, shape index: {}]  }
   0x1   :  { %s1314_s17 = smov 0  }
   0x2 LB: > { %s26_s18 = sadd.s32 1, %s1279_s16  ;;  %p1079_p0 = scmp.ge.s32.totalorder %s1283_s17, 1  ;;  %s1283_s17 = sphi %s1314_s17, %s14_s17   ;;  %s1279_s16 = sphi %s1312_s16, %s1562_s16   ;;  %s1275_s15 = sphi %s1310_s15, %s1561_s15  }
   0x3   : > { %p28_p1 = scmp.ge.s32.totalorder %s26_s18, 3  ;;  %p210_p2 = scmp.lt.s32.totalorder %s1283_s17, 4 }
   0x5   : > { %s1564_s18 = smov (%p28_p1, %s26_s18), 0  ;;  %p211_p3 = pnand %p1079_p0, %p210_p2 }
   0x6   : > { %v334_v0 = vld [vmem:[%s1557_s1] sm:$0xf] (!%p211_p3)  ;;  %vm535_vm0 = vcmask (!%p211_p3), 1043456   ;;  %s254_s21 = smul.u32 (!%p211_p3), 48, %s1275_s15  ;;  %vm462_vm1 = vcmask (!%p211_p3), 64512  }
   0x7   : > { %214 = sbr.rel (%p211_p3) target bundleno = 282 (0x11a), region = 36  ;;  %1211 = vmatprep.subr.msk.bf16.mxu0 (!%p211_p3), %vm535_vm0, %v334_v0  ;;  %1212 = vmatprep.subr.msk.bf16.mxu1 (!%p211_p3), %vm535_vm0, %v334_v0  ;;  %v537_v1 = vsel (!%p211_p3), %vm535_vm0, %v334_v0, 0  ;;  %v1396_v26 = vld [vmem:[%s1558_s2] ss:$0 sm:$0xff] (!%p211_p3) }
   0x8   : > { %1160 = vmatpush3.bf16.msra.mxu0 (!%p211_p3), %v537_v1  ;;  %1210 = vmatpush3.bf16.msra.mxu1 (!%p211_p3), %v537_v1  ;;  %p255_p4 = scmp.lt.s32.totalorder (!%p211_p3), %s254_s21, 143 }
   0xe   : > { %s1566_s21 = smov (!%p255_p4, %s254_s21), 143 }
   0xf   : > { %s1080_s22 = sshll.u32 %s1566_s21, 2  ;;  %s1081_s26 = sshll.u32 %s1566_s21, 3 }
  0x10   : > { %s1337_s25 = scalar_lea.vmem %s1556_s0, %s1080_s22  ;;  %s1391_s29 = scalar_lea.vmem %s1559_s3, %s1081_s26 }
  0x11   : > { %v1237_v2 = vld [vmem:[%s1337_s25] sm:$0xff]   ;;  %v1239_v4 = vld [vmem:[%s1337_s25 + $0x8] sm:$0xff]   ;;  %v1241_v6 = vld [vmem:[%s1337_s25 + $0x10] sm:$0xff]   ;;  %s1413_s8 = scalar_lea.vmem %s1560_s4, %s1081_s26 }
  0x12   : > { %v1238_v3 = vld [vmem:[%s1337_s25 + $0x60] sm:$0xff]   ;;  %1161 = vmatprep.mubr.msk.bf16.mxu0 %vm462_vm1, %v1237_v2  ;;  %v1240_v5 = vld [vmem:[%s1337_s25 + $0x68] sm:$0xff]   ;;  %v1242_v7 = vld [vmem:[%s1337_s25 + $0x70] sm:$0xff]  }
  0x13   : > { %1185 = vmatprep.mubr.msk.bf16.mxu1 %vm462_vm1, %v1238_v3  ;;  %1162 = vmatmul.mubr.msk.bf16.vlgmr.msra.gmra.mrb[0].mxu0 %vm462_vm1, %v1239_v4  ;;  %v1243_v8 = vld [vmem:[%s1337_s25 + $0x18] sm:$0xff]   ;;  %v1245_v10 = vld [vmem:[%s1337_s25 + $0x20] sm:$0xff]   ;;  %v1247_v12 = vld [vmem:[%s1337_s25 + $0x28] sm:$0xff]  }
  0x14   : > { %1186 = vmatmul.mubr.msk.bf16.vlgmr.msra.gmra.mrb[0].mxu1 %vm462_vm1, %v1240_v5  ;;  %1165 = vmatprep.mubr.msk.bf16.mxu0 %vm462_vm1, %v1241_v6  ;;  %v1244_v9 = vld [vmem:[%s1337_s25 + $0x78] sm:$0xff]   ;;  %v1246_v11 = vld [vmem:[%s1337_s25 + $0x80] sm:$0xff]   ;;  %v1248_v13 = vld [vmem:[%s1337_s25 + $0x88] sm:$0xff]  }
  0x15   : > { %1189 = vmatprep.mubr.msk.bf16.mxu1 %vm462_vm1, %v1242_v7  ;;  %v1249_v14 = vld [vmem:[%s1337_s25 + $0x30] sm:$0xff]   ;;  %v1251_v16 = vld [vmem:[%s1337_s25 + $0x38] sm:$0xff]   ;;  %v1253_v18 = vld [vmem:[%s1337_s25 + $0x40] sm:$0xff]  }
  0x16   : > { %v1250_v15 = vld [vmem:[%s1337_s25 + $0x90] sm:$0xff]   ;;  %v1252_v17 = vld [vmem:[%s1337_s25 + $0x98] sm:$0xff]   ;;  %v1254_v19 = vld [vmem:[%s1337_s25 + $0xa0] sm:$0xff]  }
  0x17   : > { %v1255_v20 = vld [vmem:[%s1337_s25 + $0x48] sm:$0xff]   ;;  %v1257_v22 = vld [vmem:[%s1337_s25 + $0x50] sm:$0xff]   ;;  %v1259_v24 = vld [vmem:[%s1337_s25 + $0x58] sm:$0xff]  }
  0x18   : > { %v1256_v21 = vld [vmem:[%s1337_s25 + $0xa8] sm:$0xff]   ;;  %v1258_v23 = vld [vmem:[%s1337_s25 + $0xb0] sm:$0xff]   ;;  %v1260_v25 = vld [vmem:[%s1337_s25 + $0xb8] sm:$0xff]  }
  0x19   : > { %v766_v28 = vld [vmem:[%s1391_s29 + $0x10] sm:$0xff]  ;;  %v764_v33 = vld [vmem:[%s1391_s29] sm:$0xff]  ;;  %v767_v39 = vld [vmem:[%s1391_s29 + $0x18] sm:$0xff] }
  0x1a   : > { %v790_v31 = vld [vmem:[%s1391_s29 + $0xd0] sm:$0xff]  ;;  %v788_v37 = vld [vmem:[%s1391_s29 + $0xc0] sm:$0xff]  ;;  %v791_v44 = vld [vmem:[%s1391_s29 + $0xd8] sm:$0xff] }
  0x1b   : > { %1166 = vmatmul.mubr.msk.bf16.gmra.mrb[4].mxu0 %vm462_vm1, %v1243_v8  ;;  %v765_v46 = vld [vmem:[%s1391_s29 + $0x8] sm:$0xff]  ;;  %v770_v3 = vld [vmem:[%s1391_s29 + $0x30] sm:$0xff] }
  0x1c   : > { %1190 = vmatmul.mubr.msk.bf16.gmra.mrb[4].mxu1 %vm462_vm1, %v1244_v9  ;;  %1169 = vmatprep.mubr.msk.bf16.mxu0 %vm462_vm1, %v1245_v10  ;;  %v789_v52 = vld [vmem:[%s1391_s29 + $0xc8] sm:$0xff]  ;;  %v794_v7 = vld [vmem:[%s1391_s29 + $0xf0] sm:$0xff]  ;;  %v768_v9 = vld [vmem:[%s1391_s29 + $0x20] sm:$0xff] }
  0x1d   : > { %1193 = vmatprep.mubr.msk.bf16.mxu1 %vm462_vm1, %v1246_v11 }
  0x23   : > { %1170 = vmatmul.mubr.msk.bf16.gmra.mrb[8].mxu0 %vm462_vm1, %v1247_v12 }
  0x24   : > { %1194 = vmatmul.mubr.msk.bf16.gmra.mrb[8].mxu1 %vm462_vm1, %v1248_v13  ;;  %1173 = vmatprep.mubr.msk.bf16.mxu0 %vm462_vm1, %v1249_v14  ;;  %v792_v13 = vld [vmem:[%s1391_s29 + $0xe0] sm:$0xff] }
  0x25   : > { %1197 = vmatprep.mubr.msk.bf16.mxu1 %vm462_vm1, %v1250_v15  ;;  %v771_v15 = vld [vmem:[%s1391_s29 + $0x38] sm:$0xff] }
  0x2b   : > { %1174 = vmatmul.mubr.msk.bf16.gmra.mrb[12].mxu0 %vm462_vm1, %v1251_v16 }
  0x2c   : > { %1198 = vmatmul.mubr.msk.bf16.gmra.mrb[12].mxu1 %vm462_vm1, %v1252_v17  ;;  %1177 = vmatprep.mubr.msk.bf16.mxu0 %vm462_vm1, %v1253_v18 }
  0x2d   : > { %1201 = vmatprep.mubr.msk.bf16.mxu1 %vm462_vm1, %v1254_v19 }
  0x33   : > { %1178 = vmatmul.mubr.msk.bf16.gmra.mrb[16].mxu0 %vm462_vm1, %v1255_v20  ;;  %v795_v20 = vld [vmem:[%s1391_s29 + $0xf8] sm:$0xff] }
  0x34   : > { %1202 = vmatmul.mubr.msk.bf16.gmra.mrb[16].mxu1 %vm462_vm1, %v1256_v21  ;;  %1181 = vmatprep.mubr.msk.bf16.mxu0 %vm462_vm1, %v1257_v22  ;;  %v769_v22 = vld [vmem:[%s1391_s29 + $0x28] sm:$0xff] }
  0x35   : > { %1205 = vmatprep.mubr.msk.bf16.mxu1 %vm462_vm1, %v1258_v23 }
  0x3b   : > { %1182 = vmatmul.mubr.msk.bf16.gmra.mrb[20].mxu0 %vm462_vm1, %v1259_v24 }
  0x3c   : > { %1206 = vmatmul.mubr.msk.bf16.gmra.mrb[20].mxu1 %vm462_vm1, %v1260_v25 }
  0xe6   : > { %v1163_v27 = vpop.f32.mrb[0].mxu0 }
  0xe7   : > { %v582_v29 = vadd.f32 %v1163_v27, %v1396_v26  ;;  %v1187_v30 = vpop.f32.mrb[0].mxu1  ;;  %v573_v32 = vpop.f32.mrb[1].mxu0 }
  0xe8   : > { %v678_v34 = vadd.f32 %v1187_v30, %v1396_v26  ;;  %v574_v35 = vadd.f32 %v1396_v26, %v573_v32  ;;  %v669_v36 = vpop.f32.mrb[1].mxu1  ;;  %v1164_v38 = vpop.f32.mrb[2].mxu0 }
  0xe9   : > { %v814_v40 = vadd.f32 %v766_v28, %v582_v29  ;;  %v670_v41 = vadd.f32 %v1396_v26, %v669_v36  ;;  %v585_v42 = vadd.f32 %v1164_v38, %v1396_v26  ;;  %v1188_v43 = vpop.f32.mrb[2].mxu1  ;;  %v576_v45 = vpop.f32.mrb[3].mxu0  ;;  %v793_v29 = vld [vmem:[%s1391_s29 + $0xe8] sm:$0xff] }
  0xea   : > { %v838_v47 = vadd.f32 %v790_v31, %v678_v34  ;;  %v812_v48 = vadd.f32 %v764_v33, %v574_v35  ;;  %v681_v49 = vadd.f32 %v1188_v43, %v1396_v26  ;;  %v577_v50 = vadd.f32 %v1396_v26, %v576_v45  ;;  %v672_v51 = vpop.f32.mrb[3].mxu1 }
  0xeb   : > { %v862_v53 = vmax.f32 %v814_v40, 0.0  ;;  %v836_v54 = vadd.f32 %v788_v37, %v670_v41  ;;  %v815_v55 = vadd.f32 %v767_v39, %v585_v42  ;;  %v673_v56 = vadd.f32 %v1396_v26, %v672_v51 }
  0xec   : > { %v886_v57 = vmax.f32 %v838_v47, 0.0  ;;  %v860_v58 = vmax.f32 %v812_v48, 0.0  ;;  %v839_v59 = vadd.f32 %v791_v44, %v681_v49  ;;  %v813_v60 = vadd.f32 %v765_v46, %v577_v50  ;;  %v774_v44 = vld [vmem:[%s1391_s29 + $0x50] sm:$0xff]  ;;  %v772_v50 = vld [vmem:[%s1391_s29 + $0x40] sm:$0xff] }
  0xed   : > { %910 = vst [vmem:[%s1413_s8 + $0x10] sm:$0xff] %v862_v53  ;;  %v884_v61 = vmax.f32 %v836_v54, 0.0  ;;  %v863_v62 = vmax.f32 %v815_v55, 0.0  ;;  %v837_v63 = vadd.f32 %v789_v52, %v673_v56  ;;  %v798_v48 = vld [vmem:[%s1391_s29 + $0x110] sm:$0xff]  ;;  %v796_v54 = vld [vmem:[%s1391_s29 + $0x100] sm:$0xff]  ;;  %v775_v56 = vld [vmem:[%s1391_s29 + $0x58] sm:$0xff] }
  0xee   : > { %934 = vst [vmem:[%s1413_s8 + $0xd0] sm:$0xff] %v886_v57  ;;  %908 = vst [vmem:[%s1413_s8] sm:$0xff] %v860_v58  ;;  %v887_v0 = vmax.f32 %v839_v59, 0.0  ;;  %v861_v1 = vmax.f32 %v813_v60, 0.0  ;;  %v1167_v2 = vpop.f32.mrb[4].mxu0 }
  0xef   : > { %932 = vst [vmem:[%s1413_s8 + $0xc0] sm:$0xff] %v884_v61  ;;  %911 = vst [vmem:[%s1413_s8 + $0x18] sm:$0xff] %v863_v62  ;;  %v885_v4 = vmax.f32 %v837_v63, 0.0  ;;  %v598_v5 = vadd.f32 %v1167_v2, %v1396_v26  ;;  %v1191_v6 = vpop.f32.mrb[4].mxu1  ;;  %v589_v8 = vpop.f32.mrb[5].mxu0  ;;  %v799_v61 = vld [vmem:[%s1391_s29 + $0x118] sm:$0xff] }
  0xf0   : > { %935 = vst [vmem:[%s1413_s8 + $0xd8] sm:$0xff] %v887_v0  ;;  %909 = vst [vmem:[%s1413_s8 + $0x8] sm:$0xff] %v861_v1  ;;  %v694_v10 = vadd.f32 %v1191_v6, %v1396_v26  ;;  %v590_v11 = vadd.f32 %v1396_v26, %v589_v8  ;;  %v685_v12 = vpop.f32.mrb[5].mxu1  ;;  %v1168_v14 = vpop.f32.mrb[6].mxu0  ;;  %v773_v63 = vld [vmem:[%s1391_s29 + $0x48] sm:$0xff] }
  0xf1   : > { %933 = vst [vmem:[%s1413_s8 + $0xc8] sm:$0xff] %v885_v4  ;;  %v818_v16 = vadd.f32 %v770_v3, %v598_v5  ;;  %v686_v17 = vadd.f32 %v1396_v26, %v685_v12  ;;  %v601_v18 = vadd.f32 %v1168_v14, %v1396_v26  ;;  %v1192_v19 = vpop.f32.mrb[6].mxu1  ;;  %v592_v21 = vpop.f32.mrb[7].mxu0  ;;  %v797_v5 = vld [vmem:[%s1391_s29 + $0x108] sm:$0xff] }
  0xf2   : > { %v842_v23 = vadd.f32 %v794_v7, %v694_v10  ;;  %v816_v24 = vadd.f32 %v768_v9, %v590_v11  ;;  %v697_v25 = vadd.f32 %v1192_v19, %v1396_v26  ;;  %v593_v27 = vadd.f32 %v1396_v26, %v592_v21  ;;  %v688_v28 = vpop.f32.mrb[7].mxu1 }
  0xf3   : > { %v866_v30 = vmax.f32 %v818_v16, 0.0  ;;  %v840_v31 = vadd.f32 %v792_v13, %v686_v17  ;;  %v819_v32 = vadd.f32 %v771_v15, %v601_v18  ;;  %v689_v33 = vadd.f32 %v1396_v26, %v688_v28 }
  0xf4   : > { %v890_v34 = vmax.f32 %v842_v23, 0.0  ;;  %v864_v35 = vmax.f32 %v816_v24, 0.0  ;;  %v843_v36 = vadd.f32 %v795_v20, %v697_v25  ;;  %v817_v37 = vadd.f32 %v769_v22, %v593_v27  ;;  %v778_v20 = vld [vmem:[%s1391_s29 + $0x70] sm:$0xff]  ;;  %v776_v27 = vld [vmem:[%s1391_s29 + $0x60] sm:$0xff] }
  0xf5   : > { %914 = vst [vmem:[%s1413_s8 + $0x30] sm:$0xff] %v866_v30  ;;  %v888_v38 = vmax.f32 %v840_v31, 0.0  ;;  %v867_v39 = vmax.f32 %v819_v32, 0.0  ;;  %v841_v40 = vadd.f32 %v793_v29, %v689_v33  ;;  %v802_v24 = vld [vmem:[%s1391_s29 + $0x130] sm:$0xff]  ;;  %v800_v31 = vld [vmem:[%s1391_s29 + $0x120] sm:$0xff]  ;;  %v779_v33 = vld [vmem:[%s1391_s29 + $0x78] sm:$0xff] }
  0xf6   : > { %938 = vst [vmem:[%s1413_s8 + $0xf0] sm:$0xff] %v890_v34  ;;  %912 = vst [vmem:[%s1413_s8 + $0x20] sm:$0xff] %v864_v35  ;;  %v891_v41 = vmax.f32 %v843_v36, 0.0  ;;  %v865_v42 = vmax.f32 %v817_v37, 0.0  ;;  %v1171_v43 = vpop.f32.mrb[8].mxu0 }
  0xf7   : > { %936 = vst [vmem:[%s1413_s8 + $0xe0] sm:$0xff] %v888_v38  ;;  %915 = vst [vmem:[%s1413_s8 + $0x38] sm:$0xff] %v867_v39  ;;  %v889_v45 = vmax.f32 %v841_v40, 0.0  ;;  %v614_v46 = vadd.f32 %v1171_v43, %v1396_v26  ;;  %v1195_v47 = vpop.f32.mrb[8].mxu1  ;;  %v605_v49 = vpop.f32.mrb[9].mxu0  ;;  %v803_v38 = vld [vmem:[%s1391_s29 + $0x138] sm:$0xff] }
  0xf8   : > { %939 = vst [vmem:[%s1413_s8 + $0xf8] sm:$0xff] %v891_v41  ;;  %913 = vst [vmem:[%s1413_s8 + $0x28] sm:$0xff] %v865_v42  ;;  %v710_v51 = vadd.f32 %v1195_v47, %v1396_v26  ;;  %v606_v52 = vadd.f32 %v1396_v26, %v605_v49  ;;  %v701_v53 = vpop.f32.mrb[9].mxu1  ;;  %v1172_v55 = vpop.f32.mrb[10].mxu0  ;;  %v777_v40 = vld [vmem:[%s1391_s29 + $0x68] sm:$0xff] }
  0xf9   : > { %937 = vst [vmem:[%s1413_s8 + $0xe8] sm:$0xff] %v889_v45  ;;  %v822_v57 = vadd.f32 %v774_v44, %v614_v46  ;;  %v702_v58 = vadd.f32 %v1396_v26, %v701_v53  ;;  %v617_v59 = vadd.f32 %v1172_v55, %v1396_v26  ;;  %v1196_v60 = vpop.f32.mrb[10].mxu1  ;;  %v608_v62 = vpop.f32.mrb[11].mxu0  ;;  %v801_v46 = vld [vmem:[%s1391_s29 + $0x128] sm:$0xff] }
  0xfa   : > { %v846_v0 = vadd.f32 %v798_v48, %v710_v51  ;;  %v820_v1 = vadd.f32 %v772_v50, %v606_v52  ;;  %v713_v2 = vadd.f32 %v1196_v60, %v1396_v26  ;;  %v609_v3 = vadd.f32 %v1396_v26, %v608_v62  ;;  %v704_v4 = vpop.f32.mrb[11].mxu1 }
  0xfb   : > { %v870_v6 = vmax.f32 %v822_v57, 0.0  ;;  %v844_v7 = vadd.f32 %v796_v54, %v702_v58  ;;  %v823_v8 = vadd.f32 %v775_v56, %v617_v59  ;;  %v705_v9 = vadd.f32 %v1396_v26, %v704_v4 }
  0xfc   : > { %v894_v10 = vmax.f32 %v846_v0, 0.0  ;;  %v868_v11 = vmax.f32 %v820_v1, 0.0  ;;  %v847_v12 = vadd.f32 %v799_v61, %v713_v2  ;;  %v821_v13 = vadd.f32 %v773_v63, %v609_v3  ;;  %v782_v61 = vld [vmem:[%s1391_s29 + $0x90] sm:$0xff]  ;;  %v780_v3 = vld [vmem:[%s1391_s29 + $0x80] sm:$0xff] }
  0xfd   : > { %918 = vst [vmem:[%s1413_s8 + $0x50] sm:$0xff] %v870_v6  ;;  %v892_v14 = vmax.f32 %v844_v7, 0.0  ;;  %v871_v15 = vmax.f32 %v823_v8, 0.0  ;;  %v845_v16 = vadd.f32 %v797_v5, %v705_v9  ;;  %v806_v1 = vld [vmem:[%s1391_s29 + $0x150] sm:$0xff]  ;;  %v804_v7 = vld [vmem:[%s1391_s29 + $0x140] sm:$0xff]  ;;  %v783_v9 = vld [vmem:[%s1391_s29 + $0x98] sm:$0xff] }
  0xfe   : > { %942 = vst [vmem:[%s1413_s8 + $0x110] sm:$0xff] %v894_v10  ;;  %916 = vst [vmem:[%s1413_s8 + $0x40] sm:$0xff] %v868_v11  ;;  %v895_v17 = vmax.f32 %v847_v12, 0.0  ;;  %v869_v18 = vmax.f32 %v821_v13, 0.0  ;;  %v1175_v19 = vpop.f32.mrb[12].mxu0 }
  0xff   : > { %940 = vst [vmem:[%s1413_s8 + $0x100] sm:$0xff] %v892_v14  ;;  %919 = vst [vmem:[%s1413_s8 + $0x58] sm:$0xff] %v871_v15  ;;  %v893_v21 = vmax.f32 %v845_v16, 0.0  ;;  %v630_v22 = vadd.f32 %v1175_v19, %v1396_v26  ;;  %v1199_v23 = vpop.f32.mrb[12].mxu1  ;;  %v621_v25 = vpop.f32.mrb[13].mxu0  ;;  %v807_v14 = vld [vmem:[%s1391_s29 + $0x158] sm:$0xff] }
 0x100   : > { %943 = vst [vmem:[%s1413_s8 + $0x118] sm:$0xff] %v895_v17  ;;  %917 = vst [vmem:[%s1413_s8 + $0x48] sm:$0xff] %v869_v18  ;;  %v726_v28 = vadd.f32 %v1199_v23, %v1396_v26  ;;  %v622_v29 = vadd.f32 %v1396_v26, %v621_v25  ;;  %v717_v30 = vpop.f32.mrb[13].mxu1  ;;  %v1176_v32 = vpop.f32.mrb[14].mxu0  ;;  %v781_v16 = vld [vmem:[%s1391_s29 + $0x88] sm:$0xff] }
 0x101   : > { %941 = vst [vmem:[%s1413_s8 + $0x108] sm:$0xff] %v893_v21  ;;  %v826_v34 = vadd.f32 %v778_v20, %v630_v22  ;;  %v718_v35 = vadd.f32 %v1396_v26, %v717_v30  ;;  %v633_v36 = vadd.f32 %v1176_v32, %v1396_v26  ;;  %v1200_v37 = vpop.f32.mrb[14].mxu1  ;;  %v624_v39 = vpop.f32.mrb[15].mxu0  ;;  %v805_v22 = vld [vmem:[%s1391_s29 + $0x148] sm:$0xff] }
 0x102   : > { %v850_v41 = vadd.f32 %v802_v24, %v726_v28  ;;  %v824_v42 = vadd.f32 %v776_v27, %v622_v29  ;;  %v729_v43 = vadd.f32 %v1200_v37, %v1396_v26  ;;  %v625_v44 = vadd.f32 %v1396_v26, %v624_v39  ;;  %v720_v45 = vpop.f32.mrb[15].mxu1 }
 0x103   : > { %v874_v47 = vmax.f32 %v826_v34, 0.0  ;;  %v848_v48 = vadd.f32 %v800_v31, %v718_v35  ;;  %v827_v49 = vadd.f32 %v779_v33, %v633_v36  ;;  %v721_v50 = vadd.f32 %v1396_v26, %v720_v45 }
 0x104   : > { %v898_v51 = vmax.f32 %v850_v41, 0.0  ;;  %v872_v52 = vmax.f32 %v824_v42, 0.0  ;;  %v851_v53 = vadd.f32 %v803_v38, %v729_v43  ;;  %v825_v54 = vadd.f32 %v777_v40, %v625_v44  ;;  %v786_v38 = vld [vmem:[%s1391_s29 + $0xb0] sm:$0xff]  ;;  %v784_v44 = vld [vmem:[%s1391_s29 + $0xa0] sm:$0xff] }
 0x105   : > { %922 = vst [vmem:[%s1413_s8 + $0x70] sm:$0xff] %v874_v47  ;;  %v896_v55 = vmax.f32 %v848_v48, 0.0  ;;  %v875_v56 = vmax.f32 %v827_v49, 0.0  ;;  %v849_v57 = vadd.f32 %v801_v46, %v721_v50  ;;  %v810_v42 = vld [vmem:[%s1391_s29 + $0x170] sm:$0xff]  ;;  %v808_v48 = vld [vmem:[%s1391_s29 + $0x160] sm:$0xff]  ;;  %v787_v50 = vld [vmem:[%s1391_s29 + $0xb8] sm:$0xff] }
 0x106   : > { %946 = vst [vmem:[%s1413_s8 + $0x130] sm:$0xff] %v898_v51  ;;  %920 = vst [vmem:[%s1413_s8 + $0x60] sm:$0xff] %v872_v52  ;;  %v899_v58 = vmax.f32 %v851_v53, 0.0  ;;  %v873_v59 = vmax.f32 %v825_v54, 0.0  ;;  %v1179_v60 = vpop.f32.mrb[16].mxu0 }
 0x107   : > { %944 = vst [vmem:[%s1413_s8 + $0x120] sm:$0xff] %v896_v55  ;;  %923 = vst [vmem:[%s1413_s8 + $0x78] sm:$0xff] %v875_v56  ;;  %v897_v62 = vmax.f32 %v849_v57, 0.0  ;;  %v646_v63 = vadd.f32 %v1179_v60, %v1396_v26  ;;  %v1203_v0 = vpop.f32.mrb[16].mxu1  ;;  %v637_v2 = vpop.f32.mrb[17].mxu0  ;;  %v811_v55 = vld [vmem:[%s1391_s29 + $0x178] sm:$0xff] }
 0x108   : > { %947 = vst [vmem:[%s1413_s8 + $0x138] sm:$0xff] %v899_v58  ;;  %921 = vst [vmem:[%s1413_s8 + $0x68] sm:$0xff] %v873_v59  ;;  %v742_v4 = vadd.f32 %v1203_v0, %v1396_v26  ;;  %v638_v5 = vadd.f32 %v1396_v26, %v637_v2  ;;  %v733_v6 = vpop.f32.mrb[17].mxu1  ;;  %v1180_v8 = vpop.f32.mrb[18].mxu0  ;;  %v785_v57 = vld [vmem:[%s1391_s29 + $0xa8] sm:$0xff] }
 0x109   : > { %945 = vst [vmem:[%s1413_s8 + $0x128] sm:$0xff] %v897_v62  ;;  %v830_v10 = vadd.f32 %v782_v61, %v646_v63  ;;  %v734_v11 = vadd.f32 %v1396_v26, %v733_v6  ;;  %v649_v12 = vadd.f32 %v1180_v8, %v1396_v26  ;;  %v1204_v13 = vpop.f32.mrb[18].mxu1  ;;  %v640_v15 = vpop.f32.mrb[19].mxu0  ;;  %v809_v63 = vld [vmem:[%s1391_s29 + $0x168] sm:$0xff] }
 0x10a   : > { %v854_v17 = vadd.f32 %v806_v1, %v742_v4  ;;  %v828_v18 = vadd.f32 %v780_v3, %v638_v5  ;;  %v745_v19 = vadd.f32 %v1204_v13, %v1396_v26  ;;  %v641_v20 = vadd.f32 %v1396_v26, %v640_v15  ;;  %v736_v21 = vpop.f32.mrb[19].mxu1 }
 0x10b   : > { %v878_v23 = vmax.f32 %v830_v10, 0.0  ;;  %v852_v24 = vadd.f32 %v804_v7, %v734_v11  ;;  %v831_v25 = vadd.f32 %v783_v9, %v649_v12  ;;  %v737_v27 = vadd.f32 %v1396_v26, %v736_v21 }
 0x10c   : > { %v902_v28 = vmax.f32 %v854_v17, 0.0  ;;  %v876_v29 = vmax.f32 %v828_v18, 0.0  ;;  %v855_v30 = vadd.f32 %v807_v14, %v745_v19  ;;  %v829_v31 = vadd.f32 %v781_v16, %v641_v20 }
 0x10d   : > { %926 = vst [vmem:[%s1413_s8 + $0x90] sm:$0xff] %v878_v23  ;;  %v900_v32 = vmax.f32 %v852_v24, 0.0  ;;  %v879_v33 = vmax.f32 %v831_v25, 0.0  ;;  %v853_v34 = vadd.f32 %v805_v22, %v737_v27 }
 0x10e   : > { %950 = vst [vmem:[%s1413_s8 + $0x150] sm:$0xff] %v902_v28  ;;  %924 = vst [vmem:[%s1413_s8 + $0x80] sm:$0xff] %v876_v29  ;;  %v903_v35 = vmax.f32 %v855_v30, 0.0  ;;  %v877_v36 = vmax.f32 %v829_v31, 0.0  ;;  %v1183_v37 = vpop.f32.mrb[20].mxu0 }
 0x10f   : > { %948 = vst [vmem:[%s1413_s8 + $0x140] sm:$0xff] %v900_v32  ;;  %927 = vst [vmem:[%s1413_s8 + $0x98] sm:$0xff] %v879_v33  ;;  %v901_v39 = vmax.f32 %v853_v34, 0.0  ;;  %v662_v40 = vadd.f32 %v1183_v37, %v1396_v26  ;;  %v1207_v41 = vpop.f32.mrb[20].mxu1  ;;  %v653_v43 = vpop.f32.mrb[21].mxu0 }
 0x110   : > { %951 = vst [vmem:[%s1413_s8 + $0x158] sm:$0xff] %v903_v35  ;;  %925 = vst [vmem:[%s1413_s8 + $0x88] sm:$0xff] %v877_v36  ;;  %v758_v45 = vadd.f32 %v1207_v41, %v1396_v26  ;;  %v654_v46 = vadd.f32 %v1396_v26, %v653_v43  ;;  %v749_v47 = vpop.f32.mrb[21].mxu1  ;;  %v1184_v49 = vpop.f32.mrb[22].mxu0 }
 0x111   : > { %949 = vst [vmem:[%s1413_s8 + $0x148] sm:$0xff] %v901_v39  ;;  %v834_v51 = vadd.f32 %v786_v38, %v662_v40  ;;  %v750_v52 = vadd.f32 %v1396_v26, %v749_v47  ;;  %v665_v53 = vadd.f32 %v1184_v49, %v1396_v26  ;;  %v1208_v54 = vpop.f32.mrb[22].mxu1  ;;  %v656_v56 = vpop.f32.mrb[23].mxu0 }
 0x112   : > { %v858_v58 = vadd.f32 %v810_v42, %v758_v45  ;;  %v832_v59 = vadd.f32 %v784_v44, %v654_v46  ;;  %v761_v60 = vadd.f32 %v1208_v54, %v1396_v26  ;;  %v657_v61 = vadd.f32 %v1396_v26, %v656_v56  ;;  %v752_v62 = vpop.f32.mrb[23].mxu1 }
 0x113   : > { %v882_v0 = vmax.f32 %v834_v51, 0.0  ;;  %v856_v1 = vadd.f32 %v808_v48, %v750_v52  ;;  %v835_v2 = vadd.f32 %v787_v50, %v665_v53  ;;  %v753_v3 = vadd.f32 %v1396_v26, %v752_v62 }
 0x114   : > { %v906_v4 = vmax.f32 %v858_v58, 0.0  ;;  %v880_v5 = vmax.f32 %v832_v59, 0.0  ;;  %v859_v6 = vadd.f32 %v811_v55, %v761_v60  ;;  %v833_v7 = vadd.f32 %v785_v57, %v657_v61 }
 0x115   : > { %930 = vst [vmem:[%s1413_s8 + $0xb0] sm:$0xff] %v882_v0  ;;  %v904_v8 = vmax.f32 %v856_v1, 0.0  ;;  %v883_v9 = vmax.f32 %v835_v2, 0.0  ;;  %v857_v10 = vadd.f32 %v809_v63, %v753_v3 }
 0x116   : > { %954 = vst [vmem:[%s1413_s8 + $0x170] sm:$0xff] %v906_v4  ;;  %928 = vst [vmem:[%s1413_s8 + $0xa0] sm:$0xff] %v880_v5  ;;  %v907_v11 = vmax.f32 %v859_v6, 0.0  ;;  %v881_v12 = vmax.f32 %v833_v7, 0.0 }
 0x117   : > { %952 = vst [vmem:[%s1413_s8 + $0x160] sm:$0xff] %v904_v8  ;;  %931 = vst [vmem:[%s1413_s8 + $0xb8] sm:$0xff] %v883_v9  ;;  %v905_v13 = vmax.f32 %v857_v10, 0.0 }
 0x118   : > { %955 = vst [vmem:[%s1413_s8 + $0x178] sm:$0xff] %v907_v11  ;;  %929 = vst [vmem:[%s1413_s8 + $0xa8] sm:$0xff] %v881_v12 }
 0x119   : > { %953 = vst [vmem:[%s1413_s8 + $0x168] sm:$0xff] %v905_v13 }
 0x11a PF: > { %s14_s17 = sadd.s32 1, %s1283_s17   ;;  %s1561_s15 = smov %s1279_s16 }
 0x11b   : > { %p11_p5 = scmp.ge.s32.totalorder %s14_s17, 5   ;;  %s1562_s16 = smov %s1564_s18 }
 0x11d   :  { %13 = sbr.rel (!%p11_p5) target bundleno = 2 (0x2), region = 75 }

// kernel: ez_detect_forward.67
= control target key start
LH: loop header
LB: loop body
LE: loop exit
PB: predicated region body
PF: predicated region fallthrough
CT: control target
= control target key end

     0   :  { %s1151_s12 = smov 0   ;;  %s1153_s13 = smov 0   ;;  %s1347_s0 = inlined_call_operand.vmem [shape: bf16[1152,32], index: 0, kind: input, shape index: {}]   ;;  %s1348_s1 = inlined_call_operand.vmem [shape: bf16[32,128], index: 1, kind: input, shape index: {}]   ;;  %s1349_s2 = inlined_call_operand.vmem [shape: f32[1,128], index: 2, kind: input, shape index: {}]   ;;  %s1350_s3 = inlined_call_operand.vmem [shape: f32[1152,128], index: 3, kind: output, shape index: {}]  }
   0x1   :  { %s1155_s14 = smov 0  }
   0x2 LB: > { %s25_s15 = sadd.s32 1, %s1125_s13  ;;  %p919_p0 = scmp.ge.s32.totalorder %s1129_s14, 1  ;;  %s1129_s14 = sphi %s1155_s14, %s13_s14   ;;  %s1125_s13 = sphi %s1153_s13, %s1352_s13   ;;  %s1121_s12 = sphi %s1151_s12, %s1351_s12  }
   0x3   : > { %p27_p1 = scmp.ge.s32.totalorder %s25_s15, 3  ;;  %p169_p2 = scmp.lt.s32.totalorder %s1129_s14, 4 }
   0x5   : > { %s1354_s15 = smov (%p27_p1, %s25_s15), 0  ;;  %p170_p3 = pnand %p919_p0, %p169_p2 }
   0x6   : > { %v1081_v0 = vld [vmem:[%s1348_s1] sm:$0xff] (!%p170_p3)   ;;  %s203_s18 = smul.u32 (!%p170_p3), 48, %s1121_s12  ;;  %v1082_v1 = vld [vmem:[%s1348_s1 + $0x8] sm:$0xff] (!%p170_p3)   ;;  %vm417_vm0 = vcmask (!%p170_p3), 261120  }
   0x7   : > { %173 = sbr.rel (%p170_p3) target bundleno = 280 (0x118), region = 32  ;;  %1001 = vmatprep.subr.bf16.mxu0 (!%p170_p3), %v1081_v0  ;;  %1053 = vmatprep.subr.bf16.mxu1 (!%p170_p3), %v1081_v0  ;;  %v1234_v26 = vld [vmem:[%s1349_s2] ss:$0 sm:$0xff] (!%p170_p3) }
   0x8   : > { %p204_p4 = scmp.lt.s32.totalorder (!%p170_p3), %s203_s18, 143  ;;  %1002 = vmatpush3.bf16.msra.mxu0 (!%p170_p3), %v1081_v0  ;;  %1055 = vmatpush3.bf16.msra.mxu1 (!%p170_p3), %v1081_v0 }
   0x9   : > { %1003 = vmatprep.subr.bf16.mxu0 (!%p170_p3), %v1082_v1  ;;  %1054 = vmatprep.subr.bf16.mxu1 (!%p170_p3), %v1082_v1 }
   0xc   : > { %1004 = vmatpush3.bf16.msra.mxu0 (!%p170_p3), %v1082_v1  ;;  %1056 = vmatpush3.bf16.msra.mxu1 (!%p170_p3), %v1082_v1 }
   0xe   : > { %s1356_s18 = smov (!%p204_p4, %s203_s18), 143 }
   0xf   : > { %s920_s21 = sshll.u32 %s1356_s18, 2  ;;  %s921_s27 = sshll.u32 %s1356_s18, 3 }
  0x10   : > { %s1181_s24 = scalar_lea.vmem %s1347_s0, %s920_s21  ;;  %s1241_s30 = scalar_lea.vmem %s1350_s3, %s921_s27 }
  0x11   : > { %v1083_v2 = vld [vmem:[%s1181_s24] sm:$0xff]   ;;  %v1085_v4 = vld [vmem:[%s1181_s24 + $0x8] sm:$0xff]   ;;  %v1087_v6 = vld [vmem:[%s1181_s24 + $0x10] sm:$0xff]  }
  0x12   : > { %v1084_v3 = vld [vmem:[%s1181_s24 + $0x60] sm:$0xff]   ;;  %1005 = vmatprep.mubr.msk.bf16.mxu0 %vm417_vm0, %v1083_v2  ;;  %v1086_v5 = vld [vmem:[%s1181_s24 + $0x68] sm:$0xff]   ;;  %v1088_v7 = vld [vmem:[%s1181_s24 + $0x70] sm:$0xff]  }
  0x13   : > { %1029 = vmatprep.mubr.msk.bf16.mxu1 %vm417_vm0, %v1084_v3  ;;  %1006 = vmatmul.mubr.msk.bf16.vlgmr.msra.gmra.mrb[0].mxu0 %vm417_vm0, %v1085_v4  ;;  %v1089_v8 = vld [vmem:[%s1181_s24 + $0x18] sm:$0xff]   ;;  %v1091_v10 = vld [vmem:[%s1181_s24 + $0x20] sm:$0xff]   ;;  %v1093_v12 = vld [vmem:[%s1181_s24 + $0x28] sm:$0xff]  }
  0x14   : > { %1030 = vmatmul.mubr.msk.bf16.vlgmr.msra.gmra.mrb[0].mxu1 %vm417_vm0, %v1086_v5  ;;  %1009 = vmatprep.mubr.msk.bf16.mxu0 %vm417_vm0, %v1087_v6  ;;  %v1090_v9 = vld [vmem:[%s1181_s24 + $0x78] sm:$0xff]   ;;  %v1092_v11 = vld [vmem:[%s1181_s24 + $0x80] sm:$0xff]   ;;  %v1094_v13 = vld [vmem:[%s1181_s24 + $0x88] sm:$0xff]  }
  0x15   : > { %1033 = vmatprep.mubr.msk.bf16.mxu1 %vm417_vm0, %v1088_v7  ;;  %v1095_v14 = vld [vmem:[%s1181_s24 + $0x30] sm:$0xff]   ;;  %v1097_v16 = vld [vmem:[%s1181_s24 + $0x38] sm:$0xff]   ;;  %v1099_v18 = vld [vmem:[%s1181_s24 + $0x40] sm:$0xff]  }
  0x16   : > { %v1096_v15 = vld [vmem:[%s1181_s24 + $0x90] sm:$0xff]   ;;  %v1098_v17 = vld [vmem:[%s1181_s24 + $0x98] sm:$0xff]   ;;  %v1100_v19 = vld [vmem:[%s1181_s24 + $0xa0] sm:$0xff]  }
  0x17   : > { %v1101_v20 = vld [vmem:[%s1181_s24 + $0x48] sm:$0xff]   ;;  %v1103_v22 = vld [vmem:[%s1181_s24 + $0x50] sm:$0xff]   ;;  %v1105_v24 = vld [vmem:[%s1181_s24 + $0x58] sm:$0xff]  }
  0x18   : > { %v1102_v21 = vld [vmem:[%s1181_s24 + $0xa8] sm:$0xff]   ;;  %v1104_v23 = vld [vmem:[%s1181_s24 + $0xb0] sm:$0xff]   ;;  %v1106_v25 = vld [vmem:[%s1181_s24 + $0xb8] sm:$0xff]  }
  0x1b   : > { %1010 = vmatmul.mubr.msk.bf16.gmra.mrb[4].mxu0 %vm417_vm0, %v1089_v8 }
  0x1c   : > { %1034 = vmatmul.mubr.msk.bf16.gmra.mrb[4].mxu1 %vm417_vm0, %v1090_v9  ;;  %1013 = vmatprep.mubr.msk.bf16.mxu0 %vm417_vm0, %v1091_v10 }
  0x1d   : > { %1037 = vmatprep.mubr.msk.bf16.mxu1 %vm417_vm0, %v1092_v11 }
  0x23   : > { %1014 = vmatmul.mubr.msk.bf16.gmra.mrb[8].mxu0 %vm417_vm0, %v1093_v12 }
  0x24   : > { %1038 = vmatmul.mubr.msk.bf16.gmra.mrb[8].mxu1 %vm417_vm0, %v1094_v13  ;;  %1017 = vmatprep.mubr.msk.bf16.mxu0 %vm417_vm0, %v1095_v14 }
  0x25   : > { %1041 = vmatprep.mubr.msk.bf16.mxu1 %vm417_vm0, %v1096_v15 }
  0x2b   : > { %1018 = vmatmul.mubr.msk.bf16.gmra.mrb[12].mxu0 %vm417_vm0, %v1097_v16 }
  0x2c   : > { %1042 = vmatmul.mubr.msk.bf16.gmra.mrb[12].mxu1 %vm417_vm0, %v1098_v17  ;;  %1021 = vmatprep.mubr.msk.bf16.mxu0 %vm417_vm0, %v1099_v18 }
  0x2d   : > { %1045 = vmatprep.mubr.msk.bf16.mxu1 %vm417_vm0, %v1100_v19 }
  0x33   : > { %1022 = vmatmul.mubr.msk.bf16.gmra.mrb[16].mxu0 %vm417_vm0, %v1101_v20 }
  0x34   : > { %1046 = vmatmul.mubr.msk.bf16.gmra.mrb[16].mxu1 %vm417_vm0, %v1102_v21  ;;  %1025 = vmatprep.mubr.msk.bf16.mxu0 %vm417_vm0, %v1103_v22 }
  0x35   : > { %1049 = vmatprep.mubr.msk.bf16.mxu1 %vm417_vm0, %v1104_v23 }
  0x3b   : > { %1026 = vmatmul.mubr.msk.bf16.gmra.mrb[20].mxu0 %vm417_vm0, %v1105_v24 }
  0x3c   : > { %1050 = vmatmul.mubr.msk.bf16.gmra.mrb[20].mxu1 %vm417_vm0, %v1106_v25 }
  0xe6   : > { %v1007_v27 = vpop.f32.mrb[0].mxu0 }
  0xe7   : > { %v533_v28 = vadd.f32 %v1007_v27, %v1234_v26  ;;  %v1031_v29 = vpop.f32.mrb[0].mxu1  ;;  %v524_v30 = vpop.f32.mrb[1].mxu0 }
  0xe8   : > { %v629_v31 = vadd.f32 %v1031_v29, %v1234_v26  ;;  %v525_v32 = vadd.f32 %v1234_v26, %v524_v30  ;;  %v620_v33 = vpop.f32.mrb[1].mxu1  ;;  %v1008_v34 = vpop.f32.mrb[2].mxu0 }
  0xe9   : > { %v717_v35 = vmax.f32 %v533_v28, 0.0  ;;  %v621_v36 = vadd.f32 %v1234_v26, %v620_v33  ;;  %v536_v37 = vadd.f32 %v1008_v34, %v1234_v26  ;;  %v1032_v38 = vpop.f32.mrb[2].mxu1  ;;  %v527_v39 = vpop.f32.mrb[3].mxu0 }
  0xea   : > { %v741_v40 = vmax.f32 %v629_v31, 0.0  ;;  %v715_v41 = vmax.f32 %v525_v32, 0.0  ;;  %v632_v42 = vadd.f32 %v1032_v38, %v1234_v26  ;;  %v528_v43 = vadd.f32 %v1234_v26, %v527_v39  ;;  %v623_v44 = vpop.f32.mrb[3].mxu1 }
  0xeb   : > { %765 = vst [vmem:[%s1241_s30 + $0x10] sm:$0xff] %v717_v35  ;;  %v739_v45 = vmax.f32 %v621_v36, 0.0  ;;  %v718_v46 = vmax.f32 %v536_v37, 0.0  ;;  %v624_v47 = vadd.f32 %v1234_v26, %v623_v44 }
  0xec   : > { %789 = vst [vmem:[%s1241_s30 + $0xd0] sm:$0xff] %v741_v40  ;;  %763 = vst [vmem:[%s1241_s30] sm:$0xff] %v715_v41  ;;  %v742_v48 = vmax.f32 %v632_v42, 0.0  ;;  %v716_v49 = vmax.f32 %v528_v43, 0.0 }
  0xed   : > { %787 = vst [vmem:[%s1241_s30 + $0xc0] sm:$0xff] %v739_v45  ;;  %766 = vst [vmem:[%s1241_s30 + $0x18] sm:$0xff] %v718_v46  ;;  %v740_v50 = vmax.f32 %v624_v47, 0.0 }
  0xee   : > { %790 = vst [vmem:[%s1241_s30 + $0xd8] sm:$0xff] %v742_v48  ;;  %764 = vst [vmem:[%s1241_s30 + $0x8] sm:$0xff] %v716_v49  ;;  %v1011_v51 = vpop.f32.mrb[4].mxu0 }
  0xef   : > { %788 = vst [vmem:[%s1241_s30 + $0xc8] sm:$0xff] %v740_v50  ;;  %v549_v52 = vadd.f32 %v1011_v51, %v1234_v26  ;;  %v1035_v53 = vpop.f32.mrb[4].mxu1  ;;  %v540_v54 = vpop.f32.mrb[5].mxu0 }
  0xf0   : > { %v645_v55 = vadd.f32 %v1035_v53, %v1234_v26  ;;  %v541_v56 = vadd.f32 %v1234_v26, %v540_v54  ;;  %v636_v57 = vpop.f32.mrb[5].mxu1  ;;  %v1012_v58 = vpop.f32.mrb[6].mxu0 }
  0xf1   : > { %v721_v59 = vmax.f32 %v549_v52, 0.0  ;;  %v637_v60 = vadd.f32 %v1234_v26, %v636_v57  ;;  %v552_v61 = vadd.f32 %v1012_v58, %v1234_v26  ;;  %v1036_v62 = vpop.f32.mrb[6].mxu1  ;;  %v543_v63 = vpop.f32.mrb[7].mxu0 }
  0xf2   : > { %v745_v0 = vmax.f32 %v645_v55, 0.0  ;;  %v719_v1 = vmax.f32 %v541_v56, 0.0  ;;  %v648_v2 = vadd.f32 %v1036_v62, %v1234_v26  ;;  %v544_v3 = vadd.f32 %v1234_v26, %v543_v63  ;;  %v639_v4 = vpop.f32.mrb[7].mxu1 }
  0xf3   : > { %769 = vst [vmem:[%s1241_s30 + $0x30] sm:$0xff] %v721_v59  ;;  %v743_v5 = vmax.f32 %v637_v60, 0.0  ;;  %v722_v6 = vmax.f32 %v552_v61, 0.0  ;;  %v640_v7 = vadd.f32 %v1234_v26, %v639_v4 }
  0xf4   : > { %793 = vst [vmem:[%s1241_s30 + $0xf0] sm:$0xff] %v745_v0  ;;  %767 = vst [vmem:[%s1241_s30 + $0x20] sm:$0xff] %v719_v1  ;;  %v746_v8 = vmax.f32 %v648_v2, 0.0  ;;  %v720_v9 = vmax.f32 %v544_v3, 0.0 }
  0xf5   : > { %791 = vst [vmem:[%s1241_s30 + $0xe0] sm:$0xff] %v743_v5  ;;  %770 = vst [vmem:[%s1241_s30 + $0x38] sm:$0xff] %v722_v6  ;;  %v744_v10 = vmax.f32 %v640_v7, 0.0 }
  0xf6   : > { %794 = vst [vmem:[%s1241_s30 + $0xf8] sm:$0xff] %v746_v8  ;;  %768 = vst [vmem:[%s1241_s30 + $0x28] sm:$0xff] %v720_v9  ;;  %v1015_v11 = vpop.f32.mrb[8].mxu0 }
  0xf7   : > { %792 = vst [vmem:[%s1241_s30 + $0xe8] sm:$0xff] %v744_v10  ;;  %v565_v12 = vadd.f32 %v1015_v11, %v1234_v26  ;;  %v1039_v13 = vpop.f32.mrb[8].mxu1  ;;  %v556_v14 = vpop.f32.mrb[9].mxu0 }
  0xf8   : > { %v661_v15 = vadd.f32 %v1039_v13, %v1234_v26  ;;  %v557_v16 = vadd.f32 %v1234_v26, %v556_v14  ;;  %v652_v17 = vpop.f32.mrb[9].mxu1  ;;  %v1016_v18 = vpop.f32.mrb[10].mxu0 }
  0xf9   : > { %v725_v19 = vmax.f32 %v565_v12, 0.0  ;;  %v653_v20 = vadd.f32 %v1234_v26, %v652_v17  ;;  %v568_v21 = vadd.f32 %v1016_v18, %v1234_v26  ;;  %v1040_v22 = vpop.f32.mrb[10].mxu1  ;;  %v559_v23 = vpop.f32.mrb[11].mxu0 }
  0xfa   : > { %v749_v24 = vmax.f32 %v661_v15, 0.0  ;;  %v723_v25 = vmax.f32 %v557_v16, 0.0  ;;  %v664_v27 = vadd.f32 %v1040_v22, %v1234_v26  ;;  %v560_v28 = vadd.f32 %v1234_v26, %v559_v23  ;;  %v655_v29 = vpop.f32.mrb[11].mxu1 }
  0xfb   : > { %773 = vst [vmem:[%s1241_s30 + $0x50] sm:$0xff] %v725_v19  ;;  %v747_v30 = vmax.f32 %v653_v20, 0.0  ;;  %v726_v31 = vmax.f32 %v568_v21, 0.0  ;;  %v656_v32 = vadd.f32 %v1234_v26, %v655_v29 }
  0xfc   : > { %797 = vst [vmem:[%s1241_s30 + $0x110] sm:$0xff] %v749_v24  ;;  %771 = vst [vmem:[%s1241_s30 + $0x40] sm:$0xff] %v723_v25  ;;  %v750_v33 = vmax.f32 %v664_v27, 0.0  ;;  %v724_v34 = vmax.f32 %v560_v28, 0.0 }
  0xfd   : > { %795 = vst [vmem:[%s1241_s30 + $0x100] sm:$0xff] %v747_v30  ;;  %774 = vst [vmem:[%s1241_s30 + $0x58] sm:$0xff] %v726_v31  ;;  %v748_v35 = vmax.f32 %v656_v32, 0.0 }
  0xfe   : > { %798 = vst [vmem:[%s1241_s30 + $0x118] sm:$0xff] %v750_v33  ;;  %772 = vst [vmem:[%s1241_s30 + $0x48] sm:$0xff] %v724_v34  ;;  %v1019_v36 = vpop.f32.mrb[12].mxu0 }
  0xff   : > { %796 = vst [vmem:[%s1241_s30 + $0x108] sm:$0xff] %v748_v35  ;;  %v581_v37 = vadd.f32 %v1019_v36, %v1234_v26  ;;  %v1043_v38 = vpop.f32.mrb[12].mxu1  ;;  %v572_v39 = vpop.f32.mrb[13].mxu0 }
 0x100   : > { %v677_v40 = vadd.f32 %v1043_v38, %v1234_v26  ;;  %v573_v41 = vadd.f32 %v1234_v26, %v572_v39  ;;  %v668_v42 = vpop.f32.mrb[13].mxu1  ;;  %v1020_v43 = vpop.f32.mrb[14].mxu0 }
 0x101   : > { %v729_v44 = vmax.f32 %v581_v37, 0.0  ;;  %v669_v45 = vadd.f32 %v1234_v26, %v668_v42  ;;  %v584_v46 = vadd.f32 %v1020_v43, %v1234_v26  ;;  %v1044_v47 = vpop.f32.mrb[14].mxu1  ;;  %v575_v48 = vpop.f32.mrb[15].mxu0 }
 0x102   : > { %v753_v49 = vmax.f32 %v677_v40, 0.0  ;;  %v727_v50 = vmax.f32 %v573_v41, 0.0  ;;  %v680_v51 = vadd.f32 %v1044_v47, %v1234_v26  ;;  %v576_v52 = vadd.f32 %v1234_v26, %v575_v48  ;;  %v671_v53 = vpop.f32.mrb[15].mxu1 }
 0x103   : > { %777 = vst [vmem:[%s1241_s30 + $0x70] sm:$0xff] %v729_v44  ;;  %v751_v54 = vmax.f32 %v669_v45, 0.0  ;;  %v730_v55 = vmax.f32 %v584_v46, 0.0  ;;  %v672_v56 = vadd.f32 %v1234_v26, %v671_v53 }
 0x104   : > { %801 = vst [vmem:[%s1241_s30 + $0x130] sm:$0xff] %v753_v49  ;;  %775 = vst [vmem:[%s1241_s30 + $0x60] sm:$0xff] %v727_v50  ;;  %v754_v57 = vmax.f32 %v680_v51, 0.0  ;;  %v728_v58 = vmax.f32 %v576_v52, 0.0 }
 0x105   : > { %799 = vst [vmem:[%s1241_s30 + $0x120] sm:$0xff] %v751_v54  ;;  %778 = vst [vmem:[%s1241_s30 + $0x78] sm:$0xff] %v730_v55  ;;  %v752_v59 = vmax.f32 %v672_v56, 0.0 }
 0x106   : > { %802 = vst [vmem:[%s1241_s30 + $0x138] sm:$0xff] %v754_v57  ;;  %776 = vst [vmem:[%s1241_s30 + $0x68] sm:$0xff] %v728_v58  ;;  %v1023_v60 = vpop.f32.mrb[16].mxu0 }
 0x107   : > { %800 = vst [vmem:[%s1241_s30 + $0x128] sm:$0xff] %v752_v59  ;;  %v597_v61 = vadd.f32 %v1023_v60, %v1234_v26  ;;  %v1047_v62 = vpop.f32.mrb[16].mxu1  ;;  %v588_v63 = vpop.f32.mrb[17].mxu0 }
 0x108   : > { %v693_v0 = vadd.f32 %v1047_v62, %v1234_v26  ;;  %v589_v1 = vadd.f32 %v1234_v26, %v588_v63  ;;  %v684_v2 = vpop.f32.mrb[17].mxu1  ;;  %v1024_v3 = vpop.f32.mrb[18].mxu0 }
 0x109   : > { %v733_v4 = vmax.f32 %v597_v61, 0.0  ;;  %v685_v5 = vadd.f32 %v1234_v26, %v684_v2  ;;  %v600_v6 = vadd.f32 %v1024_v3, %v1234_v26  ;;  %v1048_v7 = vpop.f32.mrb[18].mxu1  ;;  %v591_v8 = vpop.f32.mrb[19].mxu0 }
 0x10a   : > { %v757_v9 = vmax.f32 %v693_v0, 0.0  ;;  %v731_v10 = vmax.f32 %v589_v1, 0.0  ;;  %v696_v11 = vadd.f32 %v1048_v7, %v1234_v26  ;;  %v592_v12 = vadd.f32 %v1234_v26, %v591_v8  ;;  %v687_v13 = vpop.f32.mrb[19].mxu1 }
 0x10b   : > { %781 = vst [vmem:[%s1241_s30 + $0x90] sm:$0xff] %v733_v4  ;;  %v755_v14 = vmax.f32 %v685_v5, 0.0  ;;  %v734_v15 = vmax.f32 %v600_v6, 0.0  ;;  %v688_v16 = vadd.f32 %v1234_v26, %v687_v13 }
 0x10c   : > { %805 = vst [vmem:[%s1241_s30 + $0x150] sm:$0xff] %v757_v9  ;;  %779 = vst [vmem:[%s1241_s30 + $0x80] sm:$0xff] %v731_v10  ;;  %v758_v17 = vmax.f32 %v696_v11, 0.0  ;;  %v732_v18 = vmax.f32 %v592_v12, 0.0 }
 0x10d   : > { %803 = vst [vmem:[%s1241_s30 + $0x140] sm:$0xff] %v755_v14  ;;  %782 = vst [vmem:[%s1241_s30 + $0x98] sm:$0xff] %v734_v15  ;;  %v756_v19 = vmax.f32 %v688_v16, 0.0 }
 0x10e   : > { %806 = vst [vmem:[%s1241_s30 + $0x158] sm:$0xff] %v758_v17  ;;  %780 = vst [vmem:[%s1241_s30 + $0x88] sm:$0xff] %v732_v18  ;;  %v1027_v20 = vpop.f32.mrb[20].mxu0 }
 0x10f   : > { %804 = vst [vmem:[%s1241_s30 + $0x148] sm:$0xff] %v756_v19  ;;  %v613_v21 = vadd.f32 %v1027_v20, %v1234_v26  ;;  %v1051_v22 = vpop.f32.mrb[20].mxu1  ;;  %v604_v23 = vpop.f32.mrb[21].mxu0 }
 0x110   : > { %v709_v24 = vadd.f32 %v1051_v22, %v1234_v26  ;;  %v605_v25 = vadd.f32 %v1234_v26, %v604_v23  ;;  %v700_v27 = vpop.f32.mrb[21].mxu1  ;;  %v1028_v28 = vpop.f32.mrb[22].mxu0 }
 0x111   : > { %v737_v29 = vmax.f32 %v613_v21, 0.0  ;;  %v701_v30 = vadd.f32 %v1234_v26, %v700_v27  ;;  %v616_v31 = vadd.f32 %v1028_v28, %v1234_v26  ;;  %v1052_v32 = vpop.f32.mrb[22].mxu1  ;;  %v607_v33 = vpop.f32.mrb[23].mxu0 }
 0x112   : > { %v761_v34 = vmax.f32 %v709_v24, 0.0  ;;  %v735_v35 = vmax.f32 %v605_v25, 0.0  ;;  %v712_v36 = vadd.f32 %v1052_v32, %v1234_v26  ;;  %v608_v37 = vadd.f32 %v1234_v26, %v607_v33  ;;  %v703_v38 = vpop.f32.mrb[23].mxu1 }
 0x113   : > { %785 = vst [vmem:[%s1241_s30 + $0xb0] sm:$0xff] %v737_v29  ;;  %v759_v39 = vmax.f32 %v701_v30, 0.0  ;;  %v738_v40 = vmax.f32 %v616_v31, 0.0  ;;  %v704_v41 = vadd.f32 %v1234_v26, %v703_v38 }
 0x114   : > { %809 = vst [vmem:[%s1241_s30 + $0x170] sm:$0xff] %v761_v34  ;;  %783 = vst [vmem:[%s1241_s30 + $0xa0] sm:$0xff] %v735_v35  ;;  %v762_v42 = vmax.f32 %v712_v36, 0.0  ;;  %v736_v43 = vmax.f32 %v608_v37, 0.0 }
 0x115   : > { %807 = vst [vmem:[%s1241_s30 + $0x160] sm:$0xff] %v759_v39  ;;  %786 = vst [vmem:[%s1241_s30 + $0xb8] sm:$0xff] %v738_v40  ;;  %v760_v44 = vmax.f32 %v704_v41, 0.0 }
 0x116   : > { %810 = vst [vmem:[%s1241_s30 + $0x178] sm:$0xff] %v762_v42  ;;  %784 = vst [vmem:[%s1241_s30 + $0xa8] sm:$0xff] %v736_v43 }
 0x117   : > { %808 = vst [vmem:[%s1241_s30 + $0x168] sm:$0xff] %v760_v44 }
 0x118 PF: > { %s13_s14 = sadd.s32 1, %s1129_s14   ;;  %s1351_s12 = smov %s1125_s13 }
 0x119   : > { %p10_p5 = scmp.ge.s32.totalorder %s13_s14, 5   ;;  %s1352_s13 = smov %s1354_s15 }
 0x11b   :  { %12 = sbr.rel (!%p10_p5) target bundleno = 2 (0x2), region = 68 }

// kernel: ez_detect_forward.74
= control target key start
LH: loop header
LB: loop body
LE: loop exit
PB: predicated region body
PF: predicated region fallthrough
CT: control target
= control target key end

     0   :  { %s852_s12 = smov 0   ;;  %s854_s13 = smov 0   ;;  %s991_s0 = inlined_call_operand.vmem [shape: bf16[288,144], index: 0, kind: input, shape index: {}]   ;;  %s992_s1 = inlined_call_operand.vmem [shape: bf16[144,128], index: 1, kind: input, shape index: {}]   ;;  %s993_s2 = inlined_call_operand.vmem [shape: f32[1,128], index: 2, kind: input, shape index: {}]   ;;  %s994_s3 = inlined_call_operand.vmem [shape: f32[288,128], index: 3, kind: output, shape index: {}]  }
   0x1   :  { %s856_s14 = smov 0  }
   0x2 LB: > { %s25_s15 = sadd.s32 1, %s825_s13  ;;  %p684_p0 = scmp.ge.s32.totalorder %s829_s14, 1  ;;  %s829_s14 = sphi %s856_s14, %s13_s14   ;;  %s825_s13 = sphi %s854_s13, %s996_s13   ;;  %s821_s12 = sphi %s852_s12, %s995_s12  }
   0x3   : > { %p27_p1 = scmp.ge.s32.totalorder %s25_s15, 2  ;;  %p170_p2 = scmp.lt.s32.totalorder %s829_s14, 3 }
   0x5   : > { %s998_s15 = smov (%p27_p1, %s25_s15), 0  ;;  %p171_p3 = pnand %p684_p0, %p170_p2 }
   0x6   : > { %v771_v0 = vld [vmem:[%s992_s1] sm:$0xff] (!%p171_p3)   ;;  %v831_v1 = vmov (!%p171_p3), 0   ;;  %s205_s18 = smul.u32 (!%p171_p3), 18, %s821_s12  ;;  %v772_v2 = vld [vmem:[%s992_s1 + $0x8] sm:$0xff] (!%p171_p3)   ;;  %v773_v3 = vld [vmem:[%s992_s1 + $0x10] sm:$0xff] (!%p171_p3)   ;;  %vm407_vm0 = vcmask (!%p171_p3), 130048  }
   0x7   : > { %174 = sbr.rel (%p171_p3) target bundleno = 294 (0x126), region = 32  ;;  %435 = vmatprep.subr.bf16.mxu0 (!%p171_p3), %v831_v1  ;;  %728 = vmatprep.subr.bf16.mxu1 (!%p171_p3), %v831_v1  ;;  %v774_v4 = vld [vmem:[%s992_s1 + $0x18] sm:$0xff] (!%p171_p3)   ;;  %v775_v7 = vld [vmem:[%s992_s1 + $0x20] sm:$0xff] (!%p171_p3)   ;;  %v776_v8 = vld [vmem:[%s992_s1 + $0x28] sm:$0xff] (!%p171_p3)  }
   0x8   : > { %436 = vmatpush1.bf16.msra.mxu0 (!%p171_p3), %v771_v0  ;;  %737 = vmatpush1.bf16.msra.mxu1 (!%p171_p3), %v771_v0  ;;  %p206_p4 = scmp.lt.s32.totalorder (!%p171_p3), %s205_s18, 35  ;;  %v777_v9 = vld [vmem:[%s992_s1 + $0x30] sm:$0xff] (!%p171_p3)   ;;  %v778_v10 = vld [vmem:[%s992_s1 + $0x38] sm:$0xff] (!%p171_p3)   ;;  %v779_v11 = vld [vmem:[%s992_s1 + $0x40] sm:$0xff] (!%p171_p3)  }
   0x9   : > { %437 = vmatprep.subr.bf16.mxu0 (!%p171_p3), %v831_v1  ;;  %729 = vmatprep.subr.bf16.mxu1 (!%p171_p3), %v831_v1  ;;  %v937_v28 = vld [vmem:[%s993_s2] ss:$0 sm:$0xff] (!%p171_p3) }
   0xc   : > { %438 = vmatpush1.bf16.msra.mxu0 (!%p171_p3), %v772_v2  ;;  %738 = vmatpush1.bf16.msra.mxu1 (!%p171_p3), %v772_v2 }
   0xd   : > { %439 = vmatprep.subr.bf16.mxu0 (!%p171_p3), %v831_v1  ;;  %730 = vmatprep.subr.bf16.mxu1 (!%p171_p3), %v831_v1 }
   0xe   : > { %s1000_s18 = smov (!%p206_p4, %s205_s18), 35 }
   0xf   : > { %s727_s23 = sshll.u32 %s1000_s18, 3 }
  0x10   : > { %s887_s26 = scalar_lea.vmem %s991_s0, %s727_s23  ;;  %440 = vmatpush1.bf16.msra.mxu0 %v773_v3  ;;  %739 = vmatpush1.bf16.msra.mxu1 %v773_v3  ;;  %s946_s20 = scalar_lea.vmem %s994_s3, %s727_s23 }
  0x11   : > { %v782_v5 = vld [vmem:[%s887_s26 + $0x4] ss:$8 sps:$4 sm:$0xff]   ;;  %441 = vmatprep.subr.bf16.mxu0 %v831_v1  ;;  %731 = vmatprep.subr.bf16.mxu1 %v831_v1  ;;  %v785_v6 = vld [vmem:[%s887_s26 + $0x54] ss:$8 sps:$4 sm:$0xff]   ;;  %v780_v12 = vld [vmem:[%s887_s26] ss:$8 sps:$4 sm:$0xff]  }
  0x12   : > { %716 = vmatprep.mubr.msk.bf16.mxu0 %vm407_vm0, %v782_v5  ;;  %721 = vmatprep.mubr.msk.bf16.mxu1 %vm407_vm0, %v785_v6  ;;  %v783_v13 = vld [vmem:[%s887_s26 + $0x50] ss:$8 sps:$4 sm:$0xff]   ;;  %v786_v14 = vld [vmem:[%s887_s26 + $0x14] ss:$8 sps:$4 sm:$0xff]   ;;  %v789_v15 = vld [vmem:[%s887_s26 + $0x64] ss:$8 sps:$4 sm:$0xff]  }
  0x13   : > { %v788_v16 = vld [vmem:[%s887_s26 + $0x10] ss:$8 sps:$4 sm:$0xff]   ;;  %v791_v17 = vld [vmem:[%s887_s26 + $0x60] ss:$8 sps:$4 sm:$0xff]   ;;  %v792_v18 = vld [vmem:[%s887_s26 + $0x24] ss:$8 sps:$4 sm:$0xff]  }
  0x14   : > { %442 = vmatpush1.bf16.msra.mxu0 %v774_v4  ;;  %740 = vmatpush1.bf16.msra.mxu1 %v774_v4  ;;  %v795_v19 = vld [vmem:[%s887_s26 + $0x74] ss:$8 sps:$4 sm:$0xff]   ;;  %v794_v20 = vld [vmem:[%s887_s26 + $0x20] ss:$8 sps:$4 sm:$0xff]   ;;  %v797_v21 = vld [vmem:[%s887_s26 + $0x70] ss:$8 sps:$4 sm:$0xff]  }
  0x15   : > { %443 = vmatprep.subr.bf16.mxu0 %v831_v1  ;;  %732 = vmatprep.subr.bf16.mxu1 %v831_v1  ;;  %v798_v22 = vld [vmem:[%s887_s26 + $0x34] ss:$8 sps:$4 sm:$0xff]   ;;  %v801_v23 = vld [vmem:[%s887_s26 + $0x84] ss:$8 sps:$4 sm:$0xff]   ;;  %v800_v24 = vld [vmem:[%s887_s26 + $0x30] ss:$8 sps:$4 sm:$0xff]  }
  0x16   : > { %v803_v25 = vld [vmem:[%s887_s26 + $0x80] ss:$8 sps:$4 sm:$0xff]   ;;  %v804_v26 = vld [vmem:[%s887_s26 + $0x44] ss:$8 sps:$4 sm:$0xff]  }
  0x17   : > { %v806_v27 = vld [vmem:[%s887_s26 + $0x40] ss:$8 sps:$4 sm:$0xff]  }
  0x18   : > { %444 = vmatpush1.bf16.msra.mxu0 %v775_v7  ;;  %741 = vmatpush1.bf16.msra.mxu1 %v775_v7 }
  0x19   : > { %445 = vmatprep.subr.bf16.mxu0 %v831_v1  ;;  %733 = vmatprep.subr.bf16.mxu1 %v831_v1 }
  0x1c   : > { %446 = vmatpush1.bf16.msra.mxu0 %v776_v8  ;;  %742 = vmatpush1.bf16.msra.mxu1 %v776_v8 }
  0x1d   : > { %447 = vmatprep.subr.bf16.mxu0 %v831_v1  ;;  %734 = vmatprep.subr.bf16.mxu1 %v831_v1 }
  0x20   : > { %448 = vmatpush1.bf16.msra.mxu0 %v777_v9  ;;  %743 = vmatpush1.bf16.msra.mxu1 %v777_v9 }
  0x21   : > { %449 = vmatprep.subr.bf16.mxu0 %v831_v1  ;;  %735 = vmatprep.subr.bf16.mxu1 %v831_v1 }
  0x24   : > { %450 = vmatpush1.bf16.msra.mxu0 %v778_v10  ;;  %744 = vmatpush1.bf16.msra.mxu1 %v778_v10 }
  0x25   : > { %451 = vmatprep.subr.bf16.mxu0 %v831_v1  ;;  %736 = vmatprep.subr.bf16.mxu1 %v831_v1 }
  0x28   : > { %452 = vmatpush1.bf16.msra.mxu0 %v779_v11  ;;  %745 = vmatpush1.bf16.msra.mxu1 %v779_v11 }
  0x2b   : > { %468 = vmatmul.mubr.bf16.vlgmr.msra.gmra.mrb[0].mxu0 %v780_v12  ;;  %508 = vmatmul.mubr.bf16.vlgmr.msra.gmra.mrb[0].mxu1 %v783_v13 }
  0x2c   : > { %717 = vmatprep.mubr.msk.bf16.mxu0 %vm407_vm0, %v786_v14  ;;  %722 = vmatprep.mubr.msk.bf16.mxu1 %vm407_vm0, %v789_v15 }
  0x33   : > { %476 = vmatmul.mubr.bf16.gmra.mrb[4].mxu0 %v788_v16  ;;  %516 = vmatmul.mubr.bf16.gmra.mrb[4].mxu1 %v791_v17 }
  0x34   : > { %718 = vmatprep.mubr.msk.bf16.mxu0 %vm407_vm0, %v792_v18  ;;  %723 = vmatprep.mubr.msk.bf16.mxu1 %vm407_vm0, %v795_v19 }
  0x3b   : > { %484 = vmatmul.mubr.bf16.gmra.mrb[8].mxu0 %v794_v20  ;;  %524 = vmatmul.mubr.bf16.gmra.mrb[8].mxu1 %v797_v21 }
  0x3c   : > { %719 = vmatprep.mubr.msk.bf16.mxu0 %vm407_vm0, %v798_v22  ;;  %724 = vmatprep.mubr.msk.bf16.mxu1 %vm407_vm0, %v801_v23 }
  0x43   : > { %492 = vmatmul.mubr.bf16.gmra.mrb[12].mxu0 %v800_v24  ;;  %532 = vmatmul.mubr.bf16.gmra.mrb[12].mxu1 %v803_v25 }
  0x44   : > { %720 = vmatprep.mubr.msk.bf16.mxu0 %vm407_vm0, %v804_v26 }
  0x4b   : > { %500 = vmatmul.mubr.bf16.gmra.mrb[16].mxu0 %v806_v27 }
  0xfe   : > { %v469_v29 = vpop.f32.mrb[0].mxu0  ;;  %v509_v30 = vpop.f32.mrb[0].mxu1 }
  0xff   : > { %v470_v31 = vadd.f32 %v937_v28, %v469_v29  ;;  %v471_v32 = vpop.f32.mrb[1].mxu0  ;;  %v510_v33 = vadd.f32 %v937_v28, %v509_v30  ;;  %v511_v34 = vpop.f32.mrb[1].mxu1 }
 0x100   : > { %v472_v35 = vpop.f32.mrb[2].mxu0  ;;  %v512_v36 = vpop.f32.mrb[2].mxu1 }
 0x101   : > { %v540_v37 = vmax.f32 %v470_v31, 0.0  ;;  %v473_v38 = vadd.f32 %v937_v28, %v472_v35  ;;  %v474_v39 = vpop.f32.mrb[3].mxu0  ;;  %v550_v40 = vmax.f32 %v510_v33, 0.0  ;;  %v513_v41 = vadd.f32 %v937_v28, %v512_v36  ;;  %v514_v42 = vpop.f32.mrb[3].mxu1 }
 0x103   : > { %558 = vst [vmem:[%s946_s20] sm:$0xff] %v540_v37  ;;  %v541_v43 = vmax.f32 %v473_v38, 0.0  ;;  %568 = vst [vmem:[%s946_s20 + $0x50] sm:$0xff] %v550_v40  ;;  %v551_v44 = vmax.f32 %v513_v41, 0.0 }
 0x105   : > { %559 = vst [vmem:[%s946_s20 + $0x8] sm:$0xff] %v541_v43  ;;  %569 = vst [vmem:[%s946_s20 + $0x58] sm:$0xff] %v551_v44 }
 0x106   : > { %v477_v45 = vpop.f32.mrb[4].mxu0  ;;  %v517_v46 = vpop.f32.mrb[4].mxu1 }
 0x107   : > { %v478_v47 = vadd.f32 %v937_v28, %v477_v45  ;;  %v479_v48 = vpop.f32.mrb[5].mxu0  ;;  %v518_v49 = vadd.f32 %v937_v28, %v517_v46  ;;  %v519_v50 = vpop.f32.mrb[5].mxu1 }
 0x108   : > { %v480_v51 = vpop.f32.mrb[6].mxu0  ;;  %v520_v52 = vpop.f32.mrb[6].mxu1 }
 0x109   : > { %v542_v53 = vmax.f32 %v478_v47, 0.0  ;;  %v481_v54 = vadd.f32 %v937_v28, %v480_v51  ;;  %v482_v55 = vpop.f32.mrb[7].mxu0  ;;  %v552_v56 = vmax.f32 %v518_v49, 0.0  ;;  %v521_v57 = vadd.f32 %v937_v28, %v520_v52  ;;  %v522_v58 = vpop.f32.mrb[7].mxu1 }
 0x10b   : > { %560 = vst [vmem:[%s946_s20 + $0x10] sm:$0xff] %v542_v53  ;;  %v543_v59 = vmax.f32 %v481_v54, 0.0  ;;  %570 = vst [vmem:[%s946_s20 + $0x60] sm:$0xff] %v552_v56  ;;  %v553_v60 = vmax.f32 %v521_v57, 0.0 }
 0x10d   : > { %561 = vst [vmem:[%s946_s20 + $0x18] sm:$0xff] %v543_v59  ;;  %571 = vst [vmem:[%s946_s20 + $0x68] sm:$0xff] %v553_v60 }
 0x10e   : > { %v485_v61 = vpop.f32.mrb[8].mxu0  ;;  %v525_v62 = vpop.f32.mrb[8].mxu1 }
 0x10f   : > { %v486_v63 = vadd.f32 %v937_v28, %v485_v61  ;;  %v487_v0 = vpop.f32.mrb[9].mxu0  ;;  %v526_v1 = vadd.f32 %v937_v28, %v525_v62  ;;  %v527_v2 = vpop.f32.mrb[9].mxu1 }
 0x110   : > { %v488_v3 = vpop.f32.mrb[10].mxu0  ;;  %v528_v4 = vpop.f32.mrb[10].mxu1 }
 0x111   : > { %v544_v5 = vmax.f32 %v486_v63, 0.0  ;;  %v489_v6 = vadd.f32 %v937_v28, %v488_v3  ;;  %v490_v7 = vpop.f32.mrb[11].mxu0  ;;  %v554_v8 = vmax.f32 %v526_v1, 0.0  ;;  %v529_v9 = vadd.f32 %v937_v28, %v528_v4  ;;  %v530_v10 = vpop.f32.mrb[11].mxu1 }
 0x113   : > { %562 = vst [vmem:[%s946_s20 + $0x20] sm:$0xff] %v544_v5  ;;  %v545_v11 = vmax.f32 %v489_v6, 0.0  ;;  %572 = vst [vmem:[%s946_s20 + $0x70] sm:$0xff] %v554_v8  ;;  %v555_v12 = vmax.f32 %v529_v9, 0.0 }
 0x115   : > { %563 = vst [vmem:[%s946_s20 + $0x28] sm:$0xff] %v545_v11  ;;  %573 = vst [vmem:[%s946_s20 + $0x78] sm:$0xff] %v555_v12 }
 0x116   : > { %v493_v13 = vpop.f32.mrb[12].mxu0  ;;  %v533_v14 = vpop.f32.mrb[12].mxu1 }
 0x117   : > { %v494_v15 = vadd.f32 %v937_v28, %v493_v13  ;;  %v495_v16 = vpop.f32.mrb[13].mxu0  ;;  %v534_v17 = vadd.f32 %v937_v28, %v533_v14  ;;  %v535_v18 = vpop.f32.mrb[13].mxu1 }
 0x118   : > { %v496_v19 = vpop.f32.mrb[14].mxu0  ;;  %v536_v20 = vpop.f32.mrb[14].mxu1 }
 0x119   : > { %v546_v21 = vmax.f32 %v494_v15, 0.0  ;;  %v497_v22 = vadd.f32 %v937_v28, %v496_v19  ;;  %v498_v23 = vpop.f32.mrb[15].mxu0  ;;  %v556_v24 = vmax.f32 %v534_v17, 0.0  ;;  %v537_v25 = vadd.f32 %v937_v28, %v536_v20  ;;  %v538_v26 = vpop.f32.mrb[15].mxu1 }
 0x11b   : > { %564 = vst [vmem:[%s946_s20 + $0x30] sm:$0xff] %v546_v21  ;;  %v547_v27 = vmax.f32 %v497_v22, 0.0  ;;  %574 = vst [vmem:[%s946_s20 + $0x80] sm:$0xff] %v556_v24  ;;  %v557_v29 = vmax.f32 %v537_v25, 0.0 }
 0x11d   : > { %565 = vst [vmem:[%s946_s20 + $0x38] sm:$0xff] %v547_v27  ;;  %575 = vst [vmem:[%s946_s20 + $0x88] sm:$0xff] %v557_v29 }
 0x11e   : > { %v501_v30 = vpop.f32.mrb[16].mxu0 }
 0x11f   : > { %v502_v31 = vadd.f32 %v937_v28, %v501_v30  ;;  %v503_v32 = vpop.f32.mrb[17].mxu0 }
 0x120   : > { %v504_v33 = vpop.f32.mrb[18].mxu0 }
 0x121   : > { %v548_v34 = vmax.f32 %v502_v31, 0.0  ;;  %v505_v35 = vadd.f32 %v937_v28, %v504_v33  ;;  %v506_v36 = vpop.f32.mrb[19].mxu0 }
 0x123   : > { %566 = vst [vmem:[%s946_s20 + $0x40] sm:$0xff] %v548_v34  ;;  %v549_v37 = vmax.f32 %v505_v35, 0.0 }
 0x125   : > { %567 = vst [vmem:[%s946_s20 + $0x48] sm:$0xff] %v549_v37 }
 0x126 PF: > { %s13_s14 = sadd.s32 1, %s829_s14   ;;  %s995_s12 = smov %s825_s13 }
 0x127   : > { %p10_p5 = scmp.ge.s32.totalorder %s13_s14, 4   ;;  %s996_s13 = smov %s998_s15 }
 0x129   :  { %12 = sbr.rel (!%p10_p5) target bundleno = 2 (0x2), region = 68 }

// kernel: ez_detect_forward.75
= control target key start
LH: loop header
LB: loop body
LE: loop exit
PB: predicated region body
PF: predicated region fallthrough
CT: control target
= control target key end

     0   :  { %s735_s12 = smov 0   ;;  %s737_s13 = smov 0   ;;  %s839_s0 = inlined_call_operand.vmem [shape: bf16[288,32], index: 0, kind: input, shape index: {}]   ;;  %s840_s1 = inlined_call_operand.vmem [shape: bf16[32,128], index: 1, kind: input, shape index: {}]   ;;  %s841_s2 = inlined_call_operand.vmem [shape: f32[1,128], index: 2, kind: input, shape index: {}]   ;;  %s842_s3 = inlined_call_operand.vmem [shape: f32[288,128], index: 3, kind: output, shape index: {}]  }
   0x1   :  { %s739_s14 = smov 0  }
   0x2 LB: > { %s25_s15 = sadd.s32 1, %s707_s13  ;;  %p571_p0 = scmp.ge.s32.totalorder %s711_s14, 1  ;;  %s711_s14 = sphi %s739_s14, %s13_s14   ;;  %s707_s13 = sphi %s737_s13, %s844_s13   ;;  %s703_s12 = sphi %s735_s12, %s843_s12  }
   0x3   : > { %p27_p1 = scmp.ge.s32.totalorder %s25_s15, 2  ;;  %p169_p2 = scmp.lt.s32.totalorder %s711_s14, 3 }
   0x5   : > { %s846_s15 = smov (%p27_p1, %s25_s15), 0  ;;  %p170_p3 = pnand %p571_p0, %p169_p2 }
   0x6   : > { %v678_v0 = vld [vmem:[%s840_s1] sm:$0xff] (!%p170_p3)   ;;  %v713_v1 = vmov (!%p170_p3), 0.0   ;;  %v679_v2 = vld [vmem:[%s840_s1 + $0x8] sm:$0xff] (!%p170_p3)   ;;  %s203_s20 = smul.u32 (!%p170_p3), 18, %s703_s12  ;;  %vm714_vm0 = vmmov (!%p170_p3), 0   ;;  %vm312_vm1 = vcmask (!%p170_p3), 261120  }
   0x7   : > { %173 = sbr.rel (%p170_p3) target bundleno = 267 (0x10b), region = 32  ;;  %608 = vmatprep.subr.bf16.mxu0 (!%p170_p3), %v713_v1  ;;  %648 = vmatprep.subr.bf16.mxu1 (!%p170_p3), %v713_v1  ;;  %v787_v12 = vld [vmem:[%s841_s2] ss:$0 sm:$0xff] (!%p170_p3) }
   0x8   : > { %609 = vmatpush3.bf16.msra.mxu0 (!%p170_p3), %v678_v0  ;;  %650 = vmatpush3.bf16.msra.mxu1 (!%p170_p3), %v678_v0  ;;  %p204_p4 = scmp.lt.s32.totalorder (!%p170_p3), %s203_s20, 35 }
   0x9   : > { %610 = vmatprep.subr.bf16.mxu0 (!%p170_p3), %v713_v1  ;;  %612 = vmatprep.mubr.msk.bf16.mxu0 (!%p170_p3), %vm714_vm0, %v713_v1 }
   0xa   : > { %649 = vmatprep.subr.bf16.mxu1 (!%p170_p3), %v713_v1  ;;  %632 = vmatprep.mubr.msk.bf16.mxu1 (!%p170_p3), %vm714_vm0, %v713_v1 }
   0xc   : > { %611 = vmatpush3.bf16.msra.mxu0 (!%p170_p3), %v679_v2  ;;  %651 = vmatpush3.bf16.msra.mxu1 (!%p170_p3), %v679_v2 }
   0xe   : > { %s848_s20 = smov (!%p204_p4, %s203_s20), 35 }
   0xf   : > { %s572_s21 = sshll.u32 %s848_s20, 2  ;;  %s573_s25 = sshll.u32 %s848_s20, 3 }
  0x10   : > { %s207_s24 = scalar_lea.vmem %s839_s0, %s572_s21  ;;  %s792_s30 = scalar_lea.vmem %s842_s3, %s573_s25 }
  0x11   : > { %v680_v3 = vld [vmem:[%s207_s24] sm:$0xff]   ;;  %v681_v4 = vld [vmem:[%s207_s24 + $0x28] sm:$0xff]   ;;  %v683_v6 = vld [vmem:[%s207_s24 + $0x30] sm:$0xff]  }
  0x12   : > { %613 = vmatmul.mubr.msk.bf16.vlgmr.msra.gmra.mrb[0].mxu0 %vm312_vm1, %v680_v3  ;;  %633 = vmatmul.mubr.msk.bf16.vlgmr.msra.gmra.mrb[0].mxu1 %vm312_vm1, %v681_v4  ;;  %v682_v5 = vld [vmem:[%s207_s24 + $0x8] sm:$0xff]   ;;  %v684_v7 = vld [vmem:[%s207_s24 + $0x10] sm:$0xff]   ;;  %v685_v8 = vld [vmem:[%s207_s24 + $0x38] sm:$0xff]  }
  0x13   : > { %616 = vmatprep.mubr.msk.bf16.mxu0 %vm714_vm0, %v713_v1  ;;  %636 = vmatprep.mubr.msk.bf16.mxu1 %vm714_vm0, %v713_v1  ;;  %v686_v9 = vld [vmem:[%s207_s24 + $0x18] sm:$0xff]   ;;  %v687_v10 = vld [vmem:[%s207_s24 + $0x40] sm:$0xff]  }
  0x14   : > { %v688_v11 = vld [vmem:[%s207_s24 + $0x20] sm:$0xff]  }
  0x1a   : > { %617 = vmatmul.mubr.msk.bf16.gmra.mrb[4].mxu0 %vm312_vm1, %v682_v5  ;;  %637 = vmatmul.mubr.msk.bf16.gmra.mrb[4].mxu1 %vm312_vm1, %v683_v6 }
  0x1b   : > { %620 = vmatprep.mubr.msk.bf16.mxu0 %vm714_vm0, %v713_v1  ;;  %640 = vmatprep.mubr.msk.bf16.mxu1 %vm714_vm0, %v713_v1 }
  0x22   : > { %621 = vmatmul.mubr.msk.bf16.gmra.mrb[8].mxu0 %vm312_vm1, %v684_v7  ;;  %641 = vmatmul.mubr.msk.bf16.gmra.mrb[8].mxu1 %vm312_vm1, %v685_v8 }
  0x23   : > { %624 = vmatprep.mubr.msk.bf16.mxu0 %vm714_vm0, %v713_v1  ;;  %644 = vmatprep.mubr.msk.bf16.mxu1 %vm714_vm0, %v713_v1 }
  0x2a   : > { %625 = vmatmul.mubr.msk.bf16.gmra.mrb[12].mxu0 %vm312_vm1, %v686_v9  ;;  %645 = vmatmul.mubr.msk.bf16.gmra.mrb[12].mxu1 %vm312_vm1, %v687_v10 }
  0x2b   : > { %628 = vmatprep.mubr.msk.bf16.mxu0 %vm714_vm0, %v713_v1 }
  0x32   : > { %629 = vmatmul.mubr.msk.bf16.gmra.mrb[16].mxu0 %vm312_vm1, %v688_v11 }
  0xe5   : > { %v374_v13 = vpop.f32.mrb[0].mxu0  ;;  %v414_v16 = vpop.f32.mrb[0].mxu1 }
  0xe6   : > { %v375_v14 = vadd.f32 %v787_v12, %v374_v13  ;;  %v614_v15 = vpop.f32.mrb[1].mxu0  ;;  %v415_v18 = vadd.f32 %v787_v12, %v414_v16  ;;  %v634_v19 = vpop.f32.mrb[1].mxu1 }
  0xe7   : > { %v377_v17 = vpop.f32.mrb[2].mxu0  ;;  %v417_v22 = vpop.f32.mrb[2].mxu1 }
  0xe8   : > { %445 = vst [vmem:[%s792_s30] sm:$0xff] %v375_v14  ;;  %v378_v20 = vadd.f32 %v787_v12, %v377_v17  ;;  %v615_v21 = vpop.f32.mrb[3].mxu0  ;;  %455 = vst [vmem:[%s792_s30 + $0x50] sm:$0xff] %v415_v18  ;;  %v418_v23 = vadd.f32 %v787_v12, %v417_v22  ;;  %v635_v24 = vpop.f32.mrb[3].mxu1 }
  0xea   : > { %446 = vst [vmem:[%s792_s30 + $0x8] sm:$0xff] %v378_v20  ;;  %456 = vst [vmem:[%s792_s30 + $0x58] sm:$0xff] %v418_v23 }
  0xed   : > { %v382_v25 = vpop.f32.mrb[4].mxu0  ;;  %v422_v28 = vpop.f32.mrb[4].mxu1 }
  0xee   : > { %v383_v26 = vadd.f32 %v787_v12, %v382_v25  ;;  %v618_v27 = vpop.f32.mrb[5].mxu0  ;;  %v423_v30 = vadd.f32 %v787_v12, %v422_v28  ;;  %v638_v31 = vpop.f32.mrb[5].mxu1 }
  0xef   : > { %v385_v29 = vpop.f32.mrb[6].mxu0  ;;  %v425_v34 = vpop.f32.mrb[6].mxu1 }
  0xf0   : > { %447 = vst [vmem:[%s792_s30 + $0x10] sm:$0xff] %v383_v26  ;;  %v386_v32 = vadd.f32 %v787_v12, %v385_v29  ;;  %v619_v33 = vpop.f32.mrb[7].mxu0  ;;  %457 = vst [vmem:[%s792_s30 + $0x60] sm:$0xff] %v423_v30  ;;  %v426_v35 = vadd.f32 %v787_v12, %v425_v34  ;;  %v639_v36 = vpop.f32.mrb[7].mxu1 }
  0xf2   : > { %448 = vst [vmem:[%s792_s30 + $0x18] sm:$0xff] %v386_v32  ;;  %458 = vst [vmem:[%s792_s30 + $0x68] sm:$0xff] %v426_v35 }
  0xf5   : > { %v390_v37 = vpop.f32.mrb[8].mxu0  ;;  %v430_v40 = vpop.f32.mrb[8].mxu1 }
  0xf6   : > { %v391_v38 = vadd.f32 %v787_v12, %v390_v37  ;;  %v622_v39 = vpop.f32.mrb[9].mxu0  ;;  %v431_v42 = vadd.f32 %v787_v12, %v430_v40  ;;  %v642_v43 = vpop.f32.mrb[9].mxu1 }
  0xf7   : > { %v393_v41 = vpop.f32.mrb[10].mxu0  ;;  %v433_v46 = vpop.f32.mrb[10].mxu1 }
  0xf8   : > { %449 = vst [vmem:[%s792_s30 + $0x20] sm:$0xff] %v391_v38  ;;  %v394_v44 = vadd.f32 %v787_v12, %v393_v41  ;;  %v623_v45 = vpop.f32.mrb[11].mxu0  ;;  %459 = vst [vmem:[%s792_s30 + $0x70] sm:$0xff] %v431_v42  ;;  %v434_v47 = vadd.f32 %v787_v12, %v433_v46  ;;  %v643_v48 = vpop.f32.mrb[11].mxu1 }
  0xfa   : > { %450 = vst [vmem:[%s792_s30 + $0x28] sm:$0xff] %v394_v44  ;;  %460 = vst [vmem:[%s792_s30 + $0x78] sm:$0xff] %v434_v47 }
  0xfd   : > { %v398_v49 = vpop.f32.mrb[12].mxu0  ;;  %v438_v52 = vpop.f32.mrb[12].mxu1 }
  0xfe   : > { %v399_v50 = vadd.f32 %v787_v12, %v398_v49  ;;  %v626_v51 = vpop.f32.mrb[13].mxu0  ;;  %v439_v54 = vadd.f32 %v787_v12, %v438_v52  ;;  %v646_v55 = vpop.f32.mrb[13].mxu1 }
  0xff   : > { %v401_v53 = vpop.f32.mrb[14].mxu0  ;;  %v441_v58 = vpop.f32.mrb[14].mxu1 }
 0x100   : > { %451 = vst [vmem:[%s792_s30 + $0x30] sm:$0xff] %v399_v50  ;;  %v402_v56 = vadd.f32 %v787_v12, %v401_v53  ;;  %v627_v57 = vpop.f32.mrb[15].mxu0  ;;  %461 = vst [vmem:[%s792_s30 + $0x80] sm:$0xff] %v439_v54  ;;  %v442_v59 = vadd.f32 %v787_v12, %v441_v58  ;;  %v647_v60 = vpop.f32.mrb[15].mxu1 }
 0x102   : > { %452 = vst [vmem:[%s792_s30 + $0x38] sm:$0xff] %v402_v56  ;;  %462 = vst [vmem:[%s792_s30 + $0x88] sm:$0xff] %v442_v59 }
 0x105   : > { %v406_v61 = vpop.f32.mrb[16].mxu0 }
 0x106   : > { %v407_v62 = vadd.f32 %v787_v12, %v406_v61  ;;  %v630_v63 = vpop.f32.mrb[17].mxu0 }
 0x107   : > { %v409_v0 = vpop.f32.mrb[18].mxu0 }
 0x108   : > { %453 = vst [vmem:[%s792_s30 + $0x40] sm:$0xff] %v407_v62  ;;  %v410_v1 = vadd.f32 %v787_v12, %v409_v0  ;;  %v631_v2 = vpop.f32.mrb[19].mxu0 }
 0x10a   : > { %454 = vst [vmem:[%s792_s30 + $0x48] sm:$0xff] %v410_v1 }
 0x10b PF: > { %s13_s14 = sadd.s32 1, %s711_s14   ;;  %s843_s12 = smov %s707_s13 }
 0x10c   : > { %p10_p5 = scmp.ge.s32.totalorder %s13_s14, 4   ;;  %s844_s13 = smov %s846_s15 }
 0x10e   :  { %12 = sbr.rel (!%p10_p5) target bundleno = 2 (0x2), region = 68 }

// kernel: ez_detect_forward.76
= control target key start
LH: loop header
LB: loop body
LE: loop exit
PB: predicated region body
PF: predicated region fallthrough
CT: control target
= control target key end

     0   :  { %s855_s15 = smov 0   ;;  %s857_s16 = smov 0   ;;  %s979_s0 = inlined_call_operand.vmem [shape: bf16[288,16], index: 0, kind: input, shape index: {}]   ;;  %s980_s1 = inlined_call_operand.vmem [shape: bf16[16,128], index: 1, kind: input, shape index: {}]   ;;  %s981_s2 = inlined_call_operand.vmem [shape: f32[1,128], index: 2, kind: input, shape index: {}]   ;;  %s982_s3 = inlined_call_operand.vmem [shape: f32[288,128], index: 3, kind: input, shape index: {}]   ;;  %s983_s4 = inlined_call_operand.vmem [shape: f32[288,128], index: 4, kind: output, shape index: {}]  }
   0x1   :  { %s859_s17 = smov 0  }
   0x2 LB: > { %s26_s18 = sadd.s32 1, %s822_s16  ;;  %p692_p0 = scmp.ge.s32.totalorder %s826_s17, 1  ;;  %s826_s17 = sphi %s859_s17, %s14_s17   ;;  %s822_s16 = sphi %s857_s16, %s985_s16   ;;  %s818_s15 = sphi %s855_s15, %s984_s15  }
   0x3   : > { %p28_p1 = scmp.ge.s32.totalorder %s26_s18, 2  ;;  %p210_p2 = scmp.lt.s32.totalorder %s826_s17, 3 }
   0x5   : > { %s987_s18 = smov (%p28_p1, %s26_s18), 0  ;;  %p211_p3 = pnand %p692_p0, %p210_p2 }
   0x6   : > { %v794_v0 = vld [vmem:[%s980_s1] sm:$0xff] (!%p211_p3)   ;;  %v828_v1 = vmov (!%p211_p3), 0.0   ;;  %s254_s21 = smul.u32 (!%p211_p3), 18, %s818_s15  ;;  %vm829_vm0 = vmmov (!%p211_p3), 0   ;;  %vm364_vm1 = vcmask (!%p211_p3), 130048  }
   0x7   : > { %214 = sbr.rel (%p211_p3) target bundleno = 271 (0x10f), region = 36  ;;  %728 = vmatprep.subr.bf16.mxu0 (!%p211_p3), %v828_v1  ;;  %766 = vmatprep.subr.bf16.mxu1 (!%p211_p3), %v828_v1  ;;  %v909_v11 = vld [vmem:[%s981_s2] ss:$0 sm:$0xff] (!%p211_p3) }
   0x8   : > { %729 = vmatpush3.bf16.msra.mxu0 (!%p211_p3), %v794_v0  ;;  %730 = vmatprep.mubr.msk.bf16.mxu0 (!%p211_p3), %vm829_vm0, %v828_v1  ;;  %p255_p4 = scmp.lt.s32.totalorder (!%p211_p3), %s254_s21, 35 }
   0x9   : > { %767 = vmatpush3.bf16.msra.mxu1 (!%p211_p3), %v794_v0  ;;  %750 = vmatprep.mubr.msk.bf16.mxu1 (!%p211_p3), %vm829_vm0, %v828_v1 }
   0xe   : > { %s989_s21 = smov (!%p255_p4, %s254_s21), 35 }
   0xf   : > { %s693_s22 = sshll.u32 %s989_s21, 2  ;;  %s694_s26 = sshll.u32 %s989_s21, 3 }
  0x10   : > { %s258_s25 = scalar_lea.vmem %s979_s0, %s693_s22  ;;  %s904_s29 = scalar_lea.vmem %s982_s3, %s694_s26 }
  0x11   : > { %v795_v2 = vld [vmem:[%s258_s25] sm:$0xff]   ;;  %v796_v3 = vld [vmem:[%s258_s25 + $0x28] sm:$0xff]   ;;  %v798_v5 = vld [vmem:[%s258_s25 + $0x30] sm:$0xff]   ;;  %s921_s8 = scalar_lea.vmem %s983_s4, %s694_s26 }
  0x12   : > { %731 = vmatmul.mubr.msk.bf16.vlgmr.msra.gmra.mrb[0].mxu0 %vm364_vm1, %v795_v2  ;;  %751 = vmatmul.mubr.msk.bf16.vlgmr.msra.gmra.mrb[0].mxu1 %vm364_vm1, %v796_v3  ;;  %v797_v4 = vld [vmem:[%s258_s25 + $0x8] sm:$0xff]   ;;  %v799_v6 = vld [vmem:[%s258_s25 + $0x10] sm:$0xff]   ;;  %v800_v7 = vld [vmem:[%s258_s25 + $0x38] sm:$0xff]  }
  0x13   : > { %734 = vmatprep.mubr.msk.bf16.mxu0 %vm829_vm0, %v828_v1  ;;  %754 = vmatprep.mubr.msk.bf16.mxu1 %vm829_vm0, %v828_v1  ;;  %v801_v8 = vld [vmem:[%s258_s25 + $0x18] sm:$0xff]   ;;  %v802_v9 = vld [vmem:[%s258_s25 + $0x40] sm:$0xff]   ;;  %v507_v17 = vld [vmem:[%s904_s29 + $0x50] sm:$0xff] }
  0x14   : > { %v803_v10 = vld [vmem:[%s258_s25 + $0x20] sm:$0xff]   ;;  %v498_v19 = vld [vmem:[%s904_s29 + $0x8] sm:$0xff]  ;;  %v508_v26 = vld [vmem:[%s904_s29 + $0x58] sm:$0xff] }
  0x15   : > { %v497_v13 = vld [vmem:[%s904_s29] sm:$0xff]  ;;  %v499_v37 = vld [vmem:[%s904_s29 + $0x10] sm:$0xff]  ;;  %v500_v43 = vld [vmem:[%s904_s29 + $0x18] sm:$0xff] }
  0x16   : > { %v509_v41 = vld [vmem:[%s904_s29 + $0x60] sm:$0xff]  ;;  %v510_v50 = vld [vmem:[%s904_s29 + $0x68] sm:$0xff] }
  0x17   : > { %v501_v61 = vld [vmem:[%s904_s29 + $0x20] sm:$0xff]  ;;  %v502_v3 = vld [vmem:[%s904_s29 + $0x28] sm:$0xff] }
  0x1a   : > { %735 = vmatmul.mubr.msk.bf16.gmra.mrb[4].mxu0 %vm364_vm1, %v797_v4  ;;  %755 = vmatmul.mubr.msk.bf16.gmra.mrb[4].mxu1 %vm364_vm1, %v798_v5 }
  0x1b   : > { %738 = vmatprep.mubr.msk.bf16.mxu0 %vm829_vm0, %v828_v1  ;;  %758 = vmatprep.mubr.msk.bf16.mxu1 %vm829_vm0, %v828_v1 }
  0x22   : > { %739 = vmatmul.mubr.msk.bf16.gmra.mrb[8].mxu0 %vm364_vm1, %v799_v6  ;;  %759 = vmatmul.mubr.msk.bf16.gmra.mrb[8].mxu1 %vm364_vm1, %v800_v7 }
  0x23   : > { %742 = vmatprep.mubr.msk.bf16.mxu0 %vm829_vm0, %v828_v1  ;;  %762 = vmatprep.mubr.msk.bf16.mxu1 %vm829_vm0, %v828_v1 }
  0x2a   : > { %743 = vmatmul.mubr.msk.bf16.gmra.mrb[12].mxu0 %vm364_vm1, %v801_v8  ;;  %763 = vmatmul.mubr.msk.bf16.gmra.mrb[12].mxu1 %vm364_vm1, %v802_v9 }
  0x2b   : > { %746 = vmatprep.mubr.msk.bf16.mxu0 %vm829_vm0, %v828_v1  ;;  %v511_v1 = vld [vmem:[%s904_s29 + $0x70] sm:$0xff] }
  0x32   : > { %747 = vmatmul.mubr.msk.bf16.gmra.mrb[16].mxu0 %vm364_vm1, %v803_v10  ;;  %v512_v10 = vld [vmem:[%s904_s29 + $0x78] sm:$0xff] }
  0xe5   : > { %v426_v12 = vpop.f32.mrb[0].mxu0  ;;  %v466_v16 = vpop.f32.mrb[0].mxu1 }
  0xe6   : > { %v427_v14 = vadd.f32 %v909_v11, %v426_v12  ;;  %v732_v15 = vpop.f32.mrb[1].mxu0  ;;  %v467_v20 = vadd.f32 %v909_v11, %v466_v16  ;;  %v752_v21 = vpop.f32.mrb[1].mxu1 }
  0xe7   : > { %v429_v18 = vpop.f32.mrb[2].mxu0  ;;  %v469_v25 = vpop.f32.mrb[2].mxu1 }
  0xe8   : > { %v515_v22 = vadd.f32 %v497_v13, %v427_v14  ;;  %v430_v23 = vadd.f32 %v909_v11, %v429_v18  ;;  %v733_v24 = vpop.f32.mrb[3].mxu0  ;;  %v525_v27 = vadd.f32 %v507_v17, %v467_v20  ;;  %v470_v28 = vadd.f32 %v909_v11, %v469_v25  ;;  %v753_v29 = vpop.f32.mrb[3].mxu1 }
  0xea   : > { %v533_v30 = vmax.f32 %v515_v22, 0.0  ;;  %v516_v31 = vadd.f32 %v498_v19, %v430_v23  ;;  %v543_v32 = vmax.f32 %v525_v27, 0.0  ;;  %v526_v33 = vadd.f32 %v508_v26, %v470_v28  ;;  %v503_v22 = vld [vmem:[%s904_s29 + $0x30] sm:$0xff]  ;;  %v513_v26 = vld [vmem:[%s904_s29 + $0x80] sm:$0xff]  ;;  %v504_v28 = vld [vmem:[%s904_s29 + $0x38] sm:$0xff] }
  0xec   : > { %551 = vst [vmem:[%s921_s8] sm:$0xff] %v533_v30  ;;  %v534_v34 = vmax.f32 %v516_v31, 0.0  ;;  %561 = vst [vmem:[%s921_s8 + $0x50] sm:$0xff] %v543_v32  ;;  %v544_v35 = vmax.f32 %v526_v33, 0.0 }
  0xed   : > { %v434_v36 = vpop.f32.mrb[4].mxu0  ;;  %v474_v40 = vpop.f32.mrb[4].mxu1 }
  0xee   : > { %552 = vst [vmem:[%s921_s8 + $0x8] sm:$0xff] %v534_v34  ;;  %v435_v38 = vadd.f32 %v909_v11, %v434_v36  ;;  %v736_v39 = vpop.f32.mrb[5].mxu0  ;;  %562 = vst [vmem:[%s921_s8 + $0x58] sm:$0xff] %v544_v35  ;;  %v475_v44 = vadd.f32 %v909_v11, %v474_v40  ;;  %v756_v45 = vpop.f32.mrb[5].mxu1  ;;  %v514_v35 = vld [vmem:[%s904_s29 + $0x88] sm:$0xff] }
  0xef   : > { %v437_v42 = vpop.f32.mrb[6].mxu0  ;;  %v477_v49 = vpop.f32.mrb[6].mxu1 }
  0xf0   : > { %v517_v46 = vadd.f32 %v499_v37, %v435_v38  ;;  %v438_v47 = vadd.f32 %v909_v11, %v437_v42  ;;  %v737_v48 = vpop.f32.mrb[7].mxu0  ;;  %v527_v51 = vadd.f32 %v509_v41, %v475_v44  ;;  %v478_v52 = vadd.f32 %v909_v11, %v477_v49  ;;  %v757_v53 = vpop.f32.mrb[7].mxu1 }
  0xf2   : > { %v535_v54 = vmax.f32 %v517_v46, 0.0  ;;  %v518_v55 = vadd.f32 %v500_v43, %v438_v47  ;;  %v545_v56 = vmax.f32 %v527_v51, 0.0  ;;  %v528_v57 = vadd.f32 %v510_v50, %v478_v52  ;;  %v505_v46 = vld [vmem:[%s904_s29 + $0x40] sm:$0xff]  ;;  %v506_v50 = vld [vmem:[%s904_s29 + $0x48] sm:$0xff] }
  0xf4   : > { %553 = vst [vmem:[%s921_s8 + $0x10] sm:$0xff] %v535_v54  ;;  %v536_v58 = vmax.f32 %v518_v55, 0.0  ;;  %563 = vst [vmem:[%s921_s8 + $0x60] sm:$0xff] %v545_v56  ;;  %v546_v59 = vmax.f32 %v528_v57, 0.0 }
  0xf5   : > { %v442_v60 = vpop.f32.mrb[8].mxu0  ;;  %v482_v0 = vpop.f32.mrb[8].mxu1 }
  0xf6   : > { %554 = vst [vmem:[%s921_s8 + $0x18] sm:$0xff] %v536_v58  ;;  %v443_v62 = vadd.f32 %v909_v11, %v442_v60  ;;  %v740_v63 = vpop.f32.mrb[9].mxu0  ;;  %564 = vst [vmem:[%s921_s8 + $0x68] sm:$0xff] %v546_v59  ;;  %v483_v4 = vadd.f32 %v909_v11, %v482_v0  ;;  %v760_v5 = vpop.f32.mrb[9].mxu1 }
  0xf7   : > { %v445_v2 = vpop.f32.mrb[10].mxu0  ;;  %v485_v9 = vpop.f32.mrb[10].mxu1 }
  0xf8   : > { %v519_v6 = vadd.f32 %v501_v61, %v443_v62  ;;  %v446_v7 = vadd.f32 %v909_v11, %v445_v2  ;;  %v741_v8 = vpop.f32.mrb[11].mxu0  ;;  %v529_v12 = vadd.f32 %v511_v1, %v483_v4  ;;  %v486_v13 = vadd.f32 %v909_v11, %v485_v9  ;;  %v761_v14 = vpop.f32.mrb[11].mxu1 }
  0xfa   : > { %v537_v15 = vmax.f32 %v519_v6, 0.0  ;;  %v520_v16 = vadd.f32 %v502_v3, %v446_v7  ;;  %v547_v17 = vmax.f32 %v529_v12, 0.0  ;;  %v530_v18 = vadd.f32 %v512_v10, %v486_v13 }
  0xfc   : > { %555 = vst [vmem:[%s921_s8 + $0x20] sm:$0xff] %v537_v15  ;;  %v538_v19 = vmax.f32 %v520_v16, 0.0  ;;  %565 = vst [vmem:[%s921_s8 + $0x70] sm:$0xff] %v547_v17  ;;  %v548_v20 = vmax.f32 %v530_v18, 0.0 }
  0xfd   : > { %v450_v21 = vpop.f32.mrb[12].mxu0  ;;  %v490_v25 = vpop.f32.mrb[12].mxu1 }
  0xfe   : > { %556 = vst [vmem:[%s921_s8 + $0x28] sm:$0xff] %v538_v19  ;;  %v451_v23 = vadd.f32 %v909_v11, %v450_v21  ;;  %v744_v24 = vpop.f32.mrb[13].mxu0  ;;  %566 = vst [vmem:[%s921_s8 + $0x78] sm:$0xff] %v548_v20  ;;  %v491_v29 = vadd.f32 %v909_v11, %v490_v25  ;;  %v764_v30 = vpop.f32.mrb[13].mxu1 }
  0xff   : > { %v453_v27 = vpop.f32.mrb[14].mxu0  ;;  %v493_v34 = vpop.f32.mrb[14].mxu1 }
 0x100   : > { %v521_v31 = vadd.f32 %v503_v22, %v451_v23  ;;  %v454_v32 = vadd.f32 %v909_v11, %v453_v27  ;;  %v745_v33 = vpop.f32.mrb[15].mxu0  ;;  %v531_v36 = vadd.f32 %v513_v26, %v491_v29  ;;  %v494_v37 = vadd.f32 %v909_v11, %v493_v34  ;;  %v765_v38 = vpop.f32.mrb[15].mxu1 }
 0x102   : > { %v539_v39 = vmax.f32 %v521_v31, 0.0  ;;  %v522_v40 = vadd.f32 %v504_v28, %v454_v32  ;;  %v549_v41 = vmax.f32 %v531_v36, 0.0  ;;  %v532_v42 = vadd.f32 %v514_v35, %v494_v37 }
 0x104   : > { %557 = vst [vmem:[%s921_s8 + $0x30] sm:$0xff] %v539_v39  ;;  %v540_v43 = vmax.f32 %v522_v40, 0.0  ;;  %567 = vst [vmem:[%s921_s8 + $0x80] sm:$0xff] %v549_v41  ;;  %v550_v44 = vmax.f32 %v532_v42, 0.0 }
 0x105   : > { %v458_v45 = vpop.f32.mrb[16].mxu0 }
 0x106   : > { %558 = vst [vmem:[%s921_s8 + $0x38] sm:$0xff] %v540_v43  ;;  %v459_v47 = vadd.f32 %v909_v11, %v458_v45  ;;  %v748_v48 = vpop.f32.mrb[17].mxu0  ;;  %568 = vst [vmem:[%s921_s8 + $0x88] sm:$0xff] %v550_v44 }
 0x107   : > { %v461_v49 = vpop.f32.mrb[18].mxu0 }
 0x108   : > { %v523_v51 = vadd.f32 %v505_v46, %v459_v47  ;;  %v462_v52 = vadd.f32 %v909_v11, %v461_v49  ;;  %v749_v53 = vpop.f32.mrb[19].mxu0 }
 0x10a   : > { %v541_v54 = vmax.f32 %v523_v51, 0.0  ;;  %v524_v55 = vadd.f32 %v506_v50, %v462_v52 }
 0x10c   : > { %559 = vst [vmem:[%s921_s8 + $0x40] sm:$0xff] %v541_v54  ;;  %v542_v56 = vmax.f32 %v524_v55, 0.0 }
 0x10e   : > { %560 = vst [vmem:[%s921_s8 + $0x48] sm:$0xff] %v542_v56 }
 0x10f PF: > { %s14_s17 = sadd.s32 1, %s826_s17   ;;  %s984_s15 = smov %s822_s16 }
 0x110   : > { %p11_p5 = scmp.ge.s32.totalorder %s14_s17, 4   ;;  %s985_s16 = smov %s987_s18 }
 0x112   :  { %13 = sbr.rel (!%p11_p5) target bundleno = 2 (0x2), region = 75 }

// kernel: ez_detect_forward.77
= control target key start
LH: loop header
LB: loop body
LE: loop exit
PB: predicated region body
PF: predicated region fallthrough
CT: control target
= control target key end

     0   :  { %s783_s12 = smov 0   ;;  %s785_s13 = smov 0   ;;  %s904_s0 = inlined_call_operand.vmem [shape: bf16[288,64], index: 0, kind: input, shape index: {}]   ;;  %s905_s1 = inlined_call_operand.vmem [shape: bf16[64,128], index: 1, kind: input, shape index: {}]   ;;  %s906_s2 = inlined_call_operand.vmem [shape: f32[1,128], index: 2, kind: input, shape index: {}]   ;;  %s907_s3 = inlined_call_operand.vmem [shape: f32[288,128], index: 3, kind: output, shape index: {}]  }
   0x1   :  { %s787_s14 = smov 0  }
   0x2 LB: > { %s25_s15 = sadd.s32 1, %s755_s13  ;;  %p605_p0 = scmp.ge.s32.totalorder %s759_s14, 1  ;;  %s759_s14 = sphi %s787_s14, %s13_s14   ;;  %s755_s13 = sphi %s785_s13, %s909_s13   ;;  %s751_s12 = sphi %s783_s12, %s908_s12  }
   0x3   : > { %p27_p1 = scmp.ge.s32.totalorder %s25_s15, 2  ;;  %p169_p2 = scmp.lt.s32.totalorder %s759_s14, 3 }
   0x5   : > { %s911_s15 = smov (%p27_p1, %s25_s15), 0  ;;  %p170_p3 = pnand %p605_p0, %p169_p2 }
   0x6   : > { %v724_v0 = vld [vmem:[%s905_s1] sm:$0xff] (!%p170_p3)   ;;  %v761_v1 = vmov (!%p170_p3), 0.0   ;;  %v725_v2 = vld [vmem:[%s905_s1 + $0x8] sm:$0xff] (!%p170_p3)   ;;  %s203_s20 = smul.u32 (!%p170_p3), 18, %s751_s12  ;;  %vm762_vm0 = vmmov (!%p170_p3), 0   ;;  %v726_v3 = vld [vmem:[%s905_s1 + $0x10] sm:$0xff] (!%p170_p3)  }
   0x7   : > { %173 = sbr.rel (%p170_p3) target bundleno = 274 (0x112), region = 32  ;;  %646 = vmatprep.subr.bf16.mxu0 (!%p170_p3), %v761_v1  ;;  %690 = vmatprep.subr.bf16.mxu1 (!%p170_p3), %v761_v1  ;;  %v727_v4 = vld [vmem:[%s905_s1 + $0x18] sm:$0xff] (!%p170_p3)   ;;  %vm328_vm1 = vcmask (!%p170_p3), 523264   ;;  %v851_v14 = vld [vmem:[%s906_s2] ss:$0 sm:$0xff] (!%p170_p3) }
   0x8   : > { %647 = vmatpush3.bf16.msra.mxu0 (!%p170_p3), %v724_v0  ;;  %694 = vmatpush3.bf16.msra.mxu1 (!%p170_p3), %v724_v0  ;;  %p204_p4 = scmp.lt.s32.totalorder (!%p170_p3), %s203_s20, 35 }
   0x9   : > { %648 = vmatprep.subr.bf16.mxu0 (!%p170_p3), %v761_v1  ;;  %691 = vmatprep.subr.bf16.mxu1 (!%p170_p3), %v761_v1 }
   0xa   : > { %654 = vmatprep.mubr.msk.bf16.mxu0 (!%p170_p3), %vm762_vm0, %v761_v1  ;;  %674 = vmatprep.mubr.msk.bf16.mxu1 (!%p170_p3), %vm762_vm0, %v761_v1 }
   0xc   : > { %649 = vmatpush3.bf16.msra.mxu0 (!%p170_p3), %v725_v2  ;;  %695 = vmatpush3.bf16.msra.mxu1 (!%p170_p3), %v725_v2 }
   0xd   : > { %650 = vmatprep.subr.bf16.mxu0 (!%p170_p3), %v761_v1  ;;  %692 = vmatprep.subr.bf16.mxu1 (!%p170_p3), %v761_v1 }
   0xe   : > { %s913_s20 = smov (!%p204_p4, %s203_s20), 35 }
   0xf   : > { %s606_s23 = sshll.u32 %s913_s20, 2  ;;  %s607_s4 = sshll.u32 %s913_s20, 3 }
  0x10   : > { %s818_s26 = scalar_lea.vmem %s904_s0, %s606_s23  ;;  %651 = vmatpush3.bf16.msra.mxu0 %v726_v3  ;;  %696 = vmatpush3.bf16.msra.mxu1 %v726_v3  ;;  %s859_s7 = scalar_lea.vmem %s907_s3, %s607_s4 }
  0x11   : > { %652 = vmatprep.subr.bf16.mxu0 %v761_v1  ;;  %693 = vmatprep.subr.bf16.mxu1 %v761_v1  ;;  %v728_v5 = vld [vmem:[%s818_s26] sm:$0xff]   ;;  %v729_v6 = vld [vmem:[%s818_s26 + $0x28] sm:$0xff]   ;;  %v731_v8 = vld [vmem:[%s818_s26 + $0x30] sm:$0xff]  }
  0x12   : > { %v730_v7 = vld [vmem:[%s818_s26 + $0x8] sm:$0xff]   ;;  %v732_v9 = vld [vmem:[%s818_s26 + $0x10] sm:$0xff]   ;;  %v733_v10 = vld [vmem:[%s818_s26 + $0x38] sm:$0xff]  }
  0x13   : > { %v734_v11 = vld [vmem:[%s818_s26 + $0x18] sm:$0xff]   ;;  %v735_v12 = vld [vmem:[%s818_s26 + $0x40] sm:$0xff]  }
  0x14   : > { %653 = vmatpush3.bf16.msra.mxu0 %v727_v4  ;;  %697 = vmatpush3.bf16.msra.mxu1 %v727_v4  ;;  %v736_v13 = vld [vmem:[%s818_s26 + $0x20] sm:$0xff]  }
  0x17   : > { %655 = vmatmul.mubr.msk.bf16.vlgmr.msra.gmra.mrb[0].mxu0 %vm328_vm1, %v728_v5  ;;  %675 = vmatmul.mubr.msk.bf16.vlgmr.msra.gmra.mrb[0].mxu1 %vm328_vm1, %v729_v6 }
  0x18   : > { %658 = vmatprep.mubr.msk.bf16.mxu0 %vm762_vm0, %v761_v1  ;;  %678 = vmatprep.mubr.msk.bf16.mxu1 %vm762_vm0, %v761_v1 }
  0x1f   : > { %659 = vmatmul.mubr.msk.bf16.gmra.mrb[4].mxu0 %vm328_vm1, %v730_v7  ;;  %679 = vmatmul.mubr.msk.bf16.gmra.mrb[4].mxu1 %vm328_vm1, %v731_v8 }
  0x20   : > { %662 = vmatprep.mubr.msk.bf16.mxu0 %vm762_vm0, %v761_v1  ;;  %682 = vmatprep.mubr.msk.bf16.mxu1 %vm762_vm0, %v761_v1 }
  0x27   : > { %663 = vmatmul.mubr.msk.bf16.gmra.mrb[8].mxu0 %vm328_vm1, %v732_v9  ;;  %683 = vmatmul.mubr.msk.bf16.gmra.mrb[8].mxu1 %vm328_vm1, %v733_v10 }
  0x28   : > { %666 = vmatprep.mubr.msk.bf16.mxu0 %vm762_vm0, %v761_v1  ;;  %686 = vmatprep.mubr.msk.bf16.mxu1 %vm762_vm0, %v761_v1 }
  0x2f   : > { %667 = vmatmul.mubr.msk.bf16.gmra.mrb[12].mxu0 %vm328_vm1, %v734_v11  ;;  %687 = vmatmul.mubr.msk.bf16.gmra.mrb[12].mxu1 %vm328_vm1, %v735_v12 }
  0x30   : > { %670 = vmatprep.mubr.msk.bf16.mxu0 %vm762_vm0, %v761_v1 }
  0x37   : > { %671 = vmatmul.mubr.msk.bf16.gmra.mrb[16].mxu0 %vm328_vm1, %v736_v13 }
  0xea   : > { %v390_v15 = vpop.f32.mrb[0].mxu0  ;;  %v430_v16 = vpop.f32.mrb[0].mxu1 }
  0xeb   : > { %v391_v17 = vadd.f32 %v851_v14, %v390_v15  ;;  %v656_v18 = vpop.f32.mrb[1].mxu0  ;;  %v431_v19 = vadd.f32 %v851_v14, %v430_v16  ;;  %v676_v20 = vpop.f32.mrb[1].mxu1 }
  0xec   : > { %v393_v21 = vpop.f32.mrb[2].mxu0  ;;  %v433_v22 = vpop.f32.mrb[2].mxu1 }
  0xed   : > { %v461_v23 = vmax.f32 %v391_v17, 0.0  ;;  %v394_v24 = vadd.f32 %v851_v14, %v393_v21  ;;  %v657_v25 = vpop.f32.mrb[3].mxu0  ;;  %v471_v26 = vmax.f32 %v431_v19, 0.0  ;;  %v434_v27 = vadd.f32 %v851_v14, %v433_v22  ;;  %v677_v28 = vpop.f32.mrb[3].mxu1 }
  0xef   : > { %479 = vst [vmem:[%s859_s7] sm:$0xff] %v461_v23  ;;  %v462_v29 = vmax.f32 %v394_v24, 0.0  ;;  %489 = vst [vmem:[%s859_s7 + $0x50] sm:$0xff] %v471_v26  ;;  %v472_v30 = vmax.f32 %v434_v27, 0.0 }
  0xf1   : > { %480 = vst [vmem:[%s859_s7 + $0x8] sm:$0xff] %v462_v29  ;;  %490 = vst [vmem:[%s859_s7 + $0x58] sm:$0xff] %v472_v30 }
  0xf2   : > { %v398_v31 = vpop.f32.mrb[4].mxu0  ;;  %v438_v32 = vpop.f32.mrb[4].mxu1 }
  0xf3   : > { %v399_v33 = vadd.f32 %v851_v14, %v398_v31  ;;  %v660_v34 = vpop.f32.mrb[5].mxu0  ;;  %v439_v35 = vadd.f32 %v851_v14, %v438_v32  ;;  %v680_v36 = vpop.f32.mrb[5].mxu1 }
  0xf4   : > { %v401_v37 = vpop.f32.mrb[6].mxu0  ;;  %v441_v38 = vpop.f32.mrb[6].mxu1 }
  0xf5   : > { %v463_v39 = vmax.f32 %v399_v33, 0.0  ;;  %v402_v40 = vadd.f32 %v851_v14, %v401_v37  ;;  %v661_v41 = vpop.f32.mrb[7].mxu0  ;;  %v473_v42 = vmax.f32 %v439_v35, 0.0  ;;  %v442_v43 = vadd.f32 %v851_v14, %v441_v38  ;;  %v681_v44 = vpop.f32.mrb[7].mxu1 }
  0xf7   : > { %481 = vst [vmem:[%s859_s7 + $0x10] sm:$0xff] %v463_v39  ;;  %v464_v45 = vmax.f32 %v402_v40, 0.0  ;;  %491 = vst [vmem:[%s859_s7 + $0x60] sm:$0xff] %v473_v42  ;;  %v474_v46 = vmax.f32 %v442_v43, 0.0 }
  0xf9   : > { %482 = vst [vmem:[%s859_s7 + $0x18] sm:$0xff] %v464_v45  ;;  %492 = vst [vmem:[%s859_s7 + $0x68] sm:$0xff] %v474_v46 }
  0xfa   : > { %v406_v47 = vpop.f32.mrb[8].mxu0  ;;  %v446_v48 = vpop.f32.mrb[8].mxu1 }
  0xfb   : > { %v407_v49 = vadd.f32 %v851_v14, %v406_v47  ;;  %v664_v50 = vpop.f32.mrb[9].mxu0  ;;  %v447_v51 = vadd.f32 %v851_v14, %v446_v48  ;;  %v684_v52 = vpop.f32.mrb[9].mxu1 }
  0xfc   : > { %v409_v53 = vpop.f32.mrb[10].mxu0  ;;  %v449_v54 = vpop.f32.mrb[10].mxu1 }
  0xfd   : > { %v465_v55 = vmax.f32 %v407_v49, 0.0  ;;  %v410_v56 = vadd.f32 %v851_v14, %v409_v53  ;;  %v665_v57 = vpop.f32.mrb[11].mxu0  ;;  %v475_v58 = vmax.f32 %v447_v51, 0.0  ;;  %v450_v59 = vadd.f32 %v851_v14, %v449_v54  ;;  %v685_v60 = vpop.f32.mrb[11].mxu1 }
  0xff   : > { %483 = vst [vmem:[%s859_s7 + $0x20] sm:$0xff] %v465_v55  ;;  %v466_v61 = vmax.f32 %v410_v56, 0.0  ;;  %493 = vst [vmem:[%s859_s7 + $0x70] sm:$0xff] %v475_v58  ;;  %v476_v62 = vmax.f32 %v450_v59, 0.0 }
 0x101   : > { %484 = vst [vmem:[%s859_s7 + $0x28] sm:$0xff] %v466_v61  ;;  %494 = vst [vmem:[%s859_s7 + $0x78] sm:$0xff] %v476_v62 }
 0x102   : > { %v414_v63 = vpop.f32.mrb[12].mxu0  ;;  %v454_v0 = vpop.f32.mrb[12].mxu1 }
 0x103   : > { %v415_v1 = vadd.f32 %v851_v14, %v414_v63  ;;  %v668_v2 = vpop.f32.mrb[13].mxu0  ;;  %v455_v3 = vadd.f32 %v851_v14, %v454_v0  ;;  %v688_v4 = vpop.f32.mrb[13].mxu1 }
 0x104   : > { %v417_v5 = vpop.f32.mrb[14].mxu0  ;;  %v457_v6 = vpop.f32.mrb[14].mxu1 }
 0x105   : > { %v467_v7 = vmax.f32 %v415_v1, 0.0  ;;  %v418_v8 = vadd.f32 %v851_v14, %v417_v5  ;;  %v669_v9 = vpop.f32.mrb[15].mxu0  ;;  %v477_v10 = vmax.f32 %v455_v3, 0.0  ;;  %v458_v11 = vadd.f32 %v851_v14, %v457_v6  ;;  %v689_v12 = vpop.f32.mrb[15].mxu1 }
 0x107   : > { %485 = vst [vmem:[%s859_s7 + $0x30] sm:$0xff] %v467_v7  ;;  %v468_v13 = vmax.f32 %v418_v8, 0.0  ;;  %495 = vst [vmem:[%s859_s7 + $0x80] sm:$0xff] %v477_v10  ;;  %v478_v15 = vmax.f32 %v458_v11, 0.0 }
 0x109   : > { %486 = vst [vmem:[%s859_s7 + $0x38] sm:$0xff] %v468_v13  ;;  %496 = vst [vmem:[%s859_s7 + $0x88] sm:$0xff] %v478_v15 }
 0x10a   : > { %v422_v16 = vpop.f32.mrb[16].mxu0 }
 0x10b   : > { %v423_v17 = vadd.f32 %v851_v14, %v422_v16  ;;  %v672_v18 = vpop.f32.mrb[17].mxu0 }
 0x10c   : > { %v425_v19 = vpop.f32.mrb[18].mxu0 }
 0x10d   : > { %v469_v20 = vmax.f32 %v423_v17, 0.0  ;;  %v426_v21 = vadd.f32 %v851_v14, %v425_v19  ;;  %v673_v22 = vpop.f32.mrb[19].mxu0 }
 0x10f   : > { %487 = vst [vmem:[%s859_s7 + $0x40] sm:$0xff] %v469_v20  ;;  %v470_v23 = vmax.f32 %v426_v21, 0.0 }
 0x111   : > { %488 = vst [vmem:[%s859_s7 + $0x48] sm:$0xff] %v470_v23 }
 0x112 PF: > { %s13_s14 = sadd.s32 1, %s759_s14   ;;  %s908_s12 = smov %s755_s13 }
 0x113   : > { %p10_p5 = scmp.ge.s32.totalorder %s13_s14, 4   ;;  %s909_s13 = smov %s911_s15 }
 0x115   :  { %12 = sbr.rel (!%p10_p5) target bundleno = 2 (0x2), region = 68 }

// kernel: ez_detect_forward.87
= control target key start
LH: loop header
LB: loop body
LE: loop exit
PB: predicated region body
PF: predicated region fallthrough
CT: control target
= control target key end

     0   :  { %s794_s12 = smov 0   ;;  %s796_s13 = smov 0   ;;  %s888_s0 = inlined_call_operand.vmem [shape: bf16[72,288], index: 0, kind: input, shape index: {}]   ;;  %s889_s1 = inlined_call_operand.vmem [shape: bf16[288,128], index: 1, kind: input, shape index: {}]   ;;  %s890_s2 = inlined_call_operand.vmem [shape: f32[1,128], index: 2, kind: input, shape index: {}]   ;;  %s891_s3 = inlined_call_operand.vmem [shape: f32[72,128], index: 3, kind: output, shape index: {}]  }
   0x1   :  { %s798_s14 = smov 0  }
   0x2 LB: > { %s25_s15 = sadd.s32 1, %s768_s13  ;;  %p628_p0 = scmp.ge.s32.totalorder %s772_s14, 1  ;;  %s772_s14 = sphi %s798_s14, %s13_s14   ;;  %s768_s13 = sphi %s796_s13, %s893_s13   ;;  %s764_s12 = sphi %s794_s12, %s892_s12  }
   0x3   : > { %p27_p1 = scmp.ge.s32.totalorder %s25_s15, 3  ;;  %p170_p2 = scmp.lt.s32.totalorder %s772_s14, 4 }
   0x5   : > { %s895_s15 = smov (%p27_p1, %s25_s15), 0  ;;  %p171_p3 = pnand %p628_p0, %p170_p2 }
   0x6   : > { %v725_v0 = vld [vmem:[%s889_s1 + $0x40] sm:$0xff] (!%p171_p3)   ;;  %s205_s18 = smul.u32 (!%p171_p3), 3, %s764_s12  ;;  %v727_v2 = vld [vmem:[%s889_s1 + $0x48] sm:$0xff] (!%p171_p3)   ;;  %v729_v4 = vld [vmem:[%s889_s1 + $0x50] sm:$0xff] (!%p171_p3)   ;;  %vm411_vm0 = vcmask (!%p171_p3), 261120  }
   0x7   : > { %174 = sbr.rel (%p171_p3) target bundleno = 269 (0x10d), region = 32  ;;  %v726_v1 = vld [vmem:[%s889_s1] sm:$0xff] (!%p171_p3)   ;;  %660 = vmatprep.subr.bf16.mxu0 (!%p171_p3), %v725_v0  ;;  %v728_v3 = vld [vmem:[%s889_s1 + $0x8] sm:$0xff] (!%p171_p3)   ;;  %v730_v5 = vld [vmem:[%s889_s1 + $0x10] sm:$0xff] (!%p171_p3)  }
   0x8   : > { %661 = vmatpush3.bf16.msra.mxu0 (!%p171_p3), %v726_v1  ;;  %p206_p4 = scmp.lt.s32.totalorder (!%p171_p3), %s205_s18, 8  ;;  %v731_v6 = vld [vmem:[%s889_s1 + $0x58] sm:$0xff] (!%p171_p3)   ;;  %v733_v8 = vld [vmem:[%s889_s1 + $0x60] sm:$0xff] (!%p171_p3)   ;;  %v735_v11 = vld [vmem:[%s889_s1 + $0x68] sm:$0xff] (!%p171_p3)  }
   0x9   : > { %662 = vmatprep.subr.bf16.mxu0 (!%p171_p3), %v727_v2  ;;  %v732_v7 = vld [vmem:[%s889_s1 + $0x18] sm:$0xff] (!%p171_p3)   ;;  %v734_v9 = vld [vmem:[%s889_s1 + $0x20] sm:$0xff] (!%p171_p3)   ;;  %v736_v12 = vld [vmem:[%s889_s1 + $0x28] sm:$0xff] (!%p171_p3)  }
   0xa   : > { %v740_v10 = vld [vmem:[%s889_s1 + $0x80] sm:$0xff] (!%p171_p3)   ;;  %v745_v14 = vld [vmem:[%s889_s1 + $0x88] sm:$0xff] (!%p171_p3)   ;;  %v737_v15 = vld [vmem:[%s889_s1 + $0x70] sm:$0xff] (!%p171_p3)  }
   0xb   : > { %692 = vmatprep.subr.bf16.mxu1 (!%p171_p3), %v740_v10  ;;  %v738_v18 = vld [vmem:[%s889_s1 + $0x30] sm:$0xff] (!%p171_p3)   ;;  %v739_v19 = vld [vmem:[%s889_s1 + $0x78] sm:$0xff] (!%p171_p3)   ;;  %v631_v31 = vld [vmem:[%s890_s2] ss:$0 sm:$0xff] (!%p171_p3) }
   0xc   : > { %663 = vmatpush3.bf16.msra.mxu0 (!%p171_p3), %v728_v3  ;;  %693 = vmatpush3.bf16.msra.mxu1 (!%p171_p3), %v740_v10  ;;  %v741_v20 = vld [vmem:[%s889_s1 + $0x38] sm:$0xff] (!%p171_p3)  }
   0xd   : > { %664 = vmatprep.subr.bf16.mxu0 (!%p171_p3), %v729_v4  ;;  %694 = vmatprep.subr.bf16.mxu1 (!%p171_p3), %v745_v14 }
   0xe   : > { %s897_s18 = smov (!%p206_p4, %s205_s18), 8 }
   0xf   : > { %s700_s6 = smul.u32 12, %s897_s18  ;;  %s630_s9 = sshll.u32 %s897_s18, 3 }
  0x10   : > { %665 = vmatpush3.bf16.msra.mxu0 %v730_v5  ;;  %695 = vmatpush3.bf16.msra.mxu1 %v745_v14  ;;  %s226_s12 = scalar_lea.vmem %s891_s3, %s630_s9 }
  0x11   : > { %666 = vmatprep.subr.bf16.mxu0 %v731_v6  ;;  %s210_s19 = scalar_lea.vmem %s888_s0, %s700_s6 }
  0x12   : > { %v744_v13 = vld [vmem:[%s210_s19 + $0x4] ss:$12 sps:$4 sm:$0xff]   ;;  %v746_v16 = vld [vmem:[%s210_s19 + $0x8] ss:$12 sps:$4 sm:$0xff]   ;;  %v747_v17 = vld [vmem:[%s210_s19 + $0x20] ss:$0 sps:$4 sm:$0xff]  }
  0x13   : > { %450 = vmatprep.mubr.bf16.mxu0 %v744_v13  ;;  %696 = vmatprep.mubr.msk.bf16.mxu1 %vm411_vm0, %v746_v16  ;;  %v233_v21 = vld [vmem:[%s210_s19 + $0x18] sm:$0xff]  ;;  %v742_v22 = vld [vmem:[%s210_s19] ss:$12 sps:$4 sm:$0xff]  }
  0x14   : > { %667 = vmatpush3.bf16.msra.mxu0 %v732_v7  ;;  %697 = vmatmul.mubr.msk.bf16.vlgmr.msra.gmra.mrb[0].mxu1 %vm411_vm0, %v747_v17  ;;  %v636_v23 = vcombine.high %v233_v21, %v233_v21  ;;  %v635_v24 = vcombine.low %v233_v21, %v233_v21 }
  0x15   : > { %668 = vmatprep.subr.bf16.mxu0 %v733_v8 }
  0x18   : > { %669 = vmatpush3.bf16.msra.mxu0 %v734_v9 }
  0x19   : > { %670 = vmatprep.subr.bf16.mxu0 %v735_v11 }
  0x1c   : > { %671 = vmatpush3.bf16.msra.mxu0 %v736_v12 }
  0x1d   : > { %672 = vmatprep.subr.bf16.mxu0 %v737_v15 }
  0x20   : > { %673 = vmatpush3.bf16.msra.mxu0 %v738_v18 }
  0x21   : > { %674 = vmatprep.subr.bf16.mxu0 %v739_v19 }
  0x24   : > { %675 = vmatpush3.bf16.msra.mxu0 %v741_v20 }
  0x27   : > { %451 = vmatmul.mubr.bf16.vlgmr.msra.gmra.mrb[0].mxu0 %v742_v22 }
  0x28   : > { %458 = vmatprep.mubr.bf16.mxu0 %v636_v23 }
  0x2f   : > { %459 = vmatmul.mubr.bf16.gmra.mrb[4].mxu0 %v635_v24 }
  0xe7   : > { %v698_v25 = vpop.f32.mrb[0].mxu1 }
  0xe8   : > { %v500_v26 = vpop.f32.mrb[1].mxu1 }
  0xe9   : > { %v699_v27 = vpop.f32.mrb[2].mxu1 }
  0xea   : > { %v503_v28 = vpop.f32.mrb[3].mxu1 }
  0xfa   : > { %v676_v29 = vpop.f32.mrb[0].mxu0 }
  0xfb   : > { %v677_v30 = vpop.f32.mrb[1].mxu0 }
  0xfc   : > { %v678_v32 = vadd.f32 %v677_v30, %v676_v29  ;;  %v679_v33 = vpop.f32.mrb[2].mxu0 }
  0xfd   : > { %v680_v34 = vpop.f32.mrb[3].mxu0 }
  0xfe   : > { %v681_v35 = vadd.f32 %v680_v34, %v679_v33  ;;  %v453_v36 = vadd.f32 %v678_v32, %v631_v31 }
 0x100   : > { %v501_v37 = vadd.f32 %v500_v26, %v453_v36  ;;  %v456_v38 = vadd.f32 %v681_v35, %v631_v31 }
 0x102   : > { %v514_v39 = vmax.f32 %v501_v37, 0.0  ;;  %v504_v40 = vadd.f32 %v503_v28, %v456_v38  ;;  %v682_v41 = vpop.f32.mrb[4].mxu0 }
 0x103   : > { %v683_v42 = vpop.f32.mrb[5].mxu0 }
 0x104   : > { %517 = vst [vmem:[%s226_s12] sm:$0xff] %v514_v39  ;;  %v515_v43 = vmax.f32 %v504_v40, 0.0  ;;  %v684_v44 = vadd.f32 %v683_v42, %v682_v41  ;;  %v685_v45 = vpop.f32.mrb[6].mxu0 }
 0x105   : > { %v686_v46 = vpop.f32.mrb[7].mxu0 }
 0x106   : > { %518 = vst [vmem:[%s226_s12 + $0x8] sm:$0xff] %v515_v43  ;;  %v461_v47 = vadd.f32 %v684_v44, %v631_v31 }
 0x108   : > { %v509_v48 = vadd.f32 %v698_v25, %v461_v47 }
 0x10a   : > { %v516_v49 = vmax.f32 %v509_v48, 0.0 }
 0x10c   : > { %519 = vst [vmem:[%s226_s12 + $0x10] sm:$0xff] %v516_v49 }
 0x10d PF: > { %s13_s14 = sadd.s32 1, %s772_s14   ;;  %s892_s12 = smov %s768_s13 }
 0x10e   : > { %p10_p5 = scmp.ge.s32.totalorder %s13_s14, 5   ;;  %s893_s13 = smov %s895_s15 }
 0x110   :  { %12 = sbr.rel (!%p10_p5) target bundleno = 2 (0x2), region = 68 }

// kernel: ez_detect_forward.89
= control target key start
LH: loop header
LB: loop body
LE: loop exit
PB: predicated region body
PF: predicated region fallthrough
CT: control target
= control target key end

     0   :  { %s612_s15 = smov 0   ;;  %s614_s16 = smov 0   ;;  %s657_s0 = inlined_call_operand.vmem [shape: bf16[72,32], index: 0, kind: input, shape index: {}]   ;;  %s658_s1 = inlined_call_operand.vmem [shape: bf16[32,128], index: 1, kind: input, shape index: {}]   ;;  %s659_s2 = inlined_call_operand.vmem [shape: f32[1,128], index: 2, kind: input, shape index: {}]   ;;  %s660_s3 = inlined_call_operand.vmem [shape: f32[72,128], index: 3, kind: input, shape index: {}]   ;;  %s661_s4 = inlined_call_operand.vmem [shape: f32[72,128], index: 4, kind: output, shape index: {}]  }
   0x1   :  { %s616_s17 = smov 0  }
   0x2 LB: > { %s26_s18 = sadd.s32 1, %s581_s16  ;;  %p510_p0 = scmp.ge.s32.totalorder %s585_s17, 1  ;;  %s585_s17 = sphi %s616_s17, %s14_s17   ;;  %s581_s16 = sphi %s614_s16, %s663_s16   ;;  %s577_s15 = sphi %s612_s15, %s662_s15  }
   0x3   : > { %p28_p1 = scmp.ge.s32.totalorder %s26_s18, 3  ;;  %p210_p2 = scmp.lt.s32.totalorder %s585_s17, 4 }
   0x5   : > { %s665_s18 = smov (%p28_p1, %s26_s18), 0  ;;  %p211_p3 = pnand %p510_p0, %p210_p2 }
   0x6   : > { %v559_v0 = vld [vmem:[%s658_s1] sm:$0xff] (!%p211_p3)   ;;  %s254_s21 = smul.u32 (!%p211_p3), 3, %s577_s15  ;;  %v560_v1 = vld [vmem:[%s658_s1 + $0x8] sm:$0xff] (!%p211_p3)   ;;  %vm320_vm0 = vcmask (!%p211_p3), 261120  }
   0x7   : > { %214 = sbr.rel (%p211_p3) target bundleno = 241 (0xf1), region = 36  ;;  %527 = vmatprep.subr.bf16.mxu0 (!%p211_p3), %v559_v0  ;;  %v514_v4 = vld [vmem:[%s659_s2] ss:$0 sm:$0xff] (!%p211_p3) }
   0x8   : > { %p255_p4 = scmp.lt.s32.totalorder (!%p211_p3), %s254_s21, 8  ;;  %528 = vmatpush3.bf16.msra.mxu0 (!%p211_p3), %v559_v0 }
   0x9   : > { %529 = vmatprep.subr.bf16.mxu0 (!%p211_p3), %v560_v1 }
   0xc   : > { %530 = vmatpush3.bf16.msra.mxu0 (!%p211_p3), %v560_v1 }
   0xe   : > { %s667_s21 = smov (!%p255_p4, %s254_s21), 8 }
   0xf   : > { %s511_s24 = sshll.u32 %s667_s21, 2  ;;  %s512_s28 = sshll.u32 %s667_s21, 3 }
  0x10   : > { %s258_s27 = scalar_lea.vmem %s657_s0, %s511_s24  ;;  %s274_s5 = scalar_lea.vmem %s660_s3, %s512_s28 }
  0x11   : > { %v561_v2 = vld [vmem:[%s258_s27] sm:$0xff]   ;;  %v562_v3 = vld [vmem:[%s258_s27 + $0x8] ss:$0 sps:$4 sm:$0xff]   ;;  %v377_v6 = vld [vmem:[%s274_s5 + $0x10] sm:$0xff]  ;;  %s283_s10 = scalar_lea.vmem %s661_s4, %s512_s28 }
  0x12   : > { %531 = vmatprep.mubr.msk.bf16.mxu0 %vm320_vm0, %v561_v2  ;;  %v375_v9 = vld [vmem:[%s274_s5] sm:$0xff]  ;;  %v376_v14 = vld [vmem:[%s274_s5 + $0x8] sm:$0xff] }
  0x13   : > { %532 = vmatmul.mubr.msk.bf16.vlgmr.msra.gmra.mrb[0].mxu0 %vm320_vm0, %v562_v3 }
  0xe6   : > { %v533_v5 = vpop.f32.mrb[0].mxu0 }
  0xe7   : > { %v370_v7 = vadd.f32 %v533_v5, %v514_v4  ;;  %v361_v8 = vpop.f32.mrb[1].mxu0 }
  0xe8   : > { %v362_v10 = vadd.f32 %v514_v4, %v361_v8  ;;  %v534_v11 = vpop.f32.mrb[2].mxu0 }
  0xe9   : > { %v380_v12 = vadd.f32 %v377_v6, %v370_v7  ;;  %v364_v13 = vpop.f32.mrb[3].mxu0 }
  0xea   : > { %v378_v15 = vadd.f32 %v375_v9, %v362_v10  ;;  %v365_v16 = vadd.f32 %v514_v4, %v364_v13 }
  0xeb   : > { %v383_v17 = vmax.f32 %v380_v12, 0.0 }
  0xec   : > { %v381_v18 = vmax.f32 %v378_v15, 0.0  ;;  %v379_v19 = vadd.f32 %v376_v14, %v365_v16 }
  0xed   : > { %386 = vst [vmem:[%s283_s10 + $0x10] sm:$0xff] %v383_v17 }
  0xee   : > { %384 = vst [vmem:[%s283_s10] sm:$0xff] %v381_v18  ;;  %v382_v20 = vmax.f32 %v379_v19, 0.0 }
  0xf0   : > { %385 = vst [vmem:[%s283_s10 + $0x8] sm:$0xff] %v382_v20 }
  0xf1 PF: > { %s14_s17 = sadd.s32 1, %s585_s17   ;;  %s662_s15 = smov %s581_s16 }
  0xf2   : > { %p11_p5 = scmp.ge.s32.totalorder %s14_s17, 5   ;;  %s663_s16 = smov %s665_s18 }
  0xf4   :  { %13 = sbr.rel (!%p11_p5) target bundleno = 2 (0x2), region = 75 }

// kernel: ez_detect_forward.88
= control target key start
LH: loop header
LB: loop body
LE: loop exit
PB: predicated region body
PF: predicated region fallthrough
CT: control target
= control target key end

     0   :  { %s548_s12 = smov 0   ;;  %s550_s13 = smov 0   ;;  %s596_s0 = inlined_call_operand.vmem [shape: bf16[72,64], index: 0, kind: input, shape index: {}]   ;;  %s597_s1 = inlined_call_operand.vmem [shape: bf16[64,128], index: 1, kind: input, shape index: {}]   ;;  %s598_s2 = inlined_call_operand.vmem [shape: f32[1,128], index: 2, kind: input, shape index: {}]   ;;  %s599_s3 = inlined_call_operand.vmem [shape: f32[72,128], index: 3, kind: output, shape index: {}]  }
   0x1   :  { %s552_s14 = smov 0  }
   0x2 LB: > { %s25_s15 = sadd.s32 1, %s522_s13  ;;  %p442_p0 = scmp.ge.s32.totalorder %s526_s14, 1  ;;  %s526_s14 = sphi %s552_s14, %s13_s14   ;;  %s522_s13 = sphi %s550_s13, %s601_s13   ;;  %s518_s12 = sphi %s548_s12, %s600_s12  }
   0x3   : > { %p27_p1 = scmp.ge.s32.totalorder %s25_s15, 3  ;;  %p169_p2 = scmp.lt.s32.totalorder %s526_s14, 4 }
   0x5   : > { %s603_s15 = smov (%p27_p1, %s25_s15), 0  ;;  %p170_p3 = pnand %p442_p0, %p169_p2 }
   0x6   : > { %v498_v0 = vld [vmem:[%s597_s1] sm:$0xff] (!%p170_p3)   ;;  %s203_s18 = smul.u32 (!%p170_p3), 3, %s518_s12  ;;  %v499_v1 = vld [vmem:[%s597_s1 + $0x8] sm:$0xff] (!%p170_p3)   ;;  %v500_v2 = vld [vmem:[%s597_s1 + $0x10] sm:$0xff] (!%p170_p3)   ;;  %vm276_vm0 = vcmask (!%p170_p3), 523264  }
   0x7   : > { %173 = sbr.rel (%p170_p3) target bundleno = 241 (0xf1), region = 32  ;;  %462 = vmatprep.subr.bf16.mxu0 (!%p170_p3), %v498_v0  ;;  %v501_v3 = vld [vmem:[%s597_s1 + $0x18] sm:$0xff] (!%p170_p3)   ;;  %v445_v6 = vld [vmem:[%s598_s2] ss:$0 sm:$0xff] (!%p170_p3) }
   0x8   : > { %p204_p4 = scmp.lt.s32.totalorder (!%p170_p3), %s203_s18, 8  ;;  %463 = vmatpush3.bf16.msra.mxu0 (!%p170_p3), %v498_v0 }
   0x9   : > { %464 = vmatprep.subr.bf16.mxu0 (!%p170_p3), %v499_v1 }
   0xc   : > { %465 = vmatpush3.bf16.msra.mxu0 (!%p170_p3), %v499_v1 }
   0xd   : > { %466 = vmatprep.subr.bf16.mxu0 (!%p170_p3), %v500_v2 }
   0xe   : > { %s605_s18 = smov (!%p204_p4, %s203_s18), 8 }
   0xf   : > { %s443_s23 = sshll.u32 %s605_s18, 2  ;;  %s444_s29 = sshll.u32 %s605_s18, 3 }
  0x10   : > { %s207_s28 = scalar_lea.vmem %s596_s0, %s443_s23  ;;  %467 = vmatpush3.bf16.msra.mxu0 %v500_v2  ;;  %s223_s7 = scalar_lea.vmem %s599_s3, %s444_s29 }
  0x11   : > { %v502_v4 = vld [vmem:[%s207_s28] sm:$0xff]   ;;  %468 = vmatprep.subr.bf16.mxu0 %v501_v3  ;;  %v503_v5 = vld [vmem:[%s207_s28 + $0x8] ss:$0 sps:$4 sm:$0xff]  }
  0x12   : > { %470 = vmatprep.mubr.msk.bf16.mxu0 %vm276_vm0, %v502_v4 }
  0x14   : > { %469 = vmatpush3.bf16.msra.mxu0 %v501_v3 }
  0x17   : > { %471 = vmatmul.mubr.msk.bf16.vlgmr.msra.gmra.mrb[0].mxu0 %vm276_vm0, %v503_v5 }
  0xea   : > { %v472_v7 = vpop.f32.mrb[0].mxu0 }
  0xeb   : > { %v326_v8 = vadd.f32 %v472_v7, %v445_v6  ;;  %v317_v9 = vpop.f32.mrb[1].mxu0 }
  0xec   : > { %v318_v10 = vadd.f32 %v445_v6, %v317_v9  ;;  %v473_v11 = vpop.f32.mrb[2].mxu0 }
  0xed   : > { %333 = vst [vmem:[%s223_s7 + $0x10] sm:$0xff] %v326_v8  ;;  %v320_v12 = vpop.f32.mrb[3].mxu0 }
  0xee   : > { %331 = vst [vmem:[%s223_s7] sm:$0xff] %v318_v10  ;;  %v321_v13 = vadd.f32 %v445_v6, %v320_v12 }
  0xf0   : > { %332 = vst [vmem:[%s223_s7 + $0x8] sm:$0xff] %v321_v13 }
  0xf1 PF: > { %s13_s14 = sadd.s32 1, %s526_s14   ;;  %s600_s12 = smov %s522_s13 }
  0xf2   : > { %p10_p5 = scmp.ge.s32.totalorder %s13_s14, 5   ;;  %s601_s13 = smov %s603_s15 }
  0xf4   :  { %12 = sbr.rel (!%p10_p5) target bundleno = 2 (0x2), region = 68 }

// kernel: ez_detect_forward.90
= control target key start
LH: loop header
LB: loop body
LE: loop exit
PB: predicated region body
PF: predicated region fallthrough
CT: control target
= control target key end

     0   :  { %s596_s12 = smov 0   ;;  %s598_s13 = smov 0   ;;  %s660_s0 = inlined_call_operand.vmem [shape: bf16[72,128], index: 0, kind: input, shape index: {}]   ;;  %s661_s1 = inlined_call_operand.vmem [shape: bf16[128,128], index: 1, kind: input, shape index: {}]   ;;  %s662_s2 = inlined_call_operand.vmem [shape: f32[1,128], index: 2, kind: input, shape index: {}]   ;;  %s663_s3 = inlined_call_operand.vmem [shape: f32[72,128], index: 3, kind: output, shape index: {}]  }
   0x1   :  { %s600_s14 = smov 0  }
   0x2 LB: > { %s25_s15 = sadd.s32 1, %s570_s13  ;;  %p472_p0 = scmp.ge.s32.totalorder %s574_s14, 1  ;;  %s574_s14 = sphi %s600_s14, %s13_s14   ;;  %s570_s13 = sphi %s598_s13, %s665_s13   ;;  %s566_s12 = sphi %s596_s12, %s664_s12  }
   0x3   : > { %p27_p1 = scmp.ge.s32.totalorder %s25_s15, 3  ;;  %p169_p2 = scmp.lt.s32.totalorder %s574_s14, 4 }
   0x5   : > { %s667_s15 = smov (%p27_p1, %s25_s15), 0  ;;  %p170_p3 = pnand %p472_p0, %p169_p2 }
   0x6   : > { %v542_v0 = vld [vmem:[%s661_s1] sm:$0xff] (!%p170_p3)   ;;  %s203_s18 = smul.u32 (!%p170_p3), 3, %s566_s12  ;;  %v543_v1 = vld [vmem:[%s661_s1 + $0x8] sm:$0xff] (!%p170_p3)   ;;  %v544_v2 = vld [vmem:[%s661_s1 + $0x10] sm:$0xff] (!%p170_p3)  }
   0x7   : > { %173 = sbr.rel (%p170_p3) target bundleno = 259 (0x103), region = 32  ;;  %498 = vmatprep.subr.bf16.mxu0 (!%p170_p3), %v542_v0  ;;  %v545_v3 = vld [vmem:[%s661_s1 + $0x18] sm:$0xff] (!%p170_p3)   ;;  %v546_v5 = vld [vmem:[%s661_s1 + $0x20] sm:$0xff] (!%p170_p3)   ;;  %v547_v6 = vld [vmem:[%s661_s1 + $0x28] sm:$0xff] (!%p170_p3)  }
   0x8   : > { %p204_p4 = scmp.lt.s32.totalorder (!%p170_p3), %s203_s18, 8  ;;  %499 = vmatpush3.bf16.msra.mxu0 (!%p170_p3), %v542_v0  ;;  %v548_v7 = vld [vmem:[%s661_s1 + $0x30] sm:$0xff] (!%p170_p3)   ;;  %v549_v8 = vld [vmem:[%s661_s1 + $0x38] sm:$0xff] (!%p170_p3)   ;;  %v475_v10 = vld [vmem:[%s662_s2] ss:$0 sm:$0xff] (!%p170_p3) }
   0x9   : > { %500 = vmatprep.subr.bf16.mxu0 (!%p170_p3), %v543_v1 }
   0xc   : > { %501 = vmatpush3.bf16.msra.mxu0 (!%p170_p3), %v543_v1 }
   0xd   : > { %502 = vmatprep.subr.bf16.mxu0 (!%p170_p3), %v544_v2 }
   0xe   : > { %s669_s18 = smov (!%p204_p4, %s203_s18), 8 }
   0xf   : > { %s473_s23 = sshll.u32 %s669_s18, 2  ;;  %s474_s12 = sshll.u32 %s669_s18, 3 }
  0x10   : > { %s207_s28 = scalar_lea.vmem %s660_s0, %s473_s23  ;;  %503 = vmatpush3.bf16.msra.mxu0 %v544_v2  ;;  %s223_s19 = scalar_lea.vmem %s663_s3, %s474_s12 }
  0x11   : > { %v550_v4 = vld [vmem:[%s207_s28] sm:$0xff]   ;;  %504 = vmatprep.subr.bf16.mxu0 %v545_v3  ;;  %v551_v9 = vld [vmem:[%s207_s28 + $0x8] ss:$0 sps:$4 sm:$0xff]  }
  0x12   : > { %514 = vmatprep.mubr.bf16.mxu0 %v550_v4 }
  0x14   : > { %505 = vmatpush3.bf16.msra.mxu0 %v545_v3 }
  0x15   : > { %506 = vmatprep.subr.bf16.mxu0 %v546_v5 }
  0x18   : > { %507 = vmatpush3.bf16.msra.mxu0 %v546_v5 }
  0x19   : > { %508 = vmatprep.subr.bf16.mxu0 %v547_v6 }
  0x1c   : > { %509 = vmatpush3.bf16.msra.mxu0 %v547_v6 }
  0x1d   : > { %510 = vmatprep.subr.bf16.mxu0 %v548_v7 }
  0x20   : > { %511 = vmatpush3.bf16.msra.mxu0 %v548_v7 }
  0x21   : > { %512 = vmatprep.subr.bf16.mxu0 %v549_v8 }
  0x24   : > { %513 = vmatpush3.bf16.msra.mxu0 %v549_v8 }
  0x27   : > { %515 = vmatmul.mubr.bf16.vlgmr.msra.gmra.mrb[0].mxu0 %v551_v9 }
  0xfa   : > { %v516_v11 = vpop.f32.mrb[0].mxu0 }
  0xfb   : > { %v353_v12 = vadd.f32 %v516_v11, %v475_v10  ;;  %v344_v13 = vpop.f32.mrb[1].mxu0 }
  0xfc   : > { %v345_v14 = vadd.f32 %v475_v10, %v344_v13  ;;  %v517_v15 = vpop.f32.mrb[2].mxu0 }
  0xfd   : > { %v360_v16 = vmax.f32 %v353_v12, 0.0  ;;  %v347_v17 = vpop.f32.mrb[3].mxu0 }
  0xfe   : > { %v358_v18 = vmax.f32 %v345_v14, 0.0  ;;  %v348_v19 = vadd.f32 %v475_v10, %v347_v17 }
  0xff   : > { %363 = vst [vmem:[%s223_s19 + $0x10] sm:$0xff] %v360_v16 }
 0x100   : > { %361 = vst [vmem:[%s223_s19] sm:$0xff] %v358_v18  ;;  %v359_v20 = vmax.f32 %v348_v19, 0.0 }
 0x102   : > { %362 = vst [vmem:[%s223_s19 + $0x8] sm:$0xff] %v359_v20 }
 0x103 PF: > { %s13_s14 = sadd.s32 1, %s574_s14   ;;  %s664_s12 = smov %s570_s13 }
 0x104   : > { %p10_p5 = scmp.ge.s32.totalorder %s13_s14, 5   ;;  %s665_s13 = smov %s667_s15 }
 0x106   :  { %12 = sbr.rel (!%p10_p5) target bundleno = 2 (0x2), region = 68 }

// kernel: ez_detect_forward.106
= control target key start
LH: loop header
LB: loop body
LE: loop exit
PB: predicated region body
PF: predicated region fallthrough
CT: control target
= control target key end

     0   :  { %s990_s12 = smov 0   ;;  %s992_s13 = smov 0   ;;  %s1147_s0 = inlined_call_operand.vmem [shape: bf16[24,576], index: 0, kind: input, shape index: {}]   ;;  %s1148_s1 = inlined_call_operand.vmem [shape: bf16[576,128], index: 1, kind: input, shape index: {}]   ;;  %s1149_s2 = inlined_call_operand.vmem [shape: f32[1,128], index: 2, kind: input, shape index: {}]   ;;  %s1150_s3 = inlined_call_operand.vmem [shape: f32[24,128], index: 3, kind: output, shape index: {}]  }
   0x1   :  { %s994_s14 = smov 0  }
   0x2 LB: > { %s25_s15 = sadd.s32 1, %s962_s13  ;;  %p767_p0 = scmp.ge.s32.totalorder %s966_s14, 1  ;;  %s966_s14 = sphi %s994_s14, %s13_s14   ;;  %s962_s13 = sphi %s992_s13, %s1152_s13   ;;  %s958_s12 = sphi %s990_s12, %s1151_s12  }
   0x3   : > { %p27_p1 = scmp.ge.s32.totalorder %s25_s15, 3  ;;  %p168_p2 = scmp.lt.s32.totalorder %s966_s14, 4 }
   0x5   : > { %s1154_s15 = smov (%p27_p1, %s25_s15), 0  ;;  %p169_p3 = pnand %p767_p0, %p168_p2 }
   0x6   : > { %v903_v0 = vld [vmem:[%s1148_s1 + $0x40] sm:$0xff] (!%p169_p3)   ;;  %v907_v4 = vld [vmem:[%s1148_s1 + $0x48] sm:$0xff] (!%p169_p3)   ;;  %v911_v8 = vld [vmem:[%s1148_s1 + $0x50] sm:$0xff] (!%p169_p3)   ;;  %p201_p4 = scmp.lt.s32.totalorder (!%p169_p3), %s958_s12, 2  ;;  %v968_v35 = vmov (!%p169_p3), 0.0   ;;  %vm969_vm0 = vmmov (!%p169_p3), 0  }
   0x7   : > { %172 = sbr.rel (%p169_p3) target bundleno = 272 (0x110), region = 32  ;;  %v904_v1 = vld [vmem:[%s1148_s1] sm:$0xff] (!%p169_p3)   ;;  %815 = vmatprep.subr.bf16.mxu0 (!%p169_p3), %v903_v0  ;;  %v908_v5 = vld [vmem:[%s1148_s1 + $0x8] sm:$0xff] (!%p169_p3)   ;;  %v912_v9 = vld [vmem:[%s1148_s1 + $0x10] sm:$0xff] (!%p169_p3)   ;;  %vm536_vm1 = vcmask (!%p169_p3), 523264  }
   0x8   : > { %v905_v2 = vld [vmem:[%s1148_s1 + $0xc0] sm:$0xff] (!%p169_p3)   ;;  %816 = vmatpush3.bf16.msra.mxu0 (!%p169_p3), %v904_v1  ;;  %v909_v6 = vld [vmem:[%s1148_s1 + $0xc8] sm:$0xff] (!%p169_p3)   ;;  %v913_v10 = vld [vmem:[%s1148_s1 + $0xd0] sm:$0xff] (!%p169_p3)  }
   0x9   : > { %v906_v3 = vld [vmem:[%s1148_s1 + $0x80] sm:$0xff] (!%p169_p3)   ;;  %837 = vmatprep.subr.bf16.mxu1 (!%p169_p3), %v905_v2  ;;  %817 = vmatprep.subr.bf16.mxu0 (!%p169_p3), %v907_v4  ;;  %v910_v7 = vld [vmem:[%s1148_s1 + $0x88] sm:$0xff] (!%p169_p3)   ;;  %v914_v11 = vld [vmem:[%s1148_s1 + $0x90] sm:$0xff] (!%p169_p3)  }
   0xa   : > { %838 = vmatpush3.bf16.msra.mxu1 (!%p169_p3), %v906_v3  ;;  %v915_v12 = vld [vmem:[%s1148_s1 + $0x58] sm:$0xff] (!%p169_p3)   ;;  %v919_v16 = vld [vmem:[%s1148_s1 + $0x60] sm:$0xff] (!%p169_p3)   ;;  %v923_v20 = vld [vmem:[%s1148_s1 + $0x68] sm:$0xff] (!%p169_p3)  }
   0xb   : > { %839 = vmatprep.subr.bf16.mxu1 (!%p169_p3), %v909_v6  ;;  %v916_v13 = vld [vmem:[%s1148_s1 + $0x18] sm:$0xff] (!%p169_p3)   ;;  %v920_v17 = vld [vmem:[%s1148_s1 + $0x20] sm:$0xff] (!%p169_p3)   ;;  %v924_v21 = vld [vmem:[%s1148_s1 + $0x28] sm:$0xff] (!%p169_p3)  }
   0xc   : > { %818 = vmatpush3.bf16.msra.mxu0 (!%p169_p3), %v908_v5  ;;  %v917_v14 = vld [vmem:[%s1148_s1 + $0xd8] sm:$0xff] (!%p169_p3)   ;;  %v921_v18 = vld [vmem:[%s1148_s1 + $0xe0] sm:$0xff] (!%p169_p3)   ;;  %v925_v22 = vld [vmem:[%s1148_s1 + $0xe8] sm:$0xff] (!%p169_p3)  }
   0xd   : > { %819 = vmatprep.subr.bf16.mxu0 (!%p169_p3), %v911_v8  ;;  %v918_v15 = vld [vmem:[%s1148_s1 + $0x98] sm:$0xff] (!%p169_p3)   ;;  %v922_v19 = vld [vmem:[%s1148_s1 + $0xa0] sm:$0xff] (!%p169_p3)   ;;  %v926_v23 = vld [vmem:[%s1148_s1 + $0xa8] sm:$0xff] (!%p169_p3)  }
   0xe   : > { %840 = vmatpush3.bf16.msra.mxu1 %v910_v7  ;;  %s1156_s12 = smov (!%p201_p4, %s958_s12), 2  ;;  %v927_v24 = vld [vmem:[%s1148_s1 + $0x70] sm:$0xff]   ;;  %v931_v28 = vld [vmem:[%s1148_s1 + $0x78] sm:$0xff]   ;;  %v940_v39 = vld [vmem:[%s1148_s1 + $0x100] sm:$0xff]  }
   0xf   : > { %841 = vmatprep.subr.bf16.mxu1 %v913_v10  ;;  %s876_s20 = smul.u32 20, %s1156_s12  ;;  %v928_v25 = vld [vmem:[%s1148_s1 + $0x30] sm:$0xff]   ;;  %v932_v29 = vld [vmem:[%s1148_s1 + $0x38] sm:$0xff]   ;;  %v941_v40 = vld [vmem:[%s1148_s1 + $0x108] sm:$0xff]   ;;  %s769_s25 = sshll.u32 %s1156_s12, 3 }
  0x10   : > { %820 = vmatpush3.bf16.msra.mxu0 %v912_v9  ;;  %v929_v26 = vld [vmem:[%s1148_s1 + $0xf0] sm:$0xff]   ;;  %v933_v30 = vld [vmem:[%s1148_s1 + $0xf8] sm:$0xff]   ;;  %v770_v45 = vld [vmem:[%s1149_s2] ss:$0 sm:$0xff]  ;;  %s219_s28 = scalar_lea.vmem %s1150_s3, %s769_s25 }
  0x11   : > { %821 = vmatprep.subr.bf16.mxu0 %v915_v12  ;;  %v930_v27 = vld [vmem:[%s1148_s1 + $0xb0] sm:$0xff]   ;;  %s1105_s4 = scalar_lea.vmem %s1147_s0, %s876_s20  ;;  %v937_v34 = vld [vmem:[%s1148_s1 + $0xb8] sm:$0xff]  }
  0x12   : > { %842 = vmatpush3.bf16.msra.mxu1 %v914_v11  ;;  %v221_v31 = vld [vmem:[%s1105_s4] sm:$0xff]  ;;  %v222_v36 = vld [vmem:[%s1105_s4 + $0x8] sm:$0xff]  ;;  %v942_v41 = vld [vmem:[%s1148_s1 + $0x110] sm:$0xff]  }
  0x13   : > { %843 = vmatprep.subr.bf16.mxu1 %v917_v14  ;;  %v771_v32 = vcombine.low %v221_v31, %v221_v31  ;;  %v772_v33 = vcombine.high %v221_v31, %v221_v31  ;;  %v773_v37 = vcombine.low %v222_v36, %v222_v36  ;;  %v774_v38 = vcombine.high %v222_v36, %v222_v36  ;;  %v943_v42 = vld [vmem:[%s1148_s1 + $0x118] sm:$0xff]   ;;  %v936_v43 = vld [vmem:[%s1105_s4 + $0x10] ss:$0 sps:$4 sm:$0xff]  }
  0x14   : > { %822 = vmatpush3.bf16.msra.mxu0 %v916_v13 }
  0x15   : > { %823 = vmatprep.subr.bf16.mxu0 %v919_v16  ;;  %572 = vmatprep.mubr.bf16.mxu0 %v772_v33 }
  0x16   : > { %844 = vmatpush3.bf16.msra.mxu1 %v918_v15  ;;  %612 = vmatprep.mubr.bf16.mxu1 %v774_v38 }
  0x17   : > { %845 = vmatprep.subr.bf16.mxu1 %v921_v18 }
  0x18   : > { %824 = vmatpush3.bf16.msra.mxu0 %v920_v17 }
  0x19   : > { %825 = vmatprep.subr.bf16.mxu0 %v923_v20 }
  0x1a   : > { %846 = vmatpush3.bf16.msra.mxu1 %v922_v19 }
  0x1b   : > { %847 = vmatprep.subr.bf16.mxu1 %v925_v22 }
  0x1c   : > { %826 = vmatpush3.bf16.msra.mxu0 %v924_v21 }
  0x1d   : > { %827 = vmatprep.subr.bf16.mxu0 %v927_v24 }
  0x1e   : > { %848 = vmatpush3.bf16.msra.mxu1 %v926_v23 }
  0x1f   : > { %849 = vmatprep.subr.bf16.mxu1 %v929_v26 }
  0x20   : > { %828 = vmatpush3.bf16.msra.mxu0 %v928_v25 }
  0x21   : > { %829 = vmatprep.subr.bf16.mxu0 %v931_v28 }
  0x22   : > { %850 = vmatpush3.bf16.msra.mxu1 %v930_v27 }
  0x23   : > { %851 = vmatprep.subr.bf16.mxu1 %v933_v30 }
  0x24   : > { %830 = vmatpush3.bf16.msra.mxu0 %v932_v29 }
  0x25   : > { %864 = vmatprep.subr.bf16.mxu0 %v968_v35 }
  0x26   : > { %852 = vmatpush3.bf16.msra.mxu1 %v937_v34 }
  0x27   : > { %573 = vmatmul.mubr.bf16.vlgmr.msra.gmra.mrb[0].mxu0 %v771_v32 }
  0x28   : > { %865 = vmatpush3.bf16.msra.mxu0 %v940_v39  ;;  %872 = vmatprep.mubr.msk.bf16.mxu0 %vm969_vm0, %v968_v35 }
  0x29   : > { %613 = vmatmul.mubr.bf16.vlgmr.msra.gmra.mrb[0].mxu1 %v773_v37  ;;  %866 = vmatprep.subr.bf16.mxu0 %v968_v35 }
  0x2c   : > { %867 = vmatpush3.bf16.msra.mxu0 %v941_v40 }
  0x2d   : > { %868 = vmatprep.subr.bf16.mxu0 %v968_v35 }
  0x30   : > { %869 = vmatpush3.bf16.msra.mxu0 %v942_v41 }
  0x31   : > { %870 = vmatprep.subr.bf16.mxu0 %v968_v35 }
  0x34   : > { %871 = vmatpush3.bf16.msra.mxu0 %v943_v42 }
  0x37   : > { %873 = vmatmul.mubr.msk.bf16.vlgmr.msra.gmra.mrb[4].mxu0 %vm536_vm1, %v936_v43 }
  0xfa   : > { %v831_v44 = vpop.f32.mrb[0].mxu0 }
  0xfb   : > { %v832_v46 = vpop.f32.mrb[1].mxu0 }
  0xfc   : > { %v833_v47 = vadd.f32 %v832_v46, %v831_v44  ;;  %v834_v48 = vpop.f32.mrb[2].mxu0  ;;  %v853_v49 = vpop.f32.mrb[0].mxu1 }
  0xfd   : > { %v835_v50 = vpop.f32.mrb[3].mxu0  ;;  %v854_v51 = vpop.f32.mrb[1].mxu1 }
  0xfe   : > { %v575_v52 = vadd.f32 %v833_v47, %v770_v45  ;;  %v855_v53 = vadd.f32 %v854_v51, %v853_v49  ;;  %v856_v54 = vpop.f32.mrb[2].mxu1 }
  0xff   : > { %v857_v55 = vpop.f32.mrb[3].mxu1 }
 0x100   : > { %v615_v56 = vadd.f32 %v855_v53, %v575_v52 }
 0x10a   : > { %v654_v57 = vpop.f32.mrb[4].mxu0 }
 0x10b   : > { %v655_v58 = vadd.f32 %v654_v57, %v615_v56  ;;  %v874_v59 = vpop.f32.mrb[5].mxu0 }
 0x10c   : > { %v657_v60 = vpop.f32.mrb[6].mxu0 }
 0x10d   : > { %v660_v61 = vmax.f32 %v655_v58, 0.0  ;;  %v875_v62 = vpop.f32.mrb[7].mxu0 }
 0x10f   : > { %661 = vst [vmem:[%s219_s28] sm:$0xff] %v660_v61 }
 0x110 PF: > { %s13_s14 = sadd.s32 1, %s966_s14   ;;  %s1151_s12 = smov %s962_s13 }
 0x111   : > { %p10_p5 = scmp.ge.s32.totalorder %s13_s14, 5   ;;  %s1152_s13 = smov %s1154_s15 }
 0x113   :  { %12 = sbr.rel (!%p10_p5) target bundleno = 2 (0x2), region = 68 }

// kernel: ez_detect_forward.107
= control target key start
LH: loop header
LB: loop body
LE: loop exit
PB: predicated region body
PF: predicated region fallthrough
CT: control target
= control target key end

     0   :  { %s616_s12 = smov 0   ;;  %s618_s13 = smov 0   ;;  %s704_s0 = inlined_call_operand.vmem [shape: bf16[24,128], index: 0, kind: input, shape index: {}]   ;;  %s705_s1 = inlined_call_operand.vmem [shape: bf16[128,256], index: 1, kind: input, shape index: {}]   ;;  %s706_s2 = inlined_call_operand.vmem [shape: f32[1,256], index: 2, kind: input, shape index: {}]   ;;  %s707_s3 = inlined_call_operand.vmem [shape: f32[24,256], index: 3, kind: output, shape index: {}]  }
   0x1   :  { %s620_s14 = smov 0  }
   0x2 LB: > { %s25_s15 = sadd.s32 1, %s589_s13  ;;  %p499_p0 = scmp.ge.s32.totalorder %s593_s14, 1  ;;  %s593_s14 = sphi %s620_s14, %s13_s14   ;;  %s589_s13 = sphi %s618_s13, %s709_s13   ;;  %s585_s12 = sphi %s616_s12, %s708_s12  }
   0x3   : > { %p27_p1 = scmp.ge.s32.totalorder %s25_s15, 3  ;;  %p171_p2 = scmp.lt.s32.totalorder %s593_s14, 4 }
   0x5   : > { %s711_s15 = smov (%p27_p1, %s25_s15), 0  ;;  %p172_p3 = pnand %p499_p0, %p171_p2 }
   0x6   : > { %v547_v0 = vld [vmem:[%s705_s1 + $0x4] ss:$8 sps:$4 sm:$0xff] (!%p172_p3)   ;;  %v549_v1 = vld [vmem:[%s705_s1] ss:$8 sps:$4 sm:$0xff] (!%p172_p3)   ;;  %v595_v2 = vmov (!%p172_p3), 0   ;;  %p207_p4 = scmp.lt.s32.totalorder (!%p172_p3), %s585_s12, 2  ;;  %v252_v18 = vlaneseq (!%p172_p3) }
   0x7   : > { %175 = sbr.rel (%p172_p3) target bundleno = 255 (0xff), region = 32  ;;  %374 = vmatprep.mubr.bf16.mxu0 (!%p172_p3), %v595_v2  ;;  %342 = vmatprep.subr.bf16.mxu0 (!%p172_p3), %v547_v0  ;;  %v550_v3 = vld [vmem:[%s705_s1 + $0x14] ss:$8 sps:$4 sm:$0xff] (!%p172_p3)   ;;  %v552_v4 = vld [vmem:[%s705_s1 + $0x10] ss:$8 sps:$4 sm:$0xff] (!%p172_p3)  }
   0x8   : > { %343 = vmatpush1.bf16.msra.mxu0 (!%p172_p3), %v549_v1  ;;  %v553_v5 = vld [vmem:[%s705_s1 + $0x24] ss:$8 sps:$4 sm:$0xff] (!%p172_p3)   ;;  %v555_v6 = vld [vmem:[%s705_s1 + $0x20] ss:$8 sps:$4 sm:$0xff] (!%p172_p3)   ;;  %v556_v7 = vld [vmem:[%s705_s1 + $0x34] ss:$8 sps:$4 sm:$0xff] (!%p172_p3)  }
   0x9   : > { %344 = vmatprep.subr.bf16.mxu0 (!%p172_p3), %v550_v3  ;;  %v558_v8 = vld [vmem:[%s705_s1 + $0x30] ss:$8 sps:$4 sm:$0xff] (!%p172_p3)   ;;  %v559_v9 = vld [vmem:[%s705_s1 + $0x44] ss:$8 sps:$4 sm:$0xff] (!%p172_p3)   ;;  %v561_v10 = vld [vmem:[%s705_s1 + $0x40] ss:$8 sps:$4 sm:$0xff] (!%p172_p3)  }
   0xa   : > { %v562_v11 = vld [vmem:[%s705_s1 + $0x54] ss:$8 sps:$4 sm:$0xff] (!%p172_p3)   ;;  %v564_v12 = vld [vmem:[%s705_s1 + $0x50] ss:$8 sps:$4 sm:$0xff] (!%p172_p3)   ;;  %v565_v13 = vld [vmem:[%s705_s1 + $0x64] ss:$8 sps:$4 sm:$0xff] (!%p172_p3)  }
   0xb   : > { %v567_v14 = vld [vmem:[%s705_s1 + $0x60] ss:$8 sps:$4 sm:$0xff] (!%p172_p3)   ;;  %v568_v15 = vld [vmem:[%s705_s1 + $0x74] ss:$8 sps:$4 sm:$0xff] (!%p172_p3)   ;;  %v570_v16 = vld [vmem:[%s705_s1 + $0x70] ss:$8 sps:$4 sm:$0xff] (!%p172_p3)  }
   0xc   : > { %345 = vmatpush1.bf16.msra.mxu0 (!%p172_p3), %v552_v4  ;;  %v253_v19 = vshrl.u32 (!%p172_p3), %v252_v18, 7  ;;  %v250_v21 = vld [vmem:[%s706_s2] sm:$0x3] (!%p172_p3) }
   0xd   : > { %346 = vmatprep.subr.bf16.mxu0 (!%p172_p3), %v553_v5 }
   0xe   : > { %s713_s12 = smov (!%p207_p4, %s585_s12), 2  ;;  %v254_v20 = vsub.s32 0, %v253_v19  ;;  %v258_v22 = vsub.s32 1, %v253_v19 }
   0xf   : > { %s500_s23 = sshll.u32 %s713_s12, 2  ;;  %s521_s4 = sshll.u32 %s713_s12, 4 }
  0x10   : > { %347 = vmatpush1.bf16.msra.mxu0 %v555_v6  ;;  %s210_s28 = scalar_lea.vmem %s704_s0, %s500_s23  ;;  %v255_v23 = vrot.slane %v250_v21, %v254_v20  ;;  %v259_v24 = vrot.slane %v250_v21, %v258_v22  ;;  %s230_s7 = scalar_lea.vmem %s707_s3, %s521_s4 }
  0x11   : > { %348 = vmatprep.subr.bf16.mxu0 %v556_v7  ;;  %v233_v17 = vld [vmem:[%s210_s28] sm:$0xf] }
  0x14   : > { %349 = vmatpush1.bf16.msra.mxu0 %v558_v8 }
  0x15   : > { %350 = vmatprep.subr.bf16.mxu0 %v559_v9 }
  0x18   : > { %351 = vmatpush1.bf16.msra.mxu0 %v561_v10 }
  0x19   : > { %352 = vmatprep.subr.bf16.mxu0 %v562_v11 }
  0x1c   : > { %353 = vmatpush1.bf16.msra.mxu0 %v564_v12 }
  0x1d   : > { %354 = vmatprep.subr.bf16.mxu0 %v565_v13 }
  0x20   : > { %355 = vmatpush1.bf16.msra.mxu0 %v567_v14 }
  0x21   : > { %356 = vmatprep.subr.bf16.mxu0 %v568_v15 }
  0x24   : > { %357 = vmatpush1.bf16.msra.mxu0 %v570_v16 }
  0x27   : > { %375 = vmatmul.mubr.bf16.vlgmr.msra.gmra.mrb[0].mxu0 %v233_v17 }
  0xfa   : > { %v376_v25 = vpop.f32.mrb[0].mxu0 }
  0xfb   : > { %v377_v26 = vadd.f32 %v376_v25, %v255_v23  ;;  %v378_v27 = vpop.f32.mrb[1].mxu0 }
  0xfc   : > { %v379_v28 = vadd.f32 %v378_v27, %v259_v24  ;;  %v380_v29 = vpop.f32.mrb[2].mxu0 }
  0xfd   : > { %383 = vst [vmem:[%s230_s7] sm:$0xff] %v377_v26  ;;  %v381_v30 = vpop.f32.mrb[3].mxu0 }
  0xfe   : > { %384 = vst [vmem:[%s230_s7 + $0x8] sm:$0xff] %v379_v28 }
  0xff PF: > { %s13_s14 = sadd.s32 1, %s593_s14   ;;  %s708_s12 = smov %s589_s13 }
 0x100   : > { %p10_p5 = scmp.ge.s32.totalorder %s13_s14, 5   ;;  %s709_s13 = smov %s711_s15 }
 0x102   :  { %12 = sbr.rel (!%p10_p5) target bundleno = 2 (0x2), region = 68 }

// kernel: ez_detect_forward.108
= control target key start
LH: loop header
LB: loop body
LE: loop exit
PB: predicated region body
PF: predicated region fallthrough
CT: control target
= control target key end

     0   :  { %s648_s15 = smov 0   ;;  %s650_s16 = smov 0   ;;  %s715_s0 = inlined_call_operand.vmem [shape: bf16[24,64], index: 0, kind: input, shape index: {}]   ;;  %s716_s1 = inlined_call_operand.vmem [shape: bf16[64,256], index: 1, kind: input, shape index: {}]   ;;  %s717_s2 = inlined_call_operand.vmem [shape: f32[1,256], index: 2, kind: input, shape index: {}]   ;;  %s718_s3 = inlined_call_operand.vmem [shape: f32[24,256], index: 3, kind: input, shape index: {}]   ;;  %s719_s4 = inlined_call_operand.vmem [shape: f32[24,256], index: 4, kind: output, shape index: {}]  }
   0x1   :  { %s652_s17 = smov 0  }
   0x2 LB: > { %s26_s18 = sadd.s32 1, %s616_s16  ;;  %p542_p0 = scmp.ge.s32.totalorder %s620_s17, 1  ;;  %s620_s17 = sphi %s652_s17, %s14_s17   ;;  %s616_s16 = sphi %s650_s16, %s721_s16   ;;  %s612_s15 = sphi %s648_s15, %s720_s15  }
   0x3   : > { %p28_p1 = scmp.ge.s32.totalorder %s26_s18, 3  ;;  %p213_p2 = scmp.lt.s32.totalorder %s620_s17, 4 }
   0x5   : > { %s723_s18 = smov (%p28_p1, %s26_s18), 0  ;;  %p214_p3 = pnand %p542_p0, %p213_p2 }
   0x6   : > { %v586_v0 = vld [vmem:[%s716_s1 + $0x4] ss:$8 sps:$4 sm:$0xff] (!%p214_p3)   ;;  %v588_v1 = vld [vmem:[%s716_s1] ss:$8 sps:$4 sm:$0xff] (!%p214_p3)   ;;  %v622_v2 = vmov (!%p214_p3), 0   ;;  %p260_p4 = scmp.lt.s32.totalorder (!%p214_p3), %s612_s15, 2  ;;  %v307_v10 = vlaneseq (!%p214_p3) }
   0x7   : > { %217 = sbr.rel (%p214_p3) target bundleno = 243 (0xf3), region = 36  ;;  %393 = vmatprep.mubr.bf16.mxu0 (!%p214_p3), %v622_v2  ;;  %361 = vmatprep.subr.bf16.mxu0 (!%p214_p3), %v586_v0  ;;  %v589_v3 = vld [vmem:[%s716_s1 + $0x14] ss:$8 sps:$4 sm:$0xff] (!%p214_p3)   ;;  %v591_v4 = vld [vmem:[%s716_s1 + $0x10] ss:$8 sps:$4 sm:$0xff] (!%p214_p3)   ;;  %vm357_vm0 = vcmask (!%p214_p3), 523264  }
   0x8   : > { %362 = vmatpush1.bf16.msra.mxu0 (!%p214_p3), %v588_v1  ;;  %v592_v5 = vld [vmem:[%s716_s1 + $0x24] ss:$8 sps:$4 sm:$0xff] (!%p214_p3)   ;;  %v594_v6 = vld [vmem:[%s716_s1 + $0x20] ss:$8 sps:$4 sm:$0xff] (!%p214_p3)   ;;  %v595_v7 = vld [vmem:[%s716_s1 + $0x34] ss:$8 sps:$4 sm:$0xff] (!%p214_p3)  }
   0x9   : > { %363 = vmatprep.subr.bf16.mxu0 (!%p214_p3), %v589_v3  ;;  %v597_v8 = vld [vmem:[%s716_s1 + $0x30] ss:$8 sps:$4 sm:$0xff] (!%p214_p3)   ;;  %v308_v11 = vshrl.u32 (!%p214_p3), %v307_v10, 7  ;;  %v305_v13 = vld [vmem:[%s717_s2] sm:$0x3] (!%p214_p3) }
   0xb   : > { %v309_v12 = vsub.s32 (!%p214_p3), 0, %v308_v11  ;;  %v313_v14 = vsub.s32 (!%p214_p3), 1, %v308_v11 }
   0xc   : > { %364 = vmatpush1.bf16.msra.mxu0 (!%p214_p3), %v591_v4 }
   0xd   : > { %365 = vmatprep.subr.bf16.mxu0 (!%p214_p3), %v592_v5  ;;  %v310_v15 = vrot.slane (!%p214_p3), %v305_v13, %v309_v12  ;;  %v314_v16 = vrot.slane (!%p214_p3), %v305_v13, %v313_v14 }
   0xe   : > { %s725_s15 = smov (!%p260_p4, %s612_s15), 2 }
   0xf   : > { %s543_s7 = sshll.u32 %s725_s15, 2  ;;  %s559_s13 = sshll.u32 %s725_s15, 4 }
  0x10   : > { %366 = vmatpush1.bf16.msra.mxu0 %v594_v6  ;;  %s263_s12 = scalar_lea.vmem %s715_s0, %s543_s7  ;;  %s283_s22 = scalar_lea.vmem %s718_s3, %s559_s13 }
  0x11   : > { %367 = vmatprep.subr.bf16.mxu0 %v595_v7  ;;  %v296_v9 = vld [vmem:[%s263_s12] sm:$0xf]  ;;  %v403_v21 = vld [vmem:[%s283_s22 + $0x8] sm:$0xff]  ;;  %s293_s24 = scalar_lea.vmem %s719_s4, %s559_s13 }
  0x12   : > { %v402_v18 = vld [vmem:[%s283_s22] sm:$0xff] }
  0x14   : > { %368 = vmatpush1.bf16.msra.mxu0 %v597_v8 }
  0x17   : > { %556 = vmatmul.mubr.msk.bf16.vlgmr.msra.gmra.mrb[0].mxu0 %vm357_vm0, %v296_v9 }
  0xea   : > { %v395_v17 = vpop.f32.mrb[0].mxu0 }
  0xeb   : > { %v396_v19 = vadd.f32 %v395_v17, %v310_v15  ;;  %v397_v20 = vpop.f32.mrb[1].mxu0 }
  0xec   : > { %v398_v22 = vadd.f32 %v397_v20, %v314_v16  ;;  %v399_v23 = vpop.f32.mrb[2].mxu0 }
  0xed   : > { %v404_v24 = vadd.f32 %v402_v18, %v396_v19  ;;  %v400_v25 = vpop.f32.mrb[3].mxu0 }
  0xee   : > { %v405_v26 = vadd.f32 %v403_v21, %v398_v22 }
  0xef   : > { %v406_v27 = vmax.f32 %v404_v24, 0.0 }
  0xf0   : > { %v407_v28 = vmax.f32 %v405_v26, 0.0 }
  0xf1   : > { %408 = vst [vmem:[%s293_s24] sm:$0xff] %v406_v27 }
  0xf2   : > { %409 = vst [vmem:[%s293_s24 + $0x8] sm:$0xff] %v407_v28 }
  0xf3 PF: > { %s14_s17 = sadd.s32 1, %s620_s17   ;;  %s720_s15 = smov %s616_s16 }
  0xf4   : > { %p11_p5 = scmp.ge.s32.totalorder %s14_s17, 5   ;;  %s721_s16 = smov %s723_s18 }
  0xf6   :  { %13 = sbr.rel (!%p11_p5) target bundleno = 2 (0x2), region = 75 }

// kernel: ez_detect_forward.109
= control target key start
LH: loop header
LB: loop body
LE: loop exit
PB: predicated region body
PF: predicated region fallthrough
CT: control target
= control target key end

     0   :  { %s645_s12 = smov 0   ;;  %s647_s13 = smov 0   ;;  %s736_s0 = inlined_call_operand.vmem [shape: bf16[24,256], index: 0, kind: input, shape index: {}]   ;;  %s737_s1 = inlined_call_operand.vmem [shape: bf16[256,128], index: 1, kind: input, shape index: {}]   ;;  %s738_s2 = inlined_call_operand.vmem [shape: f32[1,128], index: 2, kind: input, shape index: {}]   ;;  %s739_s3 = inlined_call_operand.vmem [shape: f32[24,128], index: 3, kind: output, shape index: {}]  }
   0x1   :  { %s649_s14 = smov 0  }
   0x2 LB: > { %s25_s15 = sadd.s32 1, %s619_s13  ;;  %p511_p0 = scmp.ge.s32.totalorder %s623_s14, 1  ;;  %s623_s14 = sphi %s649_s14, %s13_s14   ;;  %s619_s13 = sphi %s647_s13, %s741_s13   ;;  %s615_s12 = sphi %s645_s12, %s740_s12  }
   0x3   : > { %p27_p1 = scmp.ge.s32.totalorder %s25_s15, 3  ;;  %p168_p2 = scmp.lt.s32.totalorder %s623_s14, 4 }
   0x5   : > { %s743_s15 = smov (%p27_p1, %s25_s15), 0  ;;  %p169_p3 = pnand %p511_p0, %p168_p2 }
   0x6   : > { %v583_v0 = vld [vmem:[%s737_s1 + $0x40] sm:$0xff] (!%p169_p3)   ;;  %v585_v2 = vld [vmem:[%s737_s1 + $0x48] sm:$0xff] (!%p169_p3)   ;;  %p201_p4 = scmp.lt.s32.totalorder (!%p169_p3), %s615_s12, 2  ;;  %v587_v4 = vld [vmem:[%s737_s1 + $0x50] sm:$0xff] (!%p169_p3)  }
   0x7   : > { %172 = sbr.rel (%p169_p3) target bundleno = 259 (0x103), region = 32  ;;  %v584_v1 = vld [vmem:[%s737_s1] sm:$0xff] (!%p169_p3)   ;;  %537 = vmatprep.subr.bf16.mxu0 (!%p169_p3), %v583_v0  ;;  %v586_v3 = vld [vmem:[%s737_s1 + $0x8] sm:$0xff] (!%p169_p3)   ;;  %v588_v5 = vld [vmem:[%s737_s1 + $0x10] sm:$0xff] (!%p169_p3)  }
   0x8   : > { %538 = vmatpush3.bf16.msra.mxu0 (!%p169_p3), %v584_v1  ;;  %v589_v6 = vld [vmem:[%s737_s1 + $0x58] sm:$0xff] (!%p169_p3)   ;;  %v591_v8 = vld [vmem:[%s737_s1 + $0x60] sm:$0xff] (!%p169_p3)   ;;  %v593_v10 = vld [vmem:[%s737_s1 + $0x68] sm:$0xff] (!%p169_p3)  }
   0x9   : > { %539 = vmatprep.subr.bf16.mxu0 (!%p169_p3), %v585_v2  ;;  %v590_v7 = vld [vmem:[%s737_s1 + $0x18] sm:$0xff] (!%p169_p3)   ;;  %v592_v9 = vld [vmem:[%s737_s1 + $0x20] sm:$0xff] (!%p169_p3)   ;;  %v594_v13 = vld [vmem:[%s737_s1 + $0x28] sm:$0xff] (!%p169_p3)  }
   0xa   : > { %v595_v14 = vld [vmem:[%s737_s1 + $0x70] sm:$0xff] (!%p169_p3)   ;;  %v597_v16 = vld [vmem:[%s737_s1 + $0x78] sm:$0xff] (!%p169_p3)   ;;  %v515_v20 = vld [vmem:[%s738_s2] ss:$0 sm:$0xff] (!%p169_p3) }
   0xb   : > { %v596_v15 = vld [vmem:[%s737_s1 + $0x30] sm:$0xff] (!%p169_p3)   ;;  %v598_v17 = vld [vmem:[%s737_s1 + $0x38] sm:$0xff] (!%p169_p3)  }
   0xc   : > { %540 = vmatpush3.bf16.msra.mxu0 (!%p169_p3), %v586_v3 }
   0xd   : > { %541 = vmatprep.subr.bf16.mxu0 (!%p169_p3), %v587_v4 }
   0xe   : > { %s745_s12 = smov (!%p201_p4, %s615_s12), 2 }
   0xf   : > { %s536_s30 = sshll.u32 %s745_s12, 3 }
  0x10   : > { %542 = vmatpush3.bf16.msra.mxu0 %v588_v5  ;;  %s205_s10 = scalar_lea.vmem %s736_s0, %s536_s30  ;;  %s219_s7 = scalar_lea.vmem %s739_s3, %s536_s30 }
  0x11   : > { %543 = vmatprep.subr.bf16.mxu0 %v589_v6  ;;  %v221_v11 = vld [vmem:[%s205_s10] sm:$0xff] }
  0x12   : > { %v517_v12 = vcombine.high %v221_v11, %v221_v11  ;;  %v516_v18 = vcombine.low %v221_v11, %v221_v11 }
  0x14   : > { %544 = vmatpush3.bf16.msra.mxu0 %v590_v7  ;;  %396 = vmatprep.mubr.bf16.mxu0 %v517_v12 }
  0x15   : > { %545 = vmatprep.subr.bf16.mxu0 %v591_v8 }
  0x18   : > { %546 = vmatpush3.bf16.msra.mxu0 %v592_v9 }
  0x19   : > { %547 = vmatprep.subr.bf16.mxu0 %v593_v10 }
  0x1c   : > { %548 = vmatpush3.bf16.msra.mxu0 %v594_v13 }
  0x1d   : > { %549 = vmatprep.subr.bf16.mxu0 %v595_v14 }
  0x20   : > { %550 = vmatpush3.bf16.msra.mxu0 %v596_v15 }
  0x21   : > { %551 = vmatprep.subr.bf16.mxu0 %v597_v16 }
  0x24   : > { %552 = vmatpush3.bf16.msra.mxu0 %v598_v17 }
  0x27   : > { %397 = vmatmul.mubr.bf16.vlgmr.msra.gmra.mrb[0].mxu0 %v516_v18 }
  0xfa   : > { %v553_v19 = vpop.f32.mrb[0].mxu0 }
  0xfb   : > { %v554_v21 = vpop.f32.mrb[1].mxu0 }
  0xfc   : > { %v555_v22 = vadd.f32 %v554_v21, %v553_v19  ;;  %v556_v23 = vpop.f32.mrb[2].mxu0 }
  0xfd   : > { %v557_v24 = vpop.f32.mrb[3].mxu0 }
  0xfe   : > { %v399_v25 = vadd.f32 %v555_v22, %v515_v20 }
 0x100   : > { %v404_v26 = vmax.f32 %v399_v25, 0.0 }
 0x102   : > { %405 = vst [vmem:[%s219_s7] sm:$0xff] %v404_v26 }
 0x103 PF: > { %s13_s14 = sadd.s32 1, %s623_s14   ;;  %s740_s12 = smov %s619_s13 }
 0x104   : > { %p10_p5 = scmp.ge.s32.totalorder %s13_s14, 5   ;;  %s741_s13 = smov %s743_s15 }
 0x106   :  { %12 = sbr.rel (!%p10_p5) target bundleno = 2 (0x2), region = 68 }

// kernel: ez_detect_forward.117
= control target key start
LH: loop header
LB: loop body
LE: loop exit
PB: predicated region body
PF: predicated region fallthrough
CT: control target
= control target key end

     0   :  { %v183_v0 = vmov 0.0   ;;  %vm184_vm0 = vmmov 0   ;;  %s238_s1 = inlined_call_operand.vmem [shape: bf16[128,128], index: 1, kind: input, shape index: {}]   ;;  %s239_s0 = inlined_call_operand.vmem [shape: bf16[8,128], index: 0, kind: input, shape index: {}]   ;;  %s240_s2 = inlined_call_operand.vmem [shape: f32[1,128], index: 2, kind: input, shape index: {}]   ;;  %s241_s3 = inlined_call_operand.vmem [shape: f32[8,128], index: 3, kind: output, shape index: {}]  }
   0x1   :  { %153 = vmatprep.subr.bf16.mxu0 %v183_v0  ;;  %v175_v1 = vld [vmem:[%s238_s1] sm:$0xff]   ;;  %169 = vmatprep.mubr.msk.bf16.mxu0 %vm184_vm0, %v183_v0  ;;  %v176_v2 = vld [vmem:[%s238_s1 + $0x8] sm:$0xff]   ;;  %v177_v3 = vld [vmem:[%s238_s1 + $0x10] sm:$0xff]  }
   0x2   :  { %154 = vmatpush3.bf16.msra.mxu0 %v175_v1  ;;  %v178_v4 = vld [vmem:[%s238_s1 + $0x18] sm:$0xff]   ;;  %v179_v5 = vld [vmem:[%s238_s1 + $0x20] sm:$0xff]   ;;  %v180_v6 = vld [vmem:[%s238_s1 + $0x28] sm:$0xff]  }
   0x3   :  { %155 = vmatprep.subr.bf16.mxu0 %v183_v0  ;;  %v181_v7 = vld [vmem:[%s238_s1 + $0x30] sm:$0xff]   ;;  %v182_v8 = vld [vmem:[%s238_s1 + $0x38] sm:$0xff]   ;;  %v15_v9 = vld [vmem:[%s239_s0] sm:$0xf] }
   0x4   :  { %v135_v10 = vld [vmem:[%s240_s2] ss:$0 sm:$0xff] }
   0x6   :  { %156 = vmatpush3.bf16.msra.mxu0 %v176_v2 }
   0x7   :  { %157 = vmatprep.subr.bf16.mxu0 %v183_v0 }
   0xa   :  { %158 = vmatpush3.bf16.msra.mxu0 %v177_v3 }
   0xb   :  { %159 = vmatprep.subr.bf16.mxu0 %v183_v0 }
   0xe   :  { %160 = vmatpush3.bf16.msra.mxu0 %v178_v4 }
   0xf   :  { %161 = vmatprep.subr.bf16.mxu0 %v183_v0 }
  0x12   :  { %162 = vmatpush3.bf16.msra.mxu0 %v179_v5 }
  0x13   :  { %163 = vmatprep.subr.bf16.mxu0 %v183_v0 }
  0x16   :  { %164 = vmatpush3.bf16.msra.mxu0 %v180_v6 }
  0x17   :  { %165 = vmatprep.subr.bf16.mxu0 %v183_v0 }
  0x1a   :  { %166 = vmatpush3.bf16.msra.mxu0 %v181_v7 }
  0x1b   :  { %167 = vmatprep.subr.bf16.mxu0 %v183_v0 }
  0x1e   :  { %168 = vmatpush3.bf16.msra.mxu0 %v182_v8 }
  0x21   :  { %170 = vmatmul.mubr.bf16.vlgmr.msra.gmra.mrb[0].mxu0 %v15_v9 }
  0xf4   :  { %v121_v11 = vpop.f32.mrb[0].mxu0 }
  0xf5   :  { %v122_v12 = vadd.f32 %v135_v10, %v121_v11  ;;  %v171_v13 = vpop.f32.mrb[1].mxu0 }
  0xf6   :  { %v124_v14 = vpop.f32.mrb[2].mxu0 }
  0xf7   :  { %vm127_vm1 = vcmp.ge.f32.partialorder %v122_v12, 0.0  ;;  %v128_v15 = vmul.f32 0.2, %v122_v12  ;;  %v172_v16 = vpop.f32.mrb[3].mxu0 }
  0xf9   :  { %v129_v17 = vsel %vm127_vm1, %v122_v12, %v128_v15 }
  0xfa   :  { %130 = vst [vmem:[%s241_s3] sm:$0xff] %v129_v17 }

// kernel: ez_detect_forward.116
= control target key start
LH: loop header
LB: loop body
LE: loop exit
PB: predicated region body
PF: predicated region fallthrough
CT: control target
= control target key end

     0   :  { %vm1124_vm0 = vmmov 0   ;;  %s1382_s1 = inlined_call_operand.vmem [shape: bf16[1152,128], index: 1, kind: input, shape index: {}]   ;;  %s1383_s0 = inlined_call_operand.vmem [shape: bf16[8,1152], index: 0, kind: input, shape index: {}]   ;;  %s1384_s2 = inlined_call_operand.vmem [shape: f32[1,128], index: 2, kind: input, shape index: {}]   ;;  %s1385_s3 = inlined_call_operand.vmem [shape: f32[8,128], index: 3, kind: output, shape index: {}]  }
   0x1   :  { %v1042_v0 = vld [vmem:[%s1382_s1 + $0x40] sm:$0xff]   ;;  %v1046_v4 = vld [vmem:[%s1382_s1 + $0x48] sm:$0xff]   ;;  %v1050_v8 = vld [vmem:[%s1382_s1 + $0x50] sm:$0xff]  }
   0x2   :  { %v1043_v1 = vld [vmem:[%s1382_s1] sm:$0xff]   ;;  %923 = vmatprep.subr.bf16.mxu0 %v1042_v0  ;;  %v1047_v5 = vld [vmem:[%s1382_s1 + $0x8] sm:$0xff]   ;;  %v1051_v9 = vld [vmem:[%s1382_s1 + $0x10] sm:$0xff]  }
   0x3   :  { %v1044_v2 = vld [vmem:[%s1382_s1 + $0xc0] sm:$0xff]   ;;  %924 = vmatpush3.bf16.msra.mxu0 %v1043_v1  ;;  %v1048_v6 = vld [vmem:[%s1382_s1 + $0xc8] sm:$0xff]   ;;  %v1052_v10 = vld [vmem:[%s1382_s1 + $0xd0] sm:$0xff]  }
   0x4   :  { %v1045_v3 = vld [vmem:[%s1382_s1 + $0x80] sm:$0xff]   ;;  %945 = vmatprep.subr.bf16.mxu1 %v1044_v2  ;;  %925 = vmatprep.subr.bf16.mxu0 %v1046_v4  ;;  %v1049_v7 = vld [vmem:[%s1382_s1 + $0x88] sm:$0xff]   ;;  %v1053_v11 = vld [vmem:[%s1382_s1 + $0x90] sm:$0xff]  }
   0x5   :  { %946 = vmatpush3.bf16.msra.mxu1 %v1045_v3  ;;  %v1054_v12 = vld [vmem:[%s1382_s1 + $0x58] sm:$0xff]   ;;  %v1058_v16 = vld [vmem:[%s1382_s1 + $0x60] sm:$0xff]   ;;  %v1062_v20 = vld [vmem:[%s1382_s1 + $0x68] sm:$0xff]  }
   0x6   :  { %947 = vmatprep.subr.bf16.mxu1 %v1048_v6  ;;  %v1055_v13 = vld [vmem:[%s1382_s1 + $0x18] sm:$0xff]   ;;  %v1059_v17 = vld [vmem:[%s1382_s1 + $0x20] sm:$0xff]   ;;  %v1063_v21 = vld [vmem:[%s1382_s1 + $0x28] sm:$0xff]  }
   0x7   :  { %926 = vmatpush3.bf16.msra.mxu0 %v1047_v5  ;;  %v1056_v14 = vld [vmem:[%s1382_s1 + $0xd8] sm:$0xff]   ;;  %v1060_v18 = vld [vmem:[%s1382_s1 + $0xe0] sm:$0xff]   ;;  %v1064_v22 = vld [vmem:[%s1382_s1 + $0xe8] sm:$0xff]  }
   0x8   :  { %927 = vmatprep.subr.bf16.mxu0 %v1050_v8  ;;  %v1057_v15 = vld [vmem:[%s1382_s1 + $0x98] sm:$0xff]   ;;  %v1061_v19 = vld [vmem:[%s1382_s1 + $0xa0] sm:$0xff]   ;;  %v1065_v23 = vld [vmem:[%s1382_s1 + $0xa8] sm:$0xff]  }
   0x9   :  { %948 = vmatpush3.bf16.msra.mxu1 %v1049_v7  ;;  %v1066_v24 = vld [vmem:[%s1382_s1 + $0x70] sm:$0xff]   ;;  %v1070_v28 = vld [vmem:[%s1382_s1 + $0x78] sm:$0xff]   ;;  %v15_v31 = vld [vmem:[%s1383_s0] sm:$0xff] }
   0xa   :  { %949 = vmatprep.subr.bf16.mxu1 %v1052_v10  ;;  %v1067_v25 = vld [vmem:[%s1382_s1 + $0x30] sm:$0xff]   ;;  %v1071_v29 = vld [vmem:[%s1382_s1 + $0x38] sm:$0xff]   ;;  %v842_v32 = vcombine.low %v15_v31, %v15_v31  ;;  %v843_v33 = vcombine.high %v15_v31, %v15_v31  ;;  %v1076_v35 = vld [vmem:[%s1382_s1 + $0x140] sm:$0xff]  }
   0xb   :  { %928 = vmatpush3.bf16.msra.mxu0 %v1051_v9  ;;  %v1068_v26 = vld [vmem:[%s1382_s1 + $0xf0] sm:$0xff]   ;;  %v1072_v30 = vld [vmem:[%s1382_s1 + $0xf8] sm:$0xff]   ;;  %v16_v36 = vld [vmem:[%s1383_s0 + $0x8] sm:$0xff]  ;;  %v1123_v9 = vmov 0.0  }
   0xc   :  { %929 = vmatprep.subr.bf16.mxu0 %v1054_v12  ;;  %v1069_v27 = vld [vmem:[%s1382_s1 + $0xb0] sm:$0xff]   ;;  %v1075_v34 = vld [vmem:[%s1382_s1 + $0xb8] sm:$0xff]   ;;  %667 = vmatprep.mubr.bf16.mxu0 %v843_v33  ;;  %v844_v37 = vcombine.low %v16_v36, %v16_v36  ;;  %v845_v38 = vcombine.high %v16_v36, %v16_v36  ;;  %v1079_v39 = vld [vmem:[%s1382_s1 + $0x100] sm:$0xff]  }
   0xd   :  { %950 = vmatpush3.bf16.msra.mxu1 %v1053_v11  ;;  %v1080_v40 = vld [vmem:[%s1382_s1 + $0x1c0] sm:$0xff]   ;;  %v1082_v42 = vld [vmem:[%s1382_s1 + $0x148] sm:$0xff]   ;;  %v1086_v46 = vld [vmem:[%s1382_s1 + $0x150] sm:$0xff]  }
   0xe   :  { %951 = vmatprep.subr.bf16.mxu1 %v1056_v14  ;;  %707 = vmatprep.mubr.bf16.mxu1 %v845_v38  ;;  %v1081_v41 = vld [vmem:[%s1382_s1 + $0x180] sm:$0xff]   ;;  %v1083_v43 = vld [vmem:[%s1382_s1 + $0x108] sm:$0xff]   ;;  %v1087_v47 = vld [vmem:[%s1382_s1 + $0x110] sm:$0xff]  }
   0xf   :  { %930 = vmatpush3.bf16.msra.mxu0 %v1055_v13  ;;  %v1084_v44 = vld [vmem:[%s1382_s1 + $0x1c8] sm:$0xff]   ;;  %v1088_v48 = vld [vmem:[%s1382_s1 + $0x1d0] sm:$0xff]   ;;  %v1090_v50 = vld [vmem:[%s1382_s1 + $0x158] sm:$0xff]  }
  0x10   :  { %931 = vmatprep.subr.bf16.mxu0 %v1058_v16  ;;  %v1085_v45 = vld [vmem:[%s1382_s1 + $0x188] sm:$0xff]   ;;  %v1089_v49 = vld [vmem:[%s1382_s1 + $0x190] sm:$0xff]   ;;  %v1091_v51 = vld [vmem:[%s1382_s1 + $0x118] sm:$0xff]  }
  0x11   :  { %952 = vmatpush3.bf16.msra.mxu1 %v1057_v15  ;;  %v1092_v52 = vld [vmem:[%s1382_s1 + $0x1d8] sm:$0xff]   ;;  %v1094_v54 = vld [vmem:[%s1382_s1 + $0x160] sm:$0xff]   ;;  %v1098_v58 = vld [vmem:[%s1382_s1 + $0x168] sm:$0xff]  }
  0x12   :  { %953 = vmatprep.subr.bf16.mxu1 %v1060_v18  ;;  %v1093_v53 = vld [vmem:[%s1382_s1 + $0x198] sm:$0xff]   ;;  %v1095_v55 = vld [vmem:[%s1382_s1 + $0x120] sm:$0xff]   ;;  %v1099_v59 = vld [vmem:[%s1382_s1 + $0x128] sm:$0xff]  }
  0x13   :  { %932 = vmatpush3.bf16.msra.mxu0 %v1059_v17  ;;  %v1096_v56 = vld [vmem:[%s1382_s1 + $0x1e0] sm:$0xff]   ;;  %v1100_v60 = vld [vmem:[%s1382_s1 + $0x1e8] sm:$0xff]   ;;  %v1102_v62 = vld [vmem:[%s1382_s1 + $0x170] sm:$0xff]  }
  0x14   :  { %933 = vmatprep.subr.bf16.mxu0 %v1062_v20  ;;  %v1097_v57 = vld [vmem:[%s1382_s1 + $0x1a0] sm:$0xff]   ;;  %v1101_v61 = vld [vmem:[%s1382_s1 + $0x1a8] sm:$0xff]   ;;  %v1103_v63 = vld [vmem:[%s1382_s1 + $0x130] sm:$0xff]  }
  0x15   :  { %954 = vmatpush3.bf16.msra.mxu1 %v1061_v19  ;;  %v1104_v0 = vld [vmem:[%s1382_s1 + $0x1f0] sm:$0xff]   ;;  %v1106_v2 = vld [vmem:[%s1382_s1 + $0x178] sm:$0xff]   ;;  %v1114_v13 = vld [vmem:[%s1382_s1 + $0x200] sm:$0xff]  }
  0x16   :  { %955 = vmatprep.subr.bf16.mxu1 %v1064_v22  ;;  %v1105_v1 = vld [vmem:[%s1382_s1 + $0x1b0] sm:$0xff]   ;;  %v1107_v3 = vld [vmem:[%s1382_s1 + $0x138] sm:$0xff]   ;;  %v1115_v14 = vld [vmem:[%s1382_s1 + $0x208] sm:$0xff]  }
  0x17   :  { %934 = vmatpush3.bf16.msra.mxu0 %v1063_v21  ;;  %v1108_v4 = vld [vmem:[%s1382_s1 + $0x1f8] sm:$0xff]   ;;  %v17_v5 = vld [vmem:[%s1383_s0 + $0x10] sm:$0xff]  ;;  %v1118_v17 = vld [vmem:[%s1382_s1 + $0x220] sm:$0xff]  }
  0x18   :  { %935 = vmatprep.subr.bf16.mxu0 %v1066_v24  ;;  %v846_v6 = vcombine.low %v17_v5, %v17_v5  ;;  %v847_v7 = vcombine.high %v17_v5, %v17_v5  ;;  %v1111_v8 = vld [vmem:[%s1382_s1 + $0x1b8] sm:$0xff]   ;;  %v1116_v15 = vld [vmem:[%s1382_s1 + $0x210] sm:$0xff]   ;;  %v1119_v18 = vld [vmem:[%s1382_s1 + $0x228] sm:$0xff]  }
  0x19   :  { %956 = vmatpush3.bf16.msra.mxu1 %v1065_v23  ;;  %v18_v10 = vld [vmem:[%s1383_s0 + $0x18] sm:$0xff]  ;;  %v1120_v19 = vld [vmem:[%s1382_s1 + $0x230] sm:$0xff]   ;;  %v1122_v21 = vld [vmem:[%s1383_s0 + $0x20] ss:$0 sps:$4 sm:$0xff]  }
  0x1a   :  { %957 = vmatprep.subr.bf16.mxu1 %v1068_v26  ;;  %v848_v11 = vcombine.low %v18_v10, %v18_v10  ;;  %v849_v12 = vcombine.high %v18_v10, %v18_v10  ;;  %v1117_v16 = vld [vmem:[%s1382_s1 + $0x218] sm:$0xff]   ;;  %v841_v23 = vld [vmem:[%s1384_s2] ss:$0 sm:$0xff] }
  0x1b   :  { %936 = vmatpush3.bf16.msra.mxu0 %v1067_v25  ;;  %v1121_v20 = vld [vmem:[%s1382_s1 + $0x238] sm:$0xff]  }
  0x1c   :  { %937 = vmatprep.subr.bf16.mxu0 %v1070_v28 }
  0x1d   :  { %958 = vmatpush3.bf16.msra.mxu1 %v1069_v27 }
  0x1e   :  { %959 = vmatprep.subr.bf16.mxu1 %v1072_v30 }
  0x1f   :  { %938 = vmatpush3.bf16.msra.mxu0 %v1071_v29 }
  0x20   :  { %967 = vmatprep.subr.bf16.mxu0 %v1076_v35 }
  0x21   :  { %960 = vmatpush3.bf16.msra.mxu1 %v1075_v34 }
  0x22   :  { %668 = vmatmul.mubr.bf16.vlgmr.msra.gmra.mrb[0].mxu0 %v842_v32  ;;  %989 = vmatprep.subr.bf16.mxu1 %v1080_v40 }
  0x23   :  { %968 = vmatpush3.bf16.msra.mxu0 %v1079_v39  ;;  %747 = vmatprep.mubr.bf16.mxu0 %v847_v7 }
  0x24   :  { %708 = vmatmul.mubr.bf16.vlgmr.msra.gmra.mrb[0].mxu1 %v844_v37  ;;  %969 = vmatprep.subr.bf16.mxu0 %v1082_v42 }
  0x25   :  { %990 = vmatpush3.bf16.msra.mxu1 %v1081_v41  ;;  %787 = vmatprep.mubr.bf16.mxu1 %v849_v12 }
  0x26   :  { %991 = vmatprep.subr.bf16.mxu1 %v1084_v44 }
  0x27   :  { %970 = vmatpush3.bf16.msra.mxu0 %v1083_v43 }
  0x28   :  { %971 = vmatprep.subr.bf16.mxu0 %v1086_v46 }
  0x29   :  { %992 = vmatpush3.bf16.msra.mxu1 %v1085_v45 }
  0x2a   :  { %993 = vmatprep.subr.bf16.mxu1 %v1088_v48 }
  0x2b   :  { %972 = vmatpush3.bf16.msra.mxu0 %v1087_v47 }
  0x2c   :  { %973 = vmatprep.subr.bf16.mxu0 %v1090_v50 }
  0x2d   :  { %994 = vmatpush3.bf16.msra.mxu1 %v1089_v49 }
  0x2e   :  { %995 = vmatprep.subr.bf16.mxu1 %v1092_v52 }
  0x2f   :  { %974 = vmatpush3.bf16.msra.mxu0 %v1091_v51 }
  0x30   :  { %975 = vmatprep.subr.bf16.mxu0 %v1094_v54 }
  0x31   :  { %996 = vmatpush3.bf16.msra.mxu1 %v1093_v53 }
  0x32   :  { %997 = vmatprep.subr.bf16.mxu1 %v1096_v56 }
  0x33   :  { %976 = vmatpush3.bf16.msra.mxu0 %v1095_v55 }
  0x34   :  { %977 = vmatprep.subr.bf16.mxu0 %v1098_v58 }
  0x35   :  { %998 = vmatpush3.bf16.msra.mxu1 %v1097_v57 }
  0x36   :  { %999 = vmatprep.subr.bf16.mxu1 %v1100_v60 }
  0x37   :  { %978 = vmatpush3.bf16.msra.mxu0 %v1099_v59 }
  0x38   :  { %979 = vmatprep.subr.bf16.mxu0 %v1102_v62 }
  0x39   :  { %1000 = vmatpush3.bf16.msra.mxu1 %v1101_v61 }
  0x3a   :  { %1001 = vmatprep.subr.bf16.mxu1 %v1104_v0 }
  0x3b   :  { %980 = vmatpush3.bf16.msra.mxu0 %v1103_v63 }
  0x3c   :  { %981 = vmatprep.subr.bf16.mxu0 %v1106_v2 }
  0x3d   :  { %1002 = vmatpush3.bf16.msra.mxu1 %v1105_v1 }
  0x3e   :  { %1003 = vmatprep.subr.bf16.mxu1 %v1108_v4 }
  0x3f   :  { %982 = vmatpush3.bf16.msra.mxu0 %v1107_v3 }
  0x40   :  { %1020 = vmatprep.subr.bf16.mxu0 %v1123_v9 }
  0x41   :  { %1004 = vmatpush3.bf16.msra.mxu1 %v1111_v8 }
  0x42   :  { %748 = vmatmul.mubr.bf16.vlgmr.msra.gmra.mrb[4].mxu0 %v846_v6 }
  0x43   :  { %1021 = vmatpush3.bf16.msra.mxu0 %v1114_v13  ;;  %1036 = vmatprep.mubr.msk.bf16.mxu0 %vm1124_vm0, %v1123_v9 }
  0x44   :  { %788 = vmatmul.mubr.bf16.vlgmr.msra.gmra.mrb[4].mxu1 %v848_v11  ;;  %1022 = vmatprep.subr.bf16.mxu0 %v1123_v9 }
  0x47   :  { %1023 = vmatpush3.bf16.msra.mxu0 %v1115_v14 }
  0x48   :  { %1024 = vmatprep.subr.bf16.mxu0 %v1123_v9 }
  0x4b   :  { %1025 = vmatpush3.bf16.msra.mxu0 %v1116_v15 }
  0x4c   :  { %1026 = vmatprep.subr.bf16.mxu0 %v1123_v9 }
  0x4f   :  { %1027 = vmatpush3.bf16.msra.mxu0 %v1117_v16 }
  0x50   :  { %1028 = vmatprep.subr.bf16.mxu0 %v1123_v9 }
  0x53   :  { %1029 = vmatpush3.bf16.msra.mxu0 %v1118_v17 }
  0x54   :  { %1030 = vmatprep.subr.bf16.mxu0 %v1123_v9 }
  0x57   :  { %1031 = vmatpush3.bf16.msra.mxu0 %v1119_v18 }
  0x58   :  { %1032 = vmatprep.subr.bf16.mxu0 %v1123_v9 }
  0x5b   :  { %1033 = vmatpush3.bf16.msra.mxu0 %v1120_v19 }
  0x5c   :  { %1034 = vmatprep.subr.bf16.mxu0 %v1123_v9 }
  0x5f   :  { %1035 = vmatpush3.bf16.msra.mxu0 %v1121_v20 }
  0x62   :  { %1037 = vmatmul.mubr.bf16.vlgmr.msra.gmra.mrb[8].mxu0 %v1122_v21 }
  0xf5   :  { %v939_v22 = vpop.f32.mrb[0].mxu0 }
  0xf6   :  { %v940_v24 = vpop.f32.mrb[1].mxu0 }
  0xf7   :  { %v941_v25 = vadd.f32 %v940_v24, %v939_v22  ;;  %v942_v26 = vpop.f32.mrb[2].mxu0  ;;  %v961_v27 = vpop.f32.mrb[0].mxu1 }
  0xf8   :  { %v943_v28 = vpop.f32.mrb[3].mxu0  ;;  %v962_v29 = vpop.f32.mrb[1].mxu1 }
  0xf9   :  { %v670_v30 = vadd.f32 %v941_v25, %v841_v23  ;;  %v963_v31 = vadd.f32 %v962_v29, %v961_v27  ;;  %v964_v32 = vpop.f32.mrb[2].mxu1 }
  0xfa   :  { %v965_v33 = vpop.f32.mrb[3].mxu1 }
  0xfb   :  { %v710_v34 = vadd.f32 %v963_v31, %v670_v30 }
 0x115   :  { %v983_v35 = vpop.f32.mrb[4].mxu0 }
 0x116   :  { %v984_v36 = vpop.f32.mrb[5].mxu0 }
 0x117   :  { %v985_v37 = vadd.f32 %v984_v36, %v983_v35  ;;  %v986_v38 = vpop.f32.mrb[6].mxu0  ;;  %v1005_v39 = vpop.f32.mrb[4].mxu1 }
 0x118   :  { %v987_v40 = vpop.f32.mrb[7].mxu0  ;;  %v1006_v41 = vpop.f32.mrb[5].mxu1 }
 0x119   :  { %v750_v42 = vadd.f32 %v985_v37, %v710_v34  ;;  %v1007_v43 = vadd.f32 %v1006_v41, %v1005_v39  ;;  %v1008_v44 = vpop.f32.mrb[6].mxu1 }
 0x11a   :  { %v1009_v45 = vpop.f32.mrb[7].mxu1 }
 0x11b   :  { %v790_v46 = vadd.f32 %v1007_v43, %v750_v42 }
 0x135   :  { %v829_v47 = vpop.f32.mrb[8].mxu0 }
 0x136   :  { %v830_v48 = vadd.f32 %v829_v47, %v790_v46  ;;  %v1038_v49 = vpop.f32.mrb[9].mxu0 }
 0x137   :  { %v832_v50 = vpop.f32.mrb[10].mxu0 }
 0x138   :  { %v835_v51 = vmax.f32 %v830_v48, 0.0  ;;  %v1039_v52 = vpop.f32.mrb[11].mxu0 }
 0x13a   :  { %836 = vst [vmem:[%s1385_s3] sm:$0xff] %v835_v51 }

// kernel: ez_detect_forward.118
= control target key start
LH: loop header
LB: loop body
LE: loop exit
PB: predicated region body
PF: predicated region fallthrough
CT: control target
= control target key end

     0   :  { %v609_v35 = vmov 0.0   ;;  %vm610_vm0 = vmmov 0   ;;  %vm330_vm1 = vcmask 523264   ;;  %s754_s1 = inlined_call_operand.vmem [shape: bf16[576,128], index: 1, kind: input, shape index: {}]   ;;  %s755_s0 = inlined_call_operand.vmem [shape: bf16[8,576], index: 0, kind: input, shape index: {}]   ;;  %s756_s2 = inlined_call_operand.vmem [shape: f32[1,128], index: 2, kind: input, shape index: {}]   ;;  %s757_s3 = inlined_call_operand.vmem [shape: f32[8,128], index: 3, kind: output, shape index: {}]  }
   0x1   :  { %v568_v0 = vld [vmem:[%s754_s1 + $0x40] sm:$0xff]   ;;  %v572_v4 = vld [vmem:[%s754_s1 + $0x48] sm:$0xff]   ;;  %v576_v8 = vld [vmem:[%s754_s1 + $0x50] sm:$0xff]  }
   0x2   :  { %v569_v1 = vld [vmem:[%s754_s1] sm:$0xff]   ;;  %505 = vmatprep.subr.bf16.mxu0 %v568_v0  ;;  %v573_v5 = vld [vmem:[%s754_s1 + $0x8] sm:$0xff]   ;;  %v577_v9 = vld [vmem:[%s754_s1 + $0x10] sm:$0xff]  }
   0x3   :  { %v570_v2 = vld [vmem:[%s754_s1 + $0xc0] sm:$0xff]   ;;  %506 = vmatpush3.bf16.msra.mxu0 %v569_v1  ;;  %v574_v6 = vld [vmem:[%s754_s1 + $0xc8] sm:$0xff]   ;;  %v578_v10 = vld [vmem:[%s754_s1 + $0xd0] sm:$0xff]  }
   0x4   :  { %v571_v3 = vld [vmem:[%s754_s1 + $0x80] sm:$0xff]   ;;  %527 = vmatprep.subr.bf16.mxu1 %v570_v2  ;;  %507 = vmatprep.subr.bf16.mxu0 %v572_v4  ;;  %v575_v7 = vld [vmem:[%s754_s1 + $0x88] sm:$0xff]   ;;  %v579_v11 = vld [vmem:[%s754_s1 + $0x90] sm:$0xff]  }
   0x5   :  { %528 = vmatpush3.bf16.msra.mxu1 %v571_v3  ;;  %v580_v12 = vld [vmem:[%s754_s1 + $0x58] sm:$0xff]   ;;  %v584_v16 = vld [vmem:[%s754_s1 + $0x60] sm:$0xff]   ;;  %v588_v20 = vld [vmem:[%s754_s1 + $0x68] sm:$0xff]  }
   0x6   :  { %529 = vmatprep.subr.bf16.mxu1 %v574_v6  ;;  %v581_v13 = vld [vmem:[%s754_s1 + $0x18] sm:$0xff]   ;;  %v585_v17 = vld [vmem:[%s754_s1 + $0x20] sm:$0xff]   ;;  %v589_v21 = vld [vmem:[%s754_s1 + $0x28] sm:$0xff]  }
   0x7   :  { %508 = vmatpush3.bf16.msra.mxu0 %v573_v5  ;;  %v582_v14 = vld [vmem:[%s754_s1 + $0xd8] sm:$0xff]   ;;  %v586_v18 = vld [vmem:[%s754_s1 + $0xe0] sm:$0xff]   ;;  %v590_v22 = vld [vmem:[%s754_s1 + $0xe8] sm:$0xff]  }
   0x8   :  { %509 = vmatprep.subr.bf16.mxu0 %v576_v8  ;;  %v583_v15 = vld [vmem:[%s754_s1 + $0x98] sm:$0xff]   ;;  %v587_v19 = vld [vmem:[%s754_s1 + $0xa0] sm:$0xff]   ;;  %v591_v23 = vld [vmem:[%s754_s1 + $0xa8] sm:$0xff]  }
   0x9   :  { %530 = vmatpush3.bf16.msra.mxu1 %v575_v7  ;;  %v592_v24 = vld [vmem:[%s754_s1 + $0x70] sm:$0xff]   ;;  %v596_v28 = vld [vmem:[%s754_s1 + $0x78] sm:$0xff]   ;;  %v15_v31 = vld [vmem:[%s755_s0] sm:$0xff] }
   0xa   :  { %531 = vmatprep.subr.bf16.mxu1 %v578_v10  ;;  %v593_v25 = vld [vmem:[%s754_s1 + $0x30] sm:$0xff]   ;;  %v597_v29 = vld [vmem:[%s754_s1 + $0x38] sm:$0xff]   ;;  %v463_v32 = vcombine.low %v15_v31, %v15_v31  ;;  %v464_v33 = vcombine.high %v15_v31, %v15_v31  ;;  %v16_v36 = vld [vmem:[%s755_s0 + $0x8] sm:$0xff] }
   0xb   :  { %510 = vmatpush3.bf16.msra.mxu0 %v577_v9  ;;  %v594_v26 = vld [vmem:[%s754_s1 + $0xf0] sm:$0xff]   ;;  %v598_v30 = vld [vmem:[%s754_s1 + $0xf8] sm:$0xff]   ;;  %v465_v37 = vcombine.low %v16_v36, %v16_v36  ;;  %v466_v38 = vcombine.high %v16_v36, %v16_v36  ;;  %v605_v39 = vld [vmem:[%s754_s1 + $0x100] sm:$0xff]  }
   0xc   :  { %511 = vmatprep.subr.bf16.mxu0 %v580_v12  ;;  %v595_v27 = vld [vmem:[%s754_s1 + $0xb0] sm:$0xff]   ;;  %v602_v34 = vld [vmem:[%s754_s1 + $0xb8] sm:$0xff]   ;;  %366 = vmatprep.mubr.bf16.mxu0 %v464_v33  ;;  %v606_v40 = vld [vmem:[%s754_s1 + $0x108] sm:$0xff]  }
   0xd   :  { %532 = vmatpush3.bf16.msra.mxu1 %v579_v11  ;;  %406 = vmatprep.mubr.bf16.mxu1 %v466_v38  ;;  %v607_v41 = vld [vmem:[%s754_s1 + $0x110] sm:$0xff]   ;;  %v608_v42 = vld [vmem:[%s754_s1 + $0x118] sm:$0xff]   ;;  %v462_v45 = vld [vmem:[%s756_s2] ss:$0 sm:$0xff] }
   0xe   :  { %533 = vmatprep.subr.bf16.mxu1 %v582_v14  ;;  %v601_v43 = vld [vmem:[%s755_s0 + $0x10] ss:$0 sps:$4 sm:$0xff]  }
   0xf   :  { %512 = vmatpush3.bf16.msra.mxu0 %v581_v13 }
  0x10   :  { %513 = vmatprep.subr.bf16.mxu0 %v584_v16 }
  0x11   :  { %534 = vmatpush3.bf16.msra.mxu1 %v583_v15 }
  0x12   :  { %535 = vmatprep.subr.bf16.mxu1 %v586_v18 }
  0x13   :  { %514 = vmatpush3.bf16.msra.mxu0 %v585_v17 }
  0x14   :  { %515 = vmatprep.subr.bf16.mxu0 %v588_v20 }
  0x15   :  { %536 = vmatpush3.bf16.msra.mxu1 %v587_v19 }
  0x16   :  { %537 = vmatprep.subr.bf16.mxu1 %v590_v22 }
  0x17   :  { %516 = vmatpush3.bf16.msra.mxu0 %v589_v21 }
  0x18   :  { %517 = vmatprep.subr.bf16.mxu0 %v592_v24 }
  0x19   :  { %538 = vmatpush3.bf16.msra.mxu1 %v591_v23 }
  0x1a   :  { %539 = vmatprep.subr.bf16.mxu1 %v594_v26 }
  0x1b   :  { %518 = vmatpush3.bf16.msra.mxu0 %v593_v25 }
  0x1c   :  { %519 = vmatprep.subr.bf16.mxu0 %v596_v28 }
  0x1d   :  { %540 = vmatpush3.bf16.msra.mxu1 %v595_v27 }
  0x1e   :  { %541 = vmatprep.subr.bf16.mxu1 %v598_v30 }
  0x1f   :  { %520 = vmatpush3.bf16.msra.mxu0 %v597_v29 }
  0x20   :  { %554 = vmatprep.subr.bf16.mxu0 %v609_v35 }
  0x21   :  { %542 = vmatpush3.bf16.msra.mxu1 %v602_v34 }
  0x22   :  { %367 = vmatmul.mubr.bf16.vlgmr.msra.gmra.mrb[0].mxu0 %v463_v32 }
  0x23   :  { %555 = vmatpush3.bf16.msra.mxu0 %v605_v39  ;;  %562 = vmatprep.mubr.msk.bf16.mxu0 %vm610_vm0, %v609_v35 }
  0x24   :  { %407 = vmatmul.mubr.bf16.vlgmr.msra.gmra.mrb[0].mxu1 %v465_v37  ;;  %556 = vmatprep.subr.bf16.mxu0 %v609_v35 }
  0x27   :  { %557 = vmatpush3.bf16.msra.mxu0 %v606_v40 }
  0x28   :  { %558 = vmatprep.subr.bf16.mxu0 %v609_v35 }
  0x2b   :  { %559 = vmatpush3.bf16.msra.mxu0 %v607_v41 }
  0x2c   :  { %560 = vmatprep.subr.bf16.mxu0 %v609_v35 }
  0x2f   :  { %561 = vmatpush3.bf16.msra.mxu0 %v608_v42 }
  0x32   :  { %563 = vmatmul.mubr.msk.bf16.vlgmr.msra.gmra.mrb[4].mxu0 %vm330_vm1, %v601_v43 }
  0xf5   :  { %v521_v44 = vpop.f32.mrb[0].mxu0 }
  0xf6   :  { %v522_v46 = vpop.f32.mrb[1].mxu0 }
  0xf7   :  { %v523_v47 = vadd.f32 %v522_v46, %v521_v44  ;;  %v524_v48 = vpop.f32.mrb[2].mxu0  ;;  %v543_v49 = vpop.f32.mrb[0].mxu1 }
  0xf8   :  { %v525_v50 = vpop.f32.mrb[3].mxu0  ;;  %v544_v51 = vpop.f32.mrb[1].mxu1 }
  0xf9   :  { %v369_v52 = vadd.f32 %v523_v47, %v462_v45  ;;  %v545_v53 = vadd.f32 %v544_v51, %v543_v49  ;;  %v546_v54 = vpop.f32.mrb[2].mxu1 }
  0xfa   :  { %v547_v55 = vpop.f32.mrb[3].mxu1 }
  0xfb   :  { %v409_v56 = vadd.f32 %v545_v53, %v369_v52 }
 0x105   :  { %v448_v57 = vpop.f32.mrb[4].mxu0 }
 0x106   :  { %v449_v58 = vadd.f32 %v448_v57, %v409_v56  ;;  %v564_v59 = vpop.f32.mrb[5].mxu0 }
 0x107   :  { %v451_v60 = vpop.f32.mrb[6].mxu0 }
 0x108   :  { %vm454_vm2 = vcmp.ge.f32.partialorder %v449_v58, 0.0  ;;  %v455_v61 = vmul.f32 0.2, %v449_v58  ;;  %v565_v62 = vpop.f32.mrb[7].mxu0 }
 0x10a   :  { %v456_v63 = vsel %vm454_vm2, %v449_v58, %v455_v61 }
 0x10b   :  { %457 = vst [vmem:[%s757_s3] sm:$0xff] %v456_v63 }

// kernel: ez_detect_forward.123
= control target key start
LH: loop header
LB: loop body
LE: loop exit
PB: predicated region body
PF: predicated region fallthrough
CT: control target
= control target key end

     0   :  { %v606_v35 = vmov 0.0   ;;  %vm607_vm0 = vmmov 0   ;;  %vm330_vm1 = vcmask 523264   ;;  %s751_s1 = inlined_call_operand.vmem [shape: bf16[576,128], index: 1, kind: input, shape index: {}]   ;;  %s752_s0 = inlined_call_operand.vmem [shape: bf16[8,576], index: 0, kind: input, shape index: {}]   ;;  %s753_s2 = inlined_call_operand.vmem [shape: f32[1,128], index: 2, kind: input, shape index: {}]   ;;  %s754_s3 = inlined_call_operand.vmem [shape: f32[8,128], index: 3, kind: output, shape index: {}]  }
   0x1   :  { %v565_v0 = vld [vmem:[%s751_s1 + $0x40] sm:$0xff]   ;;  %v569_v4 = vld [vmem:[%s751_s1 + $0x48] sm:$0xff]   ;;  %v573_v8 = vld [vmem:[%s751_s1 + $0x50] sm:$0xff]  }
   0x2   :  { %v566_v1 = vld [vmem:[%s751_s1] sm:$0xff]   ;;  %502 = vmatprep.subr.bf16.mxu0 %v565_v0  ;;  %v570_v5 = vld [vmem:[%s751_s1 + $0x8] sm:$0xff]   ;;  %v574_v9 = vld [vmem:[%s751_s1 + $0x10] sm:$0xff]  }
   0x3   :  { %v567_v2 = vld [vmem:[%s751_s1 + $0xc0] sm:$0xff]   ;;  %503 = vmatpush3.bf16.msra.mxu0 %v566_v1  ;;  %v571_v6 = vld [vmem:[%s751_s1 + $0xc8] sm:$0xff]   ;;  %v575_v10 = vld [vmem:[%s751_s1 + $0xd0] sm:$0xff]  }
   0x4   :  { %v568_v3 = vld [vmem:[%s751_s1 + $0x80] sm:$0xff]   ;;  %524 = vmatprep.subr.bf16.mxu1 %v567_v2  ;;  %504 = vmatprep.subr.bf16.mxu0 %v569_v4  ;;  %v572_v7 = vld [vmem:[%s751_s1 + $0x88] sm:$0xff]   ;;  %v576_v11 = vld [vmem:[%s751_s1 + $0x90] sm:$0xff]  }
   0x5   :  { %525 = vmatpush3.bf16.msra.mxu1 %v568_v3  ;;  %v577_v12 = vld [vmem:[%s751_s1 + $0x58] sm:$0xff]   ;;  %v581_v16 = vld [vmem:[%s751_s1 + $0x60] sm:$0xff]   ;;  %v585_v20 = vld [vmem:[%s751_s1 + $0x68] sm:$0xff]  }
   0x6   :  { %526 = vmatprep.subr.bf16.mxu1 %v571_v6  ;;  %v578_v13 = vld [vmem:[%s751_s1 + $0x18] sm:$0xff]   ;;  %v582_v17 = vld [vmem:[%s751_s1 + $0x20] sm:$0xff]   ;;  %v586_v21 = vld [vmem:[%s751_s1 + $0x28] sm:$0xff]  }
   0x7   :  { %505 = vmatpush3.bf16.msra.mxu0 %v570_v5  ;;  %v579_v14 = vld [vmem:[%s751_s1 + $0xd8] sm:$0xff]   ;;  %v583_v18 = vld [vmem:[%s751_s1 + $0xe0] sm:$0xff]   ;;  %v587_v22 = vld [vmem:[%s751_s1 + $0xe8] sm:$0xff]  }
   0x8   :  { %506 = vmatprep.subr.bf16.mxu0 %v573_v8  ;;  %v580_v15 = vld [vmem:[%s751_s1 + $0x98] sm:$0xff]   ;;  %v584_v19 = vld [vmem:[%s751_s1 + $0xa0] sm:$0xff]   ;;  %v588_v23 = vld [vmem:[%s751_s1 + $0xa8] sm:$0xff]  }
   0x9   :  { %527 = vmatpush3.bf16.msra.mxu1 %v572_v7  ;;  %v589_v24 = vld [vmem:[%s751_s1 + $0x70] sm:$0xff]   ;;  %v593_v28 = vld [vmem:[%s751_s1 + $0x78] sm:$0xff]   ;;  %v15_v31 = vld [vmem:[%s752_s0] sm:$0xff] }
   0xa   :  { %528 = vmatprep.subr.bf16.mxu1 %v575_v10  ;;  %v590_v25 = vld [vmem:[%s751_s1 + $0x30] sm:$0xff]   ;;  %v594_v29 = vld [vmem:[%s751_s1 + $0x38] sm:$0xff]   ;;  %v460_v32 = vcombine.low %v15_v31, %v15_v31  ;;  %v461_v33 = vcombine.high %v15_v31, %v15_v31  ;;  %v16_v36 = vld [vmem:[%s752_s0 + $0x8] sm:$0xff] }
   0xb   :  { %507 = vmatpush3.bf16.msra.mxu0 %v574_v9  ;;  %v591_v26 = vld [vmem:[%s751_s1 + $0xf0] sm:$0xff]   ;;  %v595_v30 = vld [vmem:[%s751_s1 + $0xf8] sm:$0xff]   ;;  %v462_v37 = vcombine.low %v16_v36, %v16_v36  ;;  %v463_v38 = vcombine.high %v16_v36, %v16_v36  ;;  %v602_v39 = vld [vmem:[%s751_s1 + $0x100] sm:$0xff]  }
   0xc   :  { %508 = vmatprep.subr.bf16.mxu0 %v577_v12  ;;  %v592_v27 = vld [vmem:[%s751_s1 + $0xb0] sm:$0xff]   ;;  %v599_v34 = vld [vmem:[%s751_s1 + $0xb8] sm:$0xff]   ;;  %366 = vmatprep.mubr.bf16.mxu0 %v461_v33  ;;  %v603_v40 = vld [vmem:[%s751_s1 + $0x108] sm:$0xff]  }
   0xd   :  { %529 = vmatpush3.bf16.msra.mxu1 %v576_v11  ;;  %406 = vmatprep.mubr.bf16.mxu1 %v463_v38  ;;  %v604_v41 = vld [vmem:[%s751_s1 + $0x110] sm:$0xff]   ;;  %v605_v42 = vld [vmem:[%s751_s1 + $0x118] sm:$0xff]   ;;  %v459_v45 = vld [vmem:[%s753_s2] ss:$0 sm:$0xff] }
   0xe   :  { %530 = vmatprep.subr.bf16.mxu1 %v579_v14  ;;  %v598_v43 = vld [vmem:[%s752_s0 + $0x10] ss:$0 sps:$4 sm:$0xff]  }
   0xf   :  { %509 = vmatpush3.bf16.msra.mxu0 %v578_v13 }
  0x10   :  { %510 = vmatprep.subr.bf16.mxu0 %v581_v16 }
  0x11   :  { %531 = vmatpush3.bf16.msra.mxu1 %v580_v15 }
  0x12   :  { %532 = vmatprep.subr.bf16.mxu1 %v583_v18 }
  0x13   :  { %511 = vmatpush3.bf16.msra.mxu0 %v582_v17 }
  0x14   :  { %512 = vmatprep.subr.bf16.mxu0 %v585_v20 }
  0x15   :  { %533 = vmatpush3.bf16.msra.mxu1 %v584_v19 }
  0x16   :  { %534 = vmatprep.subr.bf16.mxu1 %v587_v22 }
  0x17   :  { %513 = vmatpush3.bf16.msra.mxu0 %v586_v21 }
  0x18   :  { %514 = vmatprep.subr.bf16.mxu0 %v589_v24 }
  0x19   :  { %535 = vmatpush3.bf16.msra.mxu1 %v588_v23 }
  0x1a   :  { %536 = vmatprep.subr.bf16.mxu1 %v591_v26 }
  0x1b   :  { %515 = vmatpush3.bf16.msra.mxu0 %v590_v25 }
  0x1c   :  { %516 = vmatprep.subr.bf16.mxu0 %v593_v28 }
  0x1d   :  { %537 = vmatpush3.bf16.msra.mxu1 %v592_v27 }
  0x1e   :  { %538 = vmatprep.subr.bf16.mxu1 %v595_v30 }
  0x1f   :  { %517 = vmatpush3.bf16.msra.mxu0 %v594_v29 }
  0x20   :  { %551 = vmatprep.subr.bf16.mxu0 %v606_v35 }
  0x21   :  { %539 = vmatpush3.bf16.msra.mxu1 %v599_v34 }
  0x22   :  { %367 = vmatmul.mubr.bf16.vlgmr.msra.gmra.mrb[0].mxu0 %v460_v32 }
  0x23   :  { %552 = vmatpush3.bf16.msra.mxu0 %v602_v39  ;;  %559 = vmatprep.mubr.msk.bf16.mxu0 %vm607_vm0, %v606_v35 }
  0x24   :  { %407 = vmatmul.mubr.bf16.vlgmr.msra.gmra.mrb[0].mxu1 %v462_v37  ;;  %553 = vmatprep.subr.bf16.mxu0 %v606_v35 }
  0x27   :  { %554 = vmatpush3.bf16.msra.mxu0 %v603_v40 }
  0x28   :  { %555 = vmatprep.subr.bf16.mxu0 %v606_v35 }
  0x2b   :  { %556 = vmatpush3.bf16.msra.mxu0 %v604_v41 }
  0x2c   :  { %557 = vmatprep.subr.bf16.mxu0 %v606_v35 }
  0x2f   :  { %558 = vmatpush3.bf16.msra.mxu0 %v605_v42 }
  0x32   :  { %560 = vmatmul.mubr.msk.bf16.vlgmr.msra.gmra.mrb[4].mxu0 %vm330_vm1, %v598_v43 }
  0xf5   :  { %v518_v44 = vpop.f32.mrb[0].mxu0 }
  0xf6   :  { %v519_v46 = vpop.f32.mrb[1].mxu0 }
  0xf7   :  { %v520_v47 = vadd.f32 %v519_v46, %v518_v44  ;;  %v521_v48 = vpop.f32.mrb[2].mxu0  ;;  %v540_v49 = vpop.f32.mrb[0].mxu1 }
  0xf8   :  { %v522_v50 = vpop.f32.mrb[3].mxu0  ;;  %v541_v51 = vpop.f32.mrb[1].mxu1 }
  0xf9   :  { %v369_v52 = vadd.f32 %v520_v47, %v459_v45  ;;  %v542_v53 = vadd.f32 %v541_v51, %v540_v49  ;;  %v543_v54 = vpop.f32.mrb[2].mxu1 }
  0xfa   :  { %v544_v55 = vpop.f32.mrb[3].mxu1 }
  0xfb   :  { %v409_v56 = vadd.f32 %v542_v53, %v369_v52 }
 0x105   :  { %v448_v57 = vpop.f32.mrb[4].mxu0 }
 0x106   :  { %v449_v58 = vadd.f32 %v448_v57, %v409_v56  ;;  %v561_v59 = vpop.f32.mrb[5].mxu0 }
 0x107   :  { %v451_v60 = vpop.f32.mrb[6].mxu0 }
 0x108   :  { %454 = vst [vmem:[%s754_s3] sm:$0xff] %v449_v58  ;;  %v562_v61 = vpop.f32.mrb[7].mxu0 }

// kernel: ez_detect_forward.122
= control target key start
LH: loop header
LB: loop body
LE: loop exit
PB: predicated region body
PF: predicated region fallthrough
CT: control target
= control target key end

     0   :  { %vm1123_vm0 = vmmov 0   ;;  %s1381_s1 = inlined_call_operand.vmem [shape: bf16[1152,128], index: 1, kind: input, shape index: {}]   ;;  %s1382_s0 = inlined_call_operand.vmem [shape: bf16[8,1152], index: 0, kind: input, shape index: {}]   ;;  %s1383_s2 = inlined_call_operand.vmem [shape: f32[1,128], index: 2, kind: input, shape index: {}]   ;;  %s1384_s3 = inlined_call_operand.vmem [shape: f32[8,128], index: 3, kind: output, shape index: {}]  }
   0x1   :  { %v1041_v0 = vld [vmem:[%s1381_s1 + $0x40] sm:$0xff]   ;;  %v1045_v4 = vld [vmem:[%s1381_s1 + $0x48] sm:$0xff]   ;;  %v1049_v8 = vld [vmem:[%s1381_s1 + $0x50] sm:$0xff]  }
   0x2   :  { %v1042_v1 = vld [vmem:[%s1381_s1] sm:$0xff]   ;;  %922 = vmatprep.subr.bf16.mxu0 %v1041_v0  ;;  %v1046_v5 = vld [vmem:[%s1381_s1 + $0x8] sm:$0xff]   ;;  %v1050_v9 = vld [vmem:[%s1381_s1 + $0x10] sm:$0xff]  }
   0x3   :  { %v1043_v2 = vld [vmem:[%s1381_s1 + $0xc0] sm:$0xff]   ;;  %923 = vmatpush3.bf16.msra.mxu0 %v1042_v1  ;;  %v1047_v6 = vld [vmem:[%s1381_s1 + $0xc8] sm:$0xff]   ;;  %v1051_v10 = vld [vmem:[%s1381_s1 + $0xd0] sm:$0xff]  }
   0x4   :  { %v1044_v3 = vld [vmem:[%s1381_s1 + $0x80] sm:$0xff]   ;;  %944 = vmatprep.subr.bf16.mxu1 %v1043_v2  ;;  %924 = vmatprep.subr.bf16.mxu0 %v1045_v4  ;;  %v1048_v7 = vld [vmem:[%s1381_s1 + $0x88] sm:$0xff]   ;;  %v1052_v11 = vld [vmem:[%s1381_s1 + $0x90] sm:$0xff]  }
   0x5   :  { %945 = vmatpush3.bf16.msra.mxu1 %v1044_v3  ;;  %v1053_v12 = vld [vmem:[%s1381_s1 + $0x58] sm:$0xff]   ;;  %v1057_v16 = vld [vmem:[%s1381_s1 + $0x60] sm:$0xff]   ;;  %v1061_v20 = vld [vmem:[%s1381_s1 + $0x68] sm:$0xff]  }
   0x6   :  { %946 = vmatprep.subr.bf16.mxu1 %v1047_v6  ;;  %v1054_v13 = vld [vmem:[%s1381_s1 + $0x18] sm:$0xff]   ;;  %v1058_v17 = vld [vmem:[%s1381_s1 + $0x20] sm:$0xff]   ;;  %v1062_v21 = vld [vmem:[%s1381_s1 + $0x28] sm:$0xff]  }
   0x7   :  { %925 = vmatpush3.bf16.msra.mxu0 %v1046_v5  ;;  %v1055_v14 = vld [vmem:[%s1381_s1 + $0xd8] sm:$0xff]   ;;  %v1059_v18 = vld [vmem:[%s1381_s1 + $0xe0] sm:$0xff]   ;;  %v1063_v22 = vld [vmem:[%s1381_s1 + $0xe8] sm:$0xff]  }
   0x8   :  { %926 = vmatprep.subr.bf16.mxu0 %v1049_v8  ;;  %v1056_v15 = vld [vmem:[%s1381_s1 + $0x98] sm:$0xff]   ;;  %v1060_v19 = vld [vmem:[%s1381_s1 + $0xa0] sm:$0xff]   ;;  %v1064_v23 = vld [vmem:[%s1381_s1 + $0xa8] sm:$0xff]  }
   0x9   :  { %947 = vmatpush3.bf16.msra.mxu1 %v1048_v7  ;;  %v1065_v24 = vld [vmem:[%s1381_s1 + $0x70] sm:$0xff]   ;;  %v1069_v28 = vld [vmem:[%s1381_s1 + $0x78] sm:$0xff]   ;;  %v15_v31 = vld [vmem:[%s1382_s0] sm:$0xff] }
   0xa   :  { %948 = vmatprep.subr.bf16.mxu1 %v1051_v10  ;;  %v1066_v25 = vld [vmem:[%s1381_s1 + $0x30] sm:$0xff]   ;;  %v1070_v29 = vld [vmem:[%s1381_s1 + $0x38] sm:$0xff]   ;;  %v841_v32 = vcombine.low %v15_v31, %v15_v31  ;;  %v842_v33 = vcombine.high %v15_v31, %v15_v31  ;;  %v1075_v35 = vld [vmem:[%s1381_s1 + $0x140] sm:$0xff]  }
   0xb   :  { %927 = vmatpush3.bf16.msra.mxu0 %v1050_v9  ;;  %v1067_v26 = vld [vmem:[%s1381_s1 + $0xf0] sm:$0xff]   ;;  %v1071_v30 = vld [vmem:[%s1381_s1 + $0xf8] sm:$0xff]   ;;  %v16_v36 = vld [vmem:[%s1382_s0 + $0x8] sm:$0xff]  ;;  %v1122_v9 = vmov 0.0  }
   0xc   :  { %928 = vmatprep.subr.bf16.mxu0 %v1053_v12  ;;  %v1068_v27 = vld [vmem:[%s1381_s1 + $0xb0] sm:$0xff]   ;;  %v1074_v34 = vld [vmem:[%s1381_s1 + $0xb8] sm:$0xff]   ;;  %667 = vmatprep.mubr.bf16.mxu0 %v842_v33  ;;  %v843_v37 = vcombine.low %v16_v36, %v16_v36  ;;  %v844_v38 = vcombine.high %v16_v36, %v16_v36  ;;  %v1078_v39 = vld [vmem:[%s1381_s1 + $0x100] sm:$0xff]  }
   0xd   :  { %949 = vmatpush3.bf16.msra.mxu1 %v1052_v11  ;;  %v1079_v40 = vld [vmem:[%s1381_s1 + $0x1c0] sm:$0xff]   ;;  %v1081_v42 = vld [vmem:[%s1381_s1 + $0x148] sm:$0xff]   ;;  %v1085_v46 = vld [vmem:[%s1381_s1 + $0x150] sm:$0xff]  }
   0xe   :  { %950 = vmatprep.subr.bf16.mxu1 %v1055_v14  ;;  %707 = vmatprep.mubr.bf16.mxu1 %v844_v38  ;;  %v1080_v41 = vld [vmem:[%s1381_s1 + $0x180] sm:$0xff]   ;;  %v1082_v43 = vld [vmem:[%s1381_s1 + $0x108] sm:$0xff]   ;;  %v1086_v47 = vld [vmem:[%s1381_s1 + $0x110] sm:$0xff]  }
   0xf   :  { %929 = vmatpush3.bf16.msra.mxu0 %v1054_v13  ;;  %v1083_v44 = vld [vmem:[%s1381_s1 + $0x1c8] sm:$0xff]   ;;  %v1087_v48 = vld [vmem:[%s1381_s1 + $0x1d0] sm:$0xff]   ;;  %v1089_v50 = vld [vmem:[%s1381_s1 + $0x158] sm:$0xff]  }
  0x10   :  { %930 = vmatprep.subr.bf16.mxu0 %v1057_v16  ;;  %v1084_v45 = vld [vmem:[%s1381_s1 + $0x188] sm:$0xff]   ;;  %v1088_v49 = vld [vmem:[%s1381_s1 + $0x190] sm:$0xff]   ;;  %v1090_v51 = vld [vmem:[%s1381_s1 + $0x118] sm:$0xff]  }
  0x11   :  { %951 = vmatpush3.bf16.msra.mxu1 %v1056_v15  ;;  %v1091_v52 = vld [vmem:[%s1381_s1 + $0x1d8] sm:$0xff]   ;;  %v1093_v54 = vld [vmem:[%s1381_s1 + $0x160] sm:$0xff]   ;;  %v1097_v58 = vld [vmem:[%s1381_s1 + $0x168] sm:$0xff]  }
  0x12   :  { %952 = vmatprep.subr.bf16.mxu1 %v1059_v18  ;;  %v1092_v53 = vld [vmem:[%s1381_s1 + $0x198] sm:$0xff]   ;;  %v1094_v55 = vld [vmem:[%s1381_s1 + $0x120] sm:$0xff]   ;;  %v1098_v59 = vld [vmem:[%s1381_s1 + $0x128] sm:$0xff]  }
  0x13   :  { %931 = vmatpush3.bf16.msra.mxu0 %v1058_v17  ;;  %v1095_v56 = vld [vmem:[%s1381_s1 + $0x1e0] sm:$0xff]   ;;  %v1099_v60 = vld [vmem:[%s1381_s1 + $0x1e8] sm:$0xff]   ;;  %v1101_v62 = vld [vmem:[%s1381_s1 + $0x170] sm:$0xff]  }
  0x14   :  { %932 = vmatprep.subr.bf16.mxu0 %v1061_v20  ;;  %v1096_v57 = vld [vmem:[%s1381_s1 + $0x1a0] sm:$0xff]   ;;  %v1100_v61 = vld [vmem:[%s1381_s1 + $0x1a8] sm:$0xff]   ;;  %v1102_v63 = vld [vmem:[%s1381_s1 + $0x130] sm:$0xff]  }
  0x15   :  { %953 = vmatpush3.bf16.msra.mxu1 %v1060_v19  ;;  %v1103_v0 = vld [vmem:[%s1381_s1 + $0x1f0] sm:$0xff]   ;;  %v1105_v2 = vld [vmem:[%s1381_s1 + $0x178] sm:$0xff]   ;;  %v1113_v13 = vld [vmem:[%s1381_s1 + $0x200] sm:$0xff]  }
  0x16   :  { %954 = vmatprep.subr.bf16.mxu1 %v1063_v22  ;;  %v1104_v1 = vld [vmem:[%s1381_s1 + $0x1b0] sm:$0xff]   ;;  %v1106_v3 = vld [vmem:[%s1381_s1 + $0x138] sm:$0xff]   ;;  %v1114_v14 = vld [vmem:[%s1381_s1 + $0x208] sm:$0xff]  }
  0x17   :  { %933 = vmatpush3.bf16.msra.mxu0 %v1062_v21  ;;  %v1107_v4 = vld [vmem:[%s1381_s1 + $0x1f8] sm:$0xff]   ;;  %v17_v5 = vld [vmem:[%s1382_s0 + $0x10] sm:$0xff]  ;;  %v1117_v17 = vld [vmem:[%s1381_s1 + $0x220] sm:$0xff]  }
  0x18   :  { %934 = vmatprep.subr.bf16.mxu0 %v1065_v24  ;;  %v845_v6 = vcombine.low %v17_v5, %v17_v5  ;;  %v846_v7 = vcombine.high %v17_v5, %v17_v5  ;;  %v1110_v8 = vld [vmem:[%s1381_s1 + $0x1b8] sm:$0xff]   ;;  %v1115_v15 = vld [vmem:[%s1381_s1 + $0x210] sm:$0xff]   ;;  %v1118_v18 = vld [vmem:[%s1381_s1 + $0x228] sm:$0xff]  }
  0x19   :  { %955 = vmatpush3.bf16.msra.mxu1 %v1064_v23  ;;  %v18_v10 = vld [vmem:[%s1382_s0 + $0x18] sm:$0xff]  ;;  %v1119_v19 = vld [vmem:[%s1381_s1 + $0x230] sm:$0xff]   ;;  %v1121_v21 = vld [vmem:[%s1382_s0 + $0x20] ss:$0 sps:$4 sm:$0xff]  }
  0x1a   :  { %956 = vmatprep.subr.bf16.mxu1 %v1067_v26  ;;  %v847_v11 = vcombine.low %v18_v10, %v18_v10  ;;  %v848_v12 = vcombine.high %v18_v10, %v18_v10  ;;  %v1116_v16 = vld [vmem:[%s1381_s1 + $0x218] sm:$0xff]   ;;  %v840_v23 = vld [vmem:[%s1383_s2] ss:$0 sm:$0xff] }
  0x1b   :  { %935 = vmatpush3.bf16.msra.mxu0 %v1066_v25  ;;  %v1120_v20 = vld [vmem:[%s1381_s1 + $0x238] sm:$0xff]  }
  0x1c   :  { %936 = vmatprep.subr.bf16.mxu0 %v1069_v28 }
  0x1d   :  { %957 = vmatpush3.bf16.msra.mxu1 %v1068_v27 }
  0x1e   :  { %958 = vmatprep.subr.bf16.mxu1 %v1071_v30 }
  0x1f   :  { %937 = vmatpush3.bf16.msra.mxu0 %v1070_v29 }
  0x20   :  { %966 = vmatprep.subr.bf16.mxu0 %v1075_v35 }
  0x21   :  { %959 = vmatpush3.bf16.msra.mxu1 %v1074_v34 }
  0x22   :  { %668 = vmatmul.mubr.bf16.vlgmr.msra.gmra.mrb[0].mxu0 %v841_v32  ;;  %988 = vmatprep.subr.bf16.mxu1 %v1079_v40 }
  0x23   :  { %967 = vmatpush3.bf16.msra.mxu0 %v1078_v39  ;;  %747 = vmatprep.mubr.bf16.mxu0 %v846_v7 }
  0x24   :  { %708 = vmatmul.mubr.bf16.vlgmr.msra.gmra.mrb[0].mxu1 %v843_v37  ;;  %968 = vmatprep.subr.bf16.mxu0 %v1081_v42 }
  0x25   :  { %989 = vmatpush3.bf16.msra.mxu1 %v1080_v41  ;;  %787 = vmatprep.mubr.bf16.mxu1 %v848_v12 }
  0x26   :  { %990 = vmatprep.subr.bf16.mxu1 %v1083_v44 }
  0x27   :  { %969 = vmatpush3.bf16.msra.mxu0 %v1082_v43 }
  0x28   :  { %970 = vmatprep.subr.bf16.mxu0 %v1085_v46 }
  0x29   :  { %991 = vmatpush3.bf16.msra.mxu1 %v1084_v45 }
  0x2a   :  { %992 = vmatprep.subr.bf16.mxu1 %v1087_v48 }
  0x2b   :  { %971 = vmatpush3.bf16.msra.mxu0 %v1086_v47 }
  0x2c   :  { %972 = vmatprep.subr.bf16.mxu0 %v1089_v50 }
  0x2d   :  { %993 = vmatpush3.bf16.msra.mxu1 %v1088_v49 }
  0x2e   :  { %994 = vmatprep.subr.bf16.mxu1 %v1091_v52 }
  0x2f   :  { %973 = vmatpush3.bf16.msra.mxu0 %v1090_v51 }
  0x30   :  { %974 = vmatprep.subr.bf16.mxu0 %v1093_v54 }
  0x31   :  { %995 = vmatpush3.bf16.msra.mxu1 %v1092_v53 }
  0x32   :  { %996 = vmatprep.subr.bf16.mxu1 %v1095_v56 }
  0x33   :  { %975 = vmatpush3.bf16.msra.mxu0 %v1094_v55 }
  0x34   :  { %976 = vmatprep.subr.bf16.mxu0 %v1097_v58 }
  0x35   :  { %997 = vmatpush3.bf16.msra.mxu1 %v1096_v57 }
  0x36   :  { %998 = vmatprep.subr.bf16.mxu1 %v1099_v60 }
  0x37   :  { %977 = vmatpush3.bf16.msra.mxu0 %v1098_v59 }
  0x38   :  { %978 = vmatprep.subr.bf16.mxu0 %v1101_v62 }
  0x39   :  { %999 = vmatpush3.bf16.msra.mxu1 %v1100_v61 }
  0x3a   :  { %1000 = vmatprep.subr.bf16.mxu1 %v1103_v0 }
  0x3b   :  { %979 = vmatpush3.bf16.msra.mxu0 %v1102_v63 }
  0x3c   :  { %980 = vmatprep.subr.bf16.mxu0 %v1105_v2 }
  0x3d   :  { %1001 = vmatpush3.bf16.msra.mxu1 %v1104_v1 }
  0x3e   :  { %1002 = vmatprep.subr.bf16.mxu1 %v1107_v4 }
  0x3f   :  { %981 = vmatpush3.bf16.msra.mxu0 %v1106_v3 }
  0x40   :  { %1019 = vmatprep.subr.bf16.mxu0 %v1122_v9 }
  0x41   :  { %1003 = vmatpush3.bf16.msra.mxu1 %v1110_v8 }
  0x42   :  { %748 = vmatmul.mubr.bf16.vlgmr.msra.gmra.mrb[4].mxu0 %v845_v6 }
  0x43   :  { %1020 = vmatpush3.bf16.msra.mxu0 %v1113_v13  ;;  %1035 = vmatprep.mubr.msk.bf16.mxu0 %vm1123_vm0, %v1122_v9 }
  0x44   :  { %788 = vmatmul.mubr.bf16.vlgmr.msra.gmra.mrb[4].mxu1 %v847_v11  ;;  %1021 = vmatprep.subr.bf16.mxu0 %v1122_v9 }
  0x47   :  { %1022 = vmatpush3.bf16.msra.mxu0 %v1114_v14 }
  0x48   :  { %1023 = vmatprep.subr.bf16.mxu0 %v1122_v9 }
  0x4b   :  { %1024 = vmatpush3.bf16.msra.mxu0 %v1115_v15 }
  0x4c   :  { %1025 = vmatprep.subr.bf16.mxu0 %v1122_v9 }
  0x4f   :  { %1026 = vmatpush3.bf16.msra.mxu0 %v1116_v16 }
  0x50   :  { %1027 = vmatprep.subr.bf16.mxu0 %v1122_v9 }
  0x53   :  { %1028 = vmatpush3.bf16.msra.mxu0 %v1117_v17 }
  0x54   :  { %1029 = vmatprep.subr.bf16.mxu0 %v1122_v9 }
  0x57   :  { %1030 = vmatpush3.bf16.msra.mxu0 %v1118_v18 }
  0x58   :  { %1031 = vmatprep.subr.bf16.mxu0 %v1122_v9 }
  0x5b   :  { %1032 = vmatpush3.bf16.msra.mxu0 %v1119_v19 }
  0x5c   :  { %1033 = vmatprep.subr.bf16.mxu0 %v1122_v9 }
  0x5f   :  { %1034 = vmatpush3.bf16.msra.mxu0 %v1120_v20 }
  0x62   :  { %1036 = vmatmul.mubr.bf16.vlgmr.msra.gmra.mrb[8].mxu0 %v1121_v21 }
  0xf5   :  { %v938_v22 = vpop.f32.mrb[0].mxu0 }
  0xf6   :  { %v939_v24 = vpop.f32.mrb[1].mxu0 }
  0xf7   :  { %v940_v25 = vadd.f32 %v939_v24, %v938_v22  ;;  %v941_v26 = vpop.f32.mrb[2].mxu0  ;;  %v960_v27 = vpop.f32.mrb[0].mxu1 }
  0xf8   :  { %v942_v28 = vpop.f32.mrb[3].mxu0  ;;  %v961_v29 = vpop.f32.mrb[1].mxu1 }
  0xf9   :  { %v670_v30 = vadd.f32 %v940_v25, %v840_v23  ;;  %v962_v31 = vadd.f32 %v961_v29, %v960_v27  ;;  %v963_v32 = vpop.f32.mrb[2].mxu1 }
  0xfa   :  { %v964_v33 = vpop.f32.mrb[3].mxu1 }
  0xfb   :  { %v710_v34 = vadd.f32 %v962_v31, %v670_v30 }
 0x115   :  { %v982_v35 = vpop.f32.mrb[4].mxu0 }
 0x116   :  { %v983_v36 = vpop.f32.mrb[5].mxu0 }
 0x117   :  { %v984_v37 = vadd.f32 %v983_v36, %v982_v35  ;;  %v985_v38 = vpop.f32.mrb[6].mxu0  ;;  %v1004_v39 = vpop.f32.mrb[4].mxu1 }
 0x118   :  { %v986_v40 = vpop.f32.mrb[7].mxu0  ;;  %v1005_v41 = vpop.f32.mrb[5].mxu1 }
 0x119   :  { %v750_v42 = vadd.f32 %v984_v37, %v710_v34  ;;  %v1006_v43 = vadd.f32 %v1005_v41, %v1004_v39  ;;  %v1007_v44 = vpop.f32.mrb[6].mxu1 }
 0x11a   :  { %v1008_v45 = vpop.f32.mrb[7].mxu1 }
 0x11b   :  { %v790_v46 = vadd.f32 %v1006_v43, %v750_v42 }
 0x135   :  { %v829_v47 = vpop.f32.mrb[8].mxu0 }
 0x136   :  { %v830_v48 = vadd.f32 %v829_v47, %v790_v46  ;;  %v1037_v49 = vpop.f32.mrb[9].mxu0 }
 0x137   :  { %v832_v50 = vpop.f32.mrb[10].mxu0 }
 0x138   :  { %835 = vst [vmem:[%s1384_s3] sm:$0xff] %v830_v48  ;;  %v1038_v51 = vpop.f32.mrb[11].mxu0 }

// kernel: ez_detect_forward.121
= control target key start
LH: loop header
LB: loop body
LE: loop exit
PB: predicated region body
PF: predicated region fallthrough
CT: control target
= control target key end

     0   :  { %s2515_s12 = smov 0   ;;  %s2517_s13 = smov 0   ;;  %s3002_s0 = inlined_call_operand.vmem [shape: bf16[24,2304], index: 0, kind: input, shape index: {}]   ;;  %s3003_s1 = inlined_call_operand.vmem [shape: bf16[2304,128], index: 1, kind: input, shape index: {}]   ;;  %s3004_s2 = inlined_call_operand.vmem [shape: f32[1,128], index: 2, kind: input, shape index: {}]   ;;  %s3005_s3 = inlined_call_operand.vmem [shape: f32[24,128], index: 3, kind: output, shape index: {}]  }
   0x1   :  { %s2519_s14 = smov 0  }
   0x2 LB: > { %s25_s15 = sadd.s32 1, %s2489_s13  ;;  %p1918_p0 = scmp.ge.s32.totalorder %s2493_s14, 1  ;;  %s2493_s14 = sphi %s2519_s14, %s13_s14   ;;  %s2489_s13 = sphi %s2517_s13, %s3007_s13   ;;  %s2485_s12 = sphi %s2515_s12, %s3006_s12  }
   0x3   : > { %p27_p1 = scmp.ge.s32.totalorder %s25_s15, 3  ;;  %p168_p2 = scmp.lt.s32.totalorder %s2493_s14, 4 }
   0x5   : > { %s3009_s15 = smov (%p27_p1, %s25_s15), 0  ;;  %p169_p3 = pnand %p1918_p0, %p168_p2 }
   0x6   : > { %v2309_v0 = vld [vmem:[%s3003_s1 + $0x40] sm:$0xff] (!%p169_p3)   ;;  %v2313_v4 = vld [vmem:[%s3003_s1 + $0x48] sm:$0xff] (!%p169_p3)   ;;  %v2317_v8 = vld [vmem:[%s3003_s1 + $0x50] sm:$0xff] (!%p169_p3)   ;;  %p201_p4 = scmp.lt.s32.totalorder (!%p169_p3), %s2485_s12, 2 }
   0x7   : > { %172 = sbr.rel (%p169_p3) target bundleno = 385 (0x181), region = 32  ;;  %v2310_v1 = vld [vmem:[%s3003_s1] sm:$0xff] (!%p169_p3)   ;;  %2086 = vmatprep.subr.bf16.mxu0 (!%p169_p3), %v2309_v0  ;;  %v2314_v5 = vld [vmem:[%s3003_s1 + $0x8] sm:$0xff] (!%p169_p3)   ;;  %v2318_v9 = vld [vmem:[%s3003_s1 + $0x10] sm:$0xff] (!%p169_p3)  }
   0x8   : > { %v2311_v2 = vld [vmem:[%s3003_s1 + $0xc0] sm:$0xff] (!%p169_p3)   ;;  %2087 = vmatpush3.bf16.msra.mxu0 (!%p169_p3), %v2310_v1  ;;  %v2315_v6 = vld [vmem:[%s3003_s1 + $0xc8] sm:$0xff] (!%p169_p3)   ;;  %v2319_v10 = vld [vmem:[%s3003_s1 + $0xd0] sm:$0xff] (!%p169_p3)  }
   0x9   : > { %v2312_v3 = vld [vmem:[%s3003_s1 + $0x80] sm:$0xff] (!%p169_p3)   ;;  %2108 = vmatprep.subr.bf16.mxu1 (!%p169_p3), %v2311_v2  ;;  %2088 = vmatprep.subr.bf16.mxu0 (!%p169_p3), %v2313_v4  ;;  %v2316_v7 = vld [vmem:[%s3003_s1 + $0x88] sm:$0xff] (!%p169_p3)   ;;  %v2320_v11 = vld [vmem:[%s3003_s1 + $0x90] sm:$0xff] (!%p169_p3)  }
   0xa   : > { %2109 = vmatpush3.bf16.msra.mxu1 (!%p169_p3), %v2312_v3  ;;  %v2321_v12 = vld [vmem:[%s3003_s1 + $0x58] sm:$0xff] (!%p169_p3)   ;;  %v2325_v16 = vld [vmem:[%s3003_s1 + $0x60] sm:$0xff] (!%p169_p3)   ;;  %v2329_v20 = vld [vmem:[%s3003_s1 + $0x68] sm:$0xff] (!%p169_p3)  }
   0xb   : > { %2110 = vmatprep.subr.bf16.mxu1 (!%p169_p3), %v2315_v6  ;;  %v2322_v13 = vld [vmem:[%s3003_s1 + $0x18] sm:$0xff] (!%p169_p3)   ;;  %v2326_v17 = vld [vmem:[%s3003_s1 + $0x20] sm:$0xff] (!%p169_p3)   ;;  %v2330_v21 = vld [vmem:[%s3003_s1 + $0x28] sm:$0xff] (!%p169_p3)  }
   0xc   : > { %2089 = vmatpush3.bf16.msra.mxu0 (!%p169_p3), %v2314_v5  ;;  %v2323_v14 = vld [vmem:[%s3003_s1 + $0xd8] sm:$0xff] (!%p169_p3)   ;;  %v2327_v18 = vld [vmem:[%s3003_s1 + $0xe0] sm:$0xff] (!%p169_p3)   ;;  %v2331_v22 = vld [vmem:[%s3003_s1 + $0xe8] sm:$0xff] (!%p169_p3)  }
   0xd   : > { %2090 = vmatprep.subr.bf16.mxu0 (!%p169_p3), %v2317_v8  ;;  %v2324_v15 = vld [vmem:[%s3003_s1 + $0x98] sm:$0xff] (!%p169_p3)   ;;  %v2328_v19 = vld [vmem:[%s3003_s1 + $0xa0] sm:$0xff] (!%p169_p3)   ;;  %v2332_v23 = vld [vmem:[%s3003_s1 + $0xa8] sm:$0xff] (!%p169_p3)  }
   0xe   : > { %2111 = vmatpush3.bf16.msra.mxu1 %v2316_v7  ;;  %s3011_s12 = smov (!%p201_p4, %s2485_s12), 2  ;;  %v2333_v24 = vld [vmem:[%s3003_s1 + $0x70] sm:$0xff]   ;;  %v2337_v28 = vld [vmem:[%s3003_s1 + $0x78] sm:$0xff]   ;;  %v2343_v35 = vld [vmem:[%s3003_s1 + $0x140] sm:$0xff]  }
   0xf   : > { %2112 = vmatprep.subr.bf16.mxu1 %v2319_v10  ;;  %s2284_s20 = smul.u32 72, %s3011_s12  ;;  %v2334_v25 = vld [vmem:[%s3003_s1 + $0x30] sm:$0xff]   ;;  %v2338_v29 = vld [vmem:[%s3003_s1 + $0x38] sm:$0xff]   ;;  %v2346_v39 = vld [vmem:[%s3003_s1 + $0x100] sm:$0xff]  }
  0x10   : > { %2091 = vmatpush3.bf16.msra.mxu0 %v2318_v9  ;;  %v2335_v26 = vld [vmem:[%s3003_s1 + $0xf0] sm:$0xff]   ;;  %v2339_v30 = vld [vmem:[%s3003_s1 + $0xf8] sm:$0xff]   ;;  %v2347_v40 = vld [vmem:[%s3003_s1 + $0x1c0] sm:$0xff]  }
  0x11   : > { %2092 = vmatprep.subr.bf16.mxu0 %v2321_v12  ;;  %v2336_v27 = vld [vmem:[%s3003_s1 + $0xb0] sm:$0xff]   ;;  %s2630_s4 = scalar_lea.vmem %s3002_s0, %s2284_s20  ;;  %v2342_v34 = vld [vmem:[%s3003_s1 + $0xb8] sm:$0xff]   ;;  %v2348_v41 = vld [vmem:[%s3003_s1 + $0x180] sm:$0xff]   ;;  %s1920_s20 = sshll.u32 %s3011_s12, 3 }
  0x12   : > { %2113 = vmatpush3.bf16.msra.mxu1 %v2320_v11  ;;  %v221_v31 = vld [vmem:[%s2630_s4] sm:$0xff]  ;;  %v222_v36 = vld [vmem:[%s2630_s4 + $0x8] sm:$0xff]  ;;  %v2353_v46 = vld [vmem:[%s3003_s1 + $0x150] sm:$0xff]   ;;  %s219_s23 = scalar_lea.vmem %s3005_s3, %s1920_s20 }
  0x13   : > { %2114 = vmatprep.subr.bf16.mxu1 %v2323_v14  ;;  %v1922_v32 = vcombine.low %v221_v31, %v221_v31  ;;  %v1923_v33 = vcombine.high %v221_v31, %v221_v31  ;;  %v1924_v37 = vcombine.low %v222_v36, %v222_v36  ;;  %v1925_v38 = vcombine.high %v222_v36, %v222_v36  ;;  %v2349_v42 = vld [vmem:[%s3003_s1 + $0x148] sm:$0xff]   ;;  %v2354_v47 = vld [vmem:[%s3003_s1 + $0x110] sm:$0xff]   ;;  %v2357_v50 = vld [vmem:[%s3003_s1 + $0x158] sm:$0xff]  }
  0x14   : > { %2093 = vmatpush3.bf16.msra.mxu0 %v2322_v13  ;;  %v2350_v43 = vld [vmem:[%s3003_s1 + $0x108] sm:$0xff]   ;;  %v2355_v48 = vld [vmem:[%s3003_s1 + $0x1d0] sm:$0xff]   ;;  %v2358_v51 = vld [vmem:[%s3003_s1 + $0x118] sm:$0xff]  }
  0x15   : > { %2094 = vmatprep.subr.bf16.mxu0 %v2325_v16  ;;  %1484 = vmatprep.mubr.bf16.mxu0 %v1923_v33  ;;  %v2351_v44 = vld [vmem:[%s3003_s1 + $0x1c8] sm:$0xff]   ;;  %v2356_v49 = vld [vmem:[%s3003_s1 + $0x190] sm:$0xff]   ;;  %v2359_v52 = vld [vmem:[%s3003_s1 + $0x1d8] sm:$0xff]  }
  0x16   : > { %2115 = vmatpush3.bf16.msra.mxu1 %v2324_v15  ;;  %1524 = vmatprep.mubr.bf16.mxu1 %v1925_v38  ;;  %v2352_v45 = vld [vmem:[%s3003_s1 + $0x188] sm:$0xff]   ;;  %v2360_v53 = vld [vmem:[%s3003_s1 + $0x198] sm:$0xff]   ;;  %v2361_v54 = vld [vmem:[%s3003_s1 + $0x160] sm:$0xff]  }
  0x17   : > { %2116 = vmatprep.subr.bf16.mxu1 %v2327_v18  ;;  %v2362_v55 = vld [vmem:[%s3003_s1 + $0x120] sm:$0xff]   ;;  %v2365_v58 = vld [vmem:[%s3003_s1 + $0x168] sm:$0xff]   ;;  %v2369_v62 = vld [vmem:[%s3003_s1 + $0x170] sm:$0xff]  }
  0x18   : > { %2095 = vmatpush3.bf16.msra.mxu0 %v2326_v17  ;;  %v2363_v56 = vld [vmem:[%s3003_s1 + $0x1e0] sm:$0xff]   ;;  %v2366_v59 = vld [vmem:[%s3003_s1 + $0x128] sm:$0xff]   ;;  %v2370_v63 = vld [vmem:[%s3003_s1 + $0x130] sm:$0xff]  }
  0x19   : > { %2096 = vmatprep.subr.bf16.mxu0 %v2329_v20  ;;  %v2364_v57 = vld [vmem:[%s3003_s1 + $0x1a0] sm:$0xff]   ;;  %v2367_v60 = vld [vmem:[%s3003_s1 + $0x1e8] sm:$0xff]   ;;  %v2371_v0 = vld [vmem:[%s3003_s1 + $0x1f0] sm:$0xff]  }
  0x1a   : > { %2117 = vmatpush3.bf16.msra.mxu1 %v2328_v19  ;;  %v2368_v61 = vld [vmem:[%s3003_s1 + $0x1a8] sm:$0xff]   ;;  %v2372_v1 = vld [vmem:[%s3003_s1 + $0x1b0] sm:$0xff]   ;;  %v2373_v2 = vld [vmem:[%s3003_s1 + $0x178] sm:$0xff]  }
  0x1b   : > { %2118 = vmatprep.subr.bf16.mxu1 %v2331_v22  ;;  %v2374_v3 = vld [vmem:[%s3003_s1 + $0x138] sm:$0xff]   ;;  %v223_v5 = vld [vmem:[%s2630_s4 + $0x10] sm:$0xff]  ;;  %v2379_v9 = vld [vmem:[%s3003_s1 + $0x240] sm:$0xff]  }
  0x1c   : > { %2097 = vmatpush3.bf16.msra.mxu0 %v2330_v21  ;;  %v2375_v4 = vld [vmem:[%s3003_s1 + $0x1f8] sm:$0xff]   ;;  %v1926_v6 = vcombine.low %v223_v5, %v223_v5  ;;  %v1927_v7 = vcombine.high %v223_v5, %v223_v5  ;;  %v2382_v13 = vld [vmem:[%s3003_s1 + $0x200] sm:$0xff]   ;;  %v2385_v16 = vld [vmem:[%s3003_s1 + $0x248] sm:$0xff]  }
  0x1d   : > { %2098 = vmatprep.subr.bf16.mxu0 %v2333_v24  ;;  %v2378_v8 = vld [vmem:[%s3003_s1 + $0x1b8] sm:$0xff]   ;;  %v2383_v14 = vld [vmem:[%s3003_s1 + $0x2c0] sm:$0xff]   ;;  %v2386_v17 = vld [vmem:[%s3003_s1 + $0x208] sm:$0xff]  }
  0x1e   : > { %2119 = vmatpush3.bf16.msra.mxu1 %v2332_v23  ;;  %v224_v10 = vld [vmem:[%s2630_s4 + $0x18] sm:$0xff]  ;;  %v2384_v15 = vld [vmem:[%s3003_s1 + $0x280] sm:$0xff]   ;;  %v2387_v18 = vld [vmem:[%s3003_s1 + $0x2c8] sm:$0xff]  }
  0x1f   : > { %2120 = vmatprep.subr.bf16.mxu1 %v2335_v26  ;;  %v1928_v11 = vcombine.low %v224_v10, %v224_v10  ;;  %v1929_v12 = vcombine.high %v224_v10, %v224_v10  ;;  %v2388_v19 = vld [vmem:[%s3003_s1 + $0x288] sm:$0xff]   ;;  %v2389_v20 = vld [vmem:[%s3003_s1 + $0x250] sm:$0xff]   ;;  %v2393_v24 = vld [vmem:[%s3003_s1 + $0x258] sm:$0xff]  }
  0x20   : > { %2099 = vmatpush3.bf16.msra.mxu0 %v2334_v25  ;;  %v2390_v21 = vld [vmem:[%s3003_s1 + $0x210] sm:$0xff]   ;;  %v2394_v25 = vld [vmem:[%s3003_s1 + $0x218] sm:$0xff]   ;;  %v2400_v31 = vld [vmem:[%s3003_s1 + $0x2a0] sm:$0xff]  }
  0x21   : > { %2100 = vmatprep.subr.bf16.mxu0 %v2337_v28  ;;  %v2391_v22 = vld [vmem:[%s3003_s1 + $0x2d0] sm:$0xff]   ;;  %v2395_v26 = vld [vmem:[%s3003_s1 + $0x2d8] sm:$0xff]   ;;  %v2397_v28 = vld [vmem:[%s3003_s1 + $0x260] sm:$0xff]  }
  0x22   : > { %2121 = vmatpush3.bf16.msra.mxu1 %v2336_v27  ;;  %v2392_v23 = vld [vmem:[%s3003_s1 + $0x290] sm:$0xff]   ;;  %v2396_v27 = vld [vmem:[%s3003_s1 + $0x298] sm:$0xff]   ;;  %v2402_v33 = vld [vmem:[%s3003_s1 + $0x228] sm:$0xff]  }
  0x23   : > { %2122 = vmatprep.subr.bf16.mxu1 %v2339_v30  ;;  %v2399_v30 = vld [vmem:[%s3003_s1 + $0x2e0] sm:$0xff]   ;;  %v2405_v36 = vld [vmem:[%s3003_s1 + $0x270] sm:$0xff]  }
  0x24   : > { %2101 = vmatpush3.bf16.msra.mxu0 %v2338_v29  ;;  %v2398_v29 = vld [vmem:[%s3003_s1 + $0x220] sm:$0xff]   ;;  %v2407_v38 = vld [vmem:[%s3003_s1 + $0x2f0] sm:$0xff]  }
  0x25   : > { %2130 = vmatprep.subr.bf16.mxu0 %v2343_v35  ;;  %v2404_v35 = vld [vmem:[%s3003_s1 + $0x2a8] sm:$0xff]   ;;  %v2436_v5 = vld [vmem:[%s3003_s1 + $0x3a0] sm:$0xff]   ;;  %v2441_v10 = vld [vmem:[%s3003_s1 + $0x370] sm:$0xff]  }
  0x26   : > { %2123 = vmatpush3.bf16.msra.mxu1 %v2342_v34  ;;  %v2403_v34 = vld [vmem:[%s3003_s1 + $0x2e8] sm:$0xff]  }
  0x27   : > { %1485 = vmatmul.mubr.bf16.vlgmr.msra.gmra.mrb[0].mxu0 %v1922_v32  ;;  %2152 = vmatprep.subr.bf16.mxu1 %v2347_v40  ;;  %v2401_v32 = vld [vmem:[%s3003_s1 + $0x268] sm:$0xff]   ;;  %v2409_v40 = vld [vmem:[%s3003_s1 + $0x278] sm:$0xff]  }
  0x28   : > { %2131 = vmatpush3.bf16.msra.mxu0 %v2346_v39  ;;  %1564 = vmatprep.mubr.bf16.mxu0 %v1927_v7  ;;  %v2408_v39 = vld [vmem:[%s3003_s1 + $0x2b0] sm:$0xff]   ;;  %v2438_v7 = vld [vmem:[%s3003_s1 + $0x328] sm:$0xff]  }
  0x29   : > { %1525 = vmatmul.mubr.bf16.vlgmr.msra.gmra.mrb[0].mxu1 %v1924_v37  ;;  %2132 = vmatprep.subr.bf16.mxu0 %v2349_v42  ;;  %v2406_v37 = vld [vmem:[%s3003_s1 + $0x230] sm:$0xff]   ;;  %v2411_v42 = vld [vmem:[%s3003_s1 + $0x2f8] sm:$0xff]  }
  0x2a   : > { %2153 = vmatpush3.bf16.msra.mxu1 %v2348_v41  ;;  %1604 = vmatprep.mubr.bf16.mxu1 %v1929_v12  ;;  %v2410_v41 = vld [vmem:[%s3003_s1 + $0x238] sm:$0xff]   ;;  %v2443_v12 = vld [vmem:[%s3003_s1 + $0x3f0] sm:$0xff]  }
  0x2b   : > { %2154 = vmatprep.subr.bf16.mxu1 %v2351_v44 }
  0x2c   : > { %2133 = vmatpush3.bf16.msra.mxu0 %v2350_v43  ;;  %v225_v43 = vld [vmem:[%s2630_s4 + $0x20] sm:$0xff] }
  0x2d   : > { %2134 = vmatprep.subr.bf16.mxu0 %v2353_v46  ;;  %v1930_v44 = vcombine.low %v225_v43, %v225_v43  ;;  %v2414_v46 = vld [vmem:[%s3003_s1 + $0x2b8] sm:$0xff]  }
  0x2e   : > { %2155 = vmatpush3.bf16.msra.mxu1 %v2352_v45  ;;  %v1931_v45 = vcombine.high %v225_v43, %v225_v43 }
  0x2f   : > { %2156 = vmatprep.subr.bf16.mxu1 %v2355_v48  ;;  %v226_v48 = vld [vmem:[%s2630_s4 + $0x28] sm:$0xff] }
  0x30   : > { %2135 = vmatpush3.bf16.msra.mxu0 %v2354_v47  ;;  %v2415_v47 = vld [vmem:[%s3003_s1 + $0x340] sm:$0xff]  }
  0x31   : > { %2136 = vmatprep.subr.bf16.mxu0 %v2357_v50  ;;  %v1933_v50 = vcombine.high %v226_v48, %v226_v48 }
  0x32   : > { %2157 = vmatpush3.bf16.msra.mxu1 %v2356_v49  ;;  %v1932_v49 = vcombine.low %v226_v48, %v226_v48 }
  0x33   : > { %2158 = vmatprep.subr.bf16.mxu1 %v2359_v52  ;;  %v2419_v52 = vld [vmem:[%s3003_s1 + $0x3c0] sm:$0xff]  }
  0x34   : > { %2137 = vmatpush3.bf16.msra.mxu0 %v2358_v51  ;;  %v2418_v51 = vld [vmem:[%s3003_s1 + $0x300] sm:$0xff]  }
  0x35   : > { %2138 = vmatprep.subr.bf16.mxu0 %v2361_v54  ;;  %v2421_v54 = vld [vmem:[%s3003_s1 + $0x348] sm:$0xff]  }
  0x36   : > { %2159 = vmatpush3.bf16.msra.mxu1 %v2360_v53  ;;  %v2420_v53 = vld [vmem:[%s3003_s1 + $0x380] sm:$0xff]  }
  0x37   : > { %2160 = vmatprep.subr.bf16.mxu1 %v2363_v56  ;;  %v2423_v56 = vld [vmem:[%s3003_s1 + $0x3c8] sm:$0xff]  }
  0x38   : > { %2139 = vmatpush3.bf16.msra.mxu0 %v2362_v55  ;;  %v2422_v55 = vld [vmem:[%s3003_s1 + $0x308] sm:$0xff]  }
  0x39   : > { %2140 = vmatprep.subr.bf16.mxu0 %v2365_v58  ;;  %v2425_v58 = vld [vmem:[%s3003_s1 + $0x350] sm:$0xff]  }
  0x3a   : > { %2161 = vmatpush3.bf16.msra.mxu1 %v2364_v57  ;;  %v2424_v57 = vld [vmem:[%s3003_s1 + $0x388] sm:$0xff]  }
  0x3b   : > { %2162 = vmatprep.subr.bf16.mxu1 %v2367_v60  ;;  %v2427_v60 = vld [vmem:[%s3003_s1 + $0x3d0] sm:$0xff]  }
  0x3c   : > { %2141 = vmatpush3.bf16.msra.mxu0 %v2366_v59  ;;  %v2426_v59 = vld [vmem:[%s3003_s1 + $0x310] sm:$0xff]  }
  0x3d   : > { %2142 = vmatprep.subr.bf16.mxu0 %v2369_v62  ;;  %v2429_v62 = vld [vmem:[%s3003_s1 + $0x358] sm:$0xff]  }
  0x3e   : > { %2163 = vmatpush3.bf16.msra.mxu1 %v2368_v61  ;;  %v2428_v61 = vld [vmem:[%s3003_s1 + $0x390] sm:$0xff]  }
  0x3f   : > { %2164 = vmatprep.subr.bf16.mxu1 %v2371_v0  ;;  %v2431_v0 = vld [vmem:[%s3003_s1 + $0x3d8] sm:$0xff]  }
  0x40   : > { %2143 = vmatpush3.bf16.msra.mxu0 %v2370_v63  ;;  %v2430_v63 = vld [vmem:[%s3003_s1 + $0x318] sm:$0xff]  }
  0x41   : > { %2144 = vmatprep.subr.bf16.mxu0 %v2373_v2  ;;  %v2433_v2 = vld [vmem:[%s3003_s1 + $0x360] sm:$0xff]  }
  0x42   : > { %2165 = vmatpush3.bf16.msra.mxu1 %v2372_v1  ;;  %v2432_v1 = vld [vmem:[%s3003_s1 + $0x398] sm:$0xff]  }
  0x43   : > { %2166 = vmatprep.subr.bf16.mxu1 %v2375_v4  ;;  %v2435_v4 = vld [vmem:[%s3003_s1 + $0x3e0] sm:$0xff]  }
  0x44   : > { %2145 = vmatpush3.bf16.msra.mxu0 %v2374_v3  ;;  %v2434_v3 = vld [vmem:[%s3003_s1 + $0x320] sm:$0xff]  }
  0x45   : > { %2174 = vmatprep.subr.bf16.mxu0 %v2379_v9  ;;  %v2440_v9 = vld [vmem:[%s3003_s1 + $0x3a8] sm:$0xff]  }
  0x46   : > { %2167 = vmatpush3.bf16.msra.mxu1 %v2378_v8  ;;  %v2439_v8 = vld [vmem:[%s3003_s1 + $0x3e8] sm:$0xff]  }
  0x47   : > { %1565 = vmatmul.mubr.bf16.vlgmr.msra.gmra.mrb[4].mxu0 %v1926_v6  ;;  %2196 = vmatprep.subr.bf16.mxu1 %v2383_v14  ;;  %v2437_v6 = vld [vmem:[%s3003_s1 + $0x368] sm:$0xff]   ;;  %v2445_v14 = vld [vmem:[%s3003_s1 + $0x378] sm:$0xff]  }
  0x48   : > { %2175 = vmatpush3.bf16.msra.mxu0 %v2382_v13  ;;  %1644 = vmatprep.mubr.bf16.mxu0 %v1931_v45  ;;  %v2444_v13 = vld [vmem:[%s3003_s1 + $0x3b0] sm:$0xff]  }
  0x49   : > { %1605 = vmatmul.mubr.bf16.vlgmr.msra.gmra.mrb[4].mxu1 %v1928_v11  ;;  %2176 = vmatprep.subr.bf16.mxu0 %v2385_v16  ;;  %v2442_v11 = vld [vmem:[%s3003_s1 + $0x330] sm:$0xff]   ;;  %v2447_v16 = vld [vmem:[%s3003_s1 + $0x3f8] sm:$0xff]  }
  0x4a   : > { %2197 = vmatpush3.bf16.msra.mxu1 %v2384_v15  ;;  %1684 = vmatprep.mubr.bf16.mxu1 %v1933_v50  ;;  %v2446_v15 = vld [vmem:[%s3003_s1 + $0x338] sm:$0xff]  }
  0x4b   : > { %2198 = vmatprep.subr.bf16.mxu1 %v2387_v18 }
  0x4c   : > { %2177 = vmatpush3.bf16.msra.mxu0 %v2386_v17  ;;  %v227_v17 = vld [vmem:[%s2630_s4 + $0x30] sm:$0xff] }
  0x4d   : > { %2178 = vmatprep.subr.bf16.mxu0 %v2389_v20  ;;  %v1934_v18 = vcombine.low %v227_v17, %v227_v17  ;;  %v2450_v20 = vld [vmem:[%s3003_s1 + $0x3b8] sm:$0xff]  }
  0x4e   : > { %2199 = vmatpush3.bf16.msra.mxu1 %v2388_v19  ;;  %v1935_v19 = vcombine.high %v227_v17, %v227_v17 }
  0x4f   : > { %2200 = vmatprep.subr.bf16.mxu1 %v2391_v22  ;;  %v228_v22 = vld [vmem:[%s2630_s4 + $0x38] sm:$0xff] }
  0x50   : > { %2179 = vmatpush3.bf16.msra.mxu0 %v2390_v21  ;;  %v2451_v21 = vld [vmem:[%s3003_s1 + $0x440] sm:$0xff]  }
  0x51   : > { %2180 = vmatprep.subr.bf16.mxu0 %v2393_v24  ;;  %v1937_v24 = vcombine.high %v228_v22, %v228_v22 }
  0x52   : > { %2201 = vmatpush3.bf16.msra.mxu1 %v2392_v23  ;;  %v1936_v23 = vcombine.low %v228_v22, %v228_v22 }
  0x53   : > { %2202 = vmatprep.subr.bf16.mxu1 %v2395_v26  ;;  %v2455_v26 = vld [vmem:[%s3003_s1 + $0x448] sm:$0xff]  }
  0x54   : > { %2181 = vmatpush3.bf16.msra.mxu0 %v2394_v25  ;;  %v2454_v25 = vld [vmem:[%s3003_s1 + $0x400] sm:$0xff]  }
  0x55   : > { %2182 = vmatprep.subr.bf16.mxu0 %v2397_v28  ;;  %v2457_v28 = vld [vmem:[%s3003_s1 + $0x450] sm:$0xff]  }
  0x56   : > { %2203 = vmatpush3.bf16.msra.mxu1 %v2396_v27  ;;  %v2456_v27 = vld [vmem:[%s3003_s1 + $0x408] sm:$0xff]  }
  0x57   : > { %2204 = vmatprep.subr.bf16.mxu1 %v2399_v30  ;;  %v2459_v30 = vld [vmem:[%s3003_s1 + $0x458] sm:$0xff]  }
  0x58   : > { %2183 = vmatpush3.bf16.msra.mxu0 %v2398_v29  ;;  %v2458_v29 = vld [vmem:[%s3003_s1 + $0x410] sm:$0xff]  }
  0x59   : > { %2184 = vmatprep.subr.bf16.mxu0 %v2401_v32  ;;  %v2461_v32 = vld [vmem:[%s3003_s1 + $0x460] sm:$0xff]  }
  0x5a   : > { %2205 = vmatpush3.bf16.msra.mxu1 %v2400_v31  ;;  %v2460_v31 = vld [vmem:[%s3003_s1 + $0x418] sm:$0xff]  }
  0x5b   : > { %2206 = vmatprep.subr.bf16.mxu1 %v2403_v34  ;;  %v229_v34 = vld [vmem:[%s2630_s4 + $0x40] sm:$0xff] }
  0x5c   : > { %2185 = vmatpush3.bf16.msra.mxu0 %v2402_v33  ;;  %v2462_v33 = vld [vmem:[%s3003_s1 + $0x420] sm:$0xff]  }
  0x5d   : > { %2186 = vmatprep.subr.bf16.mxu0 %v2405_v36  ;;  %v1939_v36 = vcombine.high %v229_v34, %v229_v34 }
  0x5e   : > { %2207 = vmatpush3.bf16.msra.mxu1 %v2404_v35  ;;  %v2463_v35 = vld [vmem:[%s3003_s1 + $0x468] sm:$0xff]  }
  0x5f   : > { %2208 = vmatprep.subr.bf16.mxu1 %v2407_v38  ;;  %v2465_v38 = vld [vmem:[%s3003_s1 + $0x470] sm:$0xff]  }
  0x60   : > { %2187 = vmatpush3.bf16.msra.mxu0 %v2406_v37  ;;  %v2464_v37 = vld [vmem:[%s3003_s1 + $0x428] sm:$0xff]  }
  0x61   : > { %2188 = vmatprep.subr.bf16.mxu0 %v2409_v40  ;;  %v2467_v40 = vld [vmem:[%s3003_s1 + $0x478] sm:$0xff]  }
  0x62   : > { %2209 = vmatpush3.bf16.msra.mxu1 %v2408_v39  ;;  %v2466_v39 = vld [vmem:[%s3003_s1 + $0x430] sm:$0xff]  }
  0x63   : > { %2210 = vmatprep.subr.bf16.mxu1 %v2411_v42  ;;  %v1938_v42 = vcombine.low %v229_v34, %v229_v34 }
  0x64   : > { %2189 = vmatpush3.bf16.msra.mxu0 %v2410_v41  ;;  %v2468_v41 = vld [vmem:[%s3003_s1 + $0x438] sm:$0xff]  }
  0x65   : > { %2218 = vmatprep.subr.bf16.mxu0 %v2415_v47 }
  0x66   : > { %2211 = vmatpush3.bf16.msra.mxu1 %v2414_v46 }
  0x67   : > { %1645 = vmatmul.mubr.bf16.vlgmr.msra.gmra.mrb[8].mxu0 %v1930_v44  ;;  %2240 = vmatprep.subr.bf16.mxu1 %v2419_v52  ;;  %v1921_v44 = vld [vmem:[%s3004_s2] ss:$0 sm:$0xff] }
  0x68   : > { %2219 = vmatpush3.bf16.msra.mxu0 %v2418_v51  ;;  %1724 = vmatprep.mubr.bf16.mxu0 %v1935_v19 }
  0x69   : > { %1685 = vmatmul.mubr.bf16.vlgmr.msra.gmra.mrb[8].mxu1 %v1932_v49  ;;  %2220 = vmatprep.subr.bf16.mxu0 %v2421_v54 }
  0x6a   : > { %2241 = vmatpush3.bf16.msra.mxu1 %v2420_v53  ;;  %1764 = vmatprep.mubr.bf16.mxu1 %v1937_v24 }
  0x6b   : > { %2242 = vmatprep.subr.bf16.mxu1 %v2423_v56 }
  0x6c   : > { %2221 = vmatpush3.bf16.msra.mxu0 %v2422_v55 }
  0x6d   : > { %2222 = vmatprep.subr.bf16.mxu0 %v2425_v58 }
  0x6e   : > { %2243 = vmatpush3.bf16.msra.mxu1 %v2424_v57 }
  0x6f   : > { %2244 = vmatprep.subr.bf16.mxu1 %v2427_v60 }
  0x70   : > { %2223 = vmatpush3.bf16.msra.mxu0 %v2426_v59 }
  0x71   : > { %2224 = vmatprep.subr.bf16.mxu0 %v2429_v62 }
  0x72   : > { %2245 = vmatpush3.bf16.msra.mxu1 %v2428_v61 }
  0x73   : > { %2246 = vmatprep.subr.bf16.mxu1 %v2431_v0 }
  0x74   : > { %2225 = vmatpush3.bf16.msra.mxu0 %v2430_v63 }
  0x75   : > { %2226 = vmatprep.subr.bf16.mxu0 %v2433_v2 }
  0x76   : > { %2247 = vmatpush3.bf16.msra.mxu1 %v2432_v1 }
  0x77   : > { %2248 = vmatprep.subr.bf16.mxu1 %v2435_v4 }
  0x78   : > { %2227 = vmatpush3.bf16.msra.mxu0 %v2434_v3 }
  0x79   : > { %2228 = vmatprep.subr.bf16.mxu0 %v2437_v6 }
  0x7a   : > { %2249 = vmatpush3.bf16.msra.mxu1 %v2436_v5 }
  0x7b   : > { %2250 = vmatprep.subr.bf16.mxu1 %v2439_v8 }
  0x7c   : > { %2229 = vmatpush3.bf16.msra.mxu0 %v2438_v7 }
  0x7d   : > { %2230 = vmatprep.subr.bf16.mxu0 %v2441_v10 }
  0x7e   : > { %2251 = vmatpush3.bf16.msra.mxu1 %v2440_v9 }
  0x7f   : > { %2252 = vmatprep.subr.bf16.mxu1 %v2443_v12 }
  0x80   : > { %2231 = vmatpush3.bf16.msra.mxu0 %v2442_v11 }
  0x81   : > { %2232 = vmatprep.subr.bf16.mxu0 %v2445_v14 }
  0x82   : > { %2253 = vmatpush3.bf16.msra.mxu1 %v2444_v13 }
  0x83   : > { %2254 = vmatprep.subr.bf16.mxu1 %v2447_v16 }
  0x84   : > { %2233 = vmatpush3.bf16.msra.mxu0 %v2446_v15 }
  0x85   : > { %2262 = vmatprep.subr.bf16.mxu0 %v2451_v21 }
  0x86   : > { %2255 = vmatpush3.bf16.msra.mxu1 %v2450_v20 }
  0x87   : > { %1725 = vmatmul.mubr.bf16.vlgmr.msra.gmra.mrb[12].mxu0 %v1934_v18 }
  0x88   : > { %2263 = vmatpush3.bf16.msra.mxu0 %v2454_v25  ;;  %1804 = vmatprep.mubr.bf16.mxu0 %v1939_v36 }
  0x89   : > { %1765 = vmatmul.mubr.bf16.vlgmr.msra.gmra.mrb[12].mxu1 %v1936_v23  ;;  %2264 = vmatprep.subr.bf16.mxu0 %v2455_v26 }
  0x8c   : > { %2265 = vmatpush3.bf16.msra.mxu0 %v2456_v27 }
  0x8d   : > { %2266 = vmatprep.subr.bf16.mxu0 %v2457_v28 }
  0x90   : > { %2267 = vmatpush3.bf16.msra.mxu0 %v2458_v29 }
  0x91   : > { %2268 = vmatprep.subr.bf16.mxu0 %v2459_v30 }
  0x94   : > { %2269 = vmatpush3.bf16.msra.mxu0 %v2460_v31 }
  0x95   : > { %2270 = vmatprep.subr.bf16.mxu0 %v2461_v32 }
  0x98   : > { %2271 = vmatpush3.bf16.msra.mxu0 %v2462_v33 }
  0x99   : > { %2272 = vmatprep.subr.bf16.mxu0 %v2463_v35 }
  0x9c   : > { %2273 = vmatpush3.bf16.msra.mxu0 %v2464_v37 }
  0x9d   : > { %2274 = vmatprep.subr.bf16.mxu0 %v2465_v38 }
  0xa0   : > { %2275 = vmatpush3.bf16.msra.mxu0 %v2466_v39 }
  0xa1   : > { %2276 = vmatprep.subr.bf16.mxu0 %v2467_v40 }
  0xa4   : > { %2277 = vmatpush3.bf16.msra.mxu0 %v2468_v41 }
  0xa7   : > { %1805 = vmatmul.mubr.bf16.vlgmr.msra.gmra.mrb[16].mxu0 %v1938_v42 }
  0xfa   : > { %v2102_v43 = vpop.f32.mrb[0].mxu0 }
  0xfb   : > { %v2103_v45 = vpop.f32.mrb[1].mxu0 }
  0xfc   : > { %v2104_v46 = vadd.f32 %v2103_v45, %v2102_v43  ;;  %v2105_v47 = vpop.f32.mrb[2].mxu0  ;;  %v2124_v48 = vpop.f32.mrb[0].mxu1 }
  0xfd   : > { %v2106_v49 = vpop.f32.mrb[3].mxu0  ;;  %v2125_v50 = vpop.f32.mrb[1].mxu1 }
  0xfe   : > { %v1487_v51 = vadd.f32 %v2104_v46, %v1921_v44  ;;  %v2126_v52 = vadd.f32 %v2125_v50, %v2124_v48  ;;  %v2127_v53 = vpop.f32.mrb[2].mxu1 }
  0xff   : > { %v2128_v54 = vpop.f32.mrb[3].mxu1 }
 0x100   : > { %v1527_v55 = vadd.f32 %v2126_v52, %v1487_v51 }
 0x11a   : > { %v2146_v56 = vpop.f32.mrb[4].mxu0 }
 0x11b   : > { %v2147_v57 = vpop.f32.mrb[5].mxu0 }
 0x11c   : > { %v2148_v58 = vadd.f32 %v2147_v57, %v2146_v56  ;;  %v2149_v59 = vpop.f32.mrb[6].mxu0  ;;  %v2168_v60 = vpop.f32.mrb[4].mxu1 }
 0x11d   : > { %v2150_v61 = vpop.f32.mrb[7].mxu0  ;;  %v2169_v63 = vpop.f32.mrb[5].mxu1 }
 0x11e   : > { %v1567_v62 = vadd.f32 %v2148_v58, %v1527_v55  ;;  %v2170_v0 = vadd.f32 %v2169_v63, %v2168_v60  ;;  %v2171_v1 = vpop.f32.mrb[6].mxu1 }
 0x11f   : > { %v2172_v2 = vpop.f32.mrb[7].mxu1 }
 0x120   : > { %v1607_v3 = vadd.f32 %v2170_v0, %v1567_v62 }
 0x13a   : > { %v2190_v4 = vpop.f32.mrb[8].mxu0 }
 0x13b   : > { %v2191_v5 = vpop.f32.mrb[9].mxu0 }
 0x13c   : > { %v2192_v6 = vadd.f32 %v2191_v5, %v2190_v4  ;;  %v2193_v7 = vpop.f32.mrb[10].mxu0  ;;  %v2212_v8 = vpop.f32.mrb[8].mxu1 }
 0x13d   : > { %v2194_v9 = vpop.f32.mrb[11].mxu0  ;;  %v2213_v10 = vpop.f32.mrb[9].mxu1 }
 0x13e   : > { %v1647_v11 = vadd.f32 %v2192_v6, %v1607_v3  ;;  %v2214_v12 = vadd.f32 %v2213_v10, %v2212_v8  ;;  %v2215_v13 = vpop.f32.mrb[10].mxu1 }
 0x13f   : > { %v2216_v14 = vpop.f32.mrb[11].mxu1 }
 0x140   : > { %v1687_v15 = vadd.f32 %v2214_v12, %v1647_v11 }
 0x15a   : > { %v2234_v16 = vpop.f32.mrb[12].mxu0 }
 0x15b   : > { %v2235_v17 = vpop.f32.mrb[13].mxu0 }
 0x15c   : > { %v2236_v18 = vadd.f32 %v2235_v17, %v2234_v16  ;;  %v2237_v19 = vpop.f32.mrb[14].mxu0  ;;  %v2256_v20 = vpop.f32.mrb[12].mxu1 }
 0x15d   : > { %v2238_v21 = vpop.f32.mrb[15].mxu0  ;;  %v2257_v22 = vpop.f32.mrb[13].mxu1 }
 0x15e   : > { %v1727_v23 = vadd.f32 %v2236_v18, %v1687_v15  ;;  %v2258_v24 = vadd.f32 %v2257_v22, %v2256_v20  ;;  %v2259_v25 = vpop.f32.mrb[14].mxu1 }
 0x15f   : > { %v2260_v26 = vpop.f32.mrb[15].mxu1 }
 0x160   : > { %v1767_v27 = vadd.f32 %v2258_v24, %v1727_v23 }
 0x17a   : > { %v2278_v28 = vpop.f32.mrb[16].mxu0 }
 0x17b   : > { %v2279_v29 = vpop.f32.mrb[17].mxu0 }
 0x17c   : > { %v2280_v30 = vadd.f32 %v2279_v29, %v2278_v28  ;;  %v2281_v31 = vpop.f32.mrb[18].mxu0 }
 0x17d   : > { %v2282_v32 = vpop.f32.mrb[19].mxu0 }
 0x17e   : > { %v1807_v33 = vadd.f32 %v2280_v30, %v1767_v27 }
 0x180   : > { %1812 = vst [vmem:[%s219_s23] sm:$0xff] %v1807_v33 }
 0x181 PF: > { %s13_s14 = sadd.s32 1, %s2493_s14   ;;  %s3006_s12 = smov %s2489_s13 }
 0x182   : > { %p10_p5 = scmp.ge.s32.totalorder %s13_s14, 5   ;;  %s3007_s13 = smov %s3009_s15 }
 0x184   :  { %12 = sbr.rel (!%p10_p5) target bundleno = 2 (0x2), region = 68 }

// kernel: ez_detect_forward.120
= control target key start
LH: loop header
LB: loop body
LE: loop exit
PB: predicated region body
PF: predicated region fallthrough
CT: control target
= control target key end

     0   :  { %s1657_s12 = smov 0   ;;  %s1659_s13 = smov 0   ;;  %s1932_s0 = inlined_call_operand.vmem [shape: bf16[72,1152], index: 0, kind: input, shape index: {}]   ;;  %s1933_s1 = inlined_call_operand.vmem [shape: bf16[1152,128], index: 1, kind: input, shape index: {}]   ;;  %s1934_s2 = inlined_call_operand.vmem [shape: f32[1,128], index: 2, kind: input, shape index: {}]   ;;  %s1935_s3 = inlined_call_operand.vmem [shape: f32[72,128], index: 3, kind: output, shape index: {}]  }
   0x1   :  { %s1661_s14 = smov 0  }
   0x2 LB: > { %s25_s15 = sadd.s32 1, %s1631_s13  ;;  %p1256_p0 = scmp.ge.s32.totalorder %s1635_s14, 1  ;;  %s1635_s14 = sphi %s1661_s14, %s13_s14   ;;  %s1631_s13 = sphi %s1659_s13, %s1937_s13   ;;  %s1627_s12 = sphi %s1657_s12, %s1936_s12  }
   0x3   : > { %p27_p1 = scmp.ge.s32.totalorder %s25_s15, 3  ;;  %p170_p2 = scmp.lt.s32.totalorder %s1635_s14, 4 }
   0x5   : > { %s1939_s15 = smov (%p27_p1, %s25_s15), 0  ;;  %p171_p3 = pnand %p1256_p0, %p170_p2 }
   0x6   : > { %v1519_v0 = vld [vmem:[%s1933_s1 + $0x40] sm:$0xff] (!%p171_p3)   ;;  %v1523_v4 = vld [vmem:[%s1933_s1 + $0x48] sm:$0xff] (!%p171_p3)   ;;  %v1527_v8 = vld [vmem:[%s1933_s1 + $0x50] sm:$0xff] (!%p171_p3)   ;;  %s205_s19 = smul.u32 (!%p171_p3), 3, %s1627_s12 }
   0x7   : > { %174 = sbr.rel (%p171_p3) target bundleno = 321 (0x141), region = 32  ;;  %v1520_v1 = vld [vmem:[%s1933_s1] sm:$0xff] (!%p171_p3)   ;;  %1352 = vmatprep.subr.bf16.mxu0 (!%p171_p3), %v1519_v0  ;;  %v1524_v5 = vld [vmem:[%s1933_s1 + $0x8] sm:$0xff] (!%p171_p3)   ;;  %v1528_v9 = vld [vmem:[%s1933_s1 + $0x10] sm:$0xff] (!%p171_p3)  }
   0x8   : > { %v1521_v2 = vld [vmem:[%s1933_s1 + $0xc0] sm:$0xff] (!%p171_p3)   ;;  %1353 = vmatpush3.bf16.msra.mxu0 (!%p171_p3), %v1520_v1  ;;  %v1525_v6 = vld [vmem:[%s1933_s1 + $0xc8] sm:$0xff] (!%p171_p3)   ;;  %v1529_v10 = vld [vmem:[%s1933_s1 + $0xd0] sm:$0xff] (!%p171_p3)   ;;  %p206_p4 = scmp.lt.s32.totalorder (!%p171_p3), %s205_s19, 8 }
   0x9   : > { %v1522_v3 = vld [vmem:[%s1933_s1 + $0x80] sm:$0xff] (!%p171_p3)   ;;  %1380 = vmatprep.subr.bf16.mxu1 (!%p171_p3), %v1521_v2  ;;  %1354 = vmatprep.subr.bf16.mxu0 (!%p171_p3), %v1523_v4  ;;  %v1526_v7 = vld [vmem:[%s1933_s1 + $0x88] sm:$0xff] (!%p171_p3)   ;;  %v1530_v11 = vld [vmem:[%s1933_s1 + $0x90] sm:$0xff] (!%p171_p3)  }
   0xa   : > { %1381 = vmatpush3.bf16.msra.mxu1 (!%p171_p3), %v1522_v3  ;;  %v1531_v12 = vld [vmem:[%s1933_s1 + $0x58] sm:$0xff] (!%p171_p3)   ;;  %v1535_v16 = vld [vmem:[%s1933_s1 + $0x60] sm:$0xff] (!%p171_p3)   ;;  %v1539_v20 = vld [vmem:[%s1933_s1 + $0x68] sm:$0xff] (!%p171_p3)  }
   0xb   : > { %1382 = vmatprep.subr.bf16.mxu1 (!%p171_p3), %v1525_v6  ;;  %v1532_v13 = vld [vmem:[%s1933_s1 + $0x18] sm:$0xff] (!%p171_p3)   ;;  %v1536_v17 = vld [vmem:[%s1933_s1 + $0x20] sm:$0xff] (!%p171_p3)   ;;  %v1540_v21 = vld [vmem:[%s1933_s1 + $0x28] sm:$0xff] (!%p171_p3)  }
   0xc   : > { %1355 = vmatpush3.bf16.msra.mxu0 (!%p171_p3), %v1524_v5  ;;  %v1533_v14 = vld [vmem:[%s1933_s1 + $0xd8] sm:$0xff] (!%p171_p3)   ;;  %v1537_v18 = vld [vmem:[%s1933_s1 + $0xe0] sm:$0xff] (!%p171_p3)   ;;  %v1541_v22 = vld [vmem:[%s1933_s1 + $0xe8] sm:$0xff] (!%p171_p3)  }
   0xd   : > { %1356 = vmatprep.subr.bf16.mxu0 (!%p171_p3), %v1527_v8  ;;  %v1534_v15 = vld [vmem:[%s1933_s1 + $0x98] sm:$0xff] (!%p171_p3)   ;;  %v1538_v19 = vld [vmem:[%s1933_s1 + $0xa0] sm:$0xff] (!%p171_p3)   ;;  %v1542_v23 = vld [vmem:[%s1933_s1 + $0xa8] sm:$0xff] (!%p171_p3)  }
   0xe   : > { %1383 = vmatpush3.bf16.msra.mxu1 %v1526_v7  ;;  %s1941_s19 = smov (!%p206_p4, %s205_s19), 8  ;;  %v1543_v24 = vld [vmem:[%s1933_s1 + $0x70] sm:$0xff]   ;;  %v1547_v28 = vld [vmem:[%s1933_s1 + $0x78] sm:$0xff]   ;;  %v1554_v34 = vld [vmem:[%s1933_s1 + $0x140] sm:$0xff]  }
   0xf   : > { %1384 = vmatprep.subr.bf16.mxu1 %v1529_v10  ;;  %s1494_s21 = smul.u32 36, %s1941_s19  ;;  %v1544_v25 = vld [vmem:[%s1933_s1 + $0x30] sm:$0xff]   ;;  %v1548_v29 = vld [vmem:[%s1933_s1 + $0x38] sm:$0xff]   ;;  %v1558_v37 = vld [vmem:[%s1933_s1 + $0x100] sm:$0xff]  }
  0x10   : > { %1357 = vmatpush3.bf16.msra.mxu0 %v1528_v9  ;;  %v1545_v26 = vld [vmem:[%s1933_s1 + $0xf0] sm:$0xff]   ;;  %v1549_v30 = vld [vmem:[%s1933_s1 + $0xf8] sm:$0xff]   ;;  %v1559_v38 = vld [vmem:[%s1933_s1 + $0x1c0] sm:$0xff]  }
  0x11   : > { %1358 = vmatprep.subr.bf16.mxu0 %v1531_v12  ;;  %v1546_v27 = vld [vmem:[%s1933_s1 + $0xb0] sm:$0xff]   ;;  %s1771_s4 = scalar_lea.vmem %s1932_s0, %s1494_s21  ;;  %v1553_v33 = vld [vmem:[%s1933_s1 + $0xb8] sm:$0xff]   ;;  %v1560_v39 = vld [vmem:[%s1933_s1 + $0x180] sm:$0xff]  }
  0x12   : > { %1385 = vmatpush3.bf16.msra.mxu1 %v1530_v11  ;;  %v1550_v31 = vld [vmem:[%s1771_s4] ss:$36 sps:$4 sm:$0xff]   ;;  %v1555_v35 = vld [vmem:[%s1771_s4 + $0x8] ss:$36 sps:$4 sm:$0xff]   ;;  %v1565_v44 = vld [vmem:[%s1933_s1 + $0x150] sm:$0xff]  }
  0x13   : > { %1386 = vmatprep.subr.bf16.mxu1 %v1533_v14  ;;  %v1552_v32 = vld [vmem:[%s1771_s4 + $0x4] ss:$36 sps:$4 sm:$0xff]   ;;  %v1557_v36 = vld [vmem:[%s1771_s4 + $0xc] ss:$36 sps:$4 sm:$0xff]   ;;  %v1569_v48 = vld [vmem:[%s1933_s1 + $0x158] sm:$0xff]  }
  0x14   : > { %1359 = vmatpush3.bf16.msra.mxu0 %v1532_v13  ;;  %937 = vmatprep.mubr.bf16.mxu0 %v1552_v32  ;;  %v1561_v40 = vld [vmem:[%s1933_s1 + $0x148] sm:$0xff]   ;;  %v1566_v45 = vld [vmem:[%s1933_s1 + $0x110] sm:$0xff]   ;;  %v1570_v49 = vld [vmem:[%s1933_s1 + $0x118] sm:$0xff]  }
  0x15   : > { %1360 = vmatprep.subr.bf16.mxu0 %v1535_v16  ;;  %985 = vmatprep.mubr.bf16.mxu1 %v1557_v36  ;;  %v1562_v41 = vld [vmem:[%s1933_s1 + $0x108] sm:$0xff]   ;;  %v1567_v46 = vld [vmem:[%s1933_s1 + $0x1d0] sm:$0xff]   ;;  %v1571_v50 = vld [vmem:[%s1933_s1 + $0x1d8] sm:$0xff]  }
  0x16   : > { %1387 = vmatpush3.bf16.msra.mxu1 %v1534_v15  ;;  %v1563_v42 = vld [vmem:[%s1933_s1 + $0x1c8] sm:$0xff]   ;;  %v1568_v47 = vld [vmem:[%s1933_s1 + $0x190] sm:$0xff]   ;;  %v1572_v51 = vld [vmem:[%s1933_s1 + $0x198] sm:$0xff]  }
  0x17   : > { %1388 = vmatprep.subr.bf16.mxu1 %v1537_v18  ;;  %v1564_v43 = vld [vmem:[%s1933_s1 + $0x188] sm:$0xff]   ;;  %v1573_v52 = vld [vmem:[%s1933_s1 + $0x160] sm:$0xff]   ;;  %v1583_v63 = vld [vmem:[%s1933_s1 + $0x170] sm:$0xff]  }
  0x18   : > { %1361 = vmatpush3.bf16.msra.mxu0 %v1536_v17  ;;  %v1574_v53 = vld [vmem:[%s1933_s1 + $0x120] sm:$0xff]   ;;  %v1577_v56 = vld [vmem:[%s1933_s1 + $0x168] sm:$0xff]   ;;  %v240_v0 = vld [vmem:[%s1771_s4 + $0x50] sm:$0xff] }
  0x19   : > { %1362 = vmatprep.subr.bf16.mxu0 %v1539_v20  ;;  %v1575_v54 = vld [vmem:[%s1933_s1 + $0x1e0] sm:$0xff]   ;;  %v239_v57 = vld [vmem:[%s1771_s4 + $0x48] sm:$0xff]  ;;  %v1272_v1 = vcombine.high %v240_v0, %v240_v0  ;;  %v1585_v2 = vld [vmem:[%s1933_s1 + $0x130] sm:$0xff]   ;;  %v1271_v3 = vcombine.low %v240_v0, %v240_v0 }
  0x1a   : > { %1389 = vmatpush3.bf16.msra.mxu1 %v1538_v19  ;;  %v1576_v55 = vld [vmem:[%s1933_s1 + $0x1a0] sm:$0xff]   ;;  %v1270_v58 = vcombine.high %v239_v57, %v239_v57  ;;  %v1579_v59 = vld [vmem:[%s1933_s1 + $0x128] sm:$0xff]   ;;  %v1269_v60 = vcombine.low %v239_v57, %v239_v57  ;;  %v1587_v4 = vld [vmem:[%s1933_s1 + $0x1f0] sm:$0xff]  }
  0x1b   : > { %1390 = vmatprep.subr.bf16.mxu1 %v1541_v22  ;;  %v1581_v61 = vld [vmem:[%s1933_s1 + $0x1e8] sm:$0xff]   ;;  %v1588_v5 = vld [vmem:[%s1933_s1 + $0x1b0] sm:$0xff]   ;;  %v1589_v6 = vld [vmem:[%s1933_s1 + $0x178] sm:$0xff]  }
  0x1c   : > { %1363 = vmatpush3.bf16.msra.mxu0 %v1540_v21  ;;  %v1582_v62 = vld [vmem:[%s1933_s1 + $0x1a8] sm:$0xff]   ;;  %v1590_v7 = vld [vmem:[%s1933_s1 + $0x138] sm:$0xff]   ;;  %v1592_v9 = vld [vmem:[%s1771_s4 + $0x10] ss:$36 sps:$4 sm:$0xff]  }
  0x1d   : > { %1364 = vmatprep.subr.bf16.mxu0 %v1543_v24  ;;  %v1591_v8 = vld [vmem:[%s1933_s1 + $0x1f8] sm:$0xff]   ;;  %v1596_v12 = vld [vmem:[%s1933_s1 + $0x200] sm:$0xff]   ;;  %v1600_v15 = vld [vmem:[%s1933_s1 + $0x208] sm:$0xff]  }
  0x1e   : > { %1391 = vmatpush3.bf16.msra.mxu1 %v1542_v23  ;;  %v1594_v10 = vld [vmem:[%s1771_s4 + $0x14] ss:$36 sps:$4 sm:$0xff]   ;;  %v1599_v14 = vld [vmem:[%s1771_s4 + $0x1c] ss:$36 sps:$4 sm:$0xff]  }
  0x1f   : > { %1392 = vmatprep.subr.bf16.mxu1 %v1545_v26  ;;  %v1595_v11 = vld [vmem:[%s1933_s1 + $0x1b8] sm:$0xff]   ;;  %v1603_v18 = vld [vmem:[%s1933_s1 + $0x210] sm:$0xff]   ;;  %v242_v19 = vld [vmem:[%s1771_s4 + $0x60] sm:$0xff] }
  0x20   : > { %1365 = vmatpush3.bf16.msra.mxu0 %v1544_v25  ;;  %v1597_v13 = vld [vmem:[%s1771_s4 + $0x18] ss:$36 sps:$4 sm:$0xff]   ;;  %v1276_v21 = vcombine.high %v242_v19, %v242_v19  ;;  %v1275_v22 = vcombine.low %v242_v19, %v242_v19  ;;  %v1611_v24 = vld [vmem:[%s1771_s4 + $0x20] ss:$36 sps:$4 sm:$0xff]   ;;  %v1608_v26 = vld [vmem:[%s1933_s1 + $0x228] sm:$0xff]  }
  0x21   : > { %1366 = vmatprep.subr.bf16.mxu0 %v1547_v28  ;;  %v241_v16 = vld [vmem:[%s1771_s4 + $0x58] sm:$0xff]  ;;  %v1607_v25 = vld [vmem:[%s1933_s1 + $0x220] sm:$0xff]  }
  0x22   : > { %1393 = vmatpush3.bf16.msra.mxu1 %v1546_v27  ;;  %v1274_v17 = vcombine.high %v241_v16, %v241_v16  ;;  %v1273_v20 = vcombine.low %v241_v16, %v241_v16  ;;  %v1606_v23 = vld [vmem:[%s1933_s1 + $0x218] sm:$0xff]   ;;  %v1609_v27 = vld [vmem:[%s1933_s1 + $0x230] sm:$0xff]  }
  0x23   : > { %1394 = vmatprep.subr.bf16.mxu1 %v1549_v30  ;;  %v1610_v28 = vld [vmem:[%s1933_s1 + $0x238] sm:$0xff]  }
  0x24   : > { %1367 = vmatpush3.bf16.msra.mxu0 %v1548_v29  ;;  %v1612_v29 = vld [vmem:[%s1771_s4 + $0x68] ss:$0 sps:$4 sm:$0xff]   ;;  %s1258_s4 = sshll.u32 %s1941_s19, 3 }
  0x25   : > { %1408 = vmatprep.subr.bf16.mxu0 %v1554_v34  ;;  %s226_s7 = scalar_lea.vmem %s1935_s3, %s1258_s4 }
  0x26   : > { %1395 = vmatpush3.bf16.msra.mxu1 %v1553_v33 }
  0x27   : > { %938 = vmatmul.mubr.bf16.vlgmr.msra.gmra.mrb[0].mxu0 %v1550_v31  ;;  %1436 = vmatprep.subr.bf16.mxu1 %v1559_v38  ;;  %v1259_v31 = vld [vmem:[%s1934_s2] ss:$0 sm:$0xff] }
  0x28   : > { %1409 = vmatpush3.bf16.msra.mxu0 %v1558_v37  ;;  %945 = vmatprep.mubr.bf16.mxu0 %v1270_v58 }
  0x29   : > { %986 = vmatmul.mubr.bf16.vlgmr.msra.gmra.mrb[0].mxu1 %v1555_v35  ;;  %1410 = vmatprep.subr.bf16.mxu0 %v1561_v40 }
  0x2a   : > { %1437 = vmatpush3.bf16.msra.mxu1 %v1560_v39  ;;  %993 = vmatprep.mubr.bf16.mxu1 %v1272_v1 }
  0x2b   : > { %1438 = vmatprep.subr.bf16.mxu1 %v1563_v42 }
  0x2c   : > { %1411 = vmatpush3.bf16.msra.mxu0 %v1562_v41 }
  0x2d   : > { %1412 = vmatprep.subr.bf16.mxu0 %v1565_v44 }
  0x2e   : > { %1439 = vmatpush3.bf16.msra.mxu1 %v1564_v43 }
  0x2f   : > { %1440 = vmatprep.subr.bf16.mxu1 %v1567_v46  ;;  %946 = vmatmul.mubr.bf16.gmra.mrb[4].mxu0 %v1269_v60 }
  0x30   : > { %1413 = vmatpush3.bf16.msra.mxu0 %v1566_v45  ;;  %1033 = vmatprep.mubr.bf16.mxu0 %v1594_v10 }
  0x31   : > { %1414 = vmatprep.subr.bf16.mxu0 %v1569_v48  ;;  %994 = vmatmul.mubr.bf16.gmra.mrb[4].mxu1 %v1271_v3 }
  0x32   : > { %1441 = vmatpush3.bf16.msra.mxu1 %v1568_v47  ;;  %1081 = vmatprep.mubr.bf16.mxu1 %v1599_v14 }
  0x33   : > { %1442 = vmatprep.subr.bf16.mxu1 %v1571_v50 }
  0x34   : > { %1415 = vmatpush3.bf16.msra.mxu0 %v1570_v49 }
  0x35   : > { %1416 = vmatprep.subr.bf16.mxu0 %v1573_v52 }
  0x36   : > { %1443 = vmatpush3.bf16.msra.mxu1 %v1572_v51 }
  0x37   : > { %1444 = vmatprep.subr.bf16.mxu1 %v1575_v54 }
  0x38   : > { %1417 = vmatpush3.bf16.msra.mxu0 %v1574_v53 }
  0x39   : > { %1418 = vmatprep.subr.bf16.mxu0 %v1577_v56 }
  0x3a   : > { %1445 = vmatpush3.bf16.msra.mxu1 %v1576_v55 }
  0x3b   : > { %1446 = vmatprep.subr.bf16.mxu1 %v1581_v61 }
  0x3c   : > { %1419 = vmatpush3.bf16.msra.mxu0 %v1579_v59 }
  0x3d   : > { %1420 = vmatprep.subr.bf16.mxu0 %v1583_v63 }
  0x3e   : > { %1447 = vmatpush3.bf16.msra.mxu1 %v1582_v62 }
  0x3f   : > { %1448 = vmatprep.subr.bf16.mxu1 %v1587_v4 }
  0x40   : > { %1421 = vmatpush3.bf16.msra.mxu0 %v1585_v2 }
  0x41   : > { %1422 = vmatprep.subr.bf16.mxu0 %v1589_v6 }
  0x42   : > { %1449 = vmatpush3.bf16.msra.mxu1 %v1588_v5 }
  0x43   : > { %1450 = vmatprep.subr.bf16.mxu1 %v1591_v8 }
  0x44   : > { %1423 = vmatpush3.bf16.msra.mxu0 %v1590_v7 }
  0x45   : > { %1474 = vmatprep.subr.bf16.mxu0 %v1596_v12 }
  0x46   : > { %1451 = vmatpush3.bf16.msra.mxu1 %v1595_v11 }
  0x47   : > { %1034 = vmatmul.mubr.bf16.vlgmr.msra.gmra.mrb[8].mxu0 %v1592_v9 }
  0x48   : > { %1475 = vmatpush3.bf16.msra.mxu0 %v1596_v12  ;;  %1041 = vmatprep.mubr.bf16.mxu0 %v1274_v17 }
  0x49   : > { %1082 = vmatmul.mubr.bf16.vlgmr.msra.gmra.mrb[8].mxu1 %v1597_v13  ;;  %1476 = vmatprep.subr.bf16.mxu0 %v1600_v15 }
  0x4a   : > { %1089 = vmatprep.mubr.bf16.mxu1 %v1276_v21 }
  0x4c   : > { %1477 = vmatpush3.bf16.msra.mxu0 %v1600_v15 }
  0x4d   : > { %1478 = vmatprep.subr.bf16.mxu0 %v1603_v18 }
  0x4f   : > { %1042 = vmatmul.mubr.bf16.gmra.mrb[12].mxu0 %v1273_v20 }
  0x50   : > { %1479 = vmatpush3.bf16.msra.mxu0 %v1603_v18  ;;  %1490 = vmatprep.mubr.bf16.mxu0 %v1611_v24 }
  0x51   : > { %1090 = vmatmul.mubr.bf16.gmra.mrb[12].mxu1 %v1275_v22  ;;  %1480 = vmatprep.subr.bf16.mxu0 %v1606_v23 }
  0x54   : > { %1481 = vmatpush3.bf16.msra.mxu0 %v1606_v23 }
  0x55   : > { %1482 = vmatprep.subr.bf16.mxu0 %v1607_v25 }
  0x58   : > { %1483 = vmatpush3.bf16.msra.mxu0 %v1607_v25 }
  0x59   : > { %1484 = vmatprep.subr.bf16.mxu0 %v1608_v26 }
  0x5c   : > { %1485 = vmatpush3.bf16.msra.mxu0 %v1608_v26 }
  0x5d   : > { %1486 = vmatprep.subr.bf16.mxu0 %v1609_v27 }
  0x60   : > { %1487 = vmatpush3.bf16.msra.mxu0 %v1609_v27 }
  0x61   : > { %1488 = vmatprep.subr.bf16.mxu0 %v1610_v28 }
  0x64   : > { %1489 = vmatpush3.bf16.msra.mxu0 %v1610_v28 }
  0x67   : > { %1491 = vmatmul.mubr.bf16.vlgmr.msra.gmra.mrb[16].mxu0 %v1612_v29 }
  0xfa   : > { %v1368_v30 = vpop.f32.mrb[0].mxu0 }
  0xfb   : > { %v1369_v32 = vpop.f32.mrb[1].mxu0 }
  0xfc   : > { %v1370_v33 = vadd.f32 %v1369_v32, %v1368_v30  ;;  %v1371_v34 = vpop.f32.mrb[2].mxu0  ;;  %v1396_v35 = vpop.f32.mrb[0].mxu1 }
  0xfd   : > { %v1372_v36 = vpop.f32.mrb[3].mxu0  ;;  %v1397_v39 = vpop.f32.mrb[1].mxu1 }
  0xfe   : > { %v940_v37 = vadd.f32 %v1370_v33, %v1259_v31  ;;  %v1373_v38 = vadd.f32 %v1372_v36, %v1371_v34  ;;  %v1398_v40 = vadd.f32 %v1397_v39, %v1396_v35  ;;  %v1399_v41 = vpop.f32.mrb[2].mxu1 }
  0xff   : > { %v1400_v43 = vpop.f32.mrb[3].mxu1 }
 0x100   : > { %v943_v42 = vadd.f32 %v1373_v38, %v1259_v31  ;;  %v988_v44 = vadd.f32 %v1398_v40, %v940_v37  ;;  %v1401_v45 = vadd.f32 %v1400_v43, %v1399_v41 }
 0x102   : > { %v991_v46 = vadd.f32 %v1401_v45, %v943_v42  ;;  %v1374_v47 = vpop.f32.mrb[4].mxu0 }
 0x103   : > { %v1375_v48 = vpop.f32.mrb[5].mxu0 }
 0x104   : > { %v1376_v49 = vadd.f32 %v1375_v48, %v1374_v47  ;;  %v1377_v50 = vpop.f32.mrb[6].mxu0  ;;  %v1402_v53 = vpop.f32.mrb[4].mxu1 }
 0x105   : > { %v1378_v51 = vpop.f32.mrb[7].mxu0  ;;  %v1403_v54 = vpop.f32.mrb[5].mxu1 }
 0x106   : > { %v948_v52 = vadd.f32 %v1376_v49, %v1259_v31  ;;  %v1404_v55 = vadd.f32 %v1403_v54, %v1402_v53  ;;  %v1405_v56 = vpop.f32.mrb[6].mxu1 }
 0x107   : > { %v1406_v57 = vpop.f32.mrb[7].mxu1 }
 0x108   : > { %v996_v58 = vadd.f32 %v1404_v55, %v948_v52 }
 0x11a   : > { %v1424_v59 = vpop.f32.mrb[8].mxu0 }
 0x11b   : > { %v1425_v60 = vpop.f32.mrb[9].mxu0 }
 0x11c   : > { %v1426_v61 = vadd.f32 %v1425_v60, %v1424_v59  ;;  %v1427_v62 = vpop.f32.mrb[10].mxu0  ;;  %v1452_v63 = vpop.f32.mrb[8].mxu1 }
 0x11d   : > { %v1428_v0 = vpop.f32.mrb[11].mxu0  ;;  %v1453_v3 = vpop.f32.mrb[9].mxu1 }
 0x11e   : > { %v1036_v1 = vadd.f32 %v1426_v61, %v988_v44  ;;  %v1429_v2 = vadd.f32 %v1428_v0, %v1427_v62  ;;  %v1454_v4 = vadd.f32 %v1453_v3, %v1452_v63  ;;  %v1455_v5 = vpop.f32.mrb[10].mxu1 }
 0x11f   : > { %v1456_v7 = vpop.f32.mrb[11].mxu1 }
 0x120   : > { %v1039_v6 = vadd.f32 %v1429_v2, %v991_v46  ;;  %v1457_v8 = vadd.f32 %v1456_v7, %v1455_v5  ;;  %v1084_v9 = vadd.f32 %v1454_v4, %v1036_v1 }
 0x122   : > { %v1430_v10 = vpop.f32.mrb[12].mxu0  ;;  %v1087_v12 = vadd.f32 %v1457_v8, %v1039_v6 }
 0x123   : > { %v1431_v11 = vpop.f32.mrb[13].mxu0 }
 0x124   : > { %v1432_v13 = vadd.f32 %v1431_v11, %v1430_v10  ;;  %v1433_v14 = vpop.f32.mrb[14].mxu0  ;;  %v1458_v15 = vpop.f32.mrb[12].mxu1 }
 0x125   : > { %v1434_v16 = vpop.f32.mrb[15].mxu0  ;;  %v1459_v18 = vpop.f32.mrb[13].mxu1 }
 0x126   : > { %v1044_v17 = vadd.f32 %v1432_v13, %v996_v58  ;;  %v1460_v19 = vadd.f32 %v1459_v18, %v1458_v15  ;;  %v1461_v20 = vpop.f32.mrb[14].mxu1 }
 0x127   : > { %v1462_v21 = vpop.f32.mrb[15].mxu1 }
 0x128   : > { %v1092_v22 = vadd.f32 %v1460_v19, %v1044_v17 }
 0x13a   : > { %v1492_v23 = vpop.f32.mrb[16].mxu0 }
 0x13b   : > { %v1140_v24 = vadd.f32 %v1492_v23, %v1092_v22  ;;  %v1131_v25 = vpop.f32.mrb[17].mxu0 }
 0x13c   : > { %v1132_v26 = vadd.f32 %v1131_v25, %v1084_v9  ;;  %v1493_v27 = vpop.f32.mrb[18].mxu0 }
 0x13d   : > { %1147 = vst [vmem:[%s226_s7 + $0x10] sm:$0xff] %v1140_v24  ;;  %v1134_v28 = vpop.f32.mrb[19].mxu0 }
 0x13e   : > { %1145 = vst [vmem:[%s226_s7] sm:$0xff] %v1132_v26  ;;  %v1135_v29 = vadd.f32 %v1134_v28, %v1087_v12 }
 0x140   : > { %1146 = vst [vmem:[%s226_s7 + $0x8] sm:$0xff] %v1135_v29 }
 0x141 PF: > { %s13_s14 = sadd.s32 1, %s1635_s14   ;;  %s1936_s12 = smov %s1631_s13 }
 0x142   : > { %p10_p5 = scmp.ge.s32.totalorder %s13_s14, 5   ;;  %s1937_s13 = smov %s1939_s15 }
 0x144   :  { %12 = sbr.rel (!%p10_p5) target bundleno = 2 (0x2), region = 68 }

// kernel: ez_detect_forward.119
= control target key start
LH: loop header
LB: loop body
LE: loop exit
PB: predicated region body
PF: predicated region fallthrough
CT: control target
= control target key end

     0   :  { %s1753_s12 = smov 0   ;;  %s1755_s13 = smov 0   ;;  %s2061_s0 = inlined_call_operand.vmem [shape: bf16[288,576], index: 0, kind: input, shape index: {}]   ;;  %s2062_s1 = inlined_call_operand.vmem [shape: bf16[576,128], index: 1, kind: input, shape index: {}]   ;;  %s2063_s2 = inlined_call_operand.vmem [shape: f32[1,128], index: 2, kind: input, shape index: {}]   ;;  %s2064_s3 = inlined_call_operand.vmem [shape: f32[288,128], index: 3, kind: output, shape index: {}]  }
   0x1   :  { %s1757_s14 = smov 0  }
   0x2 LB: > { %s25_s15 = sadd.s32 1, %s1725_s13  ;;  %p1272_p0 = scmp.ge.s32.totalorder %s1729_s14, 1  ;;  %s1729_s14 = sphi %s1757_s14, %s13_s14   ;;  %s1725_s13 = sphi %s1755_s13, %s2066_s13   ;;  %s1721_s12 = sphi %s1753_s12, %s2065_s12  }
   0x3   : > { %p27_p1 = scmp.ge.s32.totalorder %s25_s15, 2  ;;  %p170_p2 = scmp.lt.s32.totalorder %s1729_s14, 3 }
   0x5   : > { %s2068_s15 = smov (%p27_p1, %s25_s15), 0  ;;  %p171_p3 = pnand %p1272_p0, %p170_p2 }
   0x6   : > { %v1608_v0 = vld [vmem:[%s2062_s1 + $0x40] sm:$0xff] (!%p171_p3)   ;;  %s205_s18 = smul.u32 (!%p171_p3), 18, %s1721_s12  ;;  %v1610_v2 = vld [vmem:[%s2062_s1 + $0x48] sm:$0xff] (!%p171_p3)   ;;  %v1612_v4 = vld [vmem:[%s2062_s1 + $0x50] sm:$0xff] (!%p171_p3)   ;;  %v1731_v24 = vmov (!%p171_p3), 0.0   ;;  %vm1732_vm0 = vmmov (!%p171_p3), 0  }
   0x7   : > { %174 = sbr.rel (%p171_p3) target bundleno = 360 (0x168), region = 32  ;;  %v1609_v1 = vld [vmem:[%s2062_s1] sm:$0xff] (!%p171_p3)   ;;  %1368 = vmatprep.subr.bf16.mxu0 (!%p171_p3), %v1608_v0  ;;  %1565 = vmatprep.subr.bf16.mxu1 (!%p171_p3), %v1608_v0  ;;  %v1611_v3 = vld [vmem:[%s2062_s1 + $0x8] sm:$0xff] (!%p171_p3)   ;;  %v1613_v5 = vld [vmem:[%s2062_s1 + $0x10] sm:$0xff] (!%p171_p3)   ;;  %vm803_vm1 = vcmask (!%p171_p3), 523264  }
   0x8   : > { %p206_p4 = scmp.lt.s32.totalorder (!%p171_p3), %s205_s18, 35  ;;  %1369 = vmatpush3.bf16.msra.mxu0 (!%p171_p3), %v1609_v1  ;;  %1573 = vmatpush3.bf16.msra.mxu1 (!%p171_p3), %v1609_v1  ;;  %v1614_v6 = vld [vmem:[%s2062_s1 + $0x58] sm:$0xff] (!%p171_p3)   ;;  %v1616_v8 = vld [vmem:[%s2062_s1 + $0x60] sm:$0xff] (!%p171_p3)   ;;  %v1618_v10 = vld [vmem:[%s2062_s1 + $0x68] sm:$0xff] (!%p171_p3)  }
   0x9   : > { %1370 = vmatprep.subr.bf16.mxu0 (!%p171_p3), %v1610_v2  ;;  %1566 = vmatprep.subr.bf16.mxu1 (!%p171_p3), %v1610_v2  ;;  %v1615_v7 = vld [vmem:[%s2062_s1 + $0x18] sm:$0xff] (!%p171_p3)   ;;  %v1617_v9 = vld [vmem:[%s2062_s1 + $0x20] sm:$0xff] (!%p171_p3)   ;;  %v1619_v13 = vld [vmem:[%s2062_s1 + $0x28] sm:$0xff] (!%p171_p3)  }
   0xa   : > { %v1620_v14 = vld [vmem:[%s2062_s1 + $0x70] sm:$0xff] (!%p171_p3)   ;;  %v1622_v16 = vld [vmem:[%s2062_s1 + $0x78] sm:$0xff] (!%p171_p3)   ;;  %v1630_v20 = vld [vmem:[%s2062_s1 + $0xc0] sm:$0xff] (!%p171_p3)  }
   0xb   : > { %v1621_v15 = vld [vmem:[%s2062_s1 + $0x30] sm:$0xff] (!%p171_p3)   ;;  %v1623_v17 = vld [vmem:[%s2062_s1 + $0x38] sm:$0xff] (!%p171_p3)   ;;  %v1631_v21 = vld [vmem:[%s2062_s1 + $0x80] sm:$0xff] (!%p171_p3)  }
   0xc   : > { %1371 = vmatpush3.bf16.msra.mxu0 (!%p171_p3), %v1611_v3  ;;  %1574 = vmatpush3.bf16.msra.mxu1 (!%p171_p3), %v1611_v3  ;;  %v1632_v22 = vld [vmem:[%s2062_s1 + $0x100] sm:$0xff] (!%p171_p3)   ;;  %v1633_v23 = vld [vmem:[%s2062_s1 + $0xc8] sm:$0xff] (!%p171_p3)   ;;  %v1641_v31 = vld [vmem:[%s2062_s1 + $0xd0] sm:$0xff] (!%p171_p3)  }
   0xd   : > { %1372 = vmatprep.subr.bf16.mxu0 (!%p171_p3), %v1612_v4  ;;  %1567 = vmatprep.subr.bf16.mxu1 (!%p171_p3), %v1612_v4  ;;  %v1634_v27 = vld [vmem:[%s2062_s1 + $0x88] sm:$0xff] (!%p171_p3)   ;;  %v1642_v32 = vld [vmem:[%s2062_s1 + $0x90] sm:$0xff] (!%p171_p3)   ;;  %v1644_v33 = vld [vmem:[%s2062_s1 + $0xd8] sm:$0xff] (!%p171_p3)  }
   0xe   : > { %s2070_s18 = smov (!%p206_p4, %s205_s18), 35  ;;  %v1643_v28 = vld [vmem:[%s2062_s1 + $0x108] sm:$0xff]   ;;  %v1656_v36 = vld [vmem:[%s2062_s1 + $0x110] sm:$0xff]   ;;  %v1645_v37 = vld [vmem:[%s2062_s1 + $0x98] sm:$0xff]  }
   0xf   : > { %s1581_s4 = smul.u32 20, %s2070_s18  ;;  %v1652_v39 = vld [vmem:[%s2062_s1 + $0xe0] sm:$0xff]   ;;  %v1654_v42 = vld [vmem:[%s2062_s1 + $0xe8] sm:$0xff]   ;;  %v1672_v45 = vld [vmem:[%s2062_s1 + $0x118] sm:$0xff]   ;;  %s1274_s27 = sshll.u32 %s2070_s18, 3 }
  0x10   : > { %1373 = vmatpush3.bf16.msra.mxu0 %v1613_v5  ;;  %1575 = vmatpush3.bf16.msra.mxu1 %v1613_v5  ;;  %v1653_v41 = vld [vmem:[%s2062_s1 + $0xa0] sm:$0xff]   ;;  %v1655_v46 = vld [vmem:[%s2062_s1 + $0xa8] sm:$0xff]   ;;  %v1663_v49 = vld [vmem:[%s2062_s1 + $0xf0] sm:$0xff]   ;;  %s2004_s30 = scalar_lea.vmem %s2064_s3, %s1274_s27 }
  0x11   : > { %1374 = vmatprep.subr.bf16.mxu0 %v1614_v6  ;;  %1568 = vmatprep.subr.bf16.mxu1 %v1614_v6  ;;  %s1804_s11 = scalar_lea.vmem %s2061_s0, %s1581_s4  ;;  %v1664_v50 = vld [vmem:[%s2062_s1 + $0xb0] sm:$0xff]   ;;  %v1665_v51 = vld [vmem:[%s2062_s1 + $0xf8] sm:$0xff]  }
  0x12   : > { %v1626_v11 = vld [vmem:[%s1804_s11 + $0x4] ss:$20 sps:$4 sm:$0xff]   ;;  %v1629_v12 = vld [vmem:[%s1804_s11 + $0xcc] ss:$20 sps:$4 sm:$0xff]   ;;  %v1627_v19 = vld [vmem:[%s1804_s11 + $0xc8] ss:$20 sps:$4 sm:$0xff]  }
  0x13   : > { %863 = vmatprep.mubr.bf16.mxu0 %v1626_v11  ;;  %903 = vmatprep.mubr.bf16.mxu1 %v1629_v12  ;;  %v1624_v18 = vld [vmem:[%s1804_s11] ss:$20 sps:$4 sm:$0xff]   ;;  %v1639_v29 = vld [vmem:[%s1804_s11 + $0x28] ss:$20 sps:$4 sm:$0xff]   ;;  %v1640_v30 = vld [vmem:[%s1804_s11 + $0xf0] ss:$20 sps:$4 sm:$0xff]  }
  0x14   : > { %1375 = vmatpush3.bf16.msra.mxu0 %v1615_v7  ;;  %1576 = vmatpush3.bf16.msra.mxu1 %v1615_v7  ;;  %v1635_v25 = vld [vmem:[%s1804_s11 + $0x2c] ss:$20 sps:$4 sm:$0xff]   ;;  %v1637_v26 = vld [vmem:[%s1804_s11 + $0xf4] ss:$20 sps:$4 sm:$0xff]   ;;  %v1648_v35 = vld [vmem:[%s1804_s11 + $0x11c] ss:$20 sps:$4 sm:$0xff]  }
  0x15   : > { %1376 = vmatprep.subr.bf16.mxu0 %v1616_v8  ;;  %1569 = vmatprep.subr.bf16.mxu1 %v1616_v8  ;;  %v1646_v34 = vld [vmem:[%s1804_s11 + $0x54] ss:$20 sps:$4 sm:$0xff]   ;;  %v1650_v38 = vld [vmem:[%s1804_s11 + $0x50] ss:$20 sps:$4 sm:$0xff]   ;;  %v1651_v40 = vld [vmem:[%s1804_s11 + $0x118] ss:$20 sps:$4 sm:$0xff]  }
  0x16   : > { %v1657_v43 = vld [vmem:[%s1804_s11 + $0x7c] ss:$20 sps:$4 sm:$0xff]   ;;  %v1659_v44 = vld [vmem:[%s1804_s11 + $0x144] ss:$20 sps:$4 sm:$0xff]   ;;  %v1662_v48 = vld [vmem:[%s1804_s11 + $0x140] ss:$20 sps:$4 sm:$0xff]  }
  0x17   : > { %v1661_v47 = vld [vmem:[%s1804_s11 + $0x78] ss:$20 sps:$4 sm:$0xff]   ;;  %v1669_v55 = vld [vmem:[%s1804_s11 + $0x8] ss:$20 sps:$4 sm:$0xff]   ;;  %v1673_v56 = vld [vmem:[%s1804_s11 + $0xa0] ss:$20 sps:$4 sm:$0xff]  }
  0x18   : > { %1377 = vmatpush3.bf16.msra.mxu0 %v1617_v9  ;;  %1577 = vmatpush3.bf16.msra.mxu1 %v1617_v9  ;;  %v1667_v52 = vld [vmem:[%s1804_s11 + $0xa4] ss:$20 sps:$4 sm:$0xff]   ;;  %v1671_v53 = vld [vmem:[%s1804_s11 + $0xc] ss:$20 sps:$4 sm:$0xff]   ;;  %v1674_v57 = vld [vmem:[%s1804_s11 + $0x34] ss:$20 sps:$4 sm:$0xff]  }
  0x19   : > { %1378 = vmatprep.subr.bf16.mxu0 %v1618_v10  ;;  %1570 = vmatprep.subr.bf16.mxu1 %v1618_v10  ;;  %v1666_v54 = vld [vmem:[%s2062_s1 + $0xb8] sm:$0xff]   ;;  %v1676_v58 = vld [vmem:[%s1804_s11 + $0x30] ss:$20 sps:$4 sm:$0xff]   ;;  %v1684_v0 = vld [vmem:[%s1804_s11 + $0x80] ss:$20 sps:$4 sm:$0xff]  }
  0x1a   : > { %v1677_v59 = vld [vmem:[%s1804_s11 + $0x10] ss:$20 sps:$4 sm:$0xff]   ;;  %v1680_v61 = vld [vmem:[%s1804_s11 + $0x58] ss:$20 sps:$4 sm:$0xff]   ;;  %v1685_v1 = vld [vmem:[%s1804_s11 + $0x60] ss:$20 sps:$4 sm:$0xff]  }
  0x1b   : > { %v1678_v60 = vld [vmem:[%s1804_s11 + $0x5c] ss:$20 sps:$4 sm:$0xff]   ;;  %v1681_v62 = vld [vmem:[%s1804_s11 + $0x38] ss:$20 sps:$4 sm:$0xff]   ;;  %v1690_v5 = vld [vmem:[%s1804_s11 + $0xd4] ss:$20 sps:$4 sm:$0xff]  }
  0x1c   : > { %1379 = vmatpush3.bf16.msra.mxu0 %v1619_v13  ;;  %1578 = vmatpush3.bf16.msra.mxu1 %v1619_v13  ;;  %v1682_v63 = vld [vmem:[%s1804_s11 + $0x84] ss:$20 sps:$4 sm:$0xff]   ;;  %v1686_v2 = vld [vmem:[%s1804_s11 + $0xac] ss:$20 sps:$4 sm:$0xff]   ;;  %v1688_v3 = vld [vmem:[%s1804_s11 + $0xa8] ss:$20 sps:$4 sm:$0xff]  }
  0x1d   : > { %1380 = vmatprep.subr.bf16.mxu0 %v1620_v14  ;;  %1571 = vmatprep.subr.bf16.mxu1 %v1620_v14  ;;  %v1689_v4 = vld [vmem:[%s1804_s11 + $0x88] ss:$20 sps:$4 sm:$0xff]   ;;  %v1692_v6 = vld [vmem:[%s1804_s11 + $0xd0] ss:$20 sps:$4 sm:$0xff]   ;;  %v1696_v9 = vld [vmem:[%s1804_s11 + $0xf8] ss:$20 sps:$4 sm:$0xff]  }
  0x1e   : > { %v1693_v7 = vld [vmem:[%s1804_s11 + $0xb0] ss:$20 sps:$4 sm:$0xff]   ;;  %v1697_v10 = vld [vmem:[%s1804_s11 + $0xd8] ss:$20 sps:$4 sm:$0xff]   ;;  %v1700_v12 = vld [vmem:[%s1804_s11 + $0x120] ss:$20 sps:$4 sm:$0xff]  }
  0x1f   : > { %v1694_v8 = vld [vmem:[%s1804_s11 + $0xfc] ss:$20 sps:$4 sm:$0xff]   ;;  %v1698_v11 = vld [vmem:[%s1804_s11 + $0x124] ss:$20 sps:$4 sm:$0xff]   ;;  %v1701_v13 = vld [vmem:[%s1804_s11 + $0x100] ss:$20 sps:$4 sm:$0xff]  }
  0x20   : > { %1381 = vmatpush3.bf16.msra.mxu0 %v1621_v15  ;;  %1579 = vmatpush3.bf16.msra.mxu1 %v1621_v15  ;;  %v1702_v14 = vld [vmem:[%s1804_s11 + $0x14c] ss:$20 sps:$4 sm:$0xff]   ;;  %v1704_v15 = vld [vmem:[%s1804_s11 + $0x148] ss:$20 sps:$4 sm:$0xff]  }
  0x21   : > { %1382 = vmatprep.subr.bf16.mxu0 %v1622_v16  ;;  %1572 = vmatprep.subr.bf16.mxu1 %v1622_v16  ;;  %v1705_v16 = vld [vmem:[%s1804_s11 + $0x128] ss:$20 sps:$4 sm:$0xff]  }
  0x24   : > { %1383 = vmatpush3.bf16.msra.mxu0 %v1623_v17  ;;  %1580 = vmatpush3.bf16.msra.mxu1 %v1623_v17  ;;  %v1706_v17 = vld [vmem:[%s1804_s11 + $0x150] ss:$20 sps:$4 sm:$0xff]  }
  0x25   : > { %1438 = vmatprep.subr.bf16.mxu1 %v1630_v20  ;;  %1521 = vmatprep.subr.bf16.mxu0 %v1731_v24 }
  0x27   : > { %864 = vmatmul.mubr.bf16.vlgmr.msra.gmra.mrb[0].mxu0 %v1624_v18  ;;  %904 = vmatmul.mubr.bf16.vlgmr.msra.gmra.mrb[0].mxu1 %v1627_v19 }
  0x28   : > { %1439 = vmatpush3.bf16.msra.mxu1 %v1631_v21  ;;  %1522 = vmatpush3.bf16.msra.mxu0 %v1632_v22 }
  0x29   : > { %1440 = vmatprep.subr.bf16.mxu1 %v1633_v23  ;;  %871 = vmatprep.mubr.bf16.mxu0 %v1635_v25 }
  0x2a   : > { %911 = vmatprep.mubr.bf16.mxu1 %v1637_v26  ;;  %1523 = vmatprep.subr.bf16.mxu0 %v1731_v24 }
  0x2c   : > { %1441 = vmatpush3.bf16.msra.mxu1 %v1634_v27  ;;  %1524 = vmatpush3.bf16.msra.mxu0 %v1643_v28 }
  0x2d   : > { %1442 = vmatprep.subr.bf16.mxu1 %v1641_v31  ;;  %1525 = vmatprep.subr.bf16.mxu0 %v1731_v24 }
  0x2f   : > { %872 = vmatmul.mubr.bf16.gmra.mrb[4].mxu0 %v1639_v29  ;;  %912 = vmatmul.mubr.bf16.gmra.mrb[4].mxu1 %v1640_v30 }
  0x30   : > { %1443 = vmatpush3.bf16.msra.mxu1 %v1642_v32  ;;  %879 = vmatprep.mubr.bf16.mxu0 %v1646_v34 }
  0x31   : > { %1444 = vmatprep.subr.bf16.mxu1 %v1644_v33  ;;  %919 = vmatprep.mubr.bf16.mxu1 %v1648_v35 }
  0x32   : > { %1526 = vmatpush3.bf16.msra.mxu0 %v1656_v36 }
  0x33   : > { %1527 = vmatprep.subr.bf16.mxu0 %v1731_v24 }
  0x34   : > { %1445 = vmatpush3.bf16.msra.mxu1 %v1645_v37 }
  0x35   : > { %1446 = vmatprep.subr.bf16.mxu1 %v1652_v39 }
  0x36   : > { %1528 = vmatpush3.bf16.msra.mxu0 %v1672_v45 }
  0x37   : > { %880 = vmatmul.mubr.bf16.gmra.mrb[8].mxu0 %v1650_v38  ;;  %920 = vmatmul.mubr.bf16.gmra.mrb[8].mxu1 %v1651_v40 }
  0x38   : > { %1447 = vmatpush3.bf16.msra.mxu1 %v1653_v41  ;;  %887 = vmatprep.mubr.bf16.mxu0 %v1657_v43 }
  0x39   : > { %1448 = vmatprep.subr.bf16.mxu1 %v1654_v42  ;;  %927 = vmatprep.mubr.bf16.mxu1 %v1659_v44 }
  0x3c   : > { %1449 = vmatpush3.bf16.msra.mxu1 %v1655_v46 }
  0x3d   : > { %1450 = vmatprep.subr.bf16.mxu1 %v1663_v49 }
  0x3f   : > { %888 = vmatmul.mubr.bf16.gmra.mrb[12].mxu0 %v1661_v47  ;;  %928 = vmatmul.mubr.bf16.gmra.mrb[12].mxu1 %v1662_v48 }
  0x40   : > { %1451 = vmatpush3.bf16.msra.mxu1 %v1664_v50  ;;  %895 = vmatprep.mubr.bf16.mxu0 %v1667_v52 }
  0x41   : > { %1452 = vmatprep.subr.bf16.mxu1 %v1665_v51  ;;  %968 = vmatprep.mubr.bf16.mxu1 %v1671_v53 }
  0x44   : > { %1453 = vmatpush3.bf16.msra.mxu1 %v1666_v54 }
  0x47   : > { %896 = vmatmul.mubr.bf16.gmra.mrb[16].mxu0 %v1673_v56  ;;  %969 = vmatmul.mubr.bf16.vlgmr.msra.gmra.mrb[16].mxu1 %v1669_v55 }
  0x48   : > { %976 = vmatprep.mubr.bf16.mxu1 %v1674_v57  ;;  %1529 = vmatprep.mubr.msk.bf16.mxu0 %vm1732_vm0, %v1731_v24 }
  0x4f   : > { %977 = vmatmul.mubr.bf16.gmra.mrb[20].mxu1 %v1676_v58  ;;  %1530 = vmatmul.mubr.msk.bf16.vlgmr.msra.gmra.mrb[20].mxu0 %vm803_vm1, %v1677_v59 }
  0x50   : > { %984 = vmatprep.mubr.bf16.mxu1 %v1678_v60  ;;  %1533 = vmatprep.mubr.msk.bf16.mxu0 %vm1732_vm0, %v1731_v24 }
  0x57   : > { %985 = vmatmul.mubr.bf16.gmra.mrb[24].mxu1 %v1680_v61  ;;  %1534 = vmatmul.mubr.msk.bf16.gmra.mrb[24].mxu0 %vm803_vm1, %v1681_v62  ;;  %v1984_v62 = vld [vmem:[%s2063_s2] ss:$0 sm:$0xff] }
  0x58   : > { %992 = vmatprep.mubr.bf16.mxu1 %v1682_v63  ;;  %1537 = vmatprep.mubr.msk.bf16.mxu0 %vm1732_vm0, %v1731_v24 }
  0x5f   : > { %993 = vmatmul.mubr.bf16.gmra.mrb[28].mxu1 %v1684_v0  ;;  %1538 = vmatmul.mubr.msk.bf16.gmra.mrb[28].mxu0 %vm803_vm1, %v1685_v1 }
  0x60   : > { %1000 = vmatprep.mubr.bf16.mxu1 %v1686_v2  ;;  %1541 = vmatprep.mubr.msk.bf16.mxu0 %vm1732_vm0, %v1731_v24 }
  0x67   : > { %1001 = vmatmul.mubr.bf16.gmra.mrb[32].mxu1 %v1688_v3  ;;  %1542 = vmatmul.mubr.msk.bf16.gmra.mrb[32].mxu0 %vm803_vm1, %v1689_v4 }
  0x68   : > { %1008 = vmatprep.mubr.bf16.mxu1 %v1690_v5  ;;  %1545 = vmatprep.mubr.msk.bf16.mxu0 %vm1732_vm0, %v1731_v24 }
  0x6f   : > { %1009 = vmatmul.mubr.bf16.gmra.mrb[36].mxu1 %v1692_v6  ;;  %1546 = vmatmul.mubr.msk.bf16.gmra.mrb[36].mxu0 %vm803_vm1, %v1693_v7 }
  0x70   : > { %1016 = vmatprep.mubr.bf16.mxu1 %v1694_v8  ;;  %1549 = vmatprep.mubr.msk.bf16.mxu0 %vm1732_vm0, %v1731_v24 }
  0x77   : > { %1017 = vmatmul.mubr.bf16.gmra.mrb[40].mxu1 %v1696_v9  ;;  %1550 = vmatmul.mubr.msk.bf16.gmra.mrb[40].mxu0 %vm803_vm1, %v1697_v10 }
  0x78   : > { %1024 = vmatprep.mubr.bf16.mxu1 %v1698_v11  ;;  %1553 = vmatprep.mubr.msk.bf16.mxu0 %vm1732_vm0, %v1731_v24 }
  0x7f   : > { %1025 = vmatmul.mubr.bf16.gmra.mrb[44].mxu1 %v1700_v12  ;;  %1554 = vmatmul.mubr.msk.bf16.gmra.mrb[44].mxu0 %vm803_vm1, %v1701_v13 }
  0x80   : > { %1032 = vmatprep.mubr.bf16.mxu1 %v1702_v14  ;;  %1557 = vmatprep.mubr.msk.bf16.mxu0 %vm1732_vm0, %v1731_v24 }
  0x87   : > { %1033 = vmatmul.mubr.bf16.gmra.mrb[48].mxu1 %v1704_v15  ;;  %1558 = vmatmul.mubr.msk.bf16.gmra.mrb[48].mxu0 %vm803_vm1, %v1705_v16 }
  0x88   : > { %1561 = vmatprep.mubr.msk.bf16.mxu0 %vm1732_vm0, %v1731_v24 }
  0x8f   : > { %1562 = vmatmul.mubr.msk.bf16.gmra.mrb[52].mxu0 %vm803_vm1, %v1706_v17 }
  0xfa   : > { %v1384_v18 = vpop.f32.mrb[0].mxu0  ;;  %v1414_v19 = vpop.f32.mrb[0].mxu1 }
  0xfb   : > { %v1385_v20 = vpop.f32.mrb[1].mxu0  ;;  %v1415_v21 = vpop.f32.mrb[1].mxu1 }
  0xfc   : > { %v1386_v22 = vadd.f32 %v1385_v20, %v1384_v18  ;;  %v1387_v23 = vpop.f32.mrb[2].mxu0  ;;  %v1963_v25 = vadd.f32 %v1415_v21, %v1414_v19  ;;  %v1417_v26 = vpop.f32.mrb[2].mxu1 }
  0xfd   : > { %v1388_v27 = vpop.f32.mrb[3].mxu0  ;;  %v1418_v28 = vpop.f32.mrb[3].mxu1 }
  0xfe   : > { %v1389_v29 = vadd.f32 %v1388_v27, %v1387_v23  ;;  %v1965_v30 = vadd.f32 %v1418_v28, %v1417_v26  ;;  %v866_v9 = vadd.f32 %v1386_v22, %v1984_v62 }
 0x100   : > { %v869_v16 = vadd.f32 %v1389_v29, %v1984_v62 }
 0x102   : > { %v1390_v31 = vpop.f32.mrb[4].mxu0  ;;  %v1420_v32 = vpop.f32.mrb[4].mxu1 }
 0x103   : > { %v1391_v24 = vpop.f32.mrb[5].mxu0  ;;  %v1421_v33 = vpop.f32.mrb[5].mxu1 }
 0x104   : > { %v1392_v34 = vadd.f32 %v1391_v24, %v1390_v31  ;;  %v1393_v35 = vpop.f32.mrb[6].mxu0  ;;  %v1967_v36 = vadd.f32 %v1421_v33, %v1420_v32  ;;  %v1423_v37 = vpop.f32.mrb[6].mxu1 }
 0x105   : > { %v1394_v38 = vpop.f32.mrb[7].mxu0  ;;  %v1424_v39 = vpop.f32.mrb[7].mxu1 }
 0x106   : > { %v1395_v40 = vadd.f32 %v1394_v38, %v1393_v35  ;;  %v1969_v41 = vadd.f32 %v1424_v39, %v1423_v37  ;;  %v874_v28 = vadd.f32 %v1392_v34, %v1984_v62 }
 0x108   : > { %v877_v37 = vadd.f32 %v1395_v40, %v1984_v62 }
 0x10a   : > { %v1396_v42 = vpop.f32.mrb[8].mxu0  ;;  %v1426_v43 = vpop.f32.mrb[8].mxu1 }
 0x10b   : > { %v1397_v44 = vpop.f32.mrb[9].mxu0  ;;  %v1427_v45 = vpop.f32.mrb[9].mxu1 }
 0x10c   : > { %v1971_v46 = vadd.f32 %v1397_v44, %v1396_v42  ;;  %v1399_v47 = vpop.f32.mrb[10].mxu0  ;;  %v1973_v48 = vadd.f32 %v1427_v45, %v1426_v43  ;;  %v1429_v49 = vpop.f32.mrb[10].mxu1 }
 0x10d   : > { %v1400_v50 = vpop.f32.mrb[11].mxu0  ;;  %v1430_v51 = vpop.f32.mrb[11].mxu1 }
 0x10e   : > { %v1975_v52 = vadd.f32 %v1400_v50, %v1399_v47  ;;  %v1977_v53 = vadd.f32 %v1430_v51, %v1429_v49  ;;  %v882_v49 = vadd.f32 %v1971_v46, %v1984_v62 }
 0x112   : > { %v1402_v54 = vpop.f32.mrb[12].mxu0  ;;  %v1432_v55 = vpop.f32.mrb[12].mxu1 }
 0x113   : > { %v1403_v56 = vpop.f32.mrb[13].mxu0  ;;  %v1433_v57 = vpop.f32.mrb[13].mxu1 }
 0x114   : > { %v1979_v58 = vadd.f32 %v1403_v56, %v1402_v54  ;;  %v1405_v59 = vpop.f32.mrb[14].mxu0  ;;  %v1434_v60 = vadd.f32 %v1433_v57, %v1432_v55  ;;  %v1435_v61 = vpop.f32.mrb[14].mxu1  ;;  %v885_v57 = vadd.f32 %v1975_v52, %v1984_v62 }
 0x115   : > { %v1406_v63 = vpop.f32.mrb[15].mxu0  ;;  %v1436_v0 = vpop.f32.mrb[15].mxu1 }
 0x116   : > { %v1987_v1 = vadd.f32 %v1434_v60, %v1984_v62  ;;  %v1989_v2 = vadd.f32 %v1406_v63, %v1405_v59  ;;  %v1437_v3 = vadd.f32 %v1436_v0, %v1435_v61 }
 0x118   : > { %v1992_v4 = vadd.f32 %v1437_v3, %v1984_v62 }
 0x11a   : > { %v1408_v5 = vpop.f32.mrb[16].mxu0  ;;  %v1454_v6 = vpop.f32.mrb[16].mxu1 }
 0x11b   : > { %v1409_v7 = vpop.f32.mrb[17].mxu0  ;;  %v1455_v8 = vpop.f32.mrb[17].mxu1 }
 0x11c   : > { %v1995_v10 = vadd.f32 %v1409_v7, %v1408_v5  ;;  %v1456_v11 = vadd.f32 %v1455_v8, %v1454_v6  ;;  %v1411_v12 = vpop.f32.mrb[18].mxu0  ;;  %v1457_v13 = vpop.f32.mrb[18].mxu1  ;;  %v890_v6 = vadd.f32 %v1979_v58, %v1984_v62 }
 0x11d   : > { %v1412_v14 = vpop.f32.mrb[19].mxu0  ;;  %v1458_v15 = vpop.f32.mrb[19].mxu1 }
 0x11e   : > { %v1998_v17 = vadd.f32 %v1412_v14, %v1411_v12  ;;  %v1459_v18 = vadd.f32 %v1458_v15, %v1457_v13  ;;  %v971_v19 = vadd.f32 %v1456_v11, %v866_v9  ;;  %v893_v13 = vadd.f32 %v1989_v2, %v1984_v62 }
 0x120   : > { %v974_v20 = vadd.f32 %v1459_v18, %v869_v16 }
 0x122   : > { %v1460_v21 = vpop.f32.mrb[20].mxu1  ;;  %v1075_v22 = vpop.f32.mrb[20].mxu0 }
 0x123   : > { %v1076_v23 = vadd.f32 %v1075_v22, %v971_v19  ;;  %v1461_v26 = vpop.f32.mrb[21].mxu1  ;;  %v1531_v27 = vpop.f32.mrb[21].mxu0  ;;  %v898_v22 = vadd.f32 %v1995_v10, %v1984_v62 }
 0x124   : > { %v1462_v29 = vadd.f32 %v1461_v26, %v1460_v21  ;;  %v1463_v31 = vpop.f32.mrb[22].mxu1  ;;  %v1078_v32 = vpop.f32.mrb[22].mxu0 }
 0x125   : > { %1146 = vst [vmem:[%s2004_s30] sm:$0xff] %v1076_v23  ;;  %v1079_v24 = vadd.f32 %v1078_v32, %v974_v20  ;;  %v1464_v33 = vpop.f32.mrb[23].mxu1  ;;  %v1532_v35 = vpop.f32.mrb[23].mxu0 }
 0x126   : > { %v1465_v38 = vadd.f32 %v1464_v33, %v1463_v31  ;;  %v979_v39 = vadd.f32 %v1462_v29, %v874_v28  ;;  %v901_v31 = vadd.f32 %v1998_v17, %v1984_v62 }
 0x127   : > { %1147 = vst [vmem:[%s2004_s30 + $0x8] sm:$0xff] %v1079_v24 }
 0x128   : > { %v982_v42 = vadd.f32 %v1465_v38, %v877_v37 }
 0x12a   : > { %v1466_v43 = vpop.f32.mrb[24].mxu1  ;;  %v1083_v44 = vpop.f32.mrb[24].mxu0 }
 0x12b   : > { %v1084_v45 = vadd.f32 %v1083_v44, %v979_v39  ;;  %v1467_v47 = vpop.f32.mrb[25].mxu1  ;;  %v1535_v34 = vpop.f32.mrb[25].mxu0 }
 0x12c   : > { %v1468_v50 = vadd.f32 %v1467_v47, %v1466_v43  ;;  %v1469_v51 = vpop.f32.mrb[26].mxu1  ;;  %v1086_v54 = vpop.f32.mrb[26].mxu0 }
 0x12d   : > { %1148 = vst [vmem:[%s2004_s30 + $0x10] sm:$0xff] %v1084_v45  ;;  %v1087_v55 = vadd.f32 %v1086_v54, %v982_v42  ;;  %v1470_v56 = vpop.f32.mrb[27].mxu1  ;;  %v1536_v40 = vpop.f32.mrb[27].mxu0  ;;  %v906_v42 = vadd.f32 %v1963_v25, %v1984_v62 }
 0x12e   : > { %v1471_v59 = vadd.f32 %v1470_v56, %v1469_v51  ;;  %v987_v60 = vadd.f32 %v1468_v50, %v882_v49  ;;  %v909_v49 = vadd.f32 %v1965_v30, %v1984_v62 }
 0x12f   : > { %1149 = vst [vmem:[%s2004_s30 + $0x18] sm:$0xff] %v1087_v55 }
 0x130   : > { %v990_v61 = vadd.f32 %v1471_v59, %v885_v57  ;;  %v914_v59 = vadd.f32 %v1967_v36, %v1984_v62 }
 0x132   : > { %v1472_v63 = vpop.f32.mrb[28].mxu1  ;;  %v1091_v0 = vpop.f32.mrb[28].mxu0 }
 0x133   : > { %v1092_v3 = vadd.f32 %v1091_v0, %v987_v60  ;;  %v1473_v46 = vpop.f32.mrb[29].mxu1  ;;  %v1539_v5 = vpop.f32.mrb[29].mxu0 }
 0x134   : > { %v1474_v7 = vadd.f32 %v1473_v46, %v1472_v63  ;;  %v1475_v8 = vpop.f32.mrb[30].mxu1  ;;  %v1094_v9 = vpop.f32.mrb[30].mxu0  ;;  %v917_v46 = vadd.f32 %v1969_v41, %v1984_v62 }
 0x135   : > { %1150 = vst [vmem:[%s2004_s30 + $0x20] sm:$0xff] %v1092_v3  ;;  %v1095_v11 = vadd.f32 %v1094_v9, %v990_v61  ;;  %v1476_v12 = vpop.f32.mrb[31].mxu1  ;;  %v1540_v52 = vpop.f32.mrb[31].mxu0 }
 0x136   : > { %v1477_v14 = vadd.f32 %v1476_v12, %v1475_v8  ;;  %v995_v15 = vadd.f32 %v1474_v7, %v890_v6  ;;  %v922_v52 = vadd.f32 %v1973_v48, %v1984_v62 }
 0x137   : > { %1151 = vst [vmem:[%s2004_s30 + $0x28] sm:$0xff] %v1095_v11 }
 0x138   : > { %v998_v16 = vadd.f32 %v1477_v14, %v893_v13 }
 0x13a   : > { %v1478_v18 = vpop.f32.mrb[32].mxu1  ;;  %v1099_v19 = vpop.f32.mrb[32].mxu0 }
 0x13b   : > { %v1100_v20 = vadd.f32 %v1099_v19, %v995_v15  ;;  %v1479_v58 = vpop.f32.mrb[33].mxu1  ;;  %v1543_v21 = vpop.f32.mrb[33].mxu0  ;;  %v925_v19 = vadd.f32 %v1977_v53, %v1984_v62 }
 0x13c   : > { %v1480_v23 = vadd.f32 %v1479_v58, %v1478_v18  ;;  %v1481_v26 = vpop.f32.mrb[34].mxu1  ;;  %v1102_v27 = vpop.f32.mrb[34].mxu0 }
 0x13d   : > { %1152 = vst [vmem:[%s2004_s30 + $0x30] sm:$0xff] %v1100_v20  ;;  %v1103_v28 = vadd.f32 %v1102_v27, %v998_v16  ;;  %v1482_v29 = vpop.f32.mrb[35].mxu1  ;;  %v1544_v2 = vpop.f32.mrb[35].mxu0 }
 0x13e   : > { %v1483_v32 = vadd.f32 %v1482_v29, %v1481_v26  ;;  %v1003_v24 = vadd.f32 %v1480_v23, %v898_v22 }
 0x13f   : > { %1153 = vst [vmem:[%s2004_s30 + $0x38] sm:$0xff] %v1103_v28 }
 0x140   : > { %v1006_v33 = vadd.f32 %v1483_v32, %v901_v31 }
 0x142   : > { %v1484_v35 = vpop.f32.mrb[36].mxu1  ;;  %v1107_v37 = vpop.f32.mrb[36].mxu0 }
 0x143   : > { %v1108_v38 = vadd.f32 %v1107_v37, %v1003_v24  ;;  %v1485_v10 = vpop.f32.mrb[37].mxu1  ;;  %v1547_v39 = vpop.f32.mrb[37].mxu0 }
 0x144   : > { %v1486_v43 = vadd.f32 %v1485_v10, %v1484_v35  ;;  %v1487_v44 = vpop.f32.mrb[38].mxu1  ;;  %v1110_v45 = vpop.f32.mrb[38].mxu0 }
 0x145   : > { %1154 = vst [vmem:[%s2004_s30 + $0x40] sm:$0xff] %v1108_v38  ;;  %v1111_v47 = vadd.f32 %v1110_v45, %v1006_v33  ;;  %v1488_v34 = vpop.f32.mrb[39].mxu1  ;;  %v1548_v17 = vpop.f32.mrb[39].mxu0 }
 0x146   : > { %v1489_v50 = vadd.f32 %v1488_v34, %v1487_v44  ;;  %v1011_v51 = vadd.f32 %v1486_v43, %v906_v42 }
 0x147   : > { %1155 = vst [vmem:[%s2004_s30 + $0x48] sm:$0xff] %v1111_v47 }
 0x148   : > { %v1014_v54 = vadd.f32 %v1489_v50, %v909_v49 }
 0x14a   : > { %v1490_v55 = vpop.f32.mrb[40].mxu1  ;;  %v1115_v56 = vpop.f32.mrb[40].mxu0 }
 0x14b   : > { %v1116_v40 = vadd.f32 %v1115_v56, %v1011_v51  ;;  %v1491_v25 = vpop.f32.mrb[41].mxu1  ;;  %v1551_v57 = vpop.f32.mrb[41].mxu0 }
 0x14c   : > { %v1492_v60 = vadd.f32 %v1491_v25, %v1490_v55  ;;  %v1493_v61 = vpop.f32.mrb[42].mxu1  ;;  %v1118_v63 = vpop.f32.mrb[42].mxu0 }
 0x14d   : > { %1156 = vst [vmem:[%s2004_s30 + $0x50] sm:$0xff] %v1116_v40  ;;  %v1119_v0 = vadd.f32 %v1118_v63, %v1014_v54  ;;  %v1494_v3 = vpop.f32.mrb[43].mxu1  ;;  %v1552_v30 = vpop.f32.mrb[43].mxu0 }
 0x14e   : > { %v1495_v5 = vadd.f32 %v1494_v3, %v1493_v61  ;;  %v1019_v6 = vadd.f32 %v1492_v60, %v914_v59 }
 0x14f   : > { %1157 = vst [vmem:[%s2004_s30 + $0x58] sm:$0xff] %v1119_v0 }
 0x150   : > { %v1022_v7 = vadd.f32 %v1495_v5, %v917_v46 }
 0x152   : > { %v1496_v8 = vpop.f32.mrb[44].mxu1  ;;  %v1123_v9 = vpop.f32.mrb[44].mxu0 }
 0x153   : > { %v1124_v11 = vadd.f32 %v1123_v9, %v1019_v6  ;;  %v1497_v36 = vpop.f32.mrb[45].mxu1  ;;  %v1555_v12 = vpop.f32.mrb[45].mxu0 }
 0x154   : > { %v1498_v13 = vadd.f32 %v1497_v36, %v1496_v8  ;;  %v1499_v14 = vpop.f32.mrb[46].mxu1  ;;  %v1126_v15 = vpop.f32.mrb[46].mxu0 }
 0x155   : > { %1158 = vst [vmem:[%s2004_s30 + $0x60] sm:$0xff] %v1124_v11  ;;  %v1127_v16 = vadd.f32 %v1126_v15, %v1022_v7  ;;  %v1500_v41 = vpop.f32.mrb[47].mxu1  ;;  %v1556_v18 = vpop.f32.mrb[47].mxu0 }
 0x156   : > { %v1501_v20 = vadd.f32 %v1500_v41, %v1499_v14  ;;  %v1027_v58 = vadd.f32 %v1498_v13, %v922_v52 }
 0x157   : > { %1159 = vst [vmem:[%s2004_s30 + $0x68] sm:$0xff] %v1127_v16 }
 0x158   : > { %v1030_v21 = vadd.f32 %v1501_v20, %v925_v19 }
 0x15a   : > { %v1502_v22 = vpop.f32.mrb[48].mxu1  ;;  %v1131_v23 = vpop.f32.mrb[48].mxu0 }
 0x15b   : > { %v1132_v26 = vadd.f32 %v1131_v23, %v1027_v58  ;;  %v1503_v48 = vpop.f32.mrb[49].mxu1  ;;  %v1559_v27 = vpop.f32.mrb[49].mxu0 }
 0x15c   : > { %v1504_v28 = vadd.f32 %v1503_v48, %v1502_v22  ;;  %v1505_v29 = vpop.f32.mrb[50].mxu1  ;;  %v1134_v2 = vpop.f32.mrb[50].mxu0 }
 0x15d   : > { %1160 = vst [vmem:[%s2004_s30 + $0x70] sm:$0xff] %v1132_v26  ;;  %v1135_v31 = vadd.f32 %v1134_v2, %v1030_v21  ;;  %v1506_v32 = vpop.f32.mrb[51].mxu1  ;;  %v1560_v24 = vpop.f32.mrb[51].mxu0 }
 0x15e   : > { %v1507_v53 = vadd.f32 %v1506_v32, %v1505_v29  ;;  %v1035_v62 = vadd.f32 %v1504_v28, %v1987_v1 }
 0x15f   : > { %1161 = vst [vmem:[%s2004_s30 + $0x78] sm:$0xff] %v1135_v31 }
 0x160   : > { %v1038_v33 = vadd.f32 %v1507_v53, %v1992_v4 }
 0x162   : > { %v1139_v35 = vpop.f32.mrb[52].mxu0 }
 0x163   : > { %v1140_v37 = vadd.f32 %v1139_v35, %v1035_v62  ;;  %v1563_v38 = vpop.f32.mrb[53].mxu0 }
 0x164   : > { %v1142_v10 = vpop.f32.mrb[54].mxu0 }
 0x165   : > { %1162 = vst [vmem:[%s2004_s30 + $0x80] sm:$0xff] %v1140_v37  ;;  %v1143_v39 = vadd.f32 %v1142_v10, %v1038_v33  ;;  %v1564_v42 = vpop.f32.mrb[55].mxu0 }
 0x167   : > { %1163 = vst [vmem:[%s2004_s30 + $0x88] sm:$0xff] %v1143_v39 }
 0x168 PF: > { %s13_s14 = sadd.s32 1, %s1729_s14   ;;  %s2065_s12 = smov %s1725_s13 }
 0x169   : > { %p10_p5 = scmp.ge.s32.totalorder %s13_s14, 4   ;;  %s2066_s13 = smov %s2068_s15 }
 0x16b   :  { %12 = sbr.rel (!%p10_p5) target bundleno = 2 (0x2), region = 68 }

</bundles_post_ra>
